<compile_context>
chip_gen: v7x
topology: tpu7x:2x2x1
jax: 0.10.0
libtpu: 0.0.40
codegen_flags: <defaults>
</compile_context>

<pallas_src>
import jax
import jax.numpy as jnp
from jax.experimental import pallas as pl
from jax.experimental.pallas import tpu as pltpu

# --- fixed Net3 geometry (28x28 single-channel input, implied by fc1=C*7*7) ---
H1 = W1 = 28
KH = KW = 5
PH = PW = KH // 2
TAPS = KH * KW                 # 25
TAPS_P = 32                    # taps padded to a lane-friendly 32
C1 = 64                        # conv1 out channels, zero-padded 50 -> 64
C2 = 64                        # conv2 out channels
HO1, WO1 = H1 // 2, W1 // 2    # 14, 14
WO1_P = 16                     # conv1 pooled width padded to 16 sublanes
BLK1 = HO1 * WO1_P             # 224 rows per pool-tap block
H2 = W2 = HO1                  # 14
WP2 = 24                       # conv2 padded width (>= 14+4, multiple of 8)
M2 = H2 * WP2                  # 336 conv2 accumulator rows
ROWS2 = 440                    # conv2 input rows (>= (H2+4)*WP2 + 4, mult of 8)
HO2, WO2 = H2 // 2, W2 // 2    # 7, 7
LANE = 128
NUM_CLASSES = 10


# -----------------------------------------------------------------------------
# conv1: circular 5x5 conv + bias + ReLU + 2x2 max pool via pool-major im2col.
# -----------------------------------------------------------------------------
def _conv1_kernel(x_ref, w_ref, b_ref, o_ref):
    # x_ref: (1, 4*BLK1, TAPS_P) bf16. Block b = dh*2+dw holds, at row
    # ho*WO1_P + wo, the 25 taps of conv-output pixel (2*ho+dh, 2*wo+dw).
    w = w_ref[...]                                           # (TAPS_P, C1) bf16
    pooled = None
    for b in range(4):                                       # 4 pool taps
        a = x_ref[0, b * BLK1:(b + 1) * BLK1, :]             # (BLK1, TAPS_P) bf16
        d = jnp.dot(a, w, preferred_element_type=jnp.float32)
        pooled = d if pooled is None else jnp.maximum(pooled, d)
    # bias + ReLU commute with max; garbage wo columns (14,15) are sliced later.
    o_ref[0] = jnp.maximum(pooled + b_ref[...], 0.0).astype(o_ref.dtype)


def conv1_pool(patches, w, b):
    N = patches.shape[0]
    return pl.pallas_call(
        _conv1_kernel,
        out_shape=jax.ShapeDtypeStruct((N, BLK1, C1), jnp.bfloat16),
        grid=(N,),
        in_specs=[
            pl.BlockSpec((1, 4 * BLK1, TAPS_P), lambda n: (n, 0, 0)),
            pl.BlockSpec((TAPS_P, C1), lambda n: (0, 0)),
            pl.BlockSpec((1, C1), lambda n: (0, 0)),
        ],
        out_specs=pl.BlockSpec((1, BLK1, C1), lambda n: (n, 0, 0)),
        compiler_params=pltpu.CompilerParams(dimension_semantics=("parallel",)),
    )(patches, w, b)


def _conv1_im2col(x_nhw):
    """Pool-major 25-tap im2col of the circularly padded 28x28 input (bf16)."""
    N = x_nhw.shape[0]
    xp = jnp.pad(x_nhw, ((0, 0), (PH, PH), (PW, PW)), mode="wrap")   # (N, 32, 32)
    taps = [xp[:, i:i + H1, j:j + W1] for i in range(KH) for j in range(KW)]
    pat = jnp.stack(taps, axis=-1)                                   # (N, 28, 28, 25)
    pat = pat.reshape(N, HO1, 2, WO1, 2, TAPS).transpose(0, 2, 4, 1, 3, 5)
    pat = jnp.pad(pat, ((0, 0),) * 4 + ((0, WO1_P - WO1), (0, TAPS_P - TAPS)))
    return pat.reshape(N, 4 * BLK1, TAPS_P).astype(jnp.bfloat16)     # (N, 896, 32)


# -----------------------------------------------------------------------------
# conv2: circular 5x5 conv + bias + ReLU + 2x2 max pool, 25 shifted-slab dots
# accumulated in registers (value chain), pool epilogue via a tiny VMEM scratch.
# -----------------------------------------------------------------------------
def _conv2_kernel(x_ref, w_ref, b_ref, o_ref, hrow_ref):
    # x_ref: (1, ROWS2, C1) bf16 flattened circularly padded conv1 output.
    # Tap (i, j) of conv-output row r = h*WP2 + w is x_ref[0, r + i*WP2 + j, :].
    acc = None
    for i in range(KH):
        for j in range(KW):
            start = i * WP2 + j
            a = x_ref[0, start:start + M2, :]                         # (M2, C1) bf16
            wk = w_ref[(i * KW + j) * C1:(i * KW + j + 1) * C1, :]    # (C1, C2) bf16
            d = jnp.dot(a, wk, preferred_element_type=jnp.float32)
            acc = d if acc is None else acc + d                       # register chain
    # 2x2 max pool: H-pair max on values (8-aligned slabs), W stride-2 via scratch.
    for ho in range(HO2):
        r0 = acc[(2 * ho) * WP2:(2 * ho + 1) * WP2, :]
        r1 = acc[(2 * ho + 1) * WP2:(2 * ho + 2) * WP2, :]
        hrow_ref[ho] = jnp.maximum(r0, r1)
    e0 = hrow_ref[:, pl.ds(0, WO2, 2), :]
    e1 = hrow_ref[:, pl.ds(1, WO2, 2), :]
    o_ref[0] = jnp.maximum(jnp.maximum(e0, e1) + b_ref[...], 0.0).astype(o_ref.dtype)


def conv2_pool(xf, w, b):
    N = xf.shape[0]
    return pl.pallas_call(
        _conv2_kernel,
        out_shape=jax.ShapeDtypeStruct((N, HO2, WO2, C2), jnp.bfloat16),
        grid=(N,),
        in_specs=[
            pl.BlockSpec((1, ROWS2, C1), lambda n: (n, 0, 0)),
            pl.BlockSpec((TAPS * C1, C2), lambda n: (0, 0)),
            pl.BlockSpec((1, C2), lambda n: (0, 0)),
        ],
        out_specs=pl.BlockSpec((1, HO2, WO2, C2), lambda n: (n, 0, 0, 0)),
        scratch_shapes=[pltpu.VMEM((HO2, WP2, C2), jnp.float32)],
        compiler_params=pltpu.CompilerParams(dimension_semantics=("parallel",)),
    )(xf, w, b)


def _conv2_prepad(y1):
    """Single wrap-pad of the (N,14,14,64) conv1 output, flattened to rows."""
    N = y1.shape[0]
    xp = jnp.pad(y1, ((0, 0), (PH, KH - PH), (PW, WP2 - W2 - PW), (0, 0)),
                 mode="wrap")                                        # (N, 19, 24, 64)
    return xp.reshape(N, (H2 + KH) * WP2, C1)[:, :ROWS2, :]          # (N, 440, 64) bf16


# -----------------------------------------------------------------------------
# fc1 -> ReLU -> fc2 -> ReLU -> fc3, fused in one lane-dense (128-wide) call.
# -----------------------------------------------------------------------------
def _mlp_kernel(x_ref, w1_ref, b1_ref, w2_ref, b2_ref, w3_ref, b3_ref, o_ref):
    h = jnp.dot(x_ref[...], w1_ref[...], preferred_element_type=jnp.float32) + b1_ref[...]
    h = jnp.maximum(h, 0.0).astype(jnp.bfloat16)
    h = jnp.dot(h, w2_ref[...], preferred_element_type=jnp.float32) + b2_ref[...]
    h = jnp.maximum(h, 0.0).astype(jnp.bfloat16)
    o_ref[...] = (jnp.dot(h, w3_ref[...], preferred_element_type=jnp.float32)
                  + b3_ref[...]).astype(o_ref.dtype)


def mlp(x, w1, b1, w2, b2, w3, b3):
    N = x.shape[0]
    return pl.pallas_call(
        _mlp_kernel,
        out_shape=jax.ShapeDtypeStruct((N, LANE), jnp.float32),
    )(x, w1, b1, w2, b2, w3, b3)


# -----------------------------------------------------------------------------
# Parameter init (reference shapes) + one-time packing for the kernels.
# -----------------------------------------------------------------------------
def init_params(key):
    ks = jax.random.split(key, 5)

    def he_uniform(k, shape):                      # (kh, kw, cin, cout)
        fan_in = shape[0] * shape[1] * shape[2]
        limit = (6.0 / fan_in) ** 0.5
        return jax.random.uniform(k, shape, jnp.float32, -limit, limit)

    def linear(k, fan_in, fan_out):                # PyTorch Linear default init
        kw_, kb_ = jax.random.split(k)
        bound = 1.0 / (fan_in ** 0.5)
        w = jax.random.uniform(kw_, (fan_in, fan_out), jnp.float32, -bound, bound)
        b = jax.random.uniform(kb_, (fan_out,), jnp.float32, -bound, bound)
        return w, b

    p = {}
    p["conv1_w"] = he_uniform(ks[0], (5, 5, 1, 50))
    p["conv1_b"] = jnp.zeros((50,), jnp.float32)
    p["conv2_w"] = he_uniform(ks[1], (5, 5, 50, 64))
    p["conv2_b"] = jnp.zeros((64,), jnp.float32)
    # TODO(synk): the reference declares fc1 = Linear(128*7*7, 120), inconsistent
    # with conv2's 64 output channels (64*7*7 = 3136 for a 28x28 input); we use
    # 3136 so the forward pass composes.
    p["fc1_w"], p["fc1_b"] = linear(ks[2], C2 * HO2 * WO2, 120)
    p["fc2_w"], p["fc2_b"] = linear(ks[3], 120, 84)
    p["fc3_w"], p["fc3_b"] = linear(ks[4], 84, 10)
    return p


def prepare_params(p):
    """One-time packing: lane-pad channels, flatten conv kernels, pre-cast
    every weight to bf16, and fold the NCHW flatten order into fc1."""
    out = {}

    # conv1: taps 25->32, Cout 50->64 (zero channels stay zero through ReLU).
    c1 = p["conv1_w"].reshape(TAPS, 50)
    out["conv1_w"] = jnp.pad(c1, ((0, TAPS_P - TAPS), (0, C1 - 50))).astype(jnp.bfloat16)
    out["conv1_b"] = jnp.pad(p["conv1_b"], (0, C1 - 50)).reshape(1, C1)

    # conv2: Cin 50->64 (zero rows meet conv1's zero-padded channels).
    c2 = jnp.pad(p["conv2_w"], ((0, 0), (0, 0), (0, C1 - 50), (0, 0)))
    out["conv2_w"] = c2.reshape(TAPS * C1, C2).astype(jnp.bfloat16)
    out["conv2_b"] = p["conv2_b"].reshape(1, C2)

    # fc1: reorder rows from NCHW flatten (c,h,w) to NHWC flatten (h,w,c) so
    # the forward pass needs no transpose; pad output dims to lane-dense 128.
    w1 = p["fc1_w"].reshape(C2, HO2, WO2, -1).transpose(1, 2, 0, 3)
    w1 = w1.reshape(HO2 * WO2 * C2, -1)
    out["fc1_w"] = jnp.pad(w1, ((0, 0), (0, LANE - w1.shape[1]))).astype(jnp.bfloat16)
    out["fc1_b"] = jnp.pad(p["fc1_b"], (0, LANE - p["fc1_b"].shape[0])).reshape(1, LANE)

    out["fc2_w"] = jnp.pad(p["fc2_w"], ((0, LANE - p["fc2_w"].shape[0]),
                                        (0, LANE - p["fc2_w"].shape[1]))).astype(jnp.bfloat16)
    out["fc2_b"] = jnp.pad(p["fc2_b"], (0, LANE - p["fc2_b"].shape[0])).reshape(1, LANE)

    out["fc3_w"] = jnp.pad(p["fc3_w"], ((0, LANE - p["fc3_w"].shape[0]),
                                        (0, LANE - p["fc3_w"].shape[1]))).astype(jnp.bfloat16)
    out["fc3_b"] = jnp.pad(p["fc3_b"], (0, LANE - p["fc3_b"].shape[0])).reshape(1, LANE)
    return out


# -----------------------------------------------------------------------------
# Net3 forward
# -----------------------------------------------------------------------------
def net3_forward(pp, x_nchw):
    N = x_nchw.shape[0]
    x = x_nchw[:, 0, :, :]                                       # (N, 28, 28), Cin=1
    y1 = conv1_pool(_conv1_im2col(x), pp["conv1_w"], pp["conv1_b"])
    y1 = y1.reshape(N, HO1, WO1_P, C1)[:, :, :WO1, :]            # (N, 14, 14, 64)
    y2 = conv2_pool(_conv2_prepad(y1), pp["conv2_w"], pp["conv2_b"])
    feats = y2.reshape(N, HO2 * WO2 * C2)                        # NHWC flatten (fc1 pre-permuted)
    logits = mlp(feats, pp["fc1_w"], pp["fc1_b"],
                 pp["fc2_w"], pp["fc2_b"], pp["fc3_w"], pp["fc3_b"])
    return logits[:, :NUM_CLASSES]


if __name__ == "__main__":
    key = jax.random.PRNGKey(0)
    pkey, xkey = jax.random.split(key)
    params = prepare_params(init_params(pkey))
    x = jax.random.normal(xkey, (2, 1, 28, 28), jnp.float32)     # NCHW, MNIST-like
    out = jax.jit(net3_forward)(params, x)
    out = jax.block_until_ready(out)
    assert out.shape == (2, NUM_CLASSES), out.shape
    assert bool(jnp.all(jnp.isfinite(out)))
    print("KERNEL_OK")
</pallas_src>

<mosaic_0001>
module attributes {stable_mosaic.version = 11 : i64} {
  func.func @_conv1_kernel(%arg0: i32, %arg1: memref<1x896x32xbf16, #tpu.memory_space<vmem>>, %arg2: memref<32x64xbf16, #tpu.memory_space<vmem>>, %arg3: memref<1x64xf32, #tpu.memory_space<vmem>>, %arg4: memref<1x224x64xbf16, #tpu.memory_space<vmem>>) attributes {dimension_semantics = [#tpu.dimension_semantics<parallel>], iteration_bounds = array<i64: 2>, scalar_prefetch = 0 : i64, scratch_operands = 0 : i64, tpu.core_type = #tpu.core_type<tc>, window_params = [{transform_indices = @transform_0, window_bounds = array<i64: 1, 896, 32>}, {pipeline_mode = #tpu.pipeline_mode<synchronous>, transform_indices = @transform_1, window_bounds = array<i64: 32, 64>}, {pipeline_mode = #tpu.pipeline_mode<synchronous>, transform_indices = @transform_2, window_bounds = array<i64: 1, 64>}, {transform_indices = @transform_3, window_bounds = array<i64: 1, 224, 64>}]} {
    %c0 = arith.constant 0 : index
    %c0_0 = arith.constant 0 : index
    %0 = vector.load %arg2[%c0, %c0_0] : memref<32x64xbf16, #tpu.memory_space<vmem>>, vector<32x64xbf16>
    %c0_1 = arith.constant 0 : index
    %c0_2 = arith.constant 0 : index
    %c0_3 = arith.constant 0 : index
    %1 = vector.load %arg1[%c0_1, %c0_2, %c0_3] : memref<1x896x32xbf16, #tpu.memory_space<vmem>>, vector<1x224x32xbf16>
    %2 = vector.shape_cast %1 : vector<1x224x32xbf16> to vector<224x32xbf16>
    %cst = arith.constant dense<0.000000e+00> : vector<224x64xf32>
    %3 = tpu.matmul %2, %0, %cst {dimension_numbers = #tpu.dot_dimension_numbers<[1], [0], [0], [1], [0, 0, 1, 1], [], []>} : vector<224x32xbf16>, vector<32x64xbf16>, vector<224x64xf32> -> vector<224x64xf32>
    %c0_4 = arith.constant 0 : index
    %c224 = arith.constant 224 : index
    %c0_5 = arith.constant 0 : index
    %4 = vector.load %arg1[%c0_4, %c224, %c0_5] : memref<1x896x32xbf16, #tpu.memory_space<vmem>>, vector<1x224x32xbf16>
    %5 = vector.shape_cast %4 : vector<1x224x32xbf16> to vector<224x32xbf16>
    %cst_6 = arith.constant dense<0.000000e+00> : vector<224x64xf32>
    %6 = tpu.matmul %5, %0, %cst_6 {dimension_numbers = #tpu.dot_dimension_numbers<[1], [0], [0], [1], [0, 0, 1, 1], [], []>} : vector<224x32xbf16>, vector<32x64xbf16>, vector<224x64xf32> -> vector<224x64xf32>
    %7 = arith.maximumf %3, %6 : vector<224x64xf32>
    %c0_7 = arith.constant 0 : index
    %c448 = arith.constant 448 : index
    %c0_8 = arith.constant 0 : index
    %8 = vector.load %arg1[%c0_7, %c448, %c0_8] : memref<1x896x32xbf16, #tpu.memory_space<vmem>>, vector<1x224x32xbf16>
    %9 = vector.shape_cast %8 : vector<1x224x32xbf16> to vector<224x32xbf16>
    %cst_9 = arith.constant dense<0.000000e+00> : vector<224x64xf32>
    %10 = tpu.matmul %9, %0, %cst_9 {dimension_numbers = #tpu.dot_dimension_numbers<[1], [0], [0], [1], [0, 0, 1, 1], [], []>} : vector<224x32xbf16>, vector<32x64xbf16>, vector<224x64xf32> -> vector<224x64xf32>
    %11 = arith.maximumf %7, %10 : vector<224x64xf32>
    %c0_10 = arith.constant 0 : index
    %c672 = arith.constant 672 : index
    %c0_11 = arith.constant 0 : index
    %12 = vector.load %arg1[%c0_10, %c672, %c0_11] : memref<1x896x32xbf16, #tpu.memory_space<vmem>>, vector<1x224x32xbf16>
    %13 = vector.shape_cast %12 : vector<1x224x32xbf16> to vector<224x32xbf16>
    %cst_12 = arith.constant dense<0.000000e+00> : vector<224x64xf32>
    %14 = tpu.matmul %13, %0, %cst_12 {dimension_numbers = #tpu.dot_dimension_numbers<[1], [0], [0], [1], [0, 0, 1, 1], [], []>} : vector<224x32xbf16>, vector<32x64xbf16>, vector<224x64xf32> -> vector<224x64xf32>
    %15 = arith.maximumf %11, %14 : vector<224x64xf32>
    %c0_13 = arith.constant 0 : index
    %c0_14 = arith.constant 0 : index
    %16 = vector.load %arg3[%c0_13, %c0_14] : memref<1x64xf32, #tpu.memory_space<vmem>>, vector<1x64xf32>
    %17 = vector.broadcast %16 : vector<1x64xf32> to vector<224x64xf32>
    %18 = arith.addf %15, %17 : vector<224x64xf32>
    %cst_15 = arith.constant 0.000000e+00 : f32
    %19 = vector.broadcast %cst_15 : f32 to vector<224x64xf32>
    %20 = arith.maximumf %18, %19 : vector<224x64xf32>
    %21 = arith.truncf %20 : vector<224x64xf32> to vector<224x64xbf16>
    %c0_16 = arith.constant 0 : index
    %c0_17 = arith.constant 0 : index
    %c0_18 = arith.constant 0 : index
    %22 = vector.load %arg4[%c0_16, %c0_17, %c0_18] : memref<1x224x64xbf16, #tpu.memory_space<vmem>>, vector<1x224x64xbf16>
    %23 = vector.shape_cast %22 : vector<1x224x64xbf16> to vector<224x64xbf16>
    %24 = vector.shape_cast %21 : vector<224x64xbf16> to vector<1x224x64xbf16>
    tpu.vector_store %arg4[%c0_16, %c0_17, %c0_18], %24 {strides = array<i32>} : memref<1x224x64xbf16, #tpu.memory_space<vmem>>, vector<1x224x64xbf16>,
    return
  }
  func.func @transform_0(%arg0: i32) -> (i32, i32, i32) {
    %c0_i32 = arith.constant 0 : i32
    %c0_i32_0 = arith.constant 0 : i32
    %c0_i32_1 = arith.constant 0 : i32
    return %arg0, %c0_i32, %c0_i32_0 : i32, i32, i32
  }
  func.func @transform_1(%arg0: i32) -> (i32, i32) {
    %c0_i32 = arith.constant 0 : i32
    %c0_i32_0 = arith.constant 0 : i32
    %c0_i32_1 = arith.constant 0 : i32
    return %c0_i32, %c0_i32_0 : i32, i32
  }
  func.func @transform_2(%arg0: i32) -> (i32, i32) {
    %c0_i32 = arith.constant 0 : i32
    %c0_i32_0 = arith.constant 0 : i32
    %c0_i32_1 = arith.constant 0 : i32
    return %c0_i32, %c0_i32_0 : i32, i32
  }
  func.func @transform_3(%arg0: i32) -> (i32, i32, i32) {
    %c0_i32 = arith.constant 0 : i32
    %c0_i32_0 = arith.constant 0 : i32
    %c0_i32_1 = arith.constant 0 : i32
    return %arg0, %c0_i32, %c0_i32_0 : i32, i32, i32
  }
}

module attributes {stable_mosaic.version = 11 : i64} {
  func.func @_conv2_kernel(%arg0: i32, %arg1: memref<1x440x64xbf16, #tpu.memory_space<vmem>>, %arg2: memref<1600x64xbf16, #tpu.memory_space<vmem>>, %arg3: memref<1x64xf32, #tpu.memory_space<vmem>>, %arg4: memref<1x7x7x64xbf16, #tpu.memory_space<vmem>>, %arg5: memref<7x24x64xf32, #tpu.memory_space<vmem>>) attributes {dimension_semantics = [#tpu.dimension_semantics<parallel>], iteration_bounds = array<i64: 2>, scalar_prefetch = 0 : i64, scratch_operands = 1 : i64, tpu.core_type = #tpu.core_type<tc>, window_params = [{transform_indices = @transform_0, window_bounds = array<i64: 1, 440, 64>}, {pipeline_mode = #tpu.pipeline_mode<synchronous>, transform_indices = @transform_1, window_bounds = array<i64: 1600, 64>}, {pipeline_mode = #tpu.pipeline_mode<synchronous>, transform_indices = @transform_2, window_bounds = array<i64: 1, 64>}, {transform_indices = @transform_3, window_bounds = array<i64: 1, 7, 7, 64>}]} {
    %c0 = arith.constant 0 : index
    %c0_0 = arith.constant 0 : index
    %c0_1 = arith.constant 0 : index
    %0 = vector.load %arg1[%c0, %c0_0, %c0_1] : memref<1x440x64xbf16, #tpu.memory_space<vmem>>, vector<1x336x64xbf16>
    %1 = vector.shape_cast %0 : vector<1x336x64xbf16> to vector<336x64xbf16>
    %c0_2 = arith.constant 0 : index
    %c0_3 = arith.constant 0 : index
    %2 = vector.load %arg2[%c0_2, %c0_3] : memref<1600x64xbf16, #tpu.memory_space<vmem>>, vector<64x64xbf16>
    %cst = arith.constant dense<0.000000e+00> : vector<336x64xf32>
    %3 = tpu.matmul %1, %2, %cst {dimension_numbers = #tpu.dot_dimension_numbers<[1], [0], [0], [1], [0, 0, 1, 1], [], []>} : vector<336x64xbf16>, vector<64x64xbf16>, vector<336x64xf32> -> vector<336x64xf32>
    %c0_4 = arith.constant 0 : index
    %c1 = arith.constant 1 : index
    %c0_5 = arith.constant 0 : index
    %4 = vector.load %arg1[%c0_4, %c1, %c0_5] : memref<1x440x64xbf16, #tpu.memory_space<vmem>>, vector<1x336x64xbf16>
    %5 = vector.shape_cast %4 : vector<1x336x64xbf16> to vector<336x64xbf16>
    %c64 = arith.constant 64 : index
    %c0_6 = arith.constant 0 : index
    %6 = vector.load %arg2[%c64, %c0_6] : memref<1600x64xbf16, #tpu.memory_space<vmem>>, vector<64x64xbf16>
    %cst_7 = arith.constant dense<0.000000e+00> : vector<336x64xf32>
    %7 = tpu.matmul %5, %6, %cst_7 {dimension_numbers = #tpu.dot_dimension_numbers<[1], [0], [0], [1], [0, 0, 1, 1], [], []>} : vector<336x64xbf16>, vector<64x64xbf16>, vector<336x64xf32> -> vector<336x64xf32>
    %8 = arith.addf %3, %7 : vector<336x64xf32>
    %c0_8 = arith.constant 0 : index
    %c2 = arith.constant 2 : index
    %c0_9 = arith.constant 0 : index
    %9 = vector.load %arg1[%c0_8, %c2, %c0_9] : memref<1x440x64xbf16, #tpu.memory_space<vmem>>, vector<1x336x64xbf16>
    %10 = vector.shape_cast %9 : vector<1x336x64xbf16> to vector<336x64xbf16>
    %c128 = arith.constant 128 : index
    %c0_10 = arith.constant 0 : index
    %11 = vector.load %arg2[%c128, %c0_10] : memref<1600x64xbf16, #tpu.memory_space<vmem>>, vector<64x64xbf16>
    %cst_11 = arith.constant dense<0.000000e+00> : vector<336x64xf32>
    %12 = tpu.matmul %10, %11, %cst_11 {dimension_numbers = #tpu.dot_dimension_numbers<[1], [0], [0], [1], [0, 0, 1, 1], [], []>} : vector<336x64xbf16>, vector<64x64xbf16>, vector<336x64xf32> -> vector<336x64xf32>
    %13 = arith.addf %8, %12 : vector<336x64xf32>
    %c0_12 = arith.constant 0 : index
    %c3 = arith.constant 3 : index
    %c0_13 = arith.constant 0 : index
    %14 = vector.load %arg1[%c0_12, %c3, %c0_13] : memref<1x440x64xbf16, #tpu.memory_space<vmem>>, vector<1x336x64xbf16>
    %15 = vector.shape_cast %14 : vector<1x336x64xbf16> to vector<336x64xbf16>
    %c192 = arith.constant 192 : index
    %c0_14 = arith.constant 0 : index
    %16 = vector.load %arg2[%c192, %c0_14] : memref<1600x64xbf16, #tpu.memory_space<vmem>>, vector<64x64xbf16>
    %cst_15 = arith.constant dense<0.000000e+00> : vector<336x64xf32>
    %17 = tpu.matmul %15, %16, %cst_15 {dimension_numbers = #tpu.dot_dimension_numbers<[1], [0], [0], [1], [0, 0, 1, 1], [], []>} : vector<336x64xbf16>, vector<64x64xbf16>, vector<336x64xf32> -> vector<336x64xf32>
    %18 = arith.addf %13, %17 : vector<336x64xf32>
    %c0_16 = arith.constant 0 : index
    %c4 = arith.constant 4 : index
    %c0_17 = arith.constant 0 : index
    %19 = vector.load %arg1[%c0_16, %c4, %c0_17] : memref<1x440x64xbf16, #tpu.memory_space<vmem>>, vector<1x336x64xbf16>
    %20 = vector.shape_cast %19 : vector<1x336x64xbf16> to vector<336x64xbf16>
    %c256 = arith.constant 256 : index
    %c0_18 = arith.constant 0 : index
    %21 = vector.load %arg2[%c256, %c0_18] : memref<1600x64xbf16, #tpu.memory_space<vmem>>, vector<64x64xbf16>
    %cst_19 = arith.constant dense<0.000000e+00> : vector<336x64xf32>
    %22 = tpu.matmul %20, %21, %cst_19 {dimension_numbers = #tpu.dot_dimension_numbers<[1], [0], [0], [1], [0, 0, 1, 1], [], []>} : vector<336x64xbf16>, vector<64x64xbf16>, vector<336x64xf32> -> vector<336x64xf32>
    %23 = arith.addf %18, %22 : vector<336x64xf32>
    %c0_20 = arith.constant 0 : index
    %c24 = arith.constant 24 : index
    %c0_21 = arith.constant 0 : index
    %24 = vector.load %arg1[%c0_20, %c24, %c0_21] : memref<1x440x64xbf16, #tpu.memory_space<vmem>>, vector<1x336x64xbf16>
    %25 = vector.shape_cast %24 : vector<1x336x64xbf16> to vector<336x64xbf16>
    %c320 = arith.constant 320 : index
    %c0_22 = arith.constant 0 : index
    %26 = vector.load %arg2[%c320, %c0_22] : memref<1600x64xbf16, #tpu.memory_space<vmem>>, vector<64x64xbf16>
    %cst_23 = arith.constant dense<0.000000e+00> : vector<336x64xf32>
    %27 = tpu.matmul %25, %26, %cst_23 {dimension_numbers = #tpu.dot_dimension_numbers<[1], [0], [0], [1], [0, 0, 1, 1], [], []>} : vector<336x64xbf16>, vector<64x64xbf16>, vector<336x64xf32> -> vector<336x64xf32>
    %28 = arith.addf %23, %27 : vector<336x64xf32>
    %c0_24 = arith.constant 0 : index
    %c25 = arith.constant 25 : index
    %c0_25 = arith.constant 0 : index
    %29 = vector.load %arg1[%c0_24, %c25, %c0_25] : memref<1x440x64xbf16, #tpu.memory_space<vmem>>, vector<1x336x64xbf16>
    %30 = vector.shape_cast %29 : vector<1x336x64xbf16> to vector<336x64xbf16>
    %c384 = arith.constant 384 : index
    %c0_26 = arith.constant 0 : index
    %31 = vector.load %arg2[%c384, %c0_26] : memref<1600x64xbf16, #tpu.memory_space<vmem>>, vector<64x64xbf16>
    %cst_27 = arith.constant dense<0.000000e+00> : vector<336x64xf32>
    %32 = tpu.matmul %30, %31, %cst_27 {dimension_numbers = #tpu.dot_dimension_numbers<[1], [0], [0], [1], [0, 0, 1, 1], [], []>} : vector<336x64xbf16>, vector<64x64xbf16>, vector<336x64xf32> -> vector<336x64xf32>
    %33 = arith.addf %28, %32 : vector<336x64xf32>
    %c0_28 = arith.constant 0 : index
    %c26 = arith.constant 26 : index
    %c0_29 = arith.constant 0 : index
    %34 = vector.load %arg1[%c0_28, %c26, %c0_29] : memref<1x440x64xbf16, #tpu.memory_space<vmem>>, vector<1x336x64xbf16>
    %35 = vector.shape_cast %34 : vector<1x336x64xbf16> to vector<336x64xbf16>
    %c448 = arith.constant 448 : index
    %c0_30 = arith.constant 0 : index
    %36 = vector.load %arg2[%c448, %c0_30] : memref<1600x64xbf16, #tpu.memory_space<vmem>>, vector<64x64xbf16>
    %cst_31 = arith.constant dense<0.000000e+00> : vector<336x64xf32>
    %37 = tpu.matmul %35, %36, %cst_31 {dimension_numbers = #tpu.dot_dimension_numbers<[1], [0], [0], [1], [0, 0, 1, 1], [], []>} : vector<336x64xbf16>, vector<64x64xbf16>, vector<336x64xf32> -> vector<336x64xf32>
    %38 = arith.addf %33, %37 : vector<336x64xf32>
    %c0_32 = arith.constant 0 : index
    %c27 = arith.constant 27 : index
    %c0_33 = arith.constant 0 : index
    %39 = vector.load %arg1[%c0_32, %c27, %c0_33] : memref<1x440x64xbf16, #tpu.memory_space<vmem>>, vector<1x336x64xbf16>
    %40 = vector.shape_cast %39 : vector<1x336x64xbf16> to vector<336x64xbf16>
    %c512 = arith.constant 512 : index
    %c0_34 = arith.constant 0 : index
    %41 = vector.load %arg2[%c512, %c0_34] : memref<1600x64xbf16, #tpu.memory_space<vmem>>, vector<64x64xbf16>
    %cst_35 = arith.constant dense<0.000000e+00> : vector<336x64xf32>
    %42 = tpu.matmul %40, %41, %cst_35 {dimension_numbers = #tpu.dot_dimension_numbers<[1], [0], [0], [1], [0, 0, 1, 1], [], []>} : vector<336x64xbf16>, vector<64x64xbf16>, vector<336x64xf32> -> vector<336x64xf32>
    %43 = arith.addf %38, %42 : vector<336x64xf32>
    %c0_36 = arith.constant 0 : index
    %c28 = arith.constant 28 : index
    %c0_37 = arith.constant 0 : index
    %44 = vector.load %arg1[%c0_36, %c28, %c0_37] : memref<1x440x64xbf16, #tpu.memory_space<vmem>>, vector<1x336x64xbf16>
    %45 = vector.shape_cast %44 : vector<1x336x64xbf16> to vector<336x64xbf16>
    %c576 = arith.constant 576 : index
    %c0_38 = arith.constant 0 : index
    %46 = vector.load %arg2[%c576, %c0_38] : memref<1600x64xbf16, #tpu.memory_space<vmem>>, vector<64x64xbf16>
    %cst_39 = arith.constant dense<0.000000e+00> : vector<336x64xf32>
    %47 = tpu.matmul %45, %46, %cst_39 {dimension_numbers = #tpu.dot_dimension_numbers<[1], [0], [0], [1], [0, 0, 1, 1], [], []>} : vector<336x64xbf16>, vector<64x64xbf16>, vector<336x64xf32> -> vector<336x64xf32>
    %48 = arith.addf %43, %47 : vector<336x64xf32>
    %c0_40 = arith.constant 0 : index
    %c48 = arith.constant 48 : index
    %c0_41 = arith.constant 0 : index
    %49 = vector.load %arg1[%c0_40, %c48, %c0_41] : memref<1x440x64xbf16, #tpu.memory_space<vmem>>, vector<1x336x64xbf16>
    %50 = vector.shape_cast %49 : vector<1x336x64xbf16> to vector<336x64xbf16>
    %c640 = arith.constant 640 : index
    %c0_42 = arith.constant 0 : index
    %51 = vector.load %arg2[%c640, %c0_42] : memref<1600x64xbf16, #tpu.memory_space<vmem>>, vector<64x64xbf16>
    %cst_43 = arith.constant dense<0.000000e+00> : vector<336x64xf32>
    %52 = tpu.matmul %50, %51, %cst_43 {dimension_numbers = #tpu.dot_dimension_numbers<[1], [0], [0], [1], [0, 0, 1, 1], [], []>} : vector<336x64xbf16>, vector<64x64xbf16>, vector<336x64xf32> -> vector<336x64xf32>
    %53 = arith.addf %48, %52 : vector<336x64xf32>
    %c0_44 = arith.constant 0 : index
    %c49 = arith.constant 49 : index
    %c0_45 = arith.constant 0 : index
    %54 = vector.load %arg1[%c0_44, %c49, %c0_45] : memref<1x440x64xbf16, #tpu.memory_space<vmem>>, vector<1x336x64xbf16>
    %55 = vector.shape_cast %54 : vector<1x336x64xbf16> to vector<336x64xbf16>
    %c704 = arith.constant 704 : index
    %c0_46 = arith.constant 0 : index
    %56 = vector.load %arg2[%c704, %c0_46] : memref<1600x64xbf16, #tpu.memory_space<vmem>>, vector<64x64xbf16>
    %cst_47 = arith.constant dense<0.000000e+00> : vector<336x64xf32>
    %57 = tpu.matmul %55, %56, %cst_47 {dimension_numbers = #tpu.dot_dimension_numbers<[1], [0], [0], [1], [0, 0, 1, 1], [], []>} : vector<336x64xbf16>, vector<64x64xbf16>, vector<336x64xf32> -> vector<336x64xf32>
    %58 = arith.addf %53, %57 : vector<336x64xf32>
    %c0_48 = arith.constant 0 : index
    %c50 = arith.constant 50 : index
    %c0_49 = arith.constant 0 : index
    %59 = vector.load %arg1[%c0_48, %c50, %c0_49] : memref<1x440x64xbf16, #tpu.memory_space<vmem>>, vector<1x336x64xbf16>
    %60 = vector.shape_cast %59 : vector<1x336x64xbf16> to vector<336x64xbf16>
    %c768 = arith.constant 768 : index
    %c0_50 = arith.constant 0 : index
    %61 = vector.load %arg2[%c768, %c0_50] : memref<1600x64xbf16, #tpu.memory_space<vmem>>, vector<64x64xbf16>
    %cst_51 = arith.constant dense<0.000000e+00> : vector<336x64xf32>
    %62 = tpu.matmul %60, %61, %cst_51 {dimension_numbers = #tpu.dot_dimension_numbers<[1], [0], [0], [1], [0, 0, 1, 1], [], []>} : vector<336x64xbf16>, vector<64x64xbf16>, vector<336x64xf32> -> vector<336x64xf32>
    %63 = arith.addf %58, %62 : vector<336x64xf32>
    %c0_52 = arith.constant 0 : index
    %c51 = arith.constant 51 : index
    %c0_53 = arith.constant 0 : index
    %64 = vector.load %arg1[%c0_52, %c51, %c0_53] : memref<1x440x64xbf16, #tpu.memory_space<vmem>>, vector<1x336x64xbf16>
    %65 = vector.shape_cast %64 : vector<1x336x64xbf16> to vector<336x64xbf16>
    %c832 = arith.constant 832 : index
    %c0_54 = arith.constant 0 : index
    %66 = vector.load %arg2[%c832, %c0_54] : memref<1600x64xbf16, #tpu.memory_space<vmem>>, vector<64x64xbf16>
    %cst_55 = arith.constant dense<0.000000e+00> : vector<336x64xf32>
    %67 = tpu.matmul %65, %66, %cst_55 {dimension_numbers = #tpu.dot_dimension_numbers<[1], [0], [0], [1], [0, 0, 1, 1], [], []>} : vector<336x64xbf16>, vector<64x64xbf16>, vector<336x64xf32> -> vector<336x64xf32>
    %68 = arith.addf %63, %67 : vector<336x64xf32>
    %c0_56 = arith.constant 0 : index
    %c52 = arith.constant 52 : index
    %c0_57 = arith.constant 0 : index
    %69 = vector.load %arg1[%c0_56, %c52, %c0_57] : memref<1x440x64xbf16, #tpu.memory_space<vmem>>, vector<1x336x64xbf16>
    %70 = vector.shape_cast %69 : vector<1x336x64xbf16> to vector<336x64xbf16>
    %c896 = arith.constant 896 : index
    %c0_58 = arith.constant 0 : index
    %71 = vector.load %arg2[%c896, %c0_58] : memref<1600x64xbf16, #tpu.memory_space<vmem>>, vector<64x64xbf16>
    %cst_59 = arith.constant dense<0.000000e+00> : vector<336x64xf32>
    %72 = tpu.matmul %70, %71, %cst_59 {dimension_numbers = #tpu.dot_dimension_numbers<[1], [0], [0], [1], [0, 0, 1, 1], [], []>} : vector<336x64xbf16>, vector<64x64xbf16>, vector<336x64xf32> -> vector<336x64xf32>
    %73 = arith.addf %68, %72 : vector<336x64xf32>
    %c0_60 = arith.constant 0 : index
    %c72 = arith.constant 72 : index
    %c0_61 = arith.constant 0 : index
    %74 = vector.load %arg1[%c0_60, %c72, %c0_61] : memref<1x440x64xbf16, #tpu.memory_space<vmem>>, vector<1x336x64xbf16>
    %75 = vector.shape_cast %74 : vector<1x336x64xbf16> to vector<336x64xbf16>
    %c960 = arith.constant 960 : index
    %c0_62 = arith.constant 0 : index
    %76 = vector.load %arg2[%c960, %c0_62] : memref<1600x64xbf16, #tpu.memory_space<vmem>>, vector<64x64xbf16>
    %cst_63 = arith.constant dense<0.000000e+00> : vector<336x64xf32>
    %77 = tpu.matmul %75, %76, %cst_63 {dimension_numbers = #tpu.dot_dimension_numbers<[1], [0], [0], [1], [0, 0, 1, 1], [], []>} : vector<336x64xbf16>, vector<64x64xbf16>, vector<336x64xf32> -> vector<336x64xf32>
    %78 = arith.addf %73, %77 : vector<336x64xf32>
    %c0_64 = arith.constant 0 : index
    %c73 = arith.constant 73 : index
    %c0_65 = arith.constant 0 : index
    %79 = vector.load %arg1[%c0_64, %c73, %c0_65] : memref<1x440x64xbf16, #tpu.memory_space<vmem>>, vector<1x336x64xbf16>
    %80 = vector.shape_cast %79 : vector<1x336x64xbf16> to vector<336x64xbf16>
    %c1024 = arith.constant 1024 : index
    %c0_66 = arith.constant 0 : index
    %81 = vector.load %arg2[%c1024, %c0_66] : memref<1600x64xbf16, #tpu.memory_space<vmem>>, vector<64x64xbf16>
    %cst_67 = arith.constant dense<0.000000e+00> : vector<336x64xf32>
    %82 = tpu.matmul %80, %81, %cst_67 {dimension_numbers = #tpu.dot_dimension_numbers<[1], [0], [0], [1], [0, 0, 1, 1], [], []>} : vector<336x64xbf16>, vector<64x64xbf16>, vector<336x64xf32> -> vector<336x64xf32>
    %83 = arith.addf %78, %82 : vector<336x64xf32>
    %c0_68 = arith.constant 0 : index
    %c74 = arith.constant 74 : index
    %c0_69 = arith.constant 0 : index
    %84 = vector.load %arg1[%c0_68, %c74, %c0_69] : memref<1x440x64xbf16, #tpu.memory_space<vmem>>, vector<1x336x64xbf16>
    %85 = vector.shape_cast %84 : vector<1x336x64xbf16> to vector<336x64xbf16>
    %c1088 = arith.constant 1088 : index
    %c0_70 = arith.constant 0 : index
    %86 = vector.load %arg2[%c1088, %c0_70] : memref<1600x64xbf16, #tpu.memory_space<vmem>>, vector<64x64xbf16>
    %cst_71 = arith.constant dense<0.000000e+00> : vector<336x64xf32>
    %87 = tpu.matmul %85, %86, %cst_71 {dimension_numbers = #tpu.dot_dimension_numbers<[1], [0], [0], [1], [0, 0, 1, 1], [], []>} : vector<336x64xbf16>, vector<64x64xbf16>, vector<336x64xf32> -> vector<336x64xf32>
    %88 = arith.addf %83, %87 : vector<336x64xf32>
    %c0_72 = arith.constant 0 : index
    %c75 = arith.constant 75 : index
    %c0_73 = arith.constant 0 : index
    %89 = vector.load %arg1[%c0_72, %c75, %c0_73] : memref<1x440x64xbf16, #tpu.memory_space<vmem>>, vector<1x336x64xbf16>
    %90 = vector.shape_cast %89 : vector<1x336x64xbf16> to vector<336x64xbf16>
    %c1152 = arith.constant 1152 : index
    %c0_74 = arith.constant 0 : index
    %91 = vector.load %arg2[%c1152, %c0_74] : memref<1600x64xbf16, #tpu.memory_space<vmem>>, vector<64x64xbf16>
    %cst_75 = arith.constant dense<0.000000e+00> : vector<336x64xf32>
    %92 = tpu.matmul %90, %91, %cst_75 {dimension_numbers = #tpu.dot_dimension_numbers<[1], [0], [0], [1], [0, 0, 1, 1], [], []>} : vector<336x64xbf16>, vector<64x64xbf16>, vector<336x64xf32> -> vector<336x64xf32>
    %93 = arith.addf %88, %92 : vector<336x64xf32>
    %c0_76 = arith.constant 0 : index
    %c76 = arith.constant 76 : index
    %c0_77 = arith.constant 0 : index
    %94 = vector.load %arg1[%c0_76, %c76, %c0_77] : memref<1x440x64xbf16, #tpu.memory_space<vmem>>, vector<1x336x64xbf16>
    %95 = vector.shape_cast %94 : vector<1x336x64xbf16> to vector<336x64xbf16>
    %c1216 = arith.constant 1216 : index
    %c0_78 = arith.constant 0 : index
    %96 = vector.load %arg2[%c1216, %c0_78] : memref<1600x64xbf16, #tpu.memory_space<vmem>>, vector<64x64xbf16>
    %cst_79 = arith.constant dense<0.000000e+00> : vector<336x64xf32>
    %97 = tpu.matmul %95, %96, %cst_79 {dimension_numbers = #tpu.dot_dimension_numbers<[1], [0], [0], [1], [0, 0, 1, 1], [], []>} : vector<336x64xbf16>, vector<64x64xbf16>, vector<336x64xf32> -> vector<336x64xf32>
    %98 = arith.addf %93, %97 : vector<336x64xf32>
    %c0_80 = arith.constant 0 : index
    %c96 = arith.constant 96 : index
    %c0_81 = arith.constant 0 : index
    %99 = vector.load %arg1[%c0_80, %c96, %c0_81] : memref<1x440x64xbf16, #tpu.memory_space<vmem>>, vector<1x336x64xbf16>
    %100 = vector.shape_cast %99 : vector<1x336x64xbf16> to vector<336x64xbf16>
    %c1280 = arith.constant 1280 : index
    %c0_82 = arith.constant 0 : index
    %101 = vector.load %arg2[%c1280, %c0_82] : memref<1600x64xbf16, #tpu.memory_space<vmem>>, vector<64x64xbf16>
    %cst_83 = arith.constant dense<0.000000e+00> : vector<336x64xf32>
    %102 = tpu.matmul %100, %101, %cst_83 {dimension_numbers = #tpu.dot_dimension_numbers<[1], [0], [0], [1], [0, 0, 1, 1], [], []>} : vector<336x64xbf16>, vector<64x64xbf16>, vector<336x64xf32> -> vector<336x64xf32>
    %103 = arith.addf %98, %102 : vector<336x64xf32>
    %c0_84 = arith.constant 0 : index
    %c97 = arith.constant 97 : index
    %c0_85 = arith.constant 0 : index
    %104 = vector.load %arg1[%c0_84, %c97, %c0_85] : memref<1x440x64xbf16, #tpu.memory_space<vmem>>, vector<1x336x64xbf16>
    %105 = vector.shape_cast %104 : vector<1x336x64xbf16> to vector<336x64xbf16>
    %c1344 = arith.constant 1344 : index
    %c0_86 = arith.constant 0 : index
    %106 = vector.load %arg2[%c1344, %c0_86] : memref<1600x64xbf16, #tpu.memory_space<vmem>>, vector<64x64xbf16>
    %cst_87 = arith.constant dense<0.000000e+00> : vector<336x64xf32>
    %107 = tpu.matmul %105, %106, %cst_87 {dimension_numbers = #tpu.dot_dimension_numbers<[1], [0], [0], [1], [0, 0, 1, 1], [], []>} : vector<336x64xbf16>, vector<64x64xbf16>, vector<336x64xf32> -> vector<336x64xf32>
    %108 = arith.addf %103, %107 : vector<336x64xf32>
    %c0_88 = arith.constant 0 : index
    %c98 = arith.constant 98 : index
    %c0_89 = arith.constant 0 : index
    %109 = vector.load %arg1[%c0_88, %c98, %c0_89] : memref<1x440x64xbf16, #tpu.memory_space<vmem>>, vector<1x336x64xbf16>
    %110 = vector.shape_cast %109 : vector<1x336x64xbf16> to vector<336x64xbf16>
    %c1408 = arith.constant 1408 : index
    %c0_90 = arith.constant 0 : index
    %111 = vector.load %arg2[%c1408, %c0_90] : memref<1600x64xbf16, #tpu.memory_space<vmem>>, vector<64x64xbf16>
    %cst_91 = arith.constant dense<0.000000e+00> : vector<336x64xf32>
    %112 = tpu.matmul %110, %111, %cst_91 {dimension_numbers = #tpu.dot_dimension_numbers<[1], [0], [0], [1], [0, 0, 1, 1], [], []>} : vector<336x64xbf16>, vector<64x64xbf16>, vector<336x64xf32> -> vector<336x64xf32>
    %113 = arith.addf %108, %112 : vector<336x64xf32>
    %c0_92 = arith.constant 0 : index
    %c99 = arith.constant 99 : index
    %c0_93 = arith.constant 0 : index
    %114 = vector.load %arg1[%c0_92, %c99, %c0_93] : memref<1x440x64xbf16, #tpu.memory_space<vmem>>, vector<1x336x64xbf16>
    %115 = vector.shape_cast %114 : vector<1x336x64xbf16> to vector<336x64xbf16>
    %c1472 = arith.constant 1472 : index
    %c0_94 = arith.constant 0 : index
    %116 = vector.load %arg2[%c1472, %c0_94] : memref<1600x64xbf16, #tpu.memory_space<vmem>>, vector<64x64xbf16>
    %cst_95 = arith.constant dense<0.000000e+00> : vector<336x64xf32>
    %117 = tpu.matmul %115, %116, %cst_95 {dimension_numbers = #tpu.dot_dimension_numbers<[1], [0], [0], [1], [0, 0, 1, 1], [], []>} : vector<336x64xbf16>, vector<64x64xbf16>, vector<336x64xf32> -> vector<336x64xf32>
    %118 = arith.addf %113, %117 : vector<336x64xf32>
    %c0_96 = arith.constant 0 : index
    %c100 = arith.constant 100 : index
    %c0_97 = arith.constant 0 : index
    %119 = vector.load %arg1[%c0_96, %c100, %c0_97] : memref<1x440x64xbf16, #tpu.memory_space<vmem>>, vector<1x336x64xbf16>
    %120 = vector.shape_cast %119 : vector<1x336x64xbf16> to vector<336x64xbf16>
    %c1536 = arith.constant 1536 : index
    %c0_98 = arith.constant 0 : index
    %121 = vector.load %arg2[%c1536, %c0_98] : memref<1600x64xbf16, #tpu.memory_space<vmem>>, vector<64x64xbf16>
    %cst_99 = arith.constant dense<0.000000e+00> : vector<336x64xf32>
    %122 = tpu.matmul %120, %121, %cst_99 {dimension_numbers = #tpu.dot_dimension_numbers<[1], [0], [0], [1], [0, 0, 1, 1], [], []>} : vector<336x64xbf16>, vector<64x64xbf16>, vector<336x64xf32> -> vector<336x64xf32>
    %123 = arith.addf %118, %122 : vector<336x64xf32>
    %124 = vector.extract_strided_slice %123 {offsets = [0, 0], sizes = [24, 64], strides = [1, 1]} : vector<336x64xf32> to vector<24x64xf32>
    %125 = vector.extract_strided_slice %123 {offsets = [24, 0], sizes = [24, 64], strides = [1, 1]} : vector<336x64xf32> to vector<24x64xf32>
    %126 = arith.maximumf %124, %125 : vector<24x64xf32>
    %c0_100 = arith.constant 0 : index
    %c0_101 = arith.constant 0 : index
    %c0_102 = arith.constant 0 : index
    %127 = vector.load %arg5[%c0_100, %c0_101, %c0_102] : memref<7x24x64xf32, #tpu.memory_space<vmem>>, vector<1x24x64xf32>
    %128 = vector.shape_cast %127 : vector<1x24x64xf32> to vector<24x64xf32>
    %129 = vector.shape_cast %126 : vector<24x64xf32> to vector<1x24x64xf32>
    tpu.vector_store %arg5[%c0_100, %c0_101, %c0_102], %129 {strides = array<i32>} : memref<7x24x64xf32, #tpu.memory_space<vmem>>, vector<1x24x64xf32>,
    %130 = vector.extract_strided_slice %123 {offsets = [48, 0], sizes = [24, 64], strides = [1, 1]} : vector<336x64xf32> to vector<24x64xf32>
    %131 = vector.extract_strided_slice %123 {offsets = [72, 0], sizes = [24, 64], strides = [1, 1]} : vector<336x64xf32> to vector<24x64xf32>
    %132 = arith.maximumf %130, %131 : vector<24x64xf32>
    %c1_103 = arith.constant 1 : index
    %c0_104 = arith.constant 0 : index
    %c0_105 = arith.constant 0 : index
    %133 = vector.load %arg5[%c1_103, %c0_104, %c0_105] : memref<7x24x64xf32, #tpu.memory_space<vmem>>, vector<1x24x64xf32>
    %134 = vector.shape_cast %133 : vector<1x24x64xf32> to vector<24x64xf32>
    %135 = vector.shape_cast %132 : vector<24x64xf32> to vector<1x24x64xf32>
    tpu.vector_store %arg5[%c1_103, %c0_104, %c0_105], %135 {strides = array<i32>} : memref<7x24x64xf32, #tpu.memory_space<vmem>>, vector<1x24x64xf32>,
    %136 = vector.extract_strided_slice %123 {offsets = [96, 0], sizes = [24, 64], strides = [1, 1]} : vector<336x64xf32> to vector<24x64xf32>
    %137 = vector.extract_strided_slice %123 {offsets = [120, 0], sizes = [24, 64], strides = [1, 1]} : vector<336x64xf32> to vector<24x64xf32>
    %138 = arith.maximumf %136, %137 : vector<24x64xf32>
    %c2_106 = arith.constant 2 : index
    %c0_107 = arith.constant 0 : index
    %c0_108 = arith.constant 0 : index
    %139 = vector.load %arg5[%c2_106, %c0_107, %c0_108] : memref<7x24x64xf32, #tpu.memory_space<vmem>>, vector<1x24x64xf32>
    %140 = vector.shape_cast %139 : vector<1x24x64xf32> to vector<24x64xf32>
    %141 = vector.shape_cast %138 : vector<24x64xf32> to vector<1x24x64xf32>
    tpu.vector_store %arg5[%c2_106, %c0_107, %c0_108], %141 {strides = array<i32>} : memref<7x24x64xf32, #tpu.memory_space<vmem>>, vector<1x24x64xf32>,
    %142 = vector.extract_strided_slice %123 {offsets = [144, 0], sizes = [24, 64], strides = [1, 1]} : vector<336x64xf32> to vector<24x64xf32>
    %143 = vector.extract_strided_slice %123 {offsets = [168, 0], sizes = [24, 64], strides = [1, 1]} : vector<336x64xf32> to vector<24x64xf32>
    %144 = arith.maximumf %142, %143 : vector<24x64xf32>
    %c3_109 = arith.constant 3 : index
    %c0_110 = arith.constant 0 : index
    %c0_111 = arith.constant 0 : index
    %145 = vector.load %arg5[%c3_109, %c0_110, %c0_111] : memref<7x24x64xf32, #tpu.memory_space<vmem>>, vector<1x24x64xf32>
    %146 = vector.shape_cast %145 : vector<1x24x64xf32> to vector<24x64xf32>
    %147 = vector.shape_cast %144 : vector<24x64xf32> to vector<1x24x64xf32>
    tpu.vector_store %arg5[%c3_109, %c0_110, %c0_111], %147 {strides = array<i32>} : memref<7x24x64xf32, #tpu.memory_space<vmem>>, vector<1x24x64xf32>,
    %148 = vector.extract_strided_slice %123 {offsets = [192, 0], sizes = [24, 64], strides = [1, 1]} : vector<336x64xf32> to vector<24x64xf32>
    %149 = vector.extract_strided_slice %123 {offsets = [216, 0], sizes = [24, 64], strides = [1, 1]} : vector<336x64xf32> to vector<24x64xf32>
    %150 = arith.maximumf %148, %149 : vector<24x64xf32>
    %c4_112 = arith.constant 4 : index
    %c0_113 = arith.constant 0 : index
    %c0_114 = arith.constant 0 : index
    %151 = vector.load %arg5[%c4_112, %c0_113, %c0_114] : memref<7x24x64xf32, #tpu.memory_space<vmem>>, vector<1x24x64xf32>
    %152 = vector.shape_cast %151 : vector<1x24x64xf32> to vector<24x64xf32>
    %153 = vector.shape_cast %150 : vector<24x64xf32> to vector<1x24x64xf32>
    tpu.vector_store %arg5[%c4_112, %c0_113, %c0_114], %153 {strides = array<i32>} : memref<7x24x64xf32, #tpu.memory_space<vmem>>, vector<1x24x64xf32>,
    %154 = vector.extract_strided_slice %123 {offsets = [240, 0], sizes = [24, 64], strides = [1, 1]} : vector<336x64xf32> to vector<24x64xf32>
    %155 = vector.extract_strided_slice %123 {offsets = [264, 0], sizes = [24, 64], strides = [1, 1]} : vector<336x64xf32> to vector<24x64xf32>
    %156 = arith.maximumf %154, %155 : vector<24x64xf32>
    %c5 = arith.constant 5 : index
    %c0_115 = arith.constant 0 : index
    %c0_116 = arith.constant 0 : index
    %157 = vector.load %arg5[%c5, %c0_115, %c0_116] : memref<7x24x64xf32, #tpu.memory_space<vmem>>, vector<1x24x64xf32>
    %158 = vector.shape_cast %157 : vector<1x24x64xf32> to vector<24x64xf32>
    %159 = vector.shape_cast %156 : vector<24x64xf32> to vector<1x24x64xf32>
    tpu.vector_store %arg5[%c5, %c0_115, %c0_116], %159 {strides = array<i32>} : memref<7x24x64xf32, #tpu.memory_space<vmem>>, vector<1x24x64xf32>,
    %160 = vector.extract_strided_slice %123 {offsets = [288, 0], sizes = [24, 64], strides = [1, 1]} : vector<336x64xf32> to vector<24x64xf32>
    %161 = vector.extract_strided_slice %123 {offsets = [312, 0], sizes = [24, 64], strides = [1, 1]} : vector<336x64xf32> to vector<24x64xf32>
    %162 = arith.maximumf %160, %161 : vector<24x64xf32>
    %c6 = arith.constant 6 : index
    %c0_117 = arith.constant 0 : index
    %c0_118 = arith.constant 0 : index
    %163 = vector.load %arg5[%c6, %c0_117, %c0_118] : memref<7x24x64xf32, #tpu.memory_space<vmem>>, vector<1x24x64xf32>
    %164 = vector.shape_cast %163 : vector<1x24x64xf32> to vector<24x64xf32>
    %165 = vector.shape_cast %162 : vector<24x64xf32> to vector<1x24x64xf32>
    tpu.vector_store %arg5[%c6, %c0_117, %c0_118], %165 {strides = array<i32>} : memref<7x24x64xf32, #tpu.memory_space<vmem>>, vector<1x24x64xf32>,
    %c0_119 = arith.constant 0 : index
    %c0_120 = arith.constant 0 : index
    %c0_121 = arith.constant 0 : index
    %166 = tpu.strided_load %arg5[%c0_119, %c0_120, %c0_121] {strides = array<i32: 1, 2, 1>} : memref<7x24x64xf32, #tpu.memory_space<vmem>>, vector<7x7x64xf32>
    %c0_122 = arith.constant 0 : index
    %c1_123 = arith.constant 1 : index
    %c0_124 = arith.constant 0 : index
    %167 = tpu.strided_load %arg5[%c0_122, %c1_123, %c0_124] {strides = array<i32: 1, 2, 1>} : memref<7x24x64xf32, #tpu.memory_space<vmem>>, vector<7x7x64xf32>
    %168 = arith.maximumf %166, %167 : vector<7x7x64xf32>
    %c0_125 = arith.constant 0 : index
    %c0_126 = arith.constant 0 : index
    %169 = vector.load %arg3[%c0_125, %c0_126] : memref<1x64xf32, #tpu.memory_space<vmem>>, vector<1x64xf32>
    %170 = vector.shape_cast %169 : vector<1x64xf32> to vector<1x1x64xf32>
    %171 = vector.broadcast %170 : vector<1x1x64xf32> to vector<7x7x64xf32>
    %172 = arith.addf %168, %171 : vector<7x7x64xf32>
    %cst_127 = arith.constant 0.000000e+00 : f32
    %173 = vector.broadcast %cst_127 : f32 to vector<7x7x64xf32>
    %174 = arith.maximumf %172, %173 : vector<7x7x64xf32>
    %175 = arith.truncf %174 : vector<7x7x64xf32> to vector<7x7x64xbf16>
    %c0_128 = arith.constant 0 : index
    %c0_129 = arith.constant 0 : index
    %c0_130 = arith.constant 0 : index
    %c0_131 = arith.constant 0 : index
    %176 = vector.load %arg4[%c0_128, %c0_129, %c0_130, %c0_131] : memref<1x7x7x64xbf16, #tpu.memory_space<vmem>>, vector<1x7x7x64xbf16>
    %177 = vector.shape_cast %176 : vector<1x7x7x64xbf16> to vector<7x7x64xbf16>
    %178 = vector.shape_cast %175 : vector<7x7x64xbf16> to vector<1x7x7x64xbf16>
    tpu.vector_store %arg4[%c0_128, %c0_129, %c0_130, %c0_131], %178 {strides = array<i32>} : memref<1x7x7x64xbf16, #tpu.memory_space<vmem>>, vector<1x7x7x64xbf16>,
    return
  }
  func.func @transform_0(%arg0: i32) -> (i32, i32, i32) {
    %c0_i32 = arith.constant 0 : i32
    %c0_i32_0 = arith.constant 0 : i32
    %c0_i32_1 = arith.constant 0 : i32
    return %arg0, %c0_i32, %c0_i32_0 : i32, i32, i32
  }
  func.func @transform_1(%arg0: i32) -> (i32, i32) {
    %c0_i32 = arith.constant 0 : i32
    %c0_i32_0 = arith.constant 0 : i32
    %c0_i32_1 = arith.constant 0 : i32
    return %c0_i32, %c0_i32_0 : i32, i32
  }
  func.func @transform_2(%arg0: i32) -> (i32, i32) {
    %c0_i32 = arith.constant 0 : i32
    %c0_i32_0 = arith.constant 0 : i32
    %c0_i32_1 = arith.constant 0 : i32
    return %c0_i32, %c0_i32_0 : i32, i32
  }
  func.func @transform_3(%arg0: i32) -> (i32, i32, i32, i32) {
    %c0_i32 = arith.constant 0 : i32
    %c0_i32_0 = arith.constant 0 : i32
    %c0_i32_1 = arith.constant 0 : i32
    %c0_i32_2 = arith.constant 0 : i32
    return %arg0, %c0_i32, %c0_i32_0, %c0_i32_1 : i32, i32, i32, i32
  }
}

module attributes {stable_mosaic.version = 11 : i64} {
  func.func @_mlp_kernel(%arg0: memref<2x3136xbf16, #tpu.memory_space<vmem>>, %arg1: memref<3136x128xbf16, #tpu.memory_space<vmem>>, %arg2: memref<1x128xf32, #tpu.memory_space<vmem>>, %arg3: memref<128x128xbf16, #tpu.memory_space<vmem>>, %arg4: memref<1x128xf32, #tpu.memory_space<vmem>>, %arg5: memref<128x128xbf16, #tpu.memory_space<vmem>>, %arg6: memref<1x128xf32, #tpu.memory_space<vmem>>, %arg7: memref<2x128xf32, #tpu.memory_space<vmem>>) attributes {dimension_semantics = [], scalar_prefetch = 0 : i64, scratch_operands = 0 : i64, tpu.core_type = #tpu.core_type<tc>} {
    %c0 = arith.constant 0 : index
    %c0_0 = arith.constant 0 : index
    %0 = vector.load %arg0[%c0, %c0_0] : memref<2x3136xbf16, #tpu.memory_space<vmem>>, vector<2x3136xbf16>
    %c0_1 = arith.constant 0 : index
    %c0_2 = arith.constant 0 : index
    %1 = vector.load %arg1[%c0_1, %c0_2] : memref<3136x128xbf16, #tpu.memory_space<vmem>>, vector<3136x128xbf16>
    %cst = arith.constant dense<0.000000e+00> : vector<2x128xf32>
    %2 = tpu.matmul %0, %1, %cst {dimension_numbers = #tpu.dot_dimension_numbers<[1], [0], [0], [1], [0, 0, 1, 1], [], []>} : vector<2x3136xbf16>, vector<3136x128xbf16>, vector<2x128xf32> -> vector<2x128xf32>
    %c0_3 = arith.constant 0 : index
    %c0_4 = arith.constant 0 : index
    %3 = vector.load %arg2[%c0_3, %c0_4] : memref<1x128xf32, #tpu.memory_space<vmem>>, vector<1x128xf32>
    %4 = vector.broadcast %3 : vector<1x128xf32> to vector<2x128xf32>
    %5 = arith.addf %2, %4 : vector<2x128xf32>
    %cst_5 = arith.constant 0.000000e+00 : f32
    %6 = vector.broadcast %cst_5 : f32 to vector<2x128xf32>
    %7 = arith.maximumf %5, %6 : vector<2x128xf32>
    %8 = arith.truncf %7 : vector<2x128xf32> to vector<2x128xbf16>
    %c0_6 = arith.constant 0 : index
    %c0_7 = arith.constant 0 : index
    %9 = vector.load %arg3[%c0_6, %c0_7] : memref<128x128xbf16, #tpu.memory_space<vmem>>, vector<128x128xbf16>
    %cst_8 = arith.constant dense<0.000000e+00> : vector<2x128xf32>
    %10 = tpu.matmul %8, %9, %cst_8 {dimension_numbers = #tpu.dot_dimension_numbers<[1], [0], [0], [1], [0, 0, 1, 1], [], []>} : vector<2x128xbf16>, vector<128x128xbf16>, vector<2x128xf32> -> vector<2x128xf32>
    %c0_9 = arith.constant 0 : index
    %c0_10 = arith.constant 0 : index
    %11 = vector.load %arg4[%c0_9, %c0_10] : memref<1x128xf32, #tpu.memory_space<vmem>>, vector<1x128xf32>
    %12 = vector.broadcast %11 : vector<1x128xf32> to vector<2x128xf32>
    %13 = arith.addf %10, %12 : vector<2x128xf32>
    %cst_11 = arith.constant 0.000000e+00 : f32
    %14 = vector.broadcast %cst_11 : f32 to vector<2x128xf32>
    %15 = arith.maximumf %13, %14 : vector<2x128xf32>
    %16 = arith.truncf %15 : vector<2x128xf32> to vector<2x128xbf16>
    %c0_12 = arith.constant 0 : index
    %c0_13 = arith.constant 0 : index
    %17 = vector.load %arg5[%c0_12, %c0_13] : memref<128x128xbf16, #tpu.memory_space<vmem>>, vector<128x128xbf16>
    %cst_14 = arith.constant dense<0.000000e+00> : vector<2x128xf32>
    %18 = tpu.matmul %16, %17, %cst_14 {dimension_numbers = #tpu.dot_dimension_numbers<[1], [0], [0], [1], [0, 0, 1, 1], [], []>} : vector<2x128xbf16>, vector<128x128xbf16>, vector<2x128xf32> -> vector<2x128xf32>
    %c0_15 = arith.constant 0 : index
    %c0_16 = arith.constant 0 : index
    %19 = vector.load %arg6[%c0_15, %c0_16] : memref<1x128xf32, #tpu.memory_space<vmem>>, vector<1x128xf32>
    %20 = vector.broadcast %19 : vector<1x128xf32> to vector<2x128xf32>
    %21 = arith.addf %18, %20 : vector<2x128xf32>
    %c0_17 = arith.constant 0 : index
    %c0_18 = arith.constant 0 : index
    %22 = vector.load %arg7[%c0_17, %c0_18] : memref<2x128xf32, #tpu.memory_space<vmem>>, vector<2x128xf32>
    tpu.vector_store %arg7[%c0_17, %c0_18], %21 {strides = array<i32>} : memref<2x128xf32, #tpu.memory_space<vmem>>, vector<2x128xf32>,
    return
  }
}

</mosaic_0001>

<bundles_post_ra>
// kernel: net3_forward.3
= control target key start
LH: loop header
LB: loop body
LE: loop exit
PB: predicated region body
PF: predicated region fallthrough
CT: control target
= control target key end

     0   :  { %s2140_s12 = smov 0   ;;  %s2624_s0 = inlined_call_operand.vmem [shape: bf16[2,896,32], index: 0, kind: input, shape index: {}]   ;;  %s2625_s1 = inlined_call_operand.vmem [shape: bf16[32,64], index: 1, kind: input, shape index: {}]   ;;  %s2626_s2 = inlined_call_operand.vmem [shape: f32[1,64], index: 2, kind: input, shape index: {}]   ;;  %s2627_s3 = inlined_call_operand.vmem [shape: bf16[2,224,64], index: 3, kind: output, shape index: {}]  }
   0x1 LB: > { %s1672_s13 = sadd.s32 4294967295, %s2118_s12   ;;  %p1676_p0 = scmp.ge.s32.totalorder %s2118_s12, 1  ;;  %s2118_s12 = sphi %s2140_s12, %s13_s12  }
   0x2   : > { %p137_p1 = scmp.lt.s32.totalorder %s2118_s12, 3 }
   0x4   : > { %p138_p2 = pnand %p1676_p0, %p137_p1 }
   0x6   : > { %141 = sbr.rel (%p138_p2) target bundleno = 352 (0x160), region = 32 }
   0xd   : > { %v2054_v0 = vld [vmem:[%s2625_s1] sm:$0xff]   ;;  %p161_p3 = scmp.lt.s32.totalorder %s1672_s13, 1  ;;  %v2055_v1 = vld [vmem:[%s2625_s1 + $0x8] sm:$0xff]   ;;  %vm286_vm0 = vcmask 261120   ;;  %vm1588_vm1 = vcmask 519168  }
   0xe   : > { %1916 = vmatprep.subr.bf16.mxu0 %v2054_v0  ;;  %1948 = vmatprep.subr.bf16.mxu1 %v2054_v0 }
   0xf   : > { %s2680_s13 = smov (!%p161_p3, %s1672_s13), 1  ;;  %1917 = vmatpush3.bf16.msra.mxu0 %v2054_v0  ;;  %1949 = vmatpush3.bf16.msra.mxu1 %v2054_v0 }
  0x10   : > { %1918 = vmatprep.subr.bf16.mxu0 %v2055_v1  ;;  %1950 = vmatprep.subr.bf16.mxu1 %v2055_v1  ;;  %s2044_s18 = smul.u32 448, %s2680_s13 }
  0x11   : > { %s2045_s24 = smul.u32 112, %s2680_s13 }
  0x12   : > { %s2160_s21 = scalar_lea.vmem %s2624_s0, %s2044_s18 }
  0x13   : > { %1919 = vmatpush3.bf16.msra.mxu0 %v2055_v1  ;;  %1951 = vmatpush3.bf16.msra.mxu1 %v2055_v1  ;;  %v2056_v2 = vld [vmem:[%s2160_s21] sm:$0xff]   ;;  %v2057_v3 = vld [vmem:[%s2160_s21 + $0x70] sm:$0xff]   ;;  %v2058_v4 = vld [vmem:[%s2160_s21 + $0x8] sm:$0xff]   ;;  %s2466_s27 = scalar_lea.vmem %s2627_s3, %s2045_s24 }
  0x14   : > { %1980 = vmatprep.subr.bf16.mxu0 %v2054_v0  ;;  %2012 = vmatprep.subr.bf16.mxu1 %v2054_v0  ;;  %v2059_v5 = vld [vmem:[%s2160_s21 + $0x78] sm:$0xff]   ;;  %v2060_v6 = vld [vmem:[%s2160_s21 + $0x10] sm:$0xff]   ;;  %v2061_v7 = vld [vmem:[%s2160_s21 + $0x80] sm:$0xff]  }
  0x15   : > { %1920 = vmatprep.mubr.msk.bf16.mxu0 %vm286_vm0, %v2056_v2  ;;  %1952 = vmatprep.mubr.msk.bf16.mxu1 %vm286_vm0, %v2057_v3  ;;  %v2062_v8 = vld [vmem:[%s2160_s21 + $0x18] sm:$0xff]   ;;  %v2063_v9 = vld [vmem:[%s2160_s21 + $0x88] sm:$0xff]   ;;  %v2064_v10 = vld [vmem:[%s2160_s21 + $0x20] sm:$0xff]  }
  0x16   : > { %1921 = vmatmul.mubr.msk.bf16.vlgmr.msra.gmra.mrb[0].mxu0 %vm286_vm0, %v2058_v4  ;;  %1953 = vmatmul.mubr.msk.bf16.vlgmr.msra.gmra.mrb[0].mxu1 %vm286_vm0, %v2059_v5  ;;  %v2065_v11 = vld [vmem:[%s2160_s21 + $0x90] sm:$0xff]   ;;  %v2066_v12 = vld [vmem:[%s2160_s21 + $0x28] sm:$0xff]   ;;  %v2067_v13 = vld [vmem:[%s2160_s21 + $0x98] sm:$0xff]  }
  0x17   : > { %1981 = vmatpush3.bf16.msra.mxu0 %v2054_v0  ;;  %2013 = vmatpush3.bf16.msra.mxu1 %v2054_v0  ;;  %v2068_v14 = vld [vmem:[%s2160_s21 + $0x30] sm:$0xff]   ;;  %v2069_v15 = vld [vmem:[%s2160_s21 + $0xa0] sm:$0xff]   ;;  %v2070_v16 = vld [vmem:[%s2160_s21 + $0x38] sm:$0xff]  }
  0x18   : > { %1924 = vmatprep.mubr.msk.bf16.mxu0 %vm286_vm0, %v2060_v6  ;;  %1956 = vmatprep.mubr.msk.bf16.mxu1 %vm286_vm0, %v2061_v7  ;;  %v2071_v17 = vld [vmem:[%s2160_s21 + $0xa8] sm:$0xff]   ;;  %v2072_v18 = vld [vmem:[%s2160_s21 + $0x40] sm:$0xff]   ;;  %v2073_v19 = vld [vmem:[%s2160_s21 + $0xb0] sm:$0xff]  }
  0x19   : > { %1982 = vmatprep.subr.bf16.mxu0 %v2055_v1  ;;  %2014 = vmatprep.subr.bf16.mxu1 %v2055_v1  ;;  %v2074_v20 = vld [vmem:[%s2160_s21 + $0x48] sm:$0xff]   ;;  %v2075_v21 = vld [vmem:[%s2160_s21 + $0xb8] sm:$0xff]   ;;  %v2076_v22 = vld [vmem:[%s2160_s21 + $0x50] sm:$0xff]  }
  0x1a   : > { %v2077_v23 = vld [vmem:[%s2160_s21 + $0xc0] sm:$0xff]   ;;  %v2078_v24 = vld [vmem:[%s2160_s21 + $0x58] sm:$0xff]   ;;  %v2079_v25 = vld [vmem:[%s2160_s21 + $0xc8] sm:$0xff]  }
  0x1b   : > { %1983 = vmatpush3.bf16.msra.mxu0 %v2055_v1  ;;  %2015 = vmatpush3.bf16.msra.mxu1 %v2055_v1  ;;  %v2080_v26 = vld [vmem:[%s2160_s21 + $0x60] sm:$0xff]   ;;  %v2081_v27 = vld [vmem:[%s2160_s21 + $0xd0] sm:$0xff]   ;;  %v2082_v28 = vld [vmem:[%s2160_s21 + $0x68] sm:$0xff]  }
  0x1c   : > { %v2083_v29 = vld [vmem:[%s2160_s21 + $0xd8] sm:$0xff]   ;;  %v2084_v30 = vld [vmem:[%s2160_s21 + $0xe0] sm:$0xff]   ;;  %v2085_v31 = vld [vmem:[%s2160_s21 + $0x150] sm:$0xff]  }
  0x1d   : > { %v2086_v32 = vld [vmem:[%s2160_s21 + $0xe8] sm:$0xff]   ;;  %v2087_v33 = vld [vmem:[%s2160_s21 + $0x158] sm:$0xff]   ;;  %v2088_v34 = vld [vmem:[%s2160_s21 + $0xf0] sm:$0xff]  }
  0x1e   : > { %1925 = vmatmul.mubr.msk.bf16.gmra.mrb[4].mxu0 %vm286_vm0, %v2062_v8  ;;  %1957 = vmatmul.mubr.msk.bf16.gmra.mrb[4].mxu1 %vm286_vm0, %v2063_v9  ;;  %v2089_v35 = vld [vmem:[%s2160_s21 + $0x160] sm:$0xff]   ;;  %v2090_v36 = vld [vmem:[%s2160_s21 + $0xf8] sm:$0xff]   ;;  %v2091_v37 = vld [vmem:[%s2160_s21 + $0x168] sm:$0xff]  }
  0x1f   : > { %1928 = vmatprep.mubr.msk.bf16.mxu0 %vm286_vm0, %v2064_v10  ;;  %1960 = vmatprep.mubr.msk.bf16.mxu1 %vm286_vm0, %v2065_v11  ;;  %v2092_v38 = vld [vmem:[%s2160_s21 + $0x100] sm:$0xff]   ;;  %v2093_v39 = vld [vmem:[%s2160_s21 + $0x170] sm:$0xff]   ;;  %v2094_v40 = vld [vmem:[%s2160_s21 + $0x108] sm:$0xff]  }
  0x20   : > { %v2095_v41 = vld [vmem:[%s2160_s21 + $0x178] sm:$0xff]   ;;  %v2096_v42 = vld [vmem:[%s2160_s21 + $0x110] sm:$0xff]   ;;  %v2097_v43 = vld [vmem:[%s2160_s21 + $0x180] sm:$0xff]  }
  0x21   : > { %v2098_v44 = vld [vmem:[%s2160_s21 + $0x118] sm:$0xff]   ;;  %v2099_v45 = vld [vmem:[%s2160_s21 + $0x188] sm:$0xff]   ;;  %v2100_v46 = vld [vmem:[%s2160_s21 + $0x120] sm:$0xff]  }
  0x22   : > { %v2101_v47 = vld [vmem:[%s2160_s21 + $0x190] sm:$0xff]   ;;  %v2102_v48 = vld [vmem:[%s2160_s21 + $0x128] sm:$0xff]   ;;  %v2103_v49 = vld [vmem:[%s2160_s21 + $0x198] sm:$0xff]  }
  0x23   : > { %v2104_v50 = vld [vmem:[%s2160_s21 + $0x130] sm:$0xff]   ;;  %v2105_v51 = vld [vmem:[%s2160_s21 + $0x1a0] sm:$0xff]   ;;  %v2106_v52 = vld [vmem:[%s2160_s21 + $0x138] sm:$0xff]  }
  0x24   : > { %v2107_v53 = vld [vmem:[%s2160_s21 + $0x1a8] sm:$0xff]   ;;  %v2108_v54 = vld [vmem:[%s2160_s21 + $0x140] sm:$0xff]   ;;  %v2109_v55 = vld [vmem:[%s2160_s21 + $0x1b0] sm:$0xff]  }
  0x25   : > { %v2110_v56 = vld [vmem:[%s2160_s21 + $0x148] sm:$0xff]   ;;  %v2111_v57 = vld [vmem:[%s2160_s21 + $0x1b8] sm:$0xff]   ;;  %v2448_v0 = vld [vmem:[%s2626_s2] ss:$0 sm:$0xff] }
  0x26   : > { %1929 = vmatmul.mubr.msk.bf16.gmra.mrb[8].mxu0 %vm286_vm0, %v2066_v12  ;;  %1961 = vmatmul.mubr.msk.bf16.gmra.mrb[8].mxu1 %vm286_vm0, %v2067_v13 }
  0x27   : > { %1932 = vmatprep.mubr.msk.bf16.mxu0 %vm286_vm0, %v2068_v14  ;;  %1964 = vmatprep.mubr.msk.bf16.mxu1 %vm286_vm0, %v2069_v15 }
  0x2e   : > { %1933 = vmatmul.mubr.msk.bf16.gmra.mrb[12].mxu0 %vm286_vm0, %v2070_v16  ;;  %1965 = vmatmul.mubr.msk.bf16.gmra.mrb[12].mxu1 %vm286_vm0, %v2071_v17 }
  0x2f   : > { %1936 = vmatprep.mubr.msk.bf16.mxu0 %vm286_vm0, %v2072_v18  ;;  %1968 = vmatprep.mubr.msk.bf16.mxu1 %vm286_vm0, %v2073_v19 }
  0x36   : > { %1937 = vmatmul.mubr.msk.bf16.gmra.mrb[16].mxu0 %vm286_vm0, %v2074_v20  ;;  %1969 = vmatmul.mubr.msk.bf16.gmra.mrb[16].mxu1 %vm286_vm0, %v2075_v21 }
  0x37   : > { %1940 = vmatprep.mubr.msk.bf16.mxu0 %vm286_vm0, %v2076_v22  ;;  %1972 = vmatprep.mubr.msk.bf16.mxu1 %vm286_vm0, %v2077_v23 }
  0x3e   : > { %1941 = vmatmul.mubr.msk.bf16.gmra.mrb[20].mxu0 %vm286_vm0, %v2078_v24  ;;  %1973 = vmatmul.mubr.msk.bf16.gmra.mrb[20].mxu1 %vm286_vm0, %v2079_v25 }
  0x3f   : > { %1944 = vmatprep.mubr.msk.bf16.mxu0 %vm286_vm0, %v2080_v26  ;;  %1976 = vmatprep.mubr.msk.bf16.mxu1 %vm286_vm0, %v2081_v27 }
  0x46   : > { %1945 = vmatmul.mubr.msk.bf16.gmra.mrb[24].mxu0 %vm286_vm0, %v2082_v28  ;;  %1977 = vmatmul.mubr.msk.bf16.gmra.mrb[24].mxu1 %vm286_vm0, %v2083_v29 }
  0x47   : > { %1984 = vmatprep.mubr.msk.bf16.mxu0 %vm286_vm0, %v2084_v30  ;;  %2016 = vmatprep.mubr.msk.bf16.mxu1 %vm286_vm0, %v2085_v31 }
  0x4e   : > { %1985 = vmatmul.mubr.msk.bf16.vlgmr.msra.gmra.mrb[28].mxu0 %vm286_vm0, %v2086_v32  ;;  %2017 = vmatmul.mubr.msk.bf16.vlgmr.msra.gmra.mrb[28].mxu1 %vm286_vm0, %v2087_v33 }
  0x4f   : > { %1988 = vmatprep.mubr.msk.bf16.mxu0 %vm286_vm0, %v2088_v34  ;;  %2020 = vmatprep.mubr.msk.bf16.mxu1 %vm286_vm0, %v2089_v35 }
  0x56   : > { %1989 = vmatmul.mubr.msk.bf16.gmra.mrb[32].mxu0 %vm286_vm0, %v2090_v36  ;;  %2021 = vmatmul.mubr.msk.bf16.gmra.mrb[32].mxu1 %vm286_vm0, %v2091_v37 }
  0x57   : > { %1992 = vmatprep.mubr.msk.bf16.mxu0 %vm286_vm0, %v2092_v38  ;;  %2024 = vmatprep.mubr.msk.bf16.mxu1 %vm286_vm0, %v2093_v39 }
  0x5e   : > { %1993 = vmatmul.mubr.msk.bf16.gmra.mrb[36].mxu0 %vm286_vm0, %v2094_v40  ;;  %2025 = vmatmul.mubr.msk.bf16.gmra.mrb[36].mxu1 %vm286_vm0, %v2095_v41 }
  0x5f   : > { %1996 = vmatprep.mubr.msk.bf16.mxu0 %vm286_vm0, %v2096_v42  ;;  %2028 = vmatprep.mubr.msk.bf16.mxu1 %vm286_vm0, %v2097_v43 }
  0x66   : > { %1997 = vmatmul.mubr.msk.bf16.gmra.mrb[40].mxu0 %vm286_vm0, %v2098_v44  ;;  %2029 = vmatmul.mubr.msk.bf16.gmra.mrb[40].mxu1 %vm286_vm0, %v2099_v45 }
  0x67   : > { %2000 = vmatprep.mubr.msk.bf16.mxu0 %vm286_vm0, %v2100_v46  ;;  %2032 = vmatprep.mubr.msk.bf16.mxu1 %vm286_vm0, %v2101_v47 }
  0x6e   : > { %2001 = vmatmul.mubr.msk.bf16.gmra.mrb[44].mxu0 %vm286_vm0, %v2102_v48  ;;  %2033 = vmatmul.mubr.msk.bf16.gmra.mrb[44].mxu1 %vm286_vm0, %v2103_v49 }
  0x6f   : > { %2004 = vmatprep.mubr.msk.bf16.mxu0 %vm286_vm0, %v2104_v50  ;;  %2036 = vmatprep.mubr.msk.bf16.mxu1 %vm286_vm0, %v2105_v51 }
  0x76   : > { %2005 = vmatmul.mubr.msk.bf16.gmra.mrb[48].mxu0 %vm286_vm0, %v2106_v52  ;;  %2037 = vmatmul.mubr.msk.bf16.gmra.mrb[48].mxu1 %vm286_vm0, %v2107_v53 }
  0x77   : > { %2008 = vmatprep.mubr.msk.bf16.mxu0 %vm286_vm0, %v2108_v54  ;;  %2040 = vmatprep.mubr.msk.bf16.mxu1 %vm286_vm0, %v2109_v55 }
  0x7e   : > { %2009 = vmatmul.mubr.msk.bf16.gmra.mrb[52].mxu0 %vm286_vm0, %v2110_v56  ;;  %2041 = vmatmul.mubr.msk.bf16.gmra.mrb[52].mxu1 %vm286_vm0, %v2111_v57 }
  0xe9   : > { %v2274_v58 = vpop.f32.mrb[0].mxu0  ;;  %v2276_v59 = vpop.f32.mrb[0].mxu1 }
  0xea   : > { %v2278_v60 = vpop.f32.mrb[1].mxu0  ;;  %v761_v61 = vmax.f32 %v2274_v58, %v2276_v59  ;;  %v2282_v62 = vpop.f32.mrb[1].mxu1 }
  0xeb   : > { %v2284_v63 = vpop.f32.mrb[2].mxu0  ;;  %v2288_v1 = vpop.f32.mrb[2].mxu1  ;;  %v2644_v33 = vmax.f32 %v2278_v60, %v2282_v62 }
  0xec   : > { %v2290_v2 = vpop.f32.mrb[3].mxu0  ;;  %v2294_v4 = vpop.f32.mrb[3].mxu1  ;;  %v2645_v51 = vmax.f32 %v2284_v63, %v2288_v1 }
  0xf1   : > { %v2298_v6 = vpop.f32.mrb[4].mxu0  ;;  %v2300_v7 = vpop.f32.mrb[4].mxu1 }
  0xf2   : > { %v2302_v8 = vpop.f32.mrb[5].mxu0  ;;  %v2306_v10 = vpop.f32.mrb[5].mxu1 }
  0xf3   : > { %v2308_v11 = vpop.f32.mrb[6].mxu0  ;;  %v2312_v13 = vpop.f32.mrb[6].mxu1 }
  0xf4   : > { %v2314_v14 = vpop.f32.mrb[7].mxu0  ;;  %v2318_v16 = vpop.f32.mrb[7].mxu1 }
  0xf9   : > { %v2322_v18 = vpop.f32.mrb[8].mxu0  ;;  %v2324_v19 = vpop.f32.mrb[8].mxu1 }
  0xfa   : > { %v2326_v20 = vpop.f32.mrb[9].mxu0  ;;  %v2330_v22 = vpop.f32.mrb[9].mxu1 }
  0xfb   : > { %v2332_v23 = vpop.f32.mrb[10].mxu0  ;;  %v2336_v25 = vpop.f32.mrb[10].mxu1 }
  0xfc   : > { %v2338_v26 = vpop.f32.mrb[11].mxu0  ;;  %v2342_v28 = vpop.f32.mrb[11].mxu1 }
 0x101   : > { %v2346_v30 = vpop.f32.mrb[12].mxu0  ;;  %v2348_v31 = vpop.f32.mrb[12].mxu1 }
 0x102   : > { %v2350_v32 = vpop.f32.mrb[13].mxu0  ;;  %v2354_v34 = vpop.f32.mrb[13].mxu1 }
 0x103   : > { %v2356_v35 = vpop.f32.mrb[14].mxu0  ;;  %v2360_v37 = vpop.f32.mrb[14].mxu1 }
 0x104   : > { %v2362_v38 = vpop.f32.mrb[15].mxu0  ;;  %v2366_v40 = vpop.f32.mrb[15].mxu1 }
 0x109   : > { %v2370_v42 = vpop.f32.mrb[16].mxu0  ;;  %v2372_v43 = vpop.f32.mrb[16].mxu1 }
 0x10a   : > { %v2374_v44 = vpop.f32.mrb[17].mxu0  ;;  %v2378_v46 = vpop.f32.mrb[17].mxu1 }
 0x10b   : > { %v2380_v47 = vpop.f32.mrb[18].mxu0  ;;  %v2384_v49 = vpop.f32.mrb[18].mxu1 }
 0x10c   : > { %v2386_v50 = vpop.f32.mrb[19].mxu0  ;;  %v2390_v52 = vpop.f32.mrb[19].mxu1 }
 0x111   : > { %v2394_v54 = vpop.f32.mrb[20].mxu0  ;;  %v2396_v55 = vpop.f32.mrb[20].mxu1 }
 0x112   : > { %v2398_v56 = vpop.f32.mrb[21].mxu0  ;;  %v2402_v48 = vpop.f32.mrb[21].mxu1 }
 0x113   : > { %v2404_v45 = vpop.f32.mrb[22].mxu0  ;;  %v2408_v41 = vpop.f32.mrb[22].mxu1 }
 0x114   : > { %v2410_v39 = vpop.f32.mrb[23].mxu0  ;;  %v2414_v36 = vpop.f32.mrb[23].mxu1 }
 0x119   : > { %v2418_v57 = vpop.f32.mrb[24].mxu0  ;;  %v2420_v29 = vpop.f32.mrb[24].mxu1 }
 0x11a   : > { %2636 = vst [vmem:[#allocation2_spill] sm:$0xff] %v2418_v57  ;;  %2637 = vst [vmem:[#allocation3_spill] sm:$0xff] %v2420_v29  ;;  %v2422_v27 = vpop.f32.mrb[25].mxu0  ;;  %v2426_v24 = vpop.f32.mrb[25].mxu1 }
 0x11b   : > { %2638 = vst [vmem:[#allocation4_spill] sm:$0xff] %v2422_v27  ;;  %2639 = vst [vmem:[#allocation5_spill] sm:$0xff] %v2426_v24  ;;  %v2428_v21 = vpop.f32.mrb[26].mxu0  ;;  %v2432_v17 = vpop.f32.mrb[26].mxu1 }
 0x11c   : > { %2640 = vst [vmem:[#allocation6_spill] sm:$0xff] %v2428_v21  ;;  %2641 = vst [vmem:[#allocation7_spill] sm:$0xff] %v2432_v17  ;;  %v2434_v15 = vpop.f32.mrb[27].mxu0  ;;  %v2438_v12 = vpop.f32.mrb[27].mxu1 }
 0x11d   : > { %2642 = vst [vmem:[#allocation8_spill] sm:$0xff] %v2434_v15  ;;  %2643 = vst [vmem:[#allocation9_spill] sm:$0xff] %v2438_v12 }
 0x121   : > { %v1986_v9 = vpop.f32.mrb[28].mxu0  ;;  %v2018_v3 = vpop.f32.mrb[28].mxu1 }
 0x122   : > { %v1074_v5 = vmax.f32 %v761_v61, %v1986_v9  ;;  %v961_v53 = vpop.f32.mrb[29].mxu0  ;;  %v1274_v21 = vpop.f32.mrb[29].mxu1  ;;  %v2646_v9 = vmax.f32 %v2290_v2, %v2294_v4 }
 0x123   : > { %v1072_v17 = vmax.f32 %v2644_v33, %v961_v53  ;;  %v1987_v24 = vpop.f32.mrb[30].mxu0  ;;  %v2019_v58 = vpop.f32.mrb[30].mxu1 }
 0x124   : > { %v1387_v27 = vmax.f32 %v1074_v5, %v2018_v3  ;;  %v1075_v12 = vmax.f32 %v2645_v51, %v1987_v24  ;;  %v964_v59 = vpop.f32.mrb[31].mxu0  ;;  %v1277_v29 = vpop.f32.mrb[31].mxu1  ;;  %v2648_v51 = vmax.f32 %v2302_v8, %v2306_v10  ;;  %v2650_v8 = vmax.f32 %v2314_v14, %v2318_v16 }
 0x125   : > { %v1385_v61 = vmax.f32 %v1072_v17, %v1274_v21  ;;  %v1073_v15 = vmax.f32 %v2646_v9, %v964_v59 }
 0x126   : > { %v1422_v57 = vadd.f32 %v2448_v0, %v1387_v27  ;;  %v1388_v60 = vmax.f32 %v1075_v12, %v2019_v58 }
 0x127   : > { %v1420_v62 = vadd.f32 %v2448_v0, %v1385_v61  ;;  %v1386_v33 = vmax.f32 %v1073_v15, %v1277_v29  ;;  %v2647_v15 = vmax.f32 %v2298_v6, %v2300_v7  ;;  %v2649_v6 = vmax.f32 %v2308_v11, %v2312_v13 }
 0x128   : > { %v1450_v3 = vmax.f32 %v1422_v57, 0.0  ;;  %v1423_v5 = vadd.f32 %v2448_v0, %v1388_v60 }
 0x129   : > { %v1448_v63 = vmax.f32 %v1420_v62, 0.0  ;;  %v1421_v1 = vadd.f32 %v2448_v0, %v1386_v33  ;;  %v1990_v2 = vpop.f32.mrb[32].mxu0  ;;  %v2022_v21 = vpop.f32.mrb[32].mxu1 }
 0x12a   : > { %v1826_v4 = vpack.c.bf16 %v1450_v3, %v1450_v3  ;;  %v1451_v12 = vmax.f32 %v1423_v5, 0.0  ;;  %v1078_v17 = vmax.f32 %v2647_v15, %v1990_v2  ;;  %v977_v24 = vpop.f32.mrb[33].mxu0  ;;  %v1290_v57 = vpop.f32.mrb[33].mxu1 }
 0x12b   : > { %v1824_v27 = vpack.c.bf16 %v1448_v63, %v1448_v63  ;;  %v1449_v29 = vmax.f32 %v1421_v1, 0.0  ;;  %v1076_v53 = vmax.f32 %v2648_v51, %v977_v24  ;;  %v1991_v58 = vpop.f32.mrb[34].mxu0  ;;  %v2023_v9 = vpop.f32.mrb[34].mxu1 }
 0x12c   : > { %1591 = vst.msk [vmem:[%s2466_s27 + $0x8] sm:$0xf] %vm1588_vm1, %v1826_v4  ;;  %v1827_v59 = vpack.c.bf16 %v1451_v12, %v1451_v12  ;;  %v1391_v61 = vmax.f32 %v1078_v17, %v2022_v21  ;;  %v1079_v7 = vmax.f32 %v2649_v6, %v1991_v58  ;;  %v980_v60 = vpop.f32.mrb[35].mxu0  ;;  %v1293_v3 = vpop.f32.mrb[35].mxu1  ;;  %v2651_v17 = vmax.f32 %v2322_v18, %v2324_v19 }
 0x12d   : > { %1589 = vst.msk [vmem:[%s2466_s27] sm:$0xf] %vm1588_vm1, %v1824_v27  ;;  %v1825_v62 = vpack.c.bf16 %v1449_v29, %v1449_v29  ;;  %v1389_v33 = vmax.f32 %v1076_v53, %v1290_v57  ;;  %v1077_v10 = vmax.f32 %v2650_v8, %v980_v60  ;;  %v2652_v53 = vmax.f32 %v2326_v20, %v2330_v22 }
 0x12e   : > { %1592 = vst.msk [vmem:[%s2466_s27 + $0xc] sm:$0xf] %vm1588_vm1, %v1827_v59  ;;  %v1426_v5 = vadd.f32 %v2448_v0, %v1391_v61  ;;  %v1392_v63 = vmax.f32 %v1079_v7, %v2023_v9  ;;  %v2653_v18 = vmax.f32 %v2332_v23, %v2336_v25  ;;  %v2654_v20 = vmax.f32 %v2338_v26, %v2342_v28 }
 0x12f   : > { %1590 = vst.msk [vmem:[%s2466_s27 + $0x4] sm:$0xf] %vm1588_vm1, %v1825_v62  ;;  %v1424_v11 = vadd.f32 %v2448_v0, %v1389_v33  ;;  %v1390_v13 = vmax.f32 %v1077_v10, %v1293_v3 }
 0x130   : > { %v1454_v1 = vmax.f32 %v1426_v5, 0.0  ;;  %v1427_v2 = vadd.f32 %v2448_v0, %v1392_v63 }
 0x131   : > { %v1452_v4 = vmax.f32 %v1424_v11, 0.0  ;;  %v1425_v12 = vadd.f32 %v2448_v0, %v1390_v13  ;;  %v1994_v14 = vpop.f32.mrb[36].mxu0  ;;  %v2026_v24 = vpop.f32.mrb[36].mxu1 }
 0x132   : > { %v1830_v16 = vpack.c.bf16 %v1454_v1, %v1454_v1  ;;  %v1455_v15 = vmax.f32 %v1427_v2, 0.0  ;;  %v1082_v21 = vmax.f32 %v2651_v17, %v1994_v14  ;;  %v993_v27 = vpop.f32.mrb[37].mxu0  ;;  %v1306_v58 = vpop.f32.mrb[37].mxu1  ;;  %v2655_v1 = vmax.f32 %v2346_v30, %v2348_v31 }
 0x133   : > { %v1828_v29 = vpack.c.bf16 %v1452_v4, %v1452_v4  ;;  %v1453_v51 = vmax.f32 %v1425_v12, 0.0  ;;  %v1080_v57 = vmax.f32 %v2652_v53, %v993_v27  ;;  %v1995_v59 = vpop.f32.mrb[38].mxu0  ;;  %v2027_v7 = vpop.f32.mrb[38].mxu1  ;;  %v2657_v30 = vmax.f32 %v2356_v35, %v2360_v37 }
 0x134   : > { %1595 = vst.msk [vmem:[%s2466_s27 + $0x18] sm:$0xf] %vm1588_vm1, %v1830_v16  ;;  %v1831_v61 = vpack.c.bf16 %v1455_v15, %v1455_v15  ;;  %v1395_v6 = vmax.f32 %v1082_v21, %v2026_v24  ;;  %v1083_v19 = vmax.f32 %v2653_v18, %v1995_v59  ;;  %v996_v9 = vpop.f32.mrb[39].mxu0  ;;  %v1309_v33 = vpop.f32.mrb[39].mxu1  ;;  %v2656_v15 = vmax.f32 %v2350_v32, %v2354_v34 }
 0x135   : > { %1593 = vst.msk [vmem:[%s2466_s27 + $0x10] sm:$0xf] %vm1588_vm1, %v1828_v29  ;;  %v1829_v60 = vpack.c.bf16 %v1453_v51, %v1453_v51  ;;  %v1393_v62 = vmax.f32 %v1080_v57, %v1306_v58  ;;  %v1081_v22 = vmax.f32 %v2654_v20, %v996_v9  ;;  %v2658_v32 = vmax.f32 %v2362_v38, %v2366_v40 }
 0x136   : > { %1596 = vst.msk [vmem:[%s2466_s27 + $0x1c] sm:$0xf] %vm1588_vm1, %v1831_v61  ;;  %v1430_v8 = vadd.f32 %v2448_v0, %v1395_v6  ;;  %v1396_v10 = vmax.f32 %v1083_v19, %v2027_v7 }
 0x137   : > { %1594 = vst.msk [vmem:[%s2466_s27 + $0x14] sm:$0xf] %vm1588_vm1, %v1829_v60  ;;  %v1428_v23 = vadd.f32 %v2448_v0, %v1393_v62  ;;  %v1394_v25 = vmax.f32 %v1081_v22, %v1309_v33  ;;  %v2659_v62 = vmax.f32 %v2370_v42, %v2372_v43  ;;  %v2661_v42 = vmax.f32 %v2380_v47, %v2384_v49 }
 0x138   : > { %v1458_v3 = vmax.f32 %v1430_v8, 0.0  ;;  %v1431_v5 = vadd.f32 %v2448_v0, %v1396_v10 }
 0x139   : > { %v1456_v63 = vmax.f32 %v1428_v23, 0.0  ;;  %v1429_v11 = vadd.f32 %v2448_v0, %v1394_v25  ;;  %v1998_v26 = vpop.f32.mrb[40].mxu0  ;;  %v2030_v4 = vpop.f32.mrb[40].mxu1  ;;  %v2660_v23 = vmax.f32 %v2374_v44, %v2378_v46  ;;  %v2662_v44 = vmax.f32 %v2386_v50, %v2390_v52 }
 0x13a   : > { %v1834_v28 = vpack.c.bf16 %v1458_v3, %v1458_v3  ;;  %v1459_v13 = vmax.f32 %v1431_v5, 0.0  ;;  %v1086_v2 = vmax.f32 %v2655_v1, %v1998_v26  ;;  %v1009_v12 = vpop.f32.mrb[41].mxu0  ;;  %v1322_v21 = vpop.f32.mrb[41].mxu1 }
 0x13b   : > { %v1832_v14 = vpack.c.bf16 %v1456_v63, %v1456_v63  ;;  %v1457_v16 = vmax.f32 %v1429_v11, 0.0  ;;  %v1084_v17 = vmax.f32 %v2656_v15, %v1009_v12  ;;  %v1999_v24 = vpop.f32.mrb[42].mxu0  ;;  %v2031_v51 = vpop.f32.mrb[42].mxu1 }
 0x13c   : > { %1599 = vst.msk [vmem:[%s2466_s27 + $0x28] sm:$0xf] %vm1588_vm1, %v1834_v28  ;;  %v1835_v27 = vpack.c.bf16 %v1459_v13, %v1459_v13  ;;  %v1399_v29 = vmax.f32 %v1086_v2, %v2030_v4  ;;  %v1087_v31 = vmax.f32 %v2657_v30, %v1999_v24  ;;  %v1012_v53 = vpop.f32.mrb[43].mxu0  ;;  %v1325_v59 = vpop.f32.mrb[43].mxu1  ;;  %v2663_v24 = vmax.f32 %v2394_v54, %v2396_v55 }
 0x13d   : > { %1597 = vst.msk [vmem:[%s2466_s27 + $0x20] sm:$0xf] %vm1588_vm1, %v1832_v14  ;;  %v1833_v57 = vpack.c.bf16 %v1457_v16, %v1457_v16  ;;  %v1397_v58 = vmax.f32 %v1084_v17, %v1322_v21  ;;  %v1085_v34 = vmax.f32 %v2658_v32, %v1012_v53  ;;  %v2664_v53 = vmax.f32 %v2398_v56, %v2402_v48 }
 0x13e   : > { %1600 = vst.msk [vmem:[%s2466_s27 + $0x2c] sm:$0xf] %vm1588_vm1, %v1835_v27  ;;  %v1434_v61 = vadd.f32 %v2448_v0, %v1399_v29  ;;  %v1400_v6 = vmax.f32 %v1087_v31, %v2031_v51  ;;  %v2665_v54 = vmax.f32 %v2404_v45, %v2408_v41  ;;  %v2666_v48 = vmax.f32 %v2410_v39, %v2414_v36 }
 0x13f   : > { %1598 = vst.msk [vmem:[%s2466_s27 + $0x24] sm:$0xf] %vm1588_vm1, %v1833_v57  ;;  %v1432_v35 = vadd.f32 %v2448_v0, %v1397_v58  ;;  %v1398_v37 = vmax.f32 %v1085_v34, %v1325_v59 }
 0x140   : > { %v1462_v18 = vmax.f32 %v1434_v61, 0.0  ;;  %v1435_v19 = vadd.f32 %v2448_v0, %v1400_v6 }
 0x141   : > { %v1460_v7 = vmax.f32 %v1432_v35, 0.0  ;;  %v1433_v9 = vadd.f32 %v2448_v0, %v1398_v37  ;;  %v2002_v38 = vpop.f32.mrb[44].mxu0  ;;  %v2034_v22 = vpop.f32.mrb[44].mxu1 }
 0x142   : > { %v1838_v40 = vpack.c.bf16 %v1462_v18, %v1462_v18  ;;  %v1463_v60 = vmax.f32 %v1435_v19, 0.0  ;;  %v1090_v20 = vmax.f32 %v2659_v62, %v2002_v38  ;;  %v1025_v33 = vpop.f32.mrb[45].mxu0  ;;  %v1338_v3 = vpop.f32.mrb[45].mxu1 }
 0x143   : > { %v1836_v8 = vpack.c.bf16 %v1460_v7, %v1460_v7  ;;  %v1461_v10 = vmax.f32 %v1433_v9, 0.0  ;;  %v1088_v25 = vmax.f32 %v2660_v23, %v1025_v33  ;;  %v2003_v5 = vpop.f32.mrb[46].mxu0  ;;  %v2035_v26 = vpop.f32.mrb[46].mxu1 }
 0x144   : > { %1603 = vst.msk [vmem:[%s2466_s27 + $0x38] sm:$0xf] %vm1588_vm1, %v1838_v40  ;;  %v1839_v63 = vpack.c.bf16 %v1463_v60, %v1463_v60  ;;  %v1403_v11 = vmax.f32 %v1090_v20, %v2034_v22  ;;  %v1091_v43 = vmax.f32 %v2661_v42, %v2003_v5  ;;  %v1028_v28 = vpop.f32.mrb[47].mxu0  ;;  %v1341_v2 = vpop.f32.mrb[47].mxu1  ;;  %v2667_v20 = vld [vmem:[#allocation2_spill] sm:$0xff]  ;;  %v2668_v22 = vld [vmem:[#allocation3_spill] sm:$0xff] }
 0x145   : > { %1601 = vst.msk [vmem:[%s2466_s27 + $0x30] sm:$0xf] %vm1588_vm1, %v1836_v8  ;;  %v1837_v13 = vpack.c.bf16 %v1461_v10, %v1461_v10  ;;  %v1401_v1 = vmax.f32 %v1088_v25, %v1338_v3  ;;  %v1089_v46 = vmax.f32 %v2662_v44, %v1028_v28  ;;  %v2669_v33 = vmax.f32 %v2667_v20, %v2668_v22  ;;  %v2670_v5 = vld [vmem:[#allocation4_spill] sm:$0xff]  ;;  %v2674_v44 = vld [vmem:[#allocation7_spill] sm:$0xff] }
 0x146   : > { %1604 = vst.msk [vmem:[%s2466_s27 + $0x3c] sm:$0xf] %vm1588_vm1, %v1839_v63  ;;  %v1438_v4 = vadd.f32 %v2448_v0, %v1403_v11  ;;  %v1404_v12 = vmax.f32 %v1091_v43, %v2035_v26  ;;  %v2671_v63 = vld [vmem:[#allocation5_spill] sm:$0xff] }
 0x147   : > { %1602 = vst.msk [vmem:[%s2466_s27 + $0x34] sm:$0xf] %vm1588_vm1, %v1837_v13  ;;  %v1436_v47 = vadd.f32 %v2448_v0, %v1401_v1  ;;  %v1402_v49 = vmax.f32 %v1089_v46, %v1341_v2  ;;  %v2672_v11 = vmax.f32 %v2670_v5, %v2671_v63  ;;  %v2673_v1 = vld [vmem:[#allocation6_spill] sm:$0xff] }
 0x148   : > { %v1466_v14 = vmax.f32 %v1438_v4, 0.0  ;;  %v1439_v16 = vadd.f32 %v2448_v0, %v1404_v12  ;;  %v2675_v46 = vmax.f32 %v2673_v1, %v2674_v44 }
 0x149   : > { %v1464_v15 = vmax.f32 %v1436_v47, 0.0  ;;  %v1437_v17 = vadd.f32 %v2448_v0, %v1402_v49  ;;  %v2006_v50 = vpop.f32.mrb[48].mxu0  ;;  %v2038_v29 = vpop.f32.mrb[48].mxu1 }
 0x14a   : > { %v1842_v52 = vpack.c.bf16 %v1466_v14, %v1466_v14  ;;  %v1467_v21 = vmax.f32 %v1439_v16, 0.0  ;;  %v1094_v27 = vmax.f32 %v2663_v24, %v2006_v50  ;;  %v1041_v30 = vpop.f32.mrb[49].mxu0  ;;  %v1354_v58 = vpop.f32.mrb[49].mxu1  ;;  %v2676_v14 = vld [vmem:[#allocation8_spill] sm:$0xff]  ;;  %v2677_v16 = vld [vmem:[#allocation9_spill] sm:$0xff] }
 0x14b   : > { %v1840_v31 = vpack.c.bf16 %v1464_v15, %v1464_v15  ;;  %v1465_v51 = vmax.f32 %v1437_v17, 0.0  ;;  %v1092_v57 = vmax.f32 %v2664_v53, %v1041_v30  ;;  %v2007_v32 = vpop.f32.mrb[50].mxu0  ;;  %v2039_v61 = vpop.f32.mrb[50].mxu1  ;;  %v2678_v15 = vmax.f32 %v2676_v14, %v2677_v16 }
 0x14c   : > { %1607 = vst.msk [vmem:[%s2466_s27 + $0x48] sm:$0xf] %vm1588_vm1, %v1842_v52  ;;  %v1843_v34 = vpack.c.bf16 %v1467_v21, %v1467_v21  ;;  %v1407_v59 = vmax.f32 %v1094_v27, %v2038_v29  ;;  %v1095_v55 = vmax.f32 %v2665_v54, %v2007_v32  ;;  %v1044_v6 = vpop.f32.mrb[51].mxu0  ;;  %v1357_v18 = vpop.f32.mrb[51].mxu1 }
 0x14d   : > { %1605 = vst.msk [vmem:[%s2466_s27 + $0x40] sm:$0xf] %vm1588_vm1, %v1840_v31  ;;  %v1841_v35 = vpack.c.bf16 %v1465_v51, %v1465_v51  ;;  %v1405_v37 = vmax.f32 %v1092_v57, %v1354_v58  ;;  %v1093_v56 = vmax.f32 %v2666_v48, %v1044_v6 }
 0x14e   : > { %1608 = vst.msk [vmem:[%s2466_s27 + $0x4c] sm:$0xf] %vm1588_vm1, %v1843_v34  ;;  %v1442_v19 = vadd.f32 %v2448_v0, %v1407_v59  ;;  %v1408_v7 = vmax.f32 %v1095_v55, %v2039_v61 }
 0x14f   : > { %1606 = vst.msk [vmem:[%s2466_s27 + $0x44] sm:$0xf] %vm1588_vm1, %v1841_v35  ;;  %v1440_v41 = vadd.f32 %v2448_v0, %v1405_v37  ;;  %v1406_v45 = vmax.f32 %v1093_v56, %v1357_v18 }
 0x150   : > { %v1470_v9 = vmax.f32 %v1442_v19, 0.0  ;;  %v1443_v38 = vadd.f32 %v2448_v0, %v1408_v7 }
 0x151   : > { %v1468_v40 = vmax.f32 %v1440_v41, 0.0  ;;  %v1441_v60 = vadd.f32 %v2448_v0, %v1406_v45  ;;  %v2010_v36 = vpop.f32.mrb[52].mxu0  ;;  %v2042_v10 = vpop.f32.mrb[52].mxu1 }
 0x152   : > { %v1846_v39 = vpack.c.bf16 %v1470_v9, %v1470_v9  ;;  %v1471_v62 = vmax.f32 %v1443_v38, 0.0  ;;  %v1098_v8 = vmax.f32 %v2669_v33, %v2010_v36  ;;  %v1057_v23 = vpop.f32.mrb[53].mxu0  ;;  %v1370_v43 = vpop.f32.mrb[53].mxu1 }
 0x153   : > { %v1844_v25 = vpack.c.bf16 %v1468_v40, %v1468_v40  ;;  %v1469_v3 = vmax.f32 %v1441_v60, 0.0  ;;  %v1096_v42 = vmax.f32 %v2672_v11, %v1057_v23  ;;  %v2011_v26 = vpop.f32.mrb[54].mxu0  ;;  %v2043_v4 = vpop.f32.mrb[54].mxu1 }
 0x154   : > { %1611 = vst.msk [vmem:[%s2466_s27 + $0x58] sm:$0xf] %vm1588_vm1, %v1846_v39  ;;  %v1847_v28 = vpack.c.bf16 %v1471_v62, %v1471_v62  ;;  %v1411_v13 = vmax.f32 %v1098_v8, %v2042_v10  ;;  %v1099_v2 = vmax.f32 %v2675_v46, %v2011_v26  ;;  %v1060_v12 = vpop.f32.mrb[55].mxu0  ;;  %v1373_v50 = vpop.f32.mrb[55].mxu1 }
 0x155   : > { %1609 = vst.msk [vmem:[%s2466_s27 + $0x50] sm:$0xf] %vm1588_vm1, %v1844_v25  ;;  %v1845_v47 = vpack.c.bf16 %v1469_v3, %v1469_v3  ;;  %v1409_v49 = vmax.f32 %v1096_v42, %v1370_v43  ;;  %v1097_v17 = vmax.f32 %v2678_v15, %v1060_v12 }
 0x156   : > { %1612 = vst.msk [vmem:[%s2466_s27 + $0x5c] sm:$0xf] %vm1588_vm1, %v1847_v28  ;;  %v1446_v52 = vadd.f32 %v2448_v0, %v1411_v13  ;;  %v1412_v21 = vmax.f32 %v1099_v2, %v2043_v4 }
 0x157   : > { %1610 = vst.msk [vmem:[%s2466_s27 + $0x54] sm:$0xf] %vm1588_vm1, %v1845_v47  ;;  %v1444_v24 = vadd.f32 %v2448_v0, %v1409_v49  ;;  %v1410_v27 = vmax.f32 %v1097_v17, %v1373_v50 }
 0x158   : > { %v1474_v29 = vmax.f32 %v1446_v52, 0.0  ;;  %v1447_v30 = vadd.f32 %v2448_v0, %v1412_v21 }
 0x159   : > { %v1472_v31 = vmax.f32 %v1444_v24, 0.0  ;;  %v1445_v51 = vadd.f32 %v2448_v0, %v1410_v27 }
 0x15a   : > { %v1850_v53 = vpack.c.bf16 %v1474_v29, %v1474_v29  ;;  %v1475_v57 = vmax.f32 %v1447_v30, 0.0 }
 0x15b   : > { %v1848_v58 = vpack.c.bf16 %v1472_v31, %v1472_v31  ;;  %v1473_v32 = vmax.f32 %v1445_v51, 0.0 }
 0x15c   : > { %1615 = vst.msk [vmem:[%s2466_s27 + $0x68] sm:$0xf] %vm1588_vm1, %v1850_v53  ;;  %v1851_v34 = vpack.c.bf16 %v1475_v57, %v1475_v57 }
 0x15d   : > { %1613 = vst.msk [vmem:[%s2466_s27 + $0x60] sm:$0xf] %vm1588_vm1, %v1848_v58  ;;  %v1849_v59 = vpack.c.bf16 %v1473_v32, %v1473_v32 }
 0x15e   : > { %1616 = vst.msk [vmem:[%s2466_s27 + $0x6c] sm:$0xf] %vm1588_vm1, %v1851_v34 }
 0x15f   : > { %1614 = vst.msk [vmem:[%s2466_s27 + $0x64] sm:$0xf] %vm1588_vm1, %v1849_v59 }
 0x160 PF: > { %s13_s12 = sadd.s32 1, %s2118_s12  }
 0x161   : > { %p10_p4 = scmp.ge.s32.totalorder %s13_s12, 4  }
 0x163   :  { %12 = sbr.rel (!%p10_p4) target bundleno = 1 (0x1), region = 62 }

// kernel: net3_forward.5
= control target key start
LH: loop header
LB: loop body
LE: loop exit
PB: predicated region body
PF: predicated region fallthrough
CT: control target
= control target key end

     0   :  { %v439_v27 = vlaneseq  ;;  %v3360_v35 = vmov 1966171168   ;;  %vm3362_vm0 = vmmov 0   ;;  %s4135_s0 = inlined_call_operand.vmem [shape: bf16[2,3136], index: 0, kind: input, shape index: {}]   ;;  %s4136_s1 = inlined_call_operand.vmem [shape: bf16[3136,128], index: 1, kind: input, shape index: {}]   ;;  %s4137_s2 = inlined_call_operand.vmem [shape: f32[1,128], index: 2, kind: input, shape index: {}]   ;;  %s4138_s3 = inlined_call_operand.vmem [shape: bf16[128,128], index: 3, kind: input, shape index: {}]   ;;  %s4139_s4 = inlined_call_operand.vmem [shape: f32[1,128], index: 4, kind: input, shape index: {}]   ;;  %s4140_s5 = inlined_call_operand.vmem [shape: bf16[128,128], index: 5, kind: input, shape index: {}]   ;;  %s4141_s6 = inlined_call_operand.vmem [shape: f32[1,128], index: 6, kind: input, shape index: {}]   ;;  %s4142_s7 = inlined_call_operand.hbm [shape: f32[2,128], index: 7, kind: output, shape index: {}]  }
   0x1   :  { %v3121_v0 = vld [vmem:[%s4136_s1 + $0x40] sm:$0xff]   ;;  %v3125_v4 = vld [vmem:[%s4136_s1 + $0x48] sm:$0xff]   ;;  %v3129_v8 = vld [vmem:[%s4136_s1 + $0x50] sm:$0xff]   ;;  %v437_v36 = vunpack.c.l.s4 %v3360_v35 }
   0x2   :  { %v3122_v1 = vld [vmem:[%s4136_s1] sm:$0xff]   ;;  %2778 = vmatprep.subr.bf16.mxu0 %v3121_v0  ;;  %v3126_v5 = vld [vmem:[%s4136_s1 + $0x8] sm:$0xff]   ;;  %v3130_v9 = vld [vmem:[%s4136_s1 + $0x10] sm:$0xff]   ;;  %v440_v32 = vshrl.u32 %v439_v27, 7 }
   0x3   :  { %v3123_v2 = vld [vmem:[%s4136_s1 + $0xc0] sm:$0xff]   ;;  %2779 = vmatpush3.bf16.msra.mxu0 %v3122_v1  ;;  %v3127_v6 = vld [vmem:[%s4136_s1 + $0xc8] sm:$0xff]   ;;  %v3131_v10 = vld [vmem:[%s4136_s1 + $0xd0] sm:$0xff]   ;;  %v438_v39 = vunpack.c.0.s8 %v437_v36 }
   0x4   :  { %v3124_v3 = vld [vmem:[%s4136_s1 + $0x80] sm:$0xff]   ;;  %2800 = vmatprep.subr.bf16.mxu1 %v3123_v2  ;;  %2780 = vmatprep.subr.bf16.mxu0 %v3125_v4  ;;  %v3128_v7 = vld [vmem:[%s4136_s1 + $0x88] sm:$0xff]   ;;  %v3132_v11 = vld [vmem:[%s4136_s1 + $0x90] sm:$0xff]  }
   0x5   :  { %2801 = vmatpush3.bf16.msra.mxu1 %v3124_v3  ;;  %v3133_v12 = vld [vmem:[%s4136_s1 + $0x58] sm:$0xff]   ;;  %v3137_v16 = vld [vmem:[%s4136_s1 + $0x60] sm:$0xff]   ;;  %v3141_v20 = vld [vmem:[%s4136_s1 + $0x68] sm:$0xff]   ;;  %v3509_v41 = vsub.s32 %v438_v39, %v440_v32 }
   0x6   :  { %2802 = vmatprep.subr.bf16.mxu1 %v3127_v6  ;;  %v3134_v13 = vld [vmem:[%s4136_s1 + $0x18] sm:$0xff]   ;;  %v3138_v17 = vld [vmem:[%s4136_s1 + $0x20] sm:$0xff]   ;;  %v3142_v21 = vld [vmem:[%s4136_s1 + $0x28] sm:$0xff]  }
   0x7   :  { %2781 = vmatpush3.bf16.msra.mxu0 %v3126_v5  ;;  %v3135_v14 = vld [vmem:[%s4136_s1 + $0xd8] sm:$0xff]   ;;  %v3139_v18 = vld [vmem:[%s4136_s1 + $0xe0] sm:$0xff]   ;;  %v3143_v22 = vld [vmem:[%s4136_s1 + $0xe8] sm:$0xff]  }
   0x8   :  { %2782 = vmatprep.subr.bf16.mxu0 %v3129_v8  ;;  %v3136_v15 = vld [vmem:[%s4136_s1 + $0x98] sm:$0xff]   ;;  %v3140_v19 = vld [vmem:[%s4136_s1 + $0xa0] sm:$0xff]   ;;  %v3144_v23 = vld [vmem:[%s4136_s1 + $0xa8] sm:$0xff]  }
   0x9   :  { %2803 = vmatpush3.bf16.msra.mxu1 %v3128_v7  ;;  %v3145_v24 = vld [vmem:[%s4136_s1 + $0x70] sm:$0xff]   ;;  %v3149_v29 = vld [vmem:[%s4136_s1 + $0x78] sm:$0xff]   ;;  %v28_v33 = vld [vmem:[%s4135_s0] sm:$0xff] }
   0xa   :  { %2804 = vmatprep.subr.bf16.mxu1 %v3131_v10  ;;  %v3146_v25 = vld [vmem:[%s4136_s1 + $0x30] sm:$0xff]   ;;  %v3150_v30 = vld [vmem:[%s4136_s1 + $0x38] sm:$0xff]   ;;  %v3154_v37 = vld [vmem:[%s4136_s1 + $0x140] sm:$0xff]   ;;  %v435_v38 = vcombine.high %v28_v33, %v28_v33  ;;  %v442_v42 = vrot.slane %v28_v33, %v3509_v41 }
   0xb   :  { %2783 = vmatpush3.bf16.msra.mxu0 %v3130_v9  ;;  %v3147_v26 = vld [vmem:[%s4136_s1 + $0xf0] sm:$0xff]   ;;  %v3151_v31 = vld [vmem:[%s4136_s1 + $0xf8] sm:$0xff]   ;;  %v3156_v40 = vld [vmem:[%s4136_s1 + $0x1c0] sm:$0xff]  }
   0xc   :  { %2784 = vmatprep.subr.bf16.mxu0 %v3133_v12  ;;  %v3148_v28 = vld [vmem:[%s4136_s1 + $0xb0] sm:$0xff]   ;;  %v3153_v34 = vld [vmem:[%s4136_s1 + $0xb8] sm:$0xff]   ;;  %v3513_v43 = vrot.slane %v435_v38, %v3509_v41  ;;  %v450_v44 = vcombine.high %v442_v42, %v442_v42  ;;  %v458_v45 = vrot.slane %v442_v42, %v3509_v41  ;;  %v3155_v48 = vld [vmem:[%s4136_s1 + $0x100] sm:$0xff]  }
   0xd   :  { %2805 = vmatpush3.bf16.msra.mxu1 %v3132_v11  ;;  %v3158_v51 = vld [vmem:[%s4136_s1 + $0x148] sm:$0xff]   ;;  %v3157_v53 = vld [vmem:[%s4136_s1 + $0x180] sm:$0xff]   ;;  %v3162_v57 = vld [vmem:[%s4136_s1 + $0x150] sm:$0xff]  }
   0xe   :  { %2806 = vmatprep.subr.bf16.mxu1 %v3135_v14  ;;  %v451_v46 = vcombine.high %v3513_v43, %v3513_v43  ;;  %v472_v47 = vrot.slane %v450_v44, %v3509_v41  ;;  %v480_v50 = vcombine.high %v458_v45, %v458_v45  ;;  %v3160_v54 = vld [vmem:[%s4136_s1 + $0x1c8] sm:$0xff]   ;;  %v3164_v59 = vld [vmem:[%s4136_s1 + $0x1d0] sm:$0xff]   ;;  %v3166_v61 = vld [vmem:[%s4136_s1 + $0x158] sm:$0xff]  }
   0xf   :  { %2785 = vmatpush3.bf16.msra.mxu0 %v3134_v13  ;;  %v3159_v56 = vld [vmem:[%s4136_s1 + $0x108] sm:$0xff]   ;;  %v3163_v60 = vld [vmem:[%s4136_s1 + $0x110] sm:$0xff]   ;;  %v3168_v63 = vld [vmem:[%s4136_s1 + $0x1d8] sm:$0xff]  }
  0x10   :  { %2786 = vmatprep.subr.bf16.mxu0 %v3137_v16  ;;  %v479_v49 = vrot.slane %v451_v46, %v3509_v41  ;;  %1832 = vmatprep.mubr.bf16.mxu0 %v472_v47  ;;  %v482_v52 = vcombine.high %v472_v47, %v472_v47  ;;  %v3161_v58 = vld [vmem:[%s4136_s1 + $0x188] sm:$0xff]   ;;  %v3165_v62 = vld [vmem:[%s4136_s1 + $0x190] sm:$0xff]   ;;  %v3167_v0 = vld [vmem:[%s4136_s1 + $0x118] sm:$0xff]  }
  0x11   :  { %2807 = vmatpush3.bf16.msra.mxu1 %v3136_v15  ;;  %v3170_v1 = vld [vmem:[%s4136_s1 + $0x160] sm:$0xff]   ;;  %v3169_v2 = vld [vmem:[%s4136_s1 + $0x198] sm:$0xff]   ;;  %v3174_v5 = vld [vmem:[%s4136_s1 + $0x168] sm:$0xff]  }
  0x12   :  { %2808 = vmatprep.subr.bf16.mxu1 %v3139_v18  ;;  %v483_v55 = vcombine.high %v479_v49, %v479_v49  ;;  %1872 = vmatprep.mubr.bf16.mxu1 %v482_v52  ;;  %v3172_v3 = vld [vmem:[%s4136_s1 + $0x1e0] sm:$0xff]   ;;  %v3176_v7 = vld [vmem:[%s4136_s1 + $0x1e8] sm:$0xff]   ;;  %v3178_v9 = vld [vmem:[%s4136_s1 + $0x170] sm:$0xff]  }
  0x13   :  { %2787 = vmatpush3.bf16.msra.mxu0 %v3138_v17  ;;  %v3171_v4 = vld [vmem:[%s4136_s1 + $0x120] sm:$0xff]   ;;  %v3175_v8 = vld [vmem:[%s4136_s1 + $0x128] sm:$0xff]   ;;  %v3180_v11 = vld [vmem:[%s4136_s1 + $0x1f0] sm:$0xff]   ;;  %v465_v17 = vrot.slane %v3513_v43, %v3509_v41 }
  0x14   :  { %2788 = vmatprep.subr.bf16.mxu0 %v3141_v20  ;;  %v3173_v6 = vld [vmem:[%s4136_s1 + $0x1a0] sm:$0xff]   ;;  %v3177_v10 = vld [vmem:[%s4136_s1 + $0x1a8] sm:$0xff]   ;;  %v3179_v12 = vld [vmem:[%s4136_s1 + $0x130] sm:$0xff]  }
  0x15   :  { %2809 = vmatpush3.bf16.msra.mxu1 %v3140_v19  ;;  %v3182_v13 = vld [vmem:[%s4136_s1 + $0x178] sm:$0xff]   ;;  %v3181_v14 = vld [vmem:[%s4136_s1 + $0x1b0] sm:$0xff]   ;;  %v3186_v18 = vld [vmem:[%s4136_s1 + $0x240] sm:$0xff]  }
  0x16   :  { %2810 = vmatprep.subr.bf16.mxu1 %v3143_v22  ;;  %v3184_v15 = vld [vmem:[%s4136_s1 + $0x1f8] sm:$0xff]   ;;  %v3188_v20 = vld [vmem:[%s4136_s1 + $0x2c0] sm:$0xff]   ;;  %v481_v22 = vcombine.high %v465_v17, %v465_v17  ;;  %v3194_v27 = vld [vmem:[%s4136_s1 + $0x250] sm:$0xff]  }
  0x17   :  { %2789 = vmatpush3.bf16.msra.mxu0 %v3142_v21  ;;  %v3183_v16 = vld [vmem:[%s4136_s1 + $0x138] sm:$0xff]   ;;  %v3187_v21 = vld [vmem:[%s4136_s1 + $0x200] sm:$0xff]   ;;  %v3197_v32 = vld [vmem:[%s4136_s1 + $0x290] sm:$0xff]  }
  0x18   :  { %2790 = vmatprep.subr.bf16.mxu0 %v3145_v24  ;;  %v3185_v19 = vld [vmem:[%s4136_s1 + $0x1b8] sm:$0xff]   ;;  %v3189_v24 = vld [vmem:[%s4136_s1 + $0x280] sm:$0xff]   ;;  %v3206_v39 = vld [vmem:[%s4136_s1 + $0x268] sm:$0xff]  }
  0x19   :  { %2811 = vmatpush3.bf16.msra.mxu1 %v3144_v23  ;;  %v3190_v23 = vld [vmem:[%s4136_s1 + $0x248] sm:$0xff]   ;;  %v3200_v33 = vld [vmem:[%s4136_s1 + $0x2d8] sm:$0xff]   ;;  %v3202_v35 = vld [vmem:[%s4136_s1 + $0x260] sm:$0xff]  }
  0x1a   :  { %2812 = vmatprep.subr.bf16.mxu1 %v3147_v26  ;;  %v3191_v26 = vld [vmem:[%s4136_s1 + $0x208] sm:$0xff]   ;;  %v3201_v36 = vld [vmem:[%s4136_s1 + $0x298] sm:$0xff]   ;;  %v3203_v38 = vld [vmem:[%s4136_s1 + $0x220] sm:$0xff]  }
  0x1b   :  { %2791 = vmatpush3.bf16.msra.mxu0 %v3146_v25  ;;  %v3192_v25 = vld [vmem:[%s4136_s1 + $0x2c8] sm:$0xff]   ;;  %v3210_v44 = vld [vmem:[%s4136_s1 + $0x270] sm:$0xff]  }
  0x1c   :  { %2792 = vmatprep.subr.bf16.mxu0 %v3149_v29  ;;  %v3196_v29 = vld [vmem:[%s4136_s1 + $0x2d0] sm:$0xff]   ;;  %v3208_v42 = vld [vmem:[%s4136_s1 + $0x2e8] sm:$0xff]  }
  0x1d   :  { %2813 = vmatpush3.bf16.msra.mxu1 %v3148_v28  ;;  %v3193_v28 = vld [vmem:[%s4136_s1 + $0x288] sm:$0xff]  }
  0x1e   :  { %2814 = vmatprep.subr.bf16.mxu1 %v3151_v31  ;;  %v3198_v31 = vld [vmem:[%s4136_s1 + $0x258] sm:$0xff]   ;;  %v3207_v43 = vld [vmem:[%s4136_s1 + $0x228] sm:$0xff]  }
  0x1f   :  { %2793 = vmatpush3.bf16.msra.mxu0 %v3150_v30  ;;  %v3195_v30 = vld [vmem:[%s4136_s1 + $0x210] sm:$0xff]   ;;  %v3209_v46 = vld [vmem:[%s4136_s1 + $0x2a8] sm:$0xff]  }
  0x20   :  { %2822 = vmatprep.subr.bf16.mxu0 %v3154_v37  ;;  %v3204_v37 = vld [vmem:[%s4136_s1 + $0x2e0] sm:$0xff]  }
  0x21   :  { %2815 = vmatpush3.bf16.msra.mxu1 %v3153_v34  ;;  %v3199_v34 = vld [vmem:[%s4136_s1 + $0x218] sm:$0xff]  }
  0x22   :  { %2844 = vmatprep.subr.bf16.mxu1 %v3156_v40  ;;  %1833 = vmatmul.mubr.bf16.vlgmr.msra.gmra.mrb[0].mxu0 %v458_v45  ;;  %v3205_v40 = vld [vmem:[%s4136_s1 + $0x2a0] sm:$0xff]   ;;  %v29_v45 = vld [vmem:[%s4135_s0 + $0x8] sm:$0xff] }
  0x23   :  { %2823 = vmatpush3.bf16.msra.mxu0 %v3155_v48  ;;  %1912 = vmatprep.mubr.bf16.mxu0 %v479_v49  ;;  %v491_v47 = vrot.slane %v29_v45, %v3509_v41  ;;  %v484_v48 = vcombine.high %v29_v45, %v29_v45  ;;  %v3212_v49 = vld [vmem:[%s4136_s1 + $0x2f0] sm:$0xff]  }
  0x24   :  { %1873 = vmatmul.mubr.bf16.vlgmr.msra.gmra.mrb[0].mxu1 %v480_v50  ;;  %2824 = vmatprep.subr.bf16.mxu0 %v3158_v51  ;;  %v3211_v50 = vld [vmem:[%s4136_s1 + $0x230] sm:$0xff]  }
  0x25   :  { %2845 = vmatpush3.bf16.msra.mxu1 %v3157_v53  ;;  %1952 = vmatprep.mubr.bf16.mxu1 %v483_v55  ;;  %v499_v51 = vcombine.high %v491_v47, %v491_v47  ;;  %v3698_v52 = vrot.slane %v484_v48, %v3509_v41  ;;  %v3214_v53 = vld [vmem:[%s4136_s1 + $0x278] sm:$0xff]   ;;  %v3261_v45 = vld [vmem:[%s4136_s1 + $0x4d0] sm:$0xff]  }
  0x26   :  { %2846 = vmatprep.subr.bf16.mxu1 %v3160_v54  ;;  %v3213_v54 = vld [vmem:[%s4136_s1 + $0x2b0] sm:$0xff]  }
  0x27   :  { %2825 = vmatpush3.bf16.msra.mxu0 %v3159_v56  ;;  %v521_v55 = vrot.slane %v499_v51, %v3509_v41  ;;  %v500_v56 = vcombine.high %v3698_v52, %v3698_v52  ;;  %v3262_v48 = vld [vmem:[%s4136_s1 + $0x490] sm:$0xff]   ;;  %v3267_v51 = vld [vmem:[%s4136_s1 + $0x460] sm:$0xff]  }
  0x28   :  { %2826 = vmatprep.subr.bf16.mxu0 %v3162_v57  ;;  %v3216_v57 = vld [vmem:[%s4136_s1 + $0x2f8] sm:$0xff]  }
  0x29   :  { %2847 = vmatpush3.bf16.msra.mxu1 %v3161_v58  ;;  %v3215_v58 = vld [vmem:[%s4136_s1 + $0x238] sm:$0xff]  }
  0x2a   :  { %2848 = vmatprep.subr.bf16.mxu1 %v3164_v59  ;;  %v531_v59 = vcombine.high %v521_v55, %v521_v55 }
  0x2b   :  { %2827 = vmatpush3.bf16.msra.mxu0 %v3163_v60  ;;  %v507_v60 = vrot.slane %v491_v47, %v3509_v41  ;;  %v3263_v47 = vld [vmem:[%s4136_s1 + $0x458] sm:$0xff]  }
  0x2c   :  { %2828 = vmatprep.subr.bf16.mxu0 %v3166_v61  ;;  %v3218_v61 = vld [vmem:[%s4136_s1 + $0x340] sm:$0xff]  }
  0x2d   :  { %2849 = vmatpush3.bf16.msra.mxu1 %v3165_v62  ;;  %v3217_v62 = vld [vmem:[%s4136_s1 + $0x2b8] sm:$0xff]  }
  0x2e   :  { %2850 = vmatprep.subr.bf16.mxu1 %v3168_v63  ;;  %v528_v63 = vrot.slane %v500_v56, %v3509_v41  ;;  %v3270_v56 = vld [vmem:[%s4136_s1 + $0x4a0] sm:$0xff]  }
  0x2f   :  { %2829 = vmatpush3.bf16.msra.mxu0 %v3167_v0  ;;  %v3220_v0 = vld [vmem:[%s4136_s1 + $0x3c0] sm:$0xff]  }
  0x30   :  { %2830 = vmatprep.subr.bf16.mxu0 %v3170_v1  ;;  %v3219_v1 = vld [vmem:[%s4136_s1 + $0x300] sm:$0xff]  }
  0x31   :  { %2851 = vmatpush3.bf16.msra.mxu1 %v3169_v2  ;;  %v529_v2 = vcombine.high %v507_v60, %v507_v60 }
  0x32   :  { %2852 = vmatprep.subr.bf16.mxu1 %v3172_v3  ;;  %v3222_v3 = vld [vmem:[%s4136_s1 + $0x348] sm:$0xff]  }
  0x33   :  { %2831 = vmatpush3.bf16.msra.mxu0 %v3171_v4  ;;  %v3221_v4 = vld [vmem:[%s4136_s1 + $0x380] sm:$0xff]  }
  0x34   :  { %2832 = vmatprep.subr.bf16.mxu0 %v3174_v5  ;;  %v532_v5 = vcombine.high %v528_v63, %v528_v63 }
  0x35   :  { %2853 = vmatpush3.bf16.msra.mxu1 %v3173_v6  ;;  %v3224_v6 = vld [vmem:[%s4136_s1 + $0x3c8] sm:$0xff]  }
  0x36   :  { %2854 = vmatprep.subr.bf16.mxu1 %v3176_v7  ;;  %v3223_v7 = vld [vmem:[%s4136_s1 + $0x308] sm:$0xff]  }
  0x37   :  { %2833 = vmatpush3.bf16.msra.mxu0 %v3175_v8  ;;  %v3226_v8 = vld [vmem:[%s4136_s1 + $0x350] sm:$0xff]  }
  0x38   :  { %2834 = vmatprep.subr.bf16.mxu0 %v3178_v9  ;;  %v3225_v9 = vld [vmem:[%s4136_s1 + $0x388] sm:$0xff]  }
  0x39   :  { %2855 = vmatpush3.bf16.msra.mxu1 %v3177_v10  ;;  %v3228_v10 = vld [vmem:[%s4136_s1 + $0x3d0] sm:$0xff]  }
  0x3a   :  { %2856 = vmatprep.subr.bf16.mxu1 %v3180_v11  ;;  %v3227_v11 = vld [vmem:[%s4136_s1 + $0x310] sm:$0xff]  }
  0x3b   :  { %2835 = vmatpush3.bf16.msra.mxu0 %v3179_v12  ;;  %v3230_v12 = vld [vmem:[%s4136_s1 + $0x358] sm:$0xff]  }
  0x3c   :  { %2836 = vmatprep.subr.bf16.mxu0 %v3182_v13  ;;  %v3229_v13 = vld [vmem:[%s4136_s1 + $0x390] sm:$0xff]  }
  0x3d   :  { %2857 = vmatpush3.bf16.msra.mxu1 %v3181_v14  ;;  %v3232_v14 = vld [vmem:[%s4136_s1 + $0x3d8] sm:$0xff]  }
  0x3e   :  { %2858 = vmatprep.subr.bf16.mxu1 %v3184_v15  ;;  %v3231_v15 = vld [vmem:[%s4136_s1 + $0x318] sm:$0xff]  }
  0x3f   :  { %2837 = vmatpush3.bf16.msra.mxu0 %v3183_v16  ;;  %v3234_v16 = vld [vmem:[%s4136_s1 + $0x360] sm:$0xff]  }
  0x40   :  { %2866 = vmatprep.subr.bf16.mxu0 %v3186_v18  ;;  %v3236_v18 = vld [vmem:[%s4136_s1 + $0x3e0] sm:$0xff]  }
  0x41   :  { %2859 = vmatpush3.bf16.msra.mxu1 %v3185_v19  ;;  %v3235_v19 = vld [vmem:[%s4136_s1 + $0x320] sm:$0xff]  }
  0x42   :  { %1913 = vmatmul.mubr.bf16.vlgmr.msra.gmra.mrb[4].mxu0 %v465_v17  ;;  %2888 = vmatprep.subr.bf16.mxu1 %v3188_v20  ;;  %v3233_v17 = vld [vmem:[%s4136_s1 + $0x398] sm:$0xff]   ;;  %v3238_v20 = vld [vmem:[%s4136_s1 + $0x368] sm:$0xff]  }
  0x43   :  { %2867 = vmatpush3.bf16.msra.mxu0 %v3187_v21  ;;  %1992 = vmatprep.mubr.bf16.mxu0 %v521_v55  ;;  %v3237_v21 = vld [vmem:[%s4136_s1 + $0x3a0] sm:$0xff]   ;;  %v3271_v55 = vld [vmem:[%s4136_s1 + $0x468] sm:$0xff]  }
  0x44   :  { %1953 = vmatmul.mubr.bf16.vlgmr.msra.gmra.mrb[4].mxu1 %v481_v22  ;;  %2868 = vmatprep.subr.bf16.mxu0 %v3190_v23  ;;  %v3240_v22 = vld [vmem:[%s4136_s1 + $0x3e8] sm:$0xff]  }
  0x45   :  { %2889 = vmatpush3.bf16.msra.mxu1 %v3189_v24  ;;  %2032 = vmatprep.mubr.bf16.mxu1 %v531_v59  ;;  %v3239_v23 = vld [vmem:[%s4136_s1 + $0x328] sm:$0xff]   ;;  %v3242_v24 = vld [vmem:[%s4136_s1 + $0x370] sm:$0xff]  }
  0x46   :  { %2890 = vmatprep.subr.bf16.mxu1 %v3192_v25  ;;  %v3241_v25 = vld [vmem:[%s4136_s1 + $0x3a8] sm:$0xff]   ;;  %v3275_v59 = vld [vmem:[%s4136_s1 + $0x470] sm:$0xff]  }
  0x47   :  { %2869 = vmatpush3.bf16.msra.mxu0 %v3191_v26  ;;  %v3244_v26 = vld [vmem:[%s4136_s1 + $0x3f0] sm:$0xff]  }
  0x48   :  { %2870 = vmatprep.subr.bf16.mxu0 %v3194_v27  ;;  %v3243_v27 = vld [vmem:[%s4136_s1 + $0x330] sm:$0xff]  }
  0x49   :  { %2891 = vmatpush3.bf16.msra.mxu1 %v3193_v28  ;;  %v3246_v28 = vld [vmem:[%s4136_s1 + $0x378] sm:$0xff]  }
  0x4a   :  { %2892 = vmatprep.subr.bf16.mxu1 %v3196_v29  ;;  %v3245_v29 = vld [vmem:[%s4136_s1 + $0x3b0] sm:$0xff]  }
  0x4b   :  { %2871 = vmatpush3.bf16.msra.mxu0 %v3195_v30  ;;  %v3248_v30 = vld [vmem:[%s4136_s1 + $0x3f8] sm:$0xff]  }
  0x4c   :  { %2872 = vmatprep.subr.bf16.mxu0 %v3198_v31  ;;  %v3247_v31 = vld [vmem:[%s4136_s1 + $0x338] sm:$0xff]  }
  0x4d   :  { %2893 = vmatpush3.bf16.msra.mxu1 %v3197_v32  ;;  %v514_v32 = vrot.slane %v3698_v52, %v3509_v41  ;;  %v3266_v52 = vld [vmem:[%s4136_s1 + $0x498] sm:$0xff]  }
  0x4e   :  { %2894 = vmatprep.subr.bf16.mxu1 %v3200_v33  ;;  %v3251_v33 = vld [vmem:[%s4136_s1 + $0x440] sm:$0xff]  }
  0x4f   :  { %2873 = vmatpush3.bf16.msra.mxu0 %v3199_v34  ;;  %v3250_v34 = vld [vmem:[%s4136_s1 + $0x3b8] sm:$0xff]  }
  0x50   :  { %2874 = vmatprep.subr.bf16.mxu0 %v3202_v35  ;;  %v3253_v35 = vld [vmem:[%s4136_s1 + $0x4c0] sm:$0xff]  }
  0x51   :  { %2895 = vmatpush3.bf16.msra.mxu1 %v3201_v36  ;;  %v3252_v36 = vld [vmem:[%s4136_s1 + $0x400] sm:$0xff]  }
  0x52   :  { %2896 = vmatprep.subr.bf16.mxu1 %v3204_v37  ;;  %v530_v37 = vcombine.high %v514_v32, %v514_v32 }
  0x53   :  { %2875 = vmatpush3.bf16.msra.mxu0 %v3203_v38  ;;  %v3255_v38 = vld [vmem:[%s4136_s1 + $0x448] sm:$0xff]  }
  0x54   :  { %2876 = vmatprep.subr.bf16.mxu0 %v3206_v39  ;;  %v3254_v39 = vld [vmem:[%s4136_s1 + $0x480] sm:$0xff]  }
  0x55   :  { %2897 = vmatpush3.bf16.msra.mxu1 %v3205_v40  ;;  %v3257_v40 = vld [vmem:[%s4136_s1 + $0x4c8] sm:$0xff]  }
  0x56   :  { %2898 = vmatprep.subr.bf16.mxu1 %v3208_v42  ;;  %v3256_v42 = vld [vmem:[%s4136_s1 + $0x408] sm:$0xff]  }
  0x57   :  { %2877 = vmatpush3.bf16.msra.mxu0 %v3207_v43  ;;  %v3259_v43 = vld [vmem:[%s4136_s1 + $0x450] sm:$0xff]  }
  0x58   :  { %2878 = vmatprep.subr.bf16.mxu0 %v3210_v44  ;;  %v3258_v44 = vld [vmem:[%s4136_s1 + $0x488] sm:$0xff]  }
  0x59   :  { %2899 = vmatpush3.bf16.msra.mxu1 %v3209_v46  ;;  %v3260_v46 = vld [vmem:[%s4136_s1 + $0x410] sm:$0xff]  }
  0x5a   :  { %2900 = vmatprep.subr.bf16.mxu1 %v3212_v49  ;;  %v3265_v49 = vld [vmem:[%s4136_s1 + $0x4d8] sm:$0xff]  }
  0x5b   :  { %2879 = vmatpush3.bf16.msra.mxu0 %v3211_v50  ;;  %v3264_v50 = vld [vmem:[%s4136_s1 + $0x418] sm:$0xff]  }
  0x5c   :  { %2880 = vmatprep.subr.bf16.mxu0 %v3214_v53  ;;  %v3269_v53 = vld [vmem:[%s4136_s1 + $0x4e0] sm:$0xff]  }
  0x5d   :  { %2901 = vmatpush3.bf16.msra.mxu1 %v3213_v54  ;;  %v3268_v54 = vld [vmem:[%s4136_s1 + $0x420] sm:$0xff]  }
  0x5e   :  { %2902 = vmatprep.subr.bf16.mxu1 %v3216_v57  ;;  %v3273_v57 = vld [vmem:[%s4136_s1 + $0x4e8] sm:$0xff]  }
  0x5f   :  { %2881 = vmatpush3.bf16.msra.mxu0 %v3215_v58  ;;  %v3272_v58 = vld [vmem:[%s4136_s1 + $0x428] sm:$0xff]  }
  0x60   :  { %2910 = vmatprep.subr.bf16.mxu0 %v3218_v61  ;;  %v3274_v61 = vld [vmem:[%s4136_s1 + $0x4a8] sm:$0xff]  }
  0x61   :  { %2903 = vmatpush3.bf16.msra.mxu1 %v3217_v62 }
  0x62   :  { %1993 = vmatmul.mubr.bf16.vlgmr.msra.gmra.mrb[8].mxu0 %v507_v60  ;;  %2932 = vmatprep.subr.bf16.mxu1 %v3220_v0  ;;  %v30_v60 = vld [vmem:[%s4135_s0 + $0x10] sm:$0xff] }
  0x63   :  { %2911 = vmatpush3.bf16.msra.mxu0 %v3219_v1  ;;  %2072 = vmatprep.mubr.bf16.mxu0 %v528_v63  ;;  %v540_v62 = vrot.slane %v30_v60, %v3509_v41  ;;  %v533_v63 = vcombine.high %v30_v60, %v30_v60  ;;  %v3277_v0 = vld [vmem:[%s4136_s1 + $0x4f0] sm:$0xff]  }
  0x64   :  { %2033 = vmatmul.mubr.bf16.vlgmr.msra.gmra.mrb[8].mxu1 %v529_v2  ;;  %2912 = vmatprep.subr.bf16.mxu0 %v3222_v3  ;;  %v3276_v1 = vld [vmem:[%s4136_s1 + $0x430] sm:$0xff]  }
  0x65   :  { %2933 = vmatpush3.bf16.msra.mxu1 %v3221_v4  ;;  %2112 = vmatprep.mubr.bf16.mxu1 %v532_v5  ;;  %v548_v2 = vcombine.high %v540_v62, %v540_v62  ;;  %v3904_v3 = vrot.slane %v533_v63, %v3509_v41  ;;  %v3279_v4 = vld [vmem:[%s4136_s1 + $0x478] sm:$0xff]   ;;  %v3278_v5 = vld [vmem:[%s4136_s1 + $0x4b0] sm:$0xff]  }
  0x66   :  { %2934 = vmatprep.subr.bf16.mxu1 %v3224_v6 }
  0x67   :  { %2913 = vmatpush3.bf16.msra.mxu0 %v3223_v7  ;;  %v570_v6 = vrot.slane %v548_v2, %v3509_v41  ;;  %v549_v7 = vcombine.high %v3904_v3, %v3904_v3 }
  0x68   :  { %2914 = vmatprep.subr.bf16.mxu0 %v3226_v8  ;;  %v3281_v8 = vld [vmem:[%s4136_s1 + $0x4f8] sm:$0xff]  }
  0x69   :  { %2935 = vmatpush3.bf16.msra.mxu1 %v3225_v9  ;;  %v3280_v9 = vld [vmem:[%s4136_s1 + $0x438] sm:$0xff]  }
  0x6a   :  { %2936 = vmatprep.subr.bf16.mxu1 %v3228_v10  ;;  %v580_v10 = vcombine.high %v570_v6, %v570_v6 }
  0x6b   :  { %2915 = vmatpush3.bf16.msra.mxu0 %v3227_v11  ;;  %v556_v11 = vrot.slane %v540_v62, %v3509_v41 }
  0x6c   :  { %2916 = vmatprep.subr.bf16.mxu0 %v3230_v12  ;;  %v3283_v12 = vld [vmem:[%s4136_s1 + $0x540] sm:$0xff]  }
  0x6d   :  { %2937 = vmatpush3.bf16.msra.mxu1 %v3229_v13  ;;  %v3282_v13 = vld [vmem:[%s4136_s1 + $0x4b8] sm:$0xff]  }
  0x6e   :  { %2938 = vmatprep.subr.bf16.mxu1 %v3232_v14  ;;  %v577_v14 = vrot.slane %v549_v7, %v3509_v41 }
  0x6f   :  { %2917 = vmatpush3.bf16.msra.mxu0 %v3231_v15  ;;  %v3285_v15 = vld [vmem:[%s4136_s1 + $0x5c0] sm:$0xff]  }
  0x70   :  { %2918 = vmatprep.subr.bf16.mxu0 %v3234_v16  ;;  %v3284_v16 = vld [vmem:[%s4136_s1 + $0x500] sm:$0xff]  }
  0x71   :  { %2939 = vmatpush3.bf16.msra.mxu1 %v3233_v17  ;;  %v578_v17 = vcombine.high %v556_v11, %v556_v11 }
  0x72   :  { %2940 = vmatprep.subr.bf16.mxu1 %v3236_v18  ;;  %v3287_v18 = vld [vmem:[%s4136_s1 + $0x548] sm:$0xff]  }
  0x73   :  { %2919 = vmatpush3.bf16.msra.mxu0 %v3235_v19  ;;  %v3286_v19 = vld [vmem:[%s4136_s1 + $0x580] sm:$0xff]  }
  0x74   :  { %2920 = vmatprep.subr.bf16.mxu0 %v3238_v20  ;;  %v581_v20 = vcombine.high %v577_v14, %v577_v14 }
  0x75   :  { %2941 = vmatpush3.bf16.msra.mxu1 %v3237_v21  ;;  %v3289_v21 = vld [vmem:[%s4136_s1 + $0x5c8] sm:$0xff]  }
  0x76   :  { %2942 = vmatprep.subr.bf16.mxu1 %v3240_v22  ;;  %v3288_v22 = vld [vmem:[%s4136_s1 + $0x508] sm:$0xff]  }
  0x77   :  { %2921 = vmatpush3.bf16.msra.mxu0 %v3239_v23  ;;  %v3291_v23 = vld [vmem:[%s4136_s1 + $0x550] sm:$0xff]  }
  0x78   :  { %2922 = vmatprep.subr.bf16.mxu0 %v3242_v24  ;;  %v3290_v24 = vld [vmem:[%s4136_s1 + $0x588] sm:$0xff]  }
  0x79   :  { %2943 = vmatpush3.bf16.msra.mxu1 %v3241_v25  ;;  %v3293_v25 = vld [vmem:[%s4136_s1 + $0x5d0] sm:$0xff]  }
  0x7a   :  { %2944 = vmatprep.subr.bf16.mxu1 %v3244_v26  ;;  %v3292_v26 = vld [vmem:[%s4136_s1 + $0x510] sm:$0xff]  }
  0x7b   :  { %2923 = vmatpush3.bf16.msra.mxu0 %v3243_v27  ;;  %v3295_v27 = vld [vmem:[%s4136_s1 + $0x558] sm:$0xff]  }
  0x7c   :  { %2924 = vmatprep.subr.bf16.mxu0 %v3246_v28  ;;  %v3294_v28 = vld [vmem:[%s4136_s1 + $0x590] sm:$0xff]  }
  0x7d   :  { %2945 = vmatpush3.bf16.msra.mxu1 %v3245_v29  ;;  %v3297_v29 = vld [vmem:[%s4136_s1 + $0x5d8] sm:$0xff]  }
  0x7e   :  { %2946 = vmatprep.subr.bf16.mxu1 %v3248_v30  ;;  %v3296_v30 = vld [vmem:[%s4136_s1 + $0x518] sm:$0xff]  }
  0x7f   :  { %2925 = vmatpush3.bf16.msra.mxu0 %v3247_v31  ;;  %v3299_v31 = vld [vmem:[%s4136_s1 + $0x560] sm:$0xff]  }
  0x80   :  { %2954 = vmatprep.subr.bf16.mxu0 %v3251_v33  ;;  %v3301_v33 = vld [vmem:[%s4136_s1 + $0x5e0] sm:$0xff]  }
  0x81   :  { %2947 = vmatpush3.bf16.msra.mxu1 %v3250_v34  ;;  %v3300_v34 = vld [vmem:[%s4136_s1 + $0x520] sm:$0xff]  }
  0x82   :  { %2073 = vmatmul.mubr.bf16.vlgmr.msra.gmra.mrb[12].mxu0 %v514_v32  ;;  %2976 = vmatprep.subr.bf16.mxu1 %v3253_v35  ;;  %v3298_v32 = vld [vmem:[%s4136_s1 + $0x598] sm:$0xff]   ;;  %v3303_v35 = vld [vmem:[%s4136_s1 + $0x568] sm:$0xff]  }
  0x83   :  { %2955 = vmatpush3.bf16.msra.mxu0 %v3252_v36  ;;  %2152 = vmatprep.mubr.bf16.mxu0 %v570_v6  ;;  %v3302_v36 = vld [vmem:[%s4136_s1 + $0x5a0] sm:$0xff]  }
  0x84   :  { %2113 = vmatmul.mubr.bf16.vlgmr.msra.gmra.mrb[12].mxu1 %v530_v37  ;;  %2956 = vmatprep.subr.bf16.mxu0 %v3255_v38  ;;  %v3305_v37 = vld [vmem:[%s4136_s1 + $0x5e8] sm:$0xff]  }
  0x85   :  { %2977 = vmatpush3.bf16.msra.mxu1 %v3254_v39  ;;  %2192 = vmatprep.mubr.bf16.mxu1 %v580_v10  ;;  %v3304_v38 = vld [vmem:[%s4136_s1 + $0x528] sm:$0xff]   ;;  %v3307_v39 = vld [vmem:[%s4136_s1 + $0x570] sm:$0xff]  }
  0x86   :  { %2978 = vmatprep.subr.bf16.mxu1 %v3257_v40  ;;  %v3306_v40 = vld [vmem:[%s4136_s1 + $0x5a8] sm:$0xff]  }
  0x87   :  { %2957 = vmatpush3.bf16.msra.mxu0 %v3256_v42  ;;  %v3309_v42 = vld [vmem:[%s4136_s1 + $0x5f0] sm:$0xff]  }
  0x88   :  { %2958 = vmatprep.subr.bf16.mxu0 %v3259_v43  ;;  %v3308_v43 = vld [vmem:[%s4136_s1 + $0x530] sm:$0xff]  }
  0x89   :  { %2979 = vmatpush3.bf16.msra.mxu1 %v3258_v44  ;;  %v3311_v44 = vld [vmem:[%s4136_s1 + $0x578] sm:$0xff]  }
  0x8a   :  { %2980 = vmatprep.subr.bf16.mxu1 %v3261_v45  ;;  %v3310_v45 = vld [vmem:[%s4136_s1 + $0x5b0] sm:$0xff]  }
  0x8b   :  { %2959 = vmatpush3.bf16.msra.mxu0 %v3260_v46  ;;  %v3312_v46 = vld [vmem:[%s4136_s1 + $0x538] sm:$0xff]  }
  0x8c   :  { %2960 = vmatprep.subr.bf16.mxu0 %v3263_v47  ;;  %v3313_v47 = vld [vmem:[%s4136_s1 + $0x5f8] sm:$0xff]  }
  0x8d   :  { %2981 = vmatpush3.bf16.msra.mxu1 %v3262_v48  ;;  %v3315_v48 = vld [vmem:[%s4136_s1 + $0x5b8] sm:$0xff]  }
  0x8e   :  { %2982 = vmatprep.subr.bf16.mxu1 %v3265_v49  ;;  %v563_v49 = vrot.slane %v3904_v3, %v3509_v41 }
  0x8f   :  { %2961 = vmatpush3.bf16.msra.mxu0 %v3264_v50  ;;  %v3316_v50 = vld [vmem:[%s4136_s1 + $0x600] sm:$0xff]  }
  0x90   :  { %2962 = vmatprep.subr.bf16.mxu0 %v3267_v51  ;;  %v3361_v51 = vmov 0.0  }
  0x91   :  { %2983 = vmatpush3.bf16.msra.mxu1 %v3266_v52  ;;  %v579_v52 = vcombine.high %v563_v49, %v563_v49 }
  0x92   :  { %2984 = vmatprep.subr.bf16.mxu1 %v3269_v53  ;;  %v3317_v53 = vld [vmem:[%s4136_s1 + $0x608] sm:$0xff]  }
  0x93   :  { %2963 = vmatpush3.bf16.msra.mxu0 %v3268_v54 }
  0x94   :  { %2964 = vmatprep.subr.bf16.mxu0 %v3271_v55 }
  0x95   :  { %2985 = vmatpush3.bf16.msra.mxu1 %v3270_v56 }
  0x96   :  { %2986 = vmatprep.subr.bf16.mxu1 %v3273_v57 }
  0x97   :  { %2965 = vmatpush3.bf16.msra.mxu0 %v3272_v58 }
  0x98   :  { %2966 = vmatprep.subr.bf16.mxu0 %v3275_v59 }
  0x99   :  { %2987 = vmatpush3.bf16.msra.mxu1 %v3274_v61 }
  0x9a   :  { %2988 = vmatprep.subr.bf16.mxu1 %v3277_v0 }
  0x9b   :  { %2967 = vmatpush3.bf16.msra.mxu0 %v3276_v1 }
  0x9c   :  { %2968 = vmatprep.subr.bf16.mxu0 %v3279_v4 }
  0x9d   :  { %2989 = vmatpush3.bf16.msra.mxu1 %v3278_v5 }
  0x9e   :  { %2990 = vmatprep.subr.bf16.mxu1 %v3281_v8 }
  0x9f   :  { %2969 = vmatpush3.bf16.msra.mxu0 %v3280_v9 }
  0xa0   :  { %2998 = vmatprep.subr.bf16.mxu0 %v3283_v12 }
  0xa1   :  { %2991 = vmatpush3.bf16.msra.mxu1 %v3282_v13 }
  0xa2   :  { %2153 = vmatmul.mubr.bf16.vlgmr.msra.gmra.mrb[16].mxu0 %v556_v11  ;;  %3020 = vmatprep.subr.bf16.mxu1 %v3285_v15 }
  0xa3   :  { %2999 = vmatpush3.bf16.msra.mxu0 %v3284_v16  ;;  %2232 = vmatprep.mubr.bf16.mxu0 %v577_v14 }
  0xa4   :  { %2193 = vmatmul.mubr.bf16.vlgmr.msra.gmra.mrb[16].mxu1 %v578_v17  ;;  %3000 = vmatprep.subr.bf16.mxu0 %v3287_v18 }
  0xa5   :  { %3021 = vmatpush3.bf16.msra.mxu1 %v3286_v19  ;;  %2272 = vmatprep.mubr.bf16.mxu1 %v581_v20 }
  0xa6   :  { %3022 = vmatprep.subr.bf16.mxu1 %v3289_v21 }
  0xa7   :  { %3001 = vmatpush3.bf16.msra.mxu0 %v3288_v22 }
  0xa8   :  { %3002 = vmatprep.subr.bf16.mxu0 %v3291_v23 }
  0xa9   :  { %3023 = vmatpush3.bf16.msra.mxu1 %v3290_v24 }
  0xaa   :  { %3024 = vmatprep.subr.bf16.mxu1 %v3293_v25 }
  0xab   :  { %3003 = vmatpush3.bf16.msra.mxu0 %v3292_v26 }
  0xac   :  { %3004 = vmatprep.subr.bf16.mxu0 %v3295_v27 }
  0xad   :  { %3025 = vmatpush3.bf16.msra.mxu1 %v3294_v28 }
  0xae   :  { %3026 = vmatprep.subr.bf16.mxu1 %v3297_v29 }
  0xaf   :  { %3005 = vmatpush3.bf16.msra.mxu0 %v3296_v30 }
  0xb0   :  { %3006 = vmatprep.subr.bf16.mxu0 %v3299_v31 }
  0xb1   :  { %3027 = vmatpush3.bf16.msra.mxu1 %v3298_v32 }
  0xb2   :  { %3028 = vmatprep.subr.bf16.mxu1 %v3301_v33 }
  0xb3   :  { %3007 = vmatpush3.bf16.msra.mxu0 %v3300_v34 }
  0xb4   :  { %3008 = vmatprep.subr.bf16.mxu0 %v3303_v35 }
  0xb5   :  { %3029 = vmatpush3.bf16.msra.mxu1 %v3302_v36 }
  0xb6   :  { %3030 = vmatprep.subr.bf16.mxu1 %v3305_v37 }
  0xb7   :  { %3009 = vmatpush3.bf16.msra.mxu0 %v3304_v38 }
  0xb8   :  { %3010 = vmatprep.subr.bf16.mxu0 %v3307_v39 }
  0xb9   :  { %3031 = vmatpush3.bf16.msra.mxu1 %v3306_v40 }
  0xba   :  { %3032 = vmatprep.subr.bf16.mxu1 %v3309_v42 }
  0xbb   :  { %3011 = vmatpush3.bf16.msra.mxu0 %v3308_v43 }
  0xbc   :  { %3012 = vmatprep.subr.bf16.mxu0 %v3311_v44 }
  0xbd   :  { %3033 = vmatpush3.bf16.msra.mxu1 %v3310_v45 }
  0xbe   :  { %3034 = vmatprep.subr.bf16.mxu1 %v3313_v47 }
  0xbf   :  { %3013 = vmatpush3.bf16.msra.mxu0 %v3312_v46 }
  0xc0   :  { %3065 = vmatprep.subr.bf16.mxu0 %v3361_v51 }
  0xc1   :  { %3035 = vmatpush3.bf16.msra.mxu1 %v3315_v48 }
  0xc2   :  { %2233 = vmatmul.mubr.bf16.vlgmr.msra.gmra.mrb[20].mxu0 %v563_v49  ;;  %3077 = vmatprep.subr.bf16.mxu1 %v3361_v51 }
  0xc3   :  { %3066 = vmatpush3.bf16.msra.mxu0 %v3316_v50  ;;  %3073 = vmatprep.mubr.msk.bf16.mxu0 %vm3362_vm0, %v3361_v51 }
  0xc4   :  { %2273 = vmatmul.mubr.bf16.vlgmr.msra.gmra.mrb[20].mxu1 %v579_v52  ;;  %3067 = vmatprep.subr.bf16.mxu0 %v3361_v51 }
  0xc5   :  { %3093 = vmatprep.mubr.msk.bf16.mxu1 %vm3362_vm0, %v3361_v51 }
  0xc6   :  { %12 = vsyncpa [#allocation3], 0  ;;  %v3318_v54 = vld [vmem:[%s4136_s1 + $0x610] sm:$0xff]   ;;  %v3319_v55 = vld [vmem:[%s4136_s1 + $0x618] sm:$0xff]   ;;  %vm1796_vm1 = vcmask 523264   ;;  %s3363_s18 = smov [#allocation2]  }
  0xc7   :  { %3068 = vmatpush3.bf16.msra.mxu0 %v3317_v53  ;;  %v2562_v56 = vld.sshfl [vmem:[%s4135_s0 + $0x18] sm:$0x1 pattern:$0x75316420]  ;;  %v2561_v59 = vld [vmem:[%s4137_s2] ss:$0 sm:$0xff] }
  0xc8   :  { %3069 = vmatprep.subr.bf16.mxu0 %v3361_v51  ;;  %v595_v57 = vrot.slane %v2562_v56, %v3509_v41  ;;  %v3320_v6 = vld [vmem:[%s4138_s3] sm:$0xff]   ;;  %v3321_v7 = vld [vmem:[%s4138_s3 + $0x8] sm:$0xff]   ;;  %v3322_v8 = vld [vmem:[%s4138_s3 + $0x10] sm:$0xff]   ;;  %s2553_s19 = sshll.u32 %s3363_s18, 4  ;;  %s2554_s19 = int_to_ptr.vmem [resolvable:$true] %s2553_s19 }
  0xc9   :  { %3078 = vmatpush3.bf16.msra.mxu1 %v3320_v6  ;;  %v3323_v14 = vld [vmem:[%s4138_s3 + $0x18] sm:$0xff]   ;;  %v3324_v20 = vld [vmem:[%s4138_s3 + $0x20] sm:$0xff]   ;;  %v3325_v23 = vld [vmem:[%s4138_s3 + $0x28] sm:$0xff]   ;;  %p3341_p1 = scmp.lt.s32.totalorder %s2554_s19, %s2554_s19 }
  0xca   :  { %3079 = vmatprep.subr.bf16.mxu1 %v3361_v51  ;;  %v3326_v24 = vld [vmem:[%s4138_s3 + $0x30] sm:$0xff]   ;;  %v3327_v25 = vld [vmem:[%s4138_s3 + $0x38] sm:$0xff]   ;;  %v3328_v26 = vld [vmem:[%s4140_s5] sm:$0xff]  }
  0xcb   :  { %3070 = vmatpush3.bf16.msra.mxu0 %v3318_v54  ;;  %v3329_v27 = vld [vmem:[%s4140_s5 + $0x8] sm:$0xff]   ;;  %v3330_v28 = vld [vmem:[%s4140_s5 + $0x10] sm:$0xff]   ;;  %v3331_v31 = vld [vmem:[%s4140_s5 + $0x18] sm:$0xff]  }
  0xcc   :  { %3071 = vmatprep.subr.bf16.mxu0 %v3361_v51  ;;  %v3332_v42 = vld [vmem:[%s4140_s5 + $0x20] sm:$0xff]   ;;  %v3333_v44 = vld [vmem:[%s4140_s5 + $0x28] sm:$0xff]  }
  0xcd   :  { %3080 = vmatpush3.bf16.msra.mxu1 %v3321_v7 }
  0xce   :  { %3081 = vmatprep.subr.bf16.mxu1 %v3361_v51 }
  0xcf   :  { %3072 = vmatpush3.bf16.msra.mxu0 %v3319_v55 }
  0xd0   :  { %3097 = vmatprep.subr.bf16.mxu0 %v3361_v51 }
  0xd1   :  { %3082 = vmatpush3.bf16.msra.mxu1 %v3322_v8 }
  0xd2   :  { %3074 = vmatmul.mubr.msk.bf16.vlgmr.msra.gmra.mrb[24].mxu0 %vm1796_vm1, %v595_v57  ;;  %3083 = vmatprep.subr.bf16.mxu1 %v3361_v51 }
  0xd3   :  { %3113 = vmatprep.mubr.msk.bf16.mxu0 %vm3362_vm0, %v3361_v51  ;;  %3098 = vmatpush3.bf16.msra.mxu0 %v3328_v26  ;;  %v2760_v26 = vld [vmem:[%s4139_s4] ss:$0 sm:$0xff]  ;;  %s3336_s4 = scalar_lea.vmem %s2554_s19, 32 }
  0xd4   :  { %3099 = vmatprep.subr.bf16.mxu0 %v3361_v51  ;;  %p3337_p0 = scmp.ne.s32.totalorder %s2554_s19, %s3336_s4  ;;  %p3342_p2 = scmp.lt.s32.totalorder %s3336_s4, %s3336_s4 }
  0xd5   :  { %3084 = vmatpush3.bf16.msra.mxu1 %v3323_v14 }
  0xd6   :  { %3085 = vmatprep.subr.bf16.mxu1 %v3361_v51  ;;  %p3343_p3 = por %p3342_p2, %p3341_p1 }
  0xd7   :  { %3100 = vmatpush3.bf16.msra.mxu0 %v3329_v27 }
  0xd8   :  { %3101 = vmatprep.subr.bf16.mxu0 %v3361_v51  ;;  %p3344_p4 = pnand %p3343_p3, %p3337_p0 }
  0xd9   :  { %3086 = vmatpush3.bf16.msra.mxu1 %v3324_v20 }
  0xda   :  { %3087 = vmatprep.subr.bf16.mxu1 %v3361_v51 }
  0xdb   :  { %3102 = vmatpush3.bf16.msra.mxu0 %v3330_v28 }
  0xdc   :  { %3103 = vmatprep.subr.bf16.mxu0 %v3361_v51 }
  0xdd   :  { %3088 = vmatpush3.bf16.msra.mxu1 %v3325_v23 }
  0xde   :  { %3089 = vmatprep.subr.bf16.mxu1 %v3361_v51 }
  0xdf   :  { %3104 = vmatpush3.bf16.msra.mxu0 %v3331_v31 }
  0xe0   :  { %3105 = vmatprep.subr.bf16.mxu0 %v3361_v51 }
  0xe1   :  { %3090 = vmatpush3.bf16.msra.mxu1 %v3326_v24  ;;  %v3334_v24 = vld [vmem:[%s4140_s5 + $0x30] sm:$0xff]  }
  0xe2   :  { %3091 = vmatprep.subr.bf16.mxu1 %v3361_v51 }
  0xe3   :  { %3106 = vmatpush3.bf16.msra.mxu0 %v3332_v42 }
  0xe4   :  { %3107 = vmatprep.subr.bf16.mxu0 %v3361_v51 }
  0xe5   :  { %3092 = vmatpush3.bf16.msra.mxu1 %v3327_v25  ;;  %v3335_v25 = vld [vmem:[%s4140_s5 + $0x38] sm:$0xff]  }
  0xe7   :  { %3108 = vmatpush3.bf16.msra.mxu0 %v3333_v44 }
  0xe8   :  { %3109 = vmatprep.subr.bf16.mxu0 %v3361_v51 }
  0xeb   :  { %3110 = vmatpush3.bf16.msra.mxu0 %v3334_v24 }
  0xec   :  { %3111 = vmatprep.subr.bf16.mxu0 %v3361_v51  ;;  %v2769_v51 = vld [vmem:[%s4141_s6] ss:$0 sm:$0xff] }
  0xef   :  { %3112 = vmatpush3.bf16.msra.mxu0 %v3335_v25 }
  0xf5   :  { %v2794_v58 = vpop.f32.mrb[0].mxu0 }
  0xf6   :  { %v2795_v60 = vpop.f32.mrb[1].mxu0 }
  0xf7   :  { %v2796_v61 = vadd.f32 %v2795_v60, %v2794_v58  ;;  %v2797_v62 = vpop.f32.mrb[2].mxu0  ;;  %v2816_v63 = vpop.f32.mrb[0].mxu1 }
  0xf8   :  { %v2798_v0 = vpop.f32.mrb[3].mxu0  ;;  %v2817_v1 = vpop.f32.mrb[1].mxu1 }
  0xf9   :  { %v1835_v41 = vadd.f32 %v2796_v61, %v2561_v59  ;;  %v2818_v2 = vadd.f32 %v2817_v1, %v2816_v63  ;;  %v2819_v3 = vpop.f32.mrb[2].mxu1 }
  0xfa   :  { %v2820_v4 = vpop.f32.mrb[3].mxu1 }
  0xfb   :  { %v1875_v5 = vadd.f32 %v2818_v2, %v1835_v41 }
 0x115   :  { %v2838_v9 = vpop.f32.mrb[4].mxu0 }
 0x116   :  { %v2839_v10 = vpop.f32.mrb[5].mxu0 }
 0x117   :  { %v2840_v11 = vadd.f32 %v2839_v10, %v2838_v9  ;;  %v2841_v12 = vpop.f32.mrb[6].mxu0  ;;  %v2860_v13 = vpop.f32.mrb[4].mxu1 }
 0x118   :  { %v2842_v15 = vpop.f32.mrb[7].mxu0  ;;  %v2861_v16 = vpop.f32.mrb[5].mxu1 }
 0x119   :  { %v1915_v17 = vadd.f32 %v2840_v11, %v1875_v5  ;;  %v2862_v18 = vadd.f32 %v2861_v16, %v2860_v13  ;;  %v2863_v19 = vpop.f32.mrb[6].mxu1 }
 0x11a   :  { %v2864_v21 = vpop.f32.mrb[7].mxu1 }
 0x11b   :  { %v1955_v22 = vadd.f32 %v2862_v18, %v1915_v17 }
 0x135   :  { %v2882_v29 = vpop.f32.mrb[8].mxu0 }
 0x136   :  { %v2883_v30 = vpop.f32.mrb[9].mxu0 }
 0x137   :  { %v2884_v32 = vadd.f32 %v2883_v30, %v2882_v29  ;;  %v2885_v33 = vpop.f32.mrb[10].mxu0  ;;  %v2904_v34 = vpop.f32.mrb[8].mxu1 }
 0x138   :  { %v2886_v35 = vpop.f32.mrb[11].mxu0  ;;  %v2905_v36 = vpop.f32.mrb[9].mxu1 }
 0x139   :  { %v1995_v37 = vadd.f32 %v2884_v32, %v1955_v22  ;;  %v2906_v38 = vadd.f32 %v2905_v36, %v2904_v34  ;;  %v2907_v39 = vpop.f32.mrb[10].mxu1 }
 0x13a   :  { %v2908_v40 = vpop.f32.mrb[11].mxu1 }
 0x13b   :  { %v2035_v43 = vadd.f32 %v2906_v38, %v1995_v37 }
 0x155   :  { %v2926_v45 = vpop.f32.mrb[12].mxu0 }
 0x156   :  { %v2927_v46 = vpop.f32.mrb[13].mxu0 }
 0x157   :  { %v2928_v47 = vadd.f32 %v2927_v46, %v2926_v45  ;;  %v2929_v48 = vpop.f32.mrb[14].mxu0  ;;  %v2948_v49 = vpop.f32.mrb[12].mxu1 }
 0x158   :  { %v2930_v50 = vpop.f32.mrb[15].mxu0  ;;  %v2949_v52 = vpop.f32.mrb[13].mxu1 }
 0x159   :  { %v2075_v53 = vadd.f32 %v2928_v47, %v2035_v43  ;;  %v2950_v54 = vadd.f32 %v2949_v52, %v2948_v49  ;;  %v2951_v55 = vpop.f32.mrb[14].mxu1 }
 0x15a   :  { %v2952_v56 = vpop.f32.mrb[15].mxu1 }
 0x15b   :  { %v2115_v57 = vadd.f32 %v2950_v54, %v2075_v53 }
 0x175   :  { %v2970_v58 = vpop.f32.mrb[16].mxu0 }
 0x176   :  { %v2971_v59 = vpop.f32.mrb[17].mxu0 }
 0x177   :  { %v2972_v60 = vadd.f32 %v2971_v59, %v2970_v58  ;;  %v2973_v61 = vpop.f32.mrb[18].mxu0  ;;  %v2992_v62 = vpop.f32.mrb[16].mxu1 }
 0x178   :  { %v2974_v63 = vpop.f32.mrb[19].mxu0  ;;  %v2993_v0 = vpop.f32.mrb[17].mxu1 }
 0x179   :  { %v2155_v1 = vadd.f32 %v2972_v60, %v2115_v57  ;;  %v2994_v41 = vadd.f32 %v2993_v0, %v2992_v62  ;;  %v2995_v2 = vpop.f32.mrb[18].mxu1 }
 0x17a   :  { %v2996_v3 = vpop.f32.mrb[19].mxu1 }
 0x17b   :  { %v2195_v4 = vadd.f32 %v2994_v41, %v2155_v1 }
 0x195   :  { %v3014_v5 = vpop.f32.mrb[20].mxu0 }
 0x196   :  { %v3015_v6 = vpop.f32.mrb[21].mxu0 }
 0x197   :  { %v3016_v7 = vadd.f32 %v3015_v6, %v3014_v5  ;;  %v3017_v8 = vpop.f32.mrb[22].mxu0  ;;  %v3036_v9 = vpop.f32.mrb[20].mxu1 }
 0x198   :  { %v3018_v10 = vpop.f32.mrb[23].mxu0  ;;  %v3037_v11 = vpop.f32.mrb[21].mxu1 }
 0x199   :  { %v2235_v12 = vadd.f32 %v3016_v7, %v2195_v4  ;;  %v3038_v13 = vadd.f32 %v3037_v11, %v3036_v9  ;;  %v3039_v14 = vpop.f32.mrb[22].mxu1 }
 0x19a   :  { %v3040_v15 = vpop.f32.mrb[23].mxu1 }
 0x19b   :  { %v2275_v16 = vadd.f32 %v3038_v13, %v2235_v12 }
 0x1a5   :  { %v2314_v17 = vpop.f32.mrb[24].mxu0 }
 0x1a6   :  { %v2315_v18 = vadd.f32 %v2314_v17, %v2275_v16  ;;  %v3075_v19 = vpop.f32.mrb[25].mxu0 }
 0x1a7   :  { %v2317_v20 = vpop.f32.mrb[26].mxu0 }
 0x1a8   :  { %v2320_v21 = vmax.f32 %v2315_v18, 0.0  ;;  %v3076_v22 = vpop.f32.mrb[27].mxu0 }
 0x1aa   :  { %v2321_v23 = vpack.c.bf16 %v2320_v21, %v2320_v21 }
 0x1ac   :  { %3094 = vmatmul.mubr.bf16.vlgmr.msra.gmra.mrb[24].mxu1 %v2321_v23 }
 0x27f   :  { %v2427_v27 = vpop.f32.mrb[24].mxu1 }
 0x280   :  { %v2428_v28 = vadd.f32 %v2760_v26, %v2427_v27  ;;  %v3095_v29 = vpop.f32.mrb[25].mxu1 }
 0x281   :  { %v2430_v30 = vpop.f32.mrb[26].mxu1 }
 0x282   :  { %v2433_v31 = vmax.f32 %v2428_v28, 0.0  ;;  %v3096_v32 = vpop.f32.mrb[27].mxu1 }
 0x284   :  { %v2434_v33 = vpack.c.bf16 %v2433_v31, %v2433_v31 }
 0x286   :  { %3114 = vmatmul.mubr.bf16.vlgmr.msra.gmra.mrb[28].mxu0 %v2434_v33 }
 0x359   :  { %v2540_v34 = vpop.f32.mrb[28].mxu0 }
 0x35a   :  { %v2541_v35 = vadd.f32 %v2769_v51, %v2540_v34  ;;  %v3115_v36 = vpop.f32.mrb[29].mxu0 }
 0x35b   :  { %v2543_v37 = vpop.f32.mrb[30].mxu0 }
 0x35c   :  { %2546 = vst [vmem:[#allocation2] sm:$0x3] %v2541_v35  ;;  %v3116_v38 = vpop.f32.mrb[31].mxu0 }
 0x35d   :  { %3347 = shalt.err (!%p3344_p4)
}
 0x35e   :  { %s3348_s6 = scalar_lea.hbm %s4142_s7, 32 }
 0x35f   :  { %p3349_p5 = scmp.ne.s32.totalorder %s4142_s7, %s3348_s6  ;;  %p3352_p6 = scmp.lt.u32.totalorder %s3348_s6, %s4142_s7 }
 0x361   :  { %p3354_p7 = pnand %p3352_p6, %p3349_p5 }
 0x363   :  { %3357 = shalt.err (!%p3354_p7)
}
 0x364   :  { %2556 = dma.vmem_to_hbm [thread:$0]  %s2554_s19, 32, %s4142_s7, [#allocation3]  }
 0x365   :  { %3358 = dma.done.wait [#allocation3], 32  }
 0x366   :  { %3359 = vsyncadd [#allocation3], 4294967264 }
 0x367   :  { %2560 = vsyncpa [#allocation3], 1 }

// kernel: net3_forward.4
= control target key start
LH: loop header
LB: loop body
LE: loop exit
PB: predicated region body
PF: predicated region fallthrough
CT: control target
= control target key end

     0   :  { %s18124_s12 = smov 0   ;;  %s22529_s0 = inlined_call_operand.vmem [shape: bf16[2,440,64], index: 0, kind: input, shape index: {}]   ;;  %s22530_s1 = inlined_call_operand.vmem [shape: bf16[1600,64], index: 1, kind: input, shape index: {}]   ;;  %s22531_s2 = inlined_call_operand.vmem [shape: f32[1,64], index: 2, kind: input, shape index: {}]   ;;  %s22532_s3 = inlined_call_operand.vmem [shape: bf16[2,7,7,64], index: 3, kind: output, shape index: {}]  }
   0x1 LB: > { %s11889_s13 = sadd.s32 4294967295, %s18100_s12   ;;  %p11893_p0 = scmp.ge.s32.totalorder %s18100_s12, 1  ;;  %s18100_s12 = sphi %s18124_s12, %s13_s12  }
   0x2   : > { %p137_p1 = scmp.lt.s32.totalorder %s18100_s12, 3 }
   0x4   : > { %p138_p2 = pnand %p11893_p0, %p137_p1 }
   0x6   : > { %141 = sbr.rel (%p138_p2) target bundleno = 2361 (0x939), region = 32 }
   0xd   : > { %v17652_v0 = vld [vmem:[%s22530_s1 + $0x20] sm:$0xff]   ;;  %v18102_v1 = vmov 0.0   ;;  %v17654_v3 = vld [vmem:[%s22530_s1 + $0x28] sm:$0xff]   ;;  %vm18103_vm0 = vmmov 0   ;;  %p161_p3 = scmp.lt.s32.totalorder %s11889_s13, 1  ;;  %v17656_v5 = vld [vmem:[%s22530_s1 + $0x30] sm:$0xff]  }
   0xe   : > { %13358 = vmatprep.subr.bf16.mxu1 %v18102_v1  ;;  %14462 = vmatprep.subr.bf16.mxu0 %v18102_v1  ;;  %v17653_v2 = vld [vmem:[%s22530_s1 + $0x180] sm:$0xff]   ;;  %v17655_v4 = vld [vmem:[%s22530_s1 + $0x188] sm:$0xff]   ;;  %v17657_v6 = vld [vmem:[%s22530_s1 + $0x190] sm:$0xff]   ;;  %vm1080_vm1 = vcmask 1046528   ;;  %vm339_vm2 = vsmask.f32 7424 }
   0xf   : > { %13359 = vmatpush3.bf16.msra.mxu1 %v17652_v0  ;;  %13366 = vmatprep.mubr.msk.bf16.mxu1 %vm18103_vm0, %v18102_v1  ;;  %s22868_s13 = smov (!%p161_p3, %s11889_s13), 1  ;;  %v17658_v7 = vld [vmem:[%s22530_s1 + $0x38] sm:$0xff]   ;;  %vm536_vm3 = vcmask 523264   ;;  %v17664_v25 = vld [vmem:[%s22530_s1 + $0x1a0] sm:$0xff]   ;;  %v17670_v37 = vld [vmem:[%s22530_s1 + $0x1a8] sm:$0xff]   ;;  %vm1906_vm5 = vcmask 1045504  }
  0x10   : > { %14463 = vmatpush3.bf16.msra.mxu0 %v17653_v2  ;;  %13360 = vmatprep.subr.bf16.mxu1 %v18102_v1  ;;  %s17640_s24 = smul.u32 220, %s22868_s13  ;;  %v17659_v8 = vld [vmem:[%s22530_s1 + $0x198] sm:$0xff]   ;;  %v17667_v31 = vld [vmem:[%s22530_s1] sm:$0xff]   ;;  %v17677_v44 = vld [vmem:[%s22530_s1 + $0x1b0] sm:$0xff]   ;;  %vm1466_vm4 = vsmask.f32 6400 }
  0x11   : > { %14464 = vmatprep.subr.bf16.mxu0 %v18102_v1  ;;  %14470 = vmatprep.mubr.msk.bf16.mxu0 %vm18103_vm0, %v18102_v1  ;;  %v17680_v50 = vld [vmem:[%s22530_s1 + $0x8] sm:$0xff]   ;;  %v17685_v55 = vld [vmem:[%s22530_s1 + $0x1b8] sm:$0xff]   ;;  %vm11810_vm6 = vcmask 519168   ;;  %vm11811_vm7 = vsmask.f32 3328 }
  0x12   : > { %s18169_s4 = scalar_lea.vmem %s22529_s0, %s17640_s24  ;;  %vm22467_vm8 = vmand %vm11810_vm6, %vm11811_vm7 }
  0x13   : > { %13361 = vmatpush3.bf16.msra.mxu1 %v17654_v3  ;;  %v172_v9 = vld [vmem:[%s18169_s4] sm:$0xf]  ;;  %v173_v10 = vld [vmem:[%s18169_s4 + $0x4] sm:$0xf]  ;;  %v18179_v12 = vld [vmem:[%s18169_s4 + $0x8] sm:$0xff]  }
  0x14   : > { %14465 = vmatpush3.bf16.msra.mxu0 %v17655_v4  ;;  %13362 = vmatprep.subr.bf16.mxu1 %v18102_v1  ;;  %v18176_v11 = vcombine.low %v172_v9, %v173_v10  ;;  %v5121_v13 = vld [vmem:[%s18169_s4 + $0x1c] sm:$0xf]  ;;  %v18184_v14 = vld [vmem:[%s18169_s4 + $0x20] sm:$0xff]   ;;  %v22580_v17 = vshll.u32 %v18179_v12, 16  ;;  %v5781_v18 = vld [vmem:[%s18169_s4 + $0x18] sm:$0xe] }
  0x15   : > { %14466 = vmatprep.subr.bf16.mxu0 %v18102_v1  ;;  %v18191_v19 = vcombine.low %v5781_v18, %v5121_v13  ;;  %v5794_v20 = vrot.slane %v18184_v14, 1  ;;  %v18195_v21 = vld [vmem:[%s18169_s4 + $0x10] sm:$0xff]   ;;  %v18205_v26 = vld [vmem:[%s18169_s4 + $0x28] sm:$0xff]   ;;  %v22573_v28 = vshrl.u32 %v18179_v12, 16  ;;  %v18219_v34 = vld [vmem:[%s18169_s4 + $0x18] sm:$0xff]  }
  0x16   : > { %v341_v15 = vshrl.u32 %v18176_v11, 16  ;;  %v343_v16 = vshll.u32 %v18176_v11, 16  ;;  %v350_v23 = vrot.slane %v22580_v17, 1  ;;  %v22567_v29 = vshll.u32 %v18195_v21, 16  ;;  %v18236_v39 = vld [vmem:[%s18169_s4 + $0x30] sm:$0xff]   ;;  %v18257_v47 = vld [vmem:[%s18169_s4 + $0x20] sm:$0xff]  }
  0x17   : > { %13363 = vmatpush3.bf16.msra.mxu1 %v17656_v5  ;;  %v5793_v24 = vrot.slane %v18191_v19, 1  ;;  %v5796_v33 = vrot.slane %v18205_v26, 1  ;;  %v22568_v41 = vshrl.u32 %v18195_v21, 16  ;;  %v22554_v42 = vshll.u32 %v18219_v34, 16  ;;  %v18260_v48 = vld [vmem:[%s18169_s4 + $0x38] sm:$0xff]   ;;  %v18286_v58 = vld [vmem:[%s18169_s4 + $0x28] sm:$0xff]  }
  0x18   : > { %14467 = vmatpush3.bf16.msra.mxu0 %v17657_v6  ;;  %13364 = vmatprep.subr.bf16.mxu1 %v18102_v1  ;;  %v345_v22 = vrot.slane %v343_v16, 1  ;;  %v354_v35 = vor.u32 %v22573_v28, %v350_v23  ;;  %v358_v36 = vrot.slane %v22567_v29, 1  ;;  %v5798_v43 = vrot.slane %v18236_v39, 1  ;;  %v18291_v60 = vld [vmem:[%s18169_s4 + $0x40] sm:$0xff]   ;;  %v18308_v4 = vld [vmem:[%s18169_s4 + $0x30] sm:$0xff]   ;;  %v18333_v18 = vld [vmem:[%s18169_s4 + $0x38] sm:$0xff]  }
  0x19   : > { %14468 = vmatprep.subr.bf16.mxu0 %v18102_v1  ;;  %v5795_v30 = vsel %vm1080_vm1, %v5793_v24, %v5794_v20  ;;  %v5797_v38 = vsel %vm1080_vm1, %v5794_v20, %v5796_v33  ;;  %v366_v46 = vrot.slane %v22554_v42, 1  ;;  %v22558_v52 = vshrl.u32 %v18219_v34, 16  ;;  %22699 = vst [vmem:[#allocation3_spill] sm:$0xff] %v18291_v60  ;;  %v17692_v5 = vld [vmem:[%s22530_s1 + $0x10] sm:$0xff]   ;;  %v17699_v20 = vld [vmem:[%s22530_s1 + $0x18] sm:$0xff]  }
  0x1a   : > { %v346_v27 = vor.u32 %v345_v22, %v341_v15  ;;  %v359_v40 = vsel %vm339_vm2, %v354_v35, %v358_v36  ;;  %v362_v45 = vor.u32 %v22568_v41, %v358_v36  ;;  %v5799_v49 = vsel %vm1080_vm1, %v5796_v33, %v5798_v43  ;;  %v18361_v35 = vld [vmem:[%s18169_s4 + $0x48] sm:$0xff]   ;;  %v18364_v36 = vld [vmem:[%s18169_s4 + $0x58] sm:$0xff]  }
  0x1b   : > { %13365 = vmatpush3.bf16.msra.mxu1 %v17658_v7  ;;  %v22548_v53 = vshll.u32 %v18257_v47, 16  ;;  %v5800_v54 = vrot.slane %v18260_v48, 1  ;;  %v370_v56 = vor.u32 %v22558_v52, %v366_v46  ;;  %v22553_v62 = vshrl.u32 %v18257_v47, 16  ;;  %v18315_v7 = vld [vmem:[%s18169_s4 + $0x48] sm:$0xff]   ;;  %22702 = vst [vmem:[#allocation6_spill] sm:$0xff] %v18364_v36 }
  0x1c   : > { %14469 = vmatpush3.bf16.msra.mxu0 %v17659_v8  ;;  %13450 = vmatprep.subr.bf16.mxu1 %v18102_v1  ;;  %v351_v32 = vsel %vm339_vm2, %v346_v27, %v350_v23  ;;  %v367_v51 = vsel %vm339_vm2, %v362_v45, %v366_v46  ;;  %v22544_v63 = vshll.u32 %v18286_v58, 16  ;;  %v5802_v0 = vrot.slane %v18291_v60, 1  ;;  %22700 = vst [vmem:[#allocation4_spill] sm:$0xff] %v18315_v7  ;;  %v18340_v23 = vld [vmem:[%s18169_s4 + $0x50] sm:$0xff]   ;;  %v18374_v45 = vld [vmem:[%s18169_s4 + $0x58] sm:$0xff]  }
  0x1d   : > { %14554 = vmatprep.subr.bf16.mxu0 %v18102_v1  ;;  %v374_v57 = vrot.slane %v22548_v53, 1  ;;  %v5801_v59 = vsel %vm1080_vm1, %v5798_v43, %v5800_v54  ;;  %v22545_v9 = vshrl.u32 %v18286_v58, 16  ;;  %v22539_v10 = vshll.u32 %v18308_v4, 16  ;;  %22701 = vst [vmem:[#allocation5_spill] sm:$0xff] %v18340_v23  ;;  %v18370_v43 = vld [vmem:[%s18169_s4 + $0x50] sm:$0xff]  }
  0x1e   : > { %13367 = vmatmul.mubr.msk.bf16.vlgmr.msra.gmra.mrb[0].mxu1 %vm536_vm3, %v351_v32  ;;  %v382_v3 = vrot.slane %v22544_v63, 1  ;;  %v5803_v6 = vsel %vm1080_vm1, %v5800_v54, %v5802_v0  ;;  %v5804_v13 = vrot.slane %v18315_v7, 1  ;;  %v22535_v27 = vshll.u32 %v18333_v18, 16  ;;  %v18386_v54 = vld [vmem:[%s18169_s4 + $0x60] sm:$0xff]  }
  0x1f   : > { %14471 = vmatmul.mubr.msk.bf16.vlgmr.msra.gmra.mrb[0].mxu0 %vm536_vm3, %v5795_v30  ;;  %13370 = vmatprep.mubr.msk.bf16.mxu1 %vm18103_vm0, %v18102_v1  ;;  %v375_v61 = vsel %vm339_vm2, %v370_v56, %v374_v57  ;;  %v378_v2 = vor.u32 %v22553_v62, %v374_v57  ;;  %v390_v16 = vrot.slane %v22539_v10, 1  ;;  %v5806_v30 = vrot.slane %v18340_v23, 1 }
  0x20   : > { %14555 = vmatpush3.bf16.msra.mxu0 %v17664_v25  ;;  %14474 = vmatprep.mubr.msk.bf16.mxu0 %vm18103_vm0, %v18102_v1  ;;  %v386_v15 = vor.u32 %v22545_v9, %v382_v3  ;;  %v5805_v22 = vsel %vm1080_vm1, %v5802_v0, %v5804_v13  ;;  %v22543_v25 = vshrl.u32 %v18308_v4, 16  ;;  %v398_v33 = vrot.slane %v22535_v27, 1  ;;  %v18464_v9 = vld [vmem:[%s18169_s4 + $0x78] sm:$0xff]  }
  0x21   : > { %13451 = vmatpush3.bf16.msra.mxu1 %v17667_v31  ;;  %14556 = vmatprep.subr.bf16.mxu0 %v18102_v1  ;;  %v383_v8 = vsel %vm339_vm2, %v378_v2, %v382_v3  ;;  %v18352_v31 = vld [vmem:[%s18169_s4 + $0x40] sm:$0xff]   ;;  %v22533_v46 = vshll.u32 %v18361_v35, 16  ;;  %v22537_v2 = vshll.u32 %v18374_v45, 16  ;;  %v18403_v3 = vld [vmem:[%s18169_s4 + $0x70] sm:$0xff]   ;;  %v22551_v63 = vshrl.u32 %v18236_v39, 16 }
  0x22   : > { %13452 = vmatprep.subr.bf16.mxu1 %v18102_v1  ;;  %v391_v24 = vsel %vm339_vm2, %v386_v15, %v390_v16  ;;  %v394_v32 = vor.u32 %v22543_v25, %v390_v16  ;;  %v22546_v0 = vshrl.u32 %v18352_v31, 16  ;;  %22705 = vst [vmem:[#allocation9_spill] sm:$0xff] %v18403_v3  ;;  %v18411_v15 = vld [vmem:[%s18169_s4 + $0x68] sm:$0xff]  }
  0x24   : > { %14557 = vmatpush3.bf16.msra.mxu0 %v17670_v37  ;;  %v5807_v37 = vsel %vm1080_vm1, %v5804_v13, %v5806_v30  ;;  %v22557_v13 = vshrl.u32 %v18361_v35, 16 }
  0x25   : > { %14558 = vmatprep.subr.bf16.mxu0 %v18102_v1  ;;  %13453 = vmatpush3.bf16.msra.mxu1 %v17680_v50  ;;  %v5808_v50 = vrot.slane %v18364_v36, 1 }
  0x26   : > { %13371 = vmatmul.mubr.msk.bf16.gmra.mrb[4].mxu1 %vm536_vm3, %v359_v40  ;;  %13454 = vmatprep.subr.bf16.mxu1 %v18102_v1  ;;  %v22534_v40 = vshll.u32 %v18352_v31, 16 }
  0x27   : > { %14475 = vmatmul.mubr.msk.bf16.gmra.mrb[4].mxu0 %vm536_vm3, %v5797_v38  ;;  %13374 = vmatprep.mubr.msk.bf16.mxu1 %vm18103_vm0, %v18102_v1  ;;  %v22536_v38 = vshrl.u32 %v18333_v18, 16  ;;  %v5809_v16 = vsel %vm1080_vm1, %v5806_v30, %v5808_v50  ;;  %v22561_v30 = vrot.slane %v18403_v3, 1 }
  0x28   : > { %14478 = vmatprep.mubr.msk.bf16.mxu0 %vm18103_vm0, %v18102_v1  ;;  %14559 = vmatpush3.bf16.msra.mxu0 %v17677_v44  ;;  %v399_v44 = vsel %vm339_vm2, %v394_v32, %v398_v33  ;;  %v406_v57 = vrot.slane %v22534_v40, 1  ;;  %v22566_v40 = vshrl.u32 %v18374_v45, 16 }
  0x29   : > { %14560 = vmatprep.subr.bf16.mxu0 %v18102_v1  ;;  %13455 = vmatpush3.bf16.msra.mxu1 %v17692_v5  ;;  %v402_v56 = vor.u32 %v22536_v38, %v398_v33  ;;  %v6179_v5 = vshrl.u32 %v18191_v19, 16  ;;  %v22560_v33 = vshrl.u32 %v18370_v43, 16  ;;  %v22550_v38 = vshll.u32 %v18205_v26, 16 }
  0x2a   : > { %13456 = vmatprep.subr.bf16.mxu1 %v18102_v1 }
  0x2b   : > { %v18428_v27 = vrot.slane %v6179_v5, 1  ;;  %v22549_v5 = vshrl.u32 %v18205_v26, 16 }
  0x2c   : > { %14561 = vmatpush3.bf16.msra.mxu0 %v17685_v55  ;;  %v22542_v55 = vshll.u32 %v18184_v14, 16 }
  0x2d   : > { %14646 = vmatprep.subr.bf16.mxu0 %v18102_v1  ;;  %13457 = vmatpush3.bf16.msra.mxu1 %v17699_v20  ;;  %v6190_v25 = vrot.slane %v22549_v5, 1  ;;  %v18476_v5 = vrot.slane %v22551_v63, 1  ;;  %v22562_v63 = vshll.u32 %v18260_v48, 16 }
  0x2e   : > { %13375 = vmatmul.mubr.msk.bf16.gmra.mrb[8].mxu1 %vm536_vm3, %v367_v51  ;;  %13542 = vmatprep.subr.bf16.mxu1 %v18102_v1  ;;  %v18383_v51 = vld [vmem:[%s18169_s4 + $0x68] sm:$0xff]  }
  0x2f   : > { %14479 = vmatmul.mubr.msk.bf16.gmra.mrb[8].mxu0 %vm536_vm3, %v5799_v49  ;;  %13378 = vmatprep.mubr.msk.bf16.mxu1 %vm18103_vm0, %v18102_v1  ;;  %v18378_v49 = vld [vmem:[%s18169_s4 + $0x60] sm:$0xff]   ;;  %22704 = vst [vmem:[#allocation8_spill] sm:$0xff] %v18383_v51  ;;  %v5812_v20 = vrot.slane %v18383_v51, 1 }
  0x30   : > { %14482 = vmatprep.mubr.msk.bf16.mxu0 %vm18103_vm0, %v18102_v1  ;;  %22703 = vst [vmem:[#allocation7_spill] sm:$0xff] %v18378_v49 }
  0x31   : > { %v5815_v52 = vsel %vm1080_vm1, %v5812_v20, %v22561_v30 }
  0x36   : > { %13379 = vmatmul.mubr.msk.bf16.gmra.mrb[12].mxu1 %vm536_vm3, %v375_v61  ;;  %v22540_v61 = vshrl.u32 %v18184_v14, 16 }
  0x37   : > { %14483 = vmatmul.mubr.msk.bf16.gmra.mrb[12].mxu0 %vm536_vm3, %v5801_v59  ;;  %13382 = vmatprep.mubr.msk.bf16.mxu1 %vm18103_vm0, %v18102_v1  ;;  %v22538_v59 = vshll.u32 %v18370_v43, 16 }
  0x38   : > { %14486 = vmatprep.mubr.msk.bf16.mxu0 %vm18103_vm0, %v18102_v1 }
  0x39   : > { %v422_v32 = vrot.slane %v22538_v59, 1  ;;  %v6187_v59 = vrot.slane %v22542_v55, 2  ;;  %v22577_v55 = vshrl.u32 %v18411_v15, 16 }
  0x3e   : > { %13383 = vmatmul.mubr.msk.bf16.gmra.mrb[16].mxu1 %vm536_vm3, %v383_v8  ;;  %v5810_v8 = vrot.slane %v18378_v49, 1 }
  0x3f   : > { %14487 = vmatmul.mubr.msk.bf16.gmra.mrb[16].mxu0 %vm536_vm3, %v5803_v6  ;;  %13386 = vmatprep.mubr.msk.bf16.mxu1 %vm18103_vm0, %v18102_v1  ;;  %v414_v6 = vrot.slane %v22533_v46, 1  ;;  %v430_v46 = vrot.slane %v22537_v2, 1  ;;  %v6186_v2 = vrot.slane %v22540_v61, 1  ;;  %v410_v61 = vor.u32 %v22546_v0, %v406_v57 }
  0x40   : > { %14490 = vmatprep.mubr.msk.bf16.mxu0 %vm18103_vm0, %v18102_v1  ;;  %v5813_v62 = vsel %vm1080_vm1, %v5810_v8, %v5812_v20 }
  0x41   : > { %v415_v53 = vsel %vm339_vm2, %v410_v61, %v414_v6  ;;  %v434_v20 = vor.u32 %v22566_v40, %v430_v46 }
  0x46   : > { %13387 = vmatmul.mubr.msk.bf16.gmra.mrb[20].mxu1 %vm536_vm3, %v391_v24  ;;  %v407_v24 = vsel %vm339_vm2, %v402_v56, %v406_v57  ;;  %v22547_v56 = vshll.u32 %v18411_v15, 16  ;;  %v5811_v57 = vsel %vm1080_vm1, %v5808_v50, %v5810_v8  ;;  %v418_v50 = vor.u32 %v22557_v13, %v414_v6  ;;  %v18521_v13 = vld [vmem:[%s18169_s4 + $0x88] sm:$0xff]  }
  0x47   : > { %14491 = vmatmul.mubr.msk.bf16.gmra.mrb[20].mxu0 %vm536_vm3, %v5805_v22  ;;  %13390 = vmatprep.mubr.msk.bf16.mxu1 %vm18103_vm0, %v18102_v1  ;;  %v22541_v22 = vshll.u32 %v18386_v54, 16  ;;  %v426_v8 = vor.u32 %v22560_v33, %v422_v32  ;;  %v22612_v29 = vshrl.u32 %v18521_v13, 16 }
  0x48   : > { %14494 = vmatprep.mubr.msk.bf16.mxu0 %vm18103_vm0, %v18102_v1  ;;  %v423_v42 = vsel %vm339_vm2, %v418_v50, %v422_v32 }
  0x49   : > { %v431_v32 = vsel %vm339_vm2, %v426_v8, %v430_v46  ;;  %v6188_v8 = vor.u32 %v6187_v59, %v6186_v2  ;;  %v22569_v46 = vshrl.u32 %v18315_v7, 16  ;;  %v18563_v59 = vld [vmem:[%s18169_s4 + $0x90] sm:$0xff]  }
  0x4e   : > { %13391 = vmatmul.mubr.msk.bf16.gmra.mrb[24].mxu1 %vm536_vm3, %v399_v44  ;;  %v18422_v44 = vld [vmem:[%s18169_s4 + $0x70] sm:$0xff]  }
  0x4f   : > { %14495 = vmatmul.mubr.msk.bf16.gmra.mrb[24].mxu0 %vm536_vm3, %v5807_v37  ;;  %13394 = vmatprep.mubr.msk.bf16.mxu1 %vm18103_vm0, %v18102_v1  ;;  %v6182_v37 = vshll.u32 %v18191_v19, 16  ;;  %v18435_v19 = vrot.slane %v22541_v22, 1  ;;  %v22572_v22 = vshrl.u32 %v18386_v54, 16 }
  0x50   : > { %14498 = vmatprep.mubr.msk.bf16.mxu0 %vm18103_vm0, %v18102_v1 }
  0x51   : > { %v18445_v10 = vrot.slane %v6182_v37, 2  ;;  %v6191_v37 = vrot.slane %v22550_v38, 2  ;;  %v22579_v38 = vshrl.u32 %v18422_v44, 16 }
  0x56   : > { %13395 = vmatmul.mubr.msk.bf16.gmra.mrb[28].mxu1 %vm536_vm3, %v407_v24  ;;  %v18456_v24 = vrot.slane %v22547_v56, 1  ;;  %v22555_v56 = vshll.u32 %v18236_v39, 16 }
  0x57   : > { %14499 = vmatmul.mubr.msk.bf16.gmra.mrb[28].mxu0 %vm536_vm3, %v5809_v16  ;;  %v22552_v16 = vshll.u32 %v18422_v44, 16  ;;  %13398 = vmatprep.mubr.msk.bf16.mxu1 %vm18103_vm0, %v18102_v1 }
  0x58   : > { %14502 = vmatprep.mubr.msk.bf16.mxu0 %vm18103_vm0, %v18102_v1  ;;  %v18488_v61 = vrot.slane %v22555_v56, 2  ;;  %v22613_v56 = vshrl.u32 %v18464_v9, 16 }
  0x59   : > { %v18469_v0 = vrot.slane %v22552_v16, 1  ;;  %v22559_v16 = vshrl.u32 %v18260_v48, 16 }
  0x5e   : > { %13399 = vmatmul.mubr.msk.bf16.gmra.mrb[32].mxu1 %vm536_vm3, %v415_v53  ;;  %v18494_v53 = vld [vmem:[%s18169_s4 + $0x80] sm:$0xff]  }
  0x5f   : > { %14503 = vmatmul.mubr.msk.bf16.gmra.mrb[32].mxu0 %vm536_vm3, %v5811_v57  ;;  %13402 = vmatprep.mubr.msk.bf16.mxu1 %vm18103_vm0, %v18102_v1  ;;  %v22556_v57 = vshll.u32 %v18464_v9, 16  ;;  %v22563_v50 = vshll.u32 %v18494_v53, 16 }
  0x60   : > { %14506 = vmatprep.mubr.msk.bf16.mxu0 %vm18103_vm0, %v18102_v1 }
  0x61   : > { %v18503_v6 = vrot.slane %v22556_v57, 1  ;;  %v22565_v57 = vshll.u32 %v18291_v60, 16  ;;  %v18536_v33 = vrot.slane %v22563_v50, 1  ;;  %v22571_v50 = vshll.u32 %v18521_v13, 16 }
  0x63   : > { %v18574_v40 = vrot.slane %v22571_v50, 1  ;;  %v18605_v50 = vld [vmem:[%s18169_s4 + $0x98] sm:$0xff]  }
  0x66   : > { %13403 = vmatmul.mubr.msk.bf16.gmra.mrb[36].mxu1 %vm536_vm3, %v423_v42  ;;  %v22564_v42 = vshrl.u32 %v18291_v60, 16 }
  0x67   : > { %14507 = vmatmul.mubr.msk.bf16.gmra.mrb[36].mxu0 %vm536_vm3, %v5813_v62  ;;  %13406 = vmatprep.mubr.msk.bf16.mxu1 %vm18103_vm0, %v18102_v1  ;;  %v18515_v62 = vrot.slane %v22559_v16, 1  ;;  %v18532_v16 = vrot.slane %v22562_v63, 2  ;;  %v22586_v63 = vshrl.u32 %v18494_v53, 16 }
  0x68   : > { %14510 = vmatprep.mubr.msk.bf16.mxu0 %vm18103_vm0, %v18102_v1  ;;  %v18549_v30 = vrot.slane %v22564_v42, 1  ;;  %v439_v42 = vsel %vm339_vm2, %v434_v20, %v18435_v19  ;;  %v18580_v20 = vrot.slane %v22569_v46, 1  ;;  %v17704_v46 = vld [vmem:[%s22530_s1 + $0x1d0] sm:$0xff]  }
  0x6e   : > { %13407 = vmatmul.mubr.msk.bf16.gmra.mrb[40].mxu1 %vm536_vm3, %v431_v32  ;;  %v18553_v32 = vrot.slane %v22565_v57, 2  ;;  %v17698_v57 = vld [vmem:[%s22530_s1 + $0x1c8] sm:$0xff]  }
  0x6f   : > { %14511 = vmatmul.mubr.msk.bf16.gmra.mrb[40].mxu0 %vm536_vm3, %v5815_v52  ;;  %v6185_v52 = vor.u32 %v18445_v10, %v18428_v27  ;;  %13410 = vmatprep.mubr.msk.bf16.mxu1 %vm18103_vm0, %v18102_v1  ;;  %v17691_v10 = vld [vmem:[%s22530_s1 + $0x1c0] sm:$0xff]   ;;  %v22570_v27 = vshll.u32 %v18315_v7, 16 }
  0x70   : > { %14562 = vmatprep.mubr.msk.bf16.mxu0 %vm18103_vm0, %v18102_v1  ;;  %v17725_v7 = vld [vmem:[%s22530_s1 + $0x60] sm:$0xff]  }
  0x71   : > { %v6189_v2 = vsel %vm1466_vm4, %v6185_v52, %v6188_v8  ;;  %v6192_v52 = vor.u32 %v6191_v37, %v6190_v25  ;;  %v18584_v41 = vrot.slane %v22570_v27, 2  ;;  %v22576_v25 = vshll.u32 %v18563_v59, 16 }
  0x72   : > { %v22575_v37 = vshll.u32 %v18340_v23, 16 }
  0x73   : > { %v6193_v27 = vsel %vm1466_vm4, %v6188_v8, %v6192_v52  ;;  %v450_v8 = vor.u32 %v22577_v55, %v18456_v24 }
  0x76   : > { %13411 = vmatmul.mubr.msk.bf16.gmra.mrb[44].mxu1 %vm536_vm3, %v439_v42  ;;  %v442_v42 = vor.u32 %v22572_v22, %v18435_v19  ;;  %v18611_v22 = vrot.slane %v22576_v25, 1  ;;  %v22584_v25 = vshrl.u32 %v18378_v49, 16 }
  0x77   : > { %14563 = vmatmul.mubr.msk.bf16.vlgmr.msra.gmra.mrb[0].mxu0 %vm536_vm3, %v6189_v2  ;;  %13414 = vmatprep.mubr.msk.bf16.mxu1 %vm18103_vm0, %v18102_v1  ;;  %v22611_v2 = vshrl.u32 %v18563_v59, 16 }
  0x78   : > { %14647 = vmatpush3.bf16.msra.mxu0 %v17691_v10  ;;  %14566 = vmatprep.mubr.msk.bf16.mxu0 %vm18103_vm0, %v18102_v1  ;;  %v22574_v10 = vshrl.u32 %v18340_v23, 16  ;;  %v447_v19 = vsel %vm339_vm2, %v442_v42, %v18456_v24  ;;  %v17711_v42 = vld [vmem:[%s22530_s1 + $0x1d8] sm:$0xff]   ;;  %v455_v24 = vsel %vm339_vm2, %v450_v8, %v18469_v0  ;;  %v458_v8 = vor.u32 %v22579_v38, %v18469_v0 }
  0x79   : > { %14648 = vmatprep.subr.bf16.mxu0 %v18102_v1 }
  0x7a   : > { %v18615_v28 = vrot.slane %v22574_v10, 1 }
  0x7c   : > { %14649 = vmatpush3.bf16.msra.mxu0 %v17698_v57  ;;  %v6196_v57 = vor.u32 %v18488_v61, %v18476_v5  ;;  %v22583_v5 = vshll.u32 %v18364_v36, 16  ;;  %v18636_v61 = vld [vmem:[%s18169_s4 + $0xa0] sm:$0xff]  }
  0x7d   : > { %14650 = vmatprep.subr.bf16.mxu0 %v18102_v1 }
  0x7e   : > { %13415 = vmatmul.mubr.msk.bf16.gmra.mrb[48].mxu1 %vm536_vm3, %v447_v19  ;;  %v22578_v19 = vshll.u32 %v18605_v50, 16  ;;  %v6197_v10 = vsel %vm1466_vm4, %v6192_v52, %v6196_v57  ;;  %v6200_v52 = vor.u32 %v18532_v16, %v18515_v62  ;;  %v463_v16 = vsel %vm339_vm2, %v458_v8, %v18503_v6  ;;  %v17703_v62 = vld [vmem:[%s18169_s4 + $0xa8] ss:$0 sps:$4 sm:$0x11]  }
  0x7f   : > { %14567 = vmatmul.mubr.msk.bf16.gmra.mrb[4].mxu0 %vm536_vm3, %v6193_v27  ;;  %13418 = vmatprep.mubr.msk.bf16.mxu1 %vm18103_vm0, %v18102_v1  ;;  %v6211_v27 = vrot.slane %v22575_v37, 2  ;;  %v22610_v37 = vshrl.u32 %v18605_v50, 16  ;;  %v6218_v8 = vrot.slane %v22584_v25, 1 }
  0x80   : > { %14570 = vmatprep.mubr.msk.bf16.mxu0 %vm18103_vm0, %v18102_v1  ;;  %14651 = vmatpush3.bf16.msra.mxu0 %v17704_v46  ;;  %v22582_v46 = vshrl.u32 %v18364_v36, 16  ;;  %v6201_v55 = vsel %vm1466_vm4, %v6196_v57, %v6200_v52  ;;  %v466_v57 = vor.u32 %v22613_v56, %v18503_v6  ;;  %v6208_v6 = vor.u32 %v18584_v41, %v18580_v20 }
  0x81   : > { %14652 = vmatprep.subr.bf16.mxu0 %v18102_v1 }
  0x82   : > { %v6214_v0 = vrot.slane %v22582_v46, 1  ;;  %v22587_v46 = vshrl.u32 %v18383_v51, 16 }
  0x84   : > { %14653 = vmatpush3.bf16.msra.mxu0 %v17711_v42  ;;  %v22585_v42 = vshll.u32 %v18636_v61, 16  ;;  %v6222_v25 = vrot.slane %v22587_v46, 1 }
  0x85   : > { %14738 = vmatprep.subr.bf16.mxu0 %v18102_v1 }
  0x86   : > { %13419 = vmatmul.mubr.msk.bf16.gmra.mrb[52].mxu1 %vm536_vm3, %v455_v24  ;;  %v22581_v24 = vshll.u32 %v18378_v49, 16  ;;  %v18673_v38 = vrot.slane %v22585_v42, 1  ;;  %v22606_v42 = vshrl.u32 %v18403_v3, 16  ;;  %v19130_v49 = vld [vmem:[%s18169_s4 + $0xa0] sm:$0xff]  }
  0x87   : > { %14571 = vmatmul.mubr.msk.bf16.gmra.mrb[8].mxu0 %vm536_vm3, %v6197_v10  ;;  %13422 = vmatprep.mubr.msk.bf16.mxu1 %vm18103_vm0, %v18102_v1  ;;  %v18657_v10 = vrot.slane %v22578_v19, 1  ;;  %v6215_v19 = vrot.slane %v22583_v5, 2 }
  0x88   : > { %14574 = vmatprep.mubr.msk.bf16.mxu0 %vm18103_vm0, %v18102_v1  ;;  %v6219_v17 = vrot.slane %v22581_v24, 2  ;;  %v508_v24 = vshll.u32 %v17703_v62, 16  ;;  %v22588_v62 = vshll.u32 %v18403_v3, 16 }
  0x8a   : > { %v510_v20 = vrot.slane %v508_v24, 1  ;;  %v6227_v24 = vrot.slane %v22588_v62, 2 }
  0x8e   : > { %13423 = vmatmul.mubr.msk.bf16.gmra.mrb[56].mxu1 %vm536_vm3, %v463_v16  ;;  %v22609_v16 = vshrl.u32 %v18636_v61, 16 }
  0x8f   : > { %14575 = vmatmul.mubr.msk.bf16.gmra.mrb[12].mxu0 %vm536_vm3, %v6201_v55  ;;  %v6204_v55 = vor.u32 %v18553_v32, %v18549_v30  ;;  %13426 = vmatprep.mubr.msk.bf16.mxu1 %vm18103_vm0, %v18102_v1  ;;  %v471_v30 = vsel %vm339_vm2, %v466_v57, %v18536_v33  ;;  %v474_v32 = vor.u32 %v22586_v63, %v18536_v33  ;;  %v18711_v57 = vld [vmem:[%s18169_s4 + $0x80] sm:$0xff]  }
  0x90   : > { %14578 = vmatprep.mubr.msk.bf16.mxu0 %vm18103_vm0, %v18102_v1  ;;  %22707 = vst [vmem:[#allocation11_spill] sm:$0xff] %v18711_v57  ;;  %v6212_v63 = vor.u32 %v6211_v27, %v18615_v28  ;;  %v22599_v46 = vshll.u32 %v18711_v57, 16  ;;  %v482_v28 = vor.u32 %v22612_v29, %v18574_v40 }
  0x91   : > { %v6205_v5 = vsel %vm1466_vm4, %v6200_v52, %v6204_v55  ;;  %v22589_v52 = vshll.u32 %v18383_v51, 16  ;;  %v479_v41 = vsel %vm339_vm2, %v474_v32, %v18574_v40  ;;  %v490_v40 = vor.u32 %v22611_v2, %v18611_v22 }
  0x92   : > { %v6213_v27 = vsel %vm1466_vm4, %v6208_v6, %v6212_v63 }
  0x93   : > { %v6223_v33 = vrot.slane %v22589_v52, 2  ;;  %v6216_v52 = vor.u32 %v6215_v19, %v6214_v0  ;;  %v6220_v19 = vor.u32 %v6219_v17, %v6218_v8  ;;  %v18776_v17 = vld [vmem:[%s18169_s4 + $0x88] sm:$0xff]   ;;  %v506_v8 = vor.u32 %v22609_v16, %v18673_v38 }
  0x94   : > { %v18974_v16 = vld [vmem:[%s18169_s4 + $0x48] sm:$0xff]  }
  0x96   : > { %13427 = vmatmul.mubr.msk.bf16.gmra.mrb[60].mxu1 %vm536_vm3, %v471_v30  ;;  %v6209_v30 = vsel %vm1466_vm4, %v6204_v55, %v6208_v6  ;;  %v6217_v6 = vsel %vm1466_vm4, %v6212_v63, %v6216_v52  ;;  %v498_v63 = vor.u32 %v22610_v37, %v18657_v10 }
  0x97   : > { %14579 = vmatmul.mubr.msk.bf16.gmra.mrb[16].mxu0 %vm536_vm3, %v6205_v5  ;;  %13430 = vmatprep.mubr.msk.bf16.mxu1 %vm18103_vm0, %v18102_v1  ;;  %v18708_v5 = vld [vmem:[%s18169_s4 + $0x78] sm:$0xff]  }
  0x98   : > { %14582 = vmatprep.mubr.msk.bf16.mxu0 %vm18103_vm0, %v18102_v1  ;;  %22706 = vst [vmem:[#allocation10_spill] sm:$0xff] %v18708_v5  ;;  %v22603_v55 = vshll.u32 %v18708_v5, 16  ;;  %v22600_v32 = vshrl.u32 %v18708_v5, 16  ;;  %v503_v0 = vsel %vm339_vm2, %v498_v63, %v18673_v38  ;;  %v22595_v63 = vshll.u32 %v18776_v17, 16  ;;  %v17706_v38 = vld [vmem:[%s22530_s1 + $0x40] sm:$0xff]   ;;  %v17990_v5 = vld [vmem:[%s18169_s4 + $0x68] sm:$0xff]  }
  0x99   : > { %v6636_v3 = vrot.slane %v17990_v5, 2  ;;  %v17993_v5 = vld [vmem:[%s18169_s4 + $0x70] sm:$0xff]  }
  0x9a   : > { %v6230_v62 = vrot.slane %v22600_v32, 1  ;;  %v18923_v32 = vld [vmem:[%s18169_s4 + $0x30] sm:$0xff]   ;;  %v6638_v36 = vrot.slane %v17993_v5, 2  ;;  %v17994_v5 = vld [vmem:[%s18169_s4 + $0x78] sm:$0xff]  }
  0x9b   : > { %v6640_v60 = vrot.slane %v17994_v5, 2 }
  0x9c   : > { %v6639_v23 = vsel %vm1906_vm5, %v6636_v3, %v6638_v36 }
  0x9e   : > { %13431 = vmatmul.mubr.msk.bf16.gmra.mrb[64].mxu1 %vm536_vm3, %v479_v41  ;;  %v6226_v41 = vrot.slane %v22606_v42, 1  ;;  %v18961_v42 = vld [vmem:[%s18169_s4 + $0x40] sm:$0xff]  }
  0x9f   : > { %14583 = vmatmul.mubr.msk.bf16.gmra.mrb[20].mxu0 %vm536_vm3, %v6209_v30  ;;  %13434 = vmatprep.mubr.msk.bf16.mxu1 %vm18103_vm0, %v18102_v1  ;;  %v487_v30 = vsel %vm339_vm2, %v482_v28, %v18611_v22  ;;  %v495_v28 = vsel %vm339_vm2, %v490_v40, %v18657_v10  ;;  %v6221_v22 = vsel %vm1466_vm4, %v6216_v52, %v6220_v19 }
  0xa0   : > { %14586 = vmatprep.mubr.msk.bf16.mxu0 %vm18103_vm0, %v18102_v1  ;;  %v6224_v10 = vor.u32 %v6223_v33, %v6222_v25  ;;  %v6228_v25 = vor.u32 %v6227_v24, %v6226_v41  ;;  %v6239_v33 = vrot.slane %v22595_v63, 2 }
  0xa2   : > { %v6225_v52 = vsel %vm1466_vm4, %v6220_v19, %v6224_v10 }
  0xa6   : > { %13435 = vmatmul.mubr.msk.bf16.gmra.mrb[68].mxu1 %vm536_vm3, %v487_v30  ;;  %v22596_v30 = vshrl.u32 %v18711_v57, 16 }
  0xa7   : > { %14587 = vmatmul.mubr.msk.bf16.gmra.mrb[24].mxu0 %vm536_vm3, %v6213_v27  ;;  %13438 = vmatprep.mubr.msk.bf16.mxu1 %vm18103_vm0, %v18102_v1  ;;  %v6231_v27 = vrot.slane %v22603_v55, 2 }
  0xa8   : > { %14590 = vmatprep.mubr.msk.bf16.mxu0 %vm18103_vm0, %v18102_v1  ;;  %v6234_v40 = vrot.slane %v22596_v30, 1  ;;  %v18902_v30 = vld [vmem:[%s18169_s4 + $0xb0] sm:$0xff]  }
  0xa9   : > { %v6232_v24 = vor.u32 %v6231_v27, %v6230_v62 }
  0xab   : > { %v6233_v62 = vsel %vm1466_vm4, %v6228_v25, %v6232_v24 }
  0xae   : > { %13439 = vmatmul.mubr.msk.bf16.gmra.mrb[72].mxu1 %vm536_vm3, %v495_v28  ;;  %v511_v28 = vsel %vm339_vm2, %v506_v8, %v510_v20  ;;  %v6229_v20 = vsel %vm1466_vm4, %v6224_v10, %v6228_v25  ;;  %v18837_v25 = vld [vmem:[%s18169_s4 + $0x8] sm:$0xff]  }
  0xaf   : > { %14591 = vmatmul.mubr.msk.bf16.gmra.mrb[28].mxu0 %vm536_vm3, %v6217_v6  ;;  %13442 = vmatprep.mubr.msk.bf16.mxu1 %vm18103_vm0, %v18102_v1  ;;  %v6235_v6 = vrot.slane %v22599_v46, 2  ;;  %v22605_v46 = vshll.u32 %v18902_v30, 16 }
  0xb0   : > { %14594 = vmatprep.mubr.msk.bf16.mxu0 %vm18103_vm0, %v18102_v1 }
  0xb6   : > { %13443 = vmatmul.mubr.msk.bf16.gmra.mrb[76].mxu1 %vm536_vm3, %v503_v0  ;;  %v18792_v0 = vld [vmem:[%s18169_s4 + $0x90] sm:$0xff]  }
  0xb7   : > { %14595 = vmatmul.mubr.msk.bf16.gmra.mrb[32].mxu0 %vm536_vm3, %v6221_v22  ;;  %13446 = vmatprep.mubr.msk.bf16.mxu1 %vm18103_vm0, %v18102_v1  ;;  %v22594_v22 = vshrl.u32 %v18776_v17, 16  ;;  %v22590_v19 = vshrl.u32 %v18792_v0, 16  ;;  %v22591_v10 = vshll.u32 %v18792_v0, 16 }
  0xb8   : > { %14598 = vmatprep.mubr.msk.bf16.mxu0 %vm18103_vm0, %v18102_v1 }
  0xb9   : > { %v6238_v41 = vrot.slane %v22594_v22, 1  ;;  %v6242_v8 = vrot.slane %v22590_v19, 1  ;;  %v6243_v27 = vrot.slane %v22591_v10, 2  ;;  %v18870_v10 = vld [vmem:[%s18169_s4 + $0x18] sm:$0xff]  }
  0xbe   : > { %13447 = vmatmul.mubr.msk.bf16.gmra.mrb[80].mxu1 %vm536_vm3, %v511_v28  ;;  %v18831_v28 = vld [vmem:[%s18169_s4 + $0x98] sm:$0xff]  }
  0xbf   : > { %14599 = vmatmul.mubr.msk.bf16.gmra.mrb[36].mxu0 %vm536_vm3, %v6225_v52  ;;  %13458 = vmatprep.mubr.msk.bf16.mxu1 %vm18103_vm0, %v18102_v1  ;;  %v17720_v52 = vld [vmem:[%s22530_s1 + $0x50] sm:$0xff]   ;;  %v22592_v19 = vshrl.u32 %v18831_v28, 16 }
  0xc0   : > { %14602 = vmatprep.mubr.msk.bf16.mxu0 %vm18103_vm0, %v18102_v1 }
  0xc6   : > { %13459 = vmatmul.mubr.msk.bf16.vlgmr.msra.gmra.mrb[0].mxu1 %vm536_vm3, %v18176_v11  ;;  %v17713_v11 = vld [vmem:[%s22530_s1 + $0x48] sm:$0xff]  }
  0xc7   : > { %14603 = vmatmul.mubr.msk.bf16.gmra.mrb[40].mxu0 %vm536_vm3, %v6229_v20  ;;  %13462 = vmatprep.mubr.msk.bf16.mxu1 %vm18103_vm0, %v18102_v1  ;;  %v6236_v20 = vor.u32 %v6235_v6, %v6234_v40  ;;  %v18852_v40 = vld [vmem:[%s18169_s4 + $0x10] sm:$0xff]   ;;  %v6240_v6 = vor.u32 %v6239_v33, %v6238_v41  ;;  %v6244_v33 = vor.u32 %v6243_v27, %v6242_v8 }
  0xc8   : > { %14606 = vmatprep.mubr.msk.bf16.mxu0 %vm18103_vm0, %v18102_v1  ;;  %13543 = vmatpush3.bf16.msra.mxu1 %v17706_v38  ;;  %v17722_v38 = vld [vmem:[%s22530_s1 + $0x58] sm:$0xff]  }
  0xc9   : > { %13544 = vmatprep.subr.bf16.mxu1 %v18102_v1  ;;  %v6245_v41 = vsel %vm1466_vm4, %v6240_v6, %v6244_v33 }
  0xcc   : > { %13545 = vmatpush3.bf16.msra.mxu1 %v17713_v11  ;;  %v6237_v11 = vsel %vm1466_vm4, %v6232_v24, %v6236_v20  ;;  %v6241_v24 = vsel %vm1466_vm4, %v6236_v20, %v6240_v6 }
  0xcd   : > { %13546 = vmatprep.subr.bf16.mxu1 %v18102_v1 }
  0xce   : > { %13463 = vmatmul.mubr.msk.bf16.gmra.mrb[4].mxu1 %vm536_vm3, %v18837_v25 }
  0xcf   : > { %14607 = vmatmul.mubr.msk.bf16.gmra.mrb[44].mxu0 %vm536_vm3, %v6233_v62  ;;  %13466 = vmatprep.mubr.msk.bf16.mxu1 %vm18103_vm0, %v18102_v1  ;;  %v22593_v62 = vshll.u32 %v18831_v28, 16 }
  0xd0   : > { %14610 = vmatprep.mubr.msk.bf16.mxu0 %vm18103_vm0, %v18102_v1  ;;  %13547 = vmatpush3.bf16.msra.mxu1 %v17720_v52  ;;  %v6246_v52 = vrot.slane %v22592_v19, 1  ;;  %v18882_v19 = vld [vmem:[%s18169_s4 + $0xa8] sm:$0xff]  }
  0xd1   : > { %13548 = vmatprep.subr.bf16.mxu1 %v18102_v1  ;;  %v22601_v22 = vshrl.u32 %v18882_v19, 16  ;;  %v22602_v63 = vshll.u32 %v18882_v19, 16 }
  0xd4   : > { %13549 = vmatpush3.bf16.msra.mxu1 %v17722_v38  ;;  %v6247_v38 = vrot.slane %v22593_v62, 2  ;;  %v18886_v62 = vld [vmem:[%s18169_s4 + $0x20] sm:$0xff]  }
  0xd5   : > { %13634 = vmatprep.subr.bf16.mxu1 %v18102_v1 }
  0xd6   : > { %13467 = vmatmul.mubr.msk.bf16.gmra.mrb[8].mxu1 %vm536_vm3, %v18852_v40  ;;  %v6248_v8 = vor.u32 %v6247_v38, %v6246_v52  ;;  %v18906_v52 = vld [vmem:[%s18169_s4 + $0x28] sm:$0xff]  }
  0xd7   : > { %14611 = vmatmul.mubr.msk.bf16.gmra.mrb[48].mxu0 %vm536_vm3, %v6237_v11  ;;  %13470 = vmatprep.mubr.msk.bf16.mxu1 %vm18103_vm0, %v18102_v1  ;;  %v18867_v11 = vld [vmem:[%s18169_s4 + $0xa0] sm:$0xff]  }
  0xd8   : > { %14614 = vmatprep.mubr.msk.bf16.mxu0 %vm18103_vm0, %v18102_v1  ;;  %v22598_v20 = vshll.u32 %v18867_v11, 16  ;;  %v6249_v6 = vsel %vm1466_vm4, %v6244_v33, %v6248_v8  ;;  %v6254_v33 = vrot.slane %v22601_v22, 1 }
  0xde   : > { %13471 = vmatmul.mubr.msk.bf16.gmra.mrb[12].mxu1 %vm536_vm3, %v18870_v10 }
  0xdf   : > { %14615 = vmatmul.mubr.msk.bf16.gmra.mrb[52].mxu0 %vm536_vm3, %v6241_v24  ;;  %13474 = vmatprep.mubr.msk.bf16.mxu1 %vm18103_vm0, %v18102_v1  ;;  %v22597_v24 = vshrl.u32 %v18867_v11, 16 }
  0xe0   : > { %14618 = vmatprep.mubr.msk.bf16.mxu0 %vm18103_vm0, %v18102_v1 }
  0xe1   : > { %v6250_v27 = vrot.slane %v22597_v24, 1  ;;  %v6255_v24 = vrot.slane %v22602_v63, 2 }
  0xe6   : > { %13475 = vmatmul.mubr.msk.bf16.gmra.mrb[16].mxu1 %vm536_vm3, %v18886_v62 }
  0xe7   : > { %14619 = vmatmul.mubr.msk.bf16.gmra.mrb[56].mxu0 %vm536_vm3, %v6245_v41  ;;  %13478 = vmatprep.mubr.msk.bf16.mxu1 %vm18103_vm0, %v18102_v1  ;;  %v6251_v41 = vrot.slane %v22598_v20, 2 }
  0xe8   : > { %14622 = vmatprep.mubr.msk.bf16.mxu0 %vm18103_vm0, %v18102_v1 }
  0xe9   : > { %v6252_v38 = vor.u32 %v6251_v41, %v6250_v27  ;;  %v6256_v27 = vor.u32 %v6255_v24, %v6254_v33  ;;  %v18943_v24 = vld [vmem:[%s18169_s4 + $0x38] sm:$0xff]  }
  0xeb   : > { %v6253_v20 = vsel %vm1466_vm4, %v6248_v8, %v6252_v38  ;;  %v6259_v8 = vrot.slane %v22605_v46, 2  ;;  %v6257_v22 = vsel %vm1466_vm4, %v6252_v38, %v6256_v27 }
  0xee   : > { %13479 = vmatmul.mubr.msk.bf16.gmra.mrb[20].mxu1 %vm536_vm3, %v18906_v52 }
  0xef   : > { %14623 = vmatmul.mubr.msk.bf16.gmra.mrb[60].mxu0 %vm536_vm3, %v6249_v6  ;;  %13482 = vmatprep.mubr.msk.bf16.mxu1 %vm18103_vm0, %v18102_v1  ;;  %v22604_v6 = vshrl.u32 %v18902_v30, 16 }
  0xf0   : > { %14626 = vmatprep.mubr.msk.bf16.mxu0 %vm18103_vm0, %v18102_v1 }
  0xf1   : > { %v6258_v41 = vrot.slane %v22604_v6, 1 }
  0xf3   : > { %v6260_v33 = vor.u32 %v6259_v8, %v6258_v41 }
  0xf5   : > { %v6261_v46 = vsel %vm1466_vm4, %v6256_v27, %v6260_v33 }
  0xf6   : > { %13483 = vmatmul.mubr.msk.bf16.gmra.mrb[24].mxu1 %vm536_vm3, %v18923_v32 }
  0xf7   : > { %14627 = vmatmul.mubr.msk.bf16.gmra.mrb[64].mxu0 %vm536_vm3, %v6253_v20  ;;  %13486 = vmatprep.mubr.msk.bf16.mxu1 %vm18103_vm0, %v18102_v1  ;;  %v18936_v20 = vld [vmem:[%s18169_s4 + $0xb8] sm:$0xff]  }
  0xf8   : > { %14630 = vmatprep.mubr.msk.bf16.mxu0 %vm18103_vm0, %v18102_v1  ;;  %v22608_v63 = vshll.u32 %v18936_v20, 16  ;;  %v22607_v55 = vshrl.u32 %v18936_v20, 16 }
  0xfa   : > { %v6262_v38 = vrot.slane %v22607_v55, 1  ;;  %v6263_v6 = vrot.slane %v22608_v63, 2 }
  0xfc   : > { %v6264_v41 = vor.u32 %v6263_v6, %v6262_v38  ;;  %v6605_v38 = vld [vmem:[%s18169_s4 + $0x18] sm:$0xc] }
  0xfe   : > { %13487 = vmatmul.mubr.msk.bf16.gmra.mrb[28].mxu1 %vm536_vm3, %v18943_v24 }
  0xff   : > { %14631 = vmatmul.mubr.msk.bf16.gmra.mrb[68].mxu0 %vm536_vm3, %v6257_v22  ;;  %13490 = vmatprep.mubr.msk.bf16.mxu1 %vm18103_vm0, %v18102_v1  ;;  %v18956_v22 = vld [vmem:[%s18169_s4 + $0xc0] ss:$0 sps:$4 sm:$0x33]  }
 0x100   : > { %14634 = vmatprep.mubr.msk.bf16.mxu0 %vm18103_vm0, %v18102_v1  ;;  %v6267_v8 = vshrl.u32 %v18956_v22, 16  ;;  %v6270_v55 = vshll.u32 %v18956_v22, 16 }
 0x102   : > { %v6269_v27 = vrot.slane %v6267_v8, 1  ;;  %v6272_v63 = vrot.slane %v6270_v55, 2  ;;  %v17970_v55 = vld [vmem:[%s18169_s4 + $0x1c] sm:$0xf] }
 0x103   : > { %v12362_v8 = vcombine.low %v6605_v38, %v17970_v55  ;;  %v19002_v38 = vld [vmem:[%s18169_s4 + $0x58] sm:$0xff]  }
 0x104   : > { %v6273_v6 = vor.u32 %v6272_v63, %v6269_v27  ;;  %v17972_v27 = vld [vmem:[%s18169_s4 + $0x20] sm:$0xff]  }
 0x105   : > { %v6617_v63 = vrot.slane %v12362_v8, 2  ;;  %v6618_v37 = vrot.slane %v17972_v27, 2  ;;  %v17721_v8 = vld [vmem:[%s22530_s1 + $0x1e8] sm:$0xff]   ;;  %v17724_v27 = vld [vmem:[%s22530_s1 + $0x1f0] sm:$0xff]  }
 0x106   : > { %13491 = vmatmul.mubr.msk.bf16.gmra.mrb[32].mxu1 %vm536_vm3, %v18961_v42 }
 0x107   : > { %14635 = vmatmul.mubr.msk.bf16.gmra.mrb[72].mxu0 %vm536_vm3, %v6261_v46  ;;  %13494 = vmatprep.mubr.msk.bf16.mxu1 %vm18103_vm0, %v18102_v1  ;;  %v6265_v46 = vsel %vm1466_vm4, %v6260_v33, %v6264_v41  ;;  %v6274_v33 = vsel %vm1466_vm4, %v6264_v41, %v6273_v6  ;;  %v6619_v41 = vsel %vm1906_vm5, %v6617_v63, %v6618_v37  ;;  %v17719_v6 = vld [vmem:[%s22530_s1 + $0x1e0] sm:$0xff]  }
 0x108   : > { %14638 = vmatprep.mubr.msk.bf16.mxu0 %vm18103_vm0, %v18102_v1 }
 0x10e   : > { %13495 = vmatmul.mubr.msk.bf16.gmra.mrb[36].mxu1 %vm536_vm3, %v18974_v16 }
 0x10f   : > { %14639 = vmatmul.mubr.msk.bf16.gmra.mrb[76].mxu0 %vm536_vm3, %v6265_v46  ;;  %13498 = vmatprep.mubr.msk.bf16.mxu1 %vm18103_vm0, %v18102_v1  ;;  %v18987_v46 = vld [vmem:[%s18169_s4 + $0x50] sm:$0xff]  }
 0x110   : > { %14642 = vmatprep.mubr.msk.bf16.mxu0 %vm18103_vm0, %v18102_v1 }
 0x116   : > { %13499 = vmatmul.mubr.msk.bf16.gmra.mrb[40].mxu1 %vm536_vm3, %v18987_v46 }
 0x117   : > { %14643 = vmatmul.mubr.msk.bf16.gmra.mrb[80].mxu0 %vm536_vm3, %v6274_v33  ;;  %13502 = vmatprep.mubr.msk.bf16.mxu1 %vm18103_vm0, %v18102_v1  ;;  %v17974_v33 = vld [vmem:[%s18169_s4 + $0x28] sm:$0xff]  }
 0x118   : > { %14654 = vmatprep.mubr.msk.bf16.mxu0 %vm18103_vm0, %v18102_v1  ;;  %v6620_v55 = vrot.slane %v17974_v33, 2  ;;  %v17726_v33 = vld [vmem:[%s22530_s1 + $0x1f8] sm:$0xff]  }
 0x11a   : > { %v6621_v63 = vsel %vm1906_vm5, %v6618_v37, %v6620_v55  ;;  %v17976_v37 = vld [vmem:[%s18169_s4 + $0x30] sm:$0xff]  }
 0x11e   : > { %13503 = vmatmul.mubr.msk.bf16.gmra.mrb[44].mxu1 %vm536_vm3, %v19002_v38 }
 0x11f   : > { %14655 = vmatmul.mubr.msk.bf16.vlgmr.msra.gmra.mrb[0].mxu0 %vm536_vm3, %v6619_v41  ;;  %13506 = vmatprep.mubr.msk.bf16.mxu1 %vm18103_vm0, %v18102_v1  ;;  %v19022_v41 = vld [vmem:[%s18169_s4 + $0x60] sm:$0xff]  }
 0x120   : > { %14739 = vmatpush3.bf16.msra.mxu0 %v17719_v6  ;;  %14658 = vmatprep.mubr.msk.bf16.mxu0 %vm18103_vm0, %v18102_v1  ;;  %v6622_v6 = vrot.slane %v17976_v37, 2 }
 0x121   : > { %14740 = vmatprep.subr.bf16.mxu0 %v18102_v1 }
 0x124   : > { %14741 = vmatpush3.bf16.msra.mxu0 %v17721_v8  ;;  %v6623_v8 = vsel %vm1906_vm5, %v6620_v55, %v6622_v6 }
 0x125   : > { %14742 = vmatprep.subr.bf16.mxu0 %v18102_v1 }
 0x126   : > { %13507 = vmatmul.mubr.msk.bf16.gmra.mrb[48].mxu1 %vm536_vm3, %v19022_v41 }
 0x127   : > { %14659 = vmatmul.mubr.msk.bf16.gmra.mrb[4].mxu0 %vm536_vm3, %v6621_v63  ;;  %13510 = vmatprep.mubr.msk.bf16.mxu1 %vm18103_vm0, %v18102_v1  ;;  %v19039_v63 = vld [vmem:[%s18169_s4 + $0x68] sm:$0xff]  }
 0x128   : > { %14662 = vmatprep.mubr.msk.bf16.mxu0 %vm18103_vm0, %v18102_v1  ;;  %14743 = vmatpush3.bf16.msra.mxu0 %v17724_v27  ;;  %v17978_v27 = vld [vmem:[%s18169_s4 + $0x38] sm:$0xff]  }
 0x129   : > { %14744 = vmatprep.subr.bf16.mxu0 %v18102_v1  ;;  %v6624_v37 = vrot.slane %v17978_v27, 2 }
 0x12b   : > { %v6625_v55 = vsel %vm1906_vm5, %v6622_v6, %v6624_v37  ;;  %v19063_v6 = vld [vmem:[%s18169_s4 + $0x78] sm:$0xff]  }
 0x12c   : > { %14745 = vmatpush3.bf16.msra.mxu0 %v17726_v33  ;;  %v19051_v33 = vld [vmem:[%s18169_s4 + $0x70] sm:$0xff]  }
 0x12d   : > { %14830 = vmatprep.subr.bf16.mxu0 %v18102_v1 }
 0x12e   : > { %13511 = vmatmul.mubr.msk.bf16.gmra.mrb[52].mxu1 %vm536_vm3, %v19039_v63 }
 0x12f   : > { %14663 = vmatmul.mubr.msk.bf16.gmra.mrb[8].mxu0 %vm536_vm3, %v6623_v8  ;;  %13514 = vmatprep.mubr.msk.bf16.mxu1 %vm18103_vm0, %v18102_v1  ;;  %v17980_v8 = vld [vmem:[%s18169_s4 + $0x40] sm:$0xff]  }
 0x130   : > { %14666 = vmatprep.mubr.msk.bf16.mxu0 %vm18103_vm0, %v18102_v1  ;;  %v6626_v2 = vrot.slane %v17980_v8, 2 }
 0x132   : > { %v6627_v27 = vsel %vm1906_vm5, %v6624_v37, %v6626_v2  ;;  %v19075_v37 = vld [vmem:[%s18169_s4 + $0x80] sm:$0xff]  }
 0x136   : > { %13515 = vmatmul.mubr.msk.bf16.gmra.mrb[56].mxu1 %vm536_vm3, %v19051_v33 }
 0x137   : > { %14667 = vmatmul.mubr.msk.bf16.gmra.mrb[12].mxu0 %vm536_vm3, %v6625_v55  ;;  %13518 = vmatprep.mubr.msk.bf16.mxu1 %vm18103_vm0, %v18102_v1  ;;  %v17982_v55 = vld [vmem:[%s18169_s4 + $0x48] sm:$0xff]  }
 0x138   : > { %14670 = vmatprep.mubr.msk.bf16.mxu0 %vm18103_vm0, %v18102_v1  ;;  %v6628_v29 = vrot.slane %v17982_v55, 2 }
 0x13a   : > { %v6629_v8 = vsel %vm1906_vm5, %v6626_v2, %v6628_v29  ;;  %v19087_v2 = vld [vmem:[%s18169_s4 + $0x88] sm:$0xff]  }
 0x13e   : > { %13519 = vmatmul.mubr.msk.bf16.gmra.mrb[60].mxu1 %vm536_vm3, %v19063_v6 }
 0x13f   : > { %14671 = vmatmul.mubr.msk.bf16.gmra.mrb[16].mxu0 %vm536_vm3, %v6627_v27  ;;  %13522 = vmatprep.mubr.msk.bf16.mxu1 %vm18103_vm0, %v18102_v1  ;;  %v17984_v27 = vld [vmem:[%s18169_s4 + $0x50] sm:$0xff]  }
 0x140   : > { %14674 = vmatprep.mubr.msk.bf16.mxu0 %vm18103_vm0, %v18102_v1  ;;  %v6630_v56 = vrot.slane %v17984_v27, 2 }
 0x142   : > { %v6631_v55 = vsel %vm1906_vm5, %v6628_v29, %v6630_v56  ;;  %v19099_v29 = vld [vmem:[%s18169_s4 + $0x90] sm:$0xff]  }
 0x146   : > { %13523 = vmatmul.mubr.msk.bf16.gmra.mrb[64].mxu1 %vm536_vm3, %v19075_v37 }
 0x147   : > { %14675 = vmatmul.mubr.msk.bf16.gmra.mrb[20].mxu0 %vm536_vm3, %v6629_v8  ;;  %13526 = vmatprep.mubr.msk.bf16.mxu1 %vm18103_vm0, %v18102_v1  ;;  %v17986_v8 = vld [vmem:[%s18169_s4 + $0x58] sm:$0xff]  }
 0x148   : > { %14678 = vmatprep.mubr.msk.bf16.mxu0 %vm18103_vm0, %v18102_v1  ;;  %v6632_v57 = vrot.slane %v17986_v8, 2 }
 0x14a   : > { %v6633_v27 = vsel %vm1906_vm5, %v6630_v56, %v6632_v57 }
 0x14e   : > { %13527 = vmatmul.mubr.msk.bf16.gmra.mrb[68].mxu1 %vm536_vm3, %v19087_v2 }
 0x14f   : > { %14679 = vmatmul.mubr.msk.bf16.gmra.mrb[24].mxu0 %vm536_vm3, %v6631_v55  ;;  %13530 = vmatprep.mubr.msk.bf16.mxu1 %vm18103_vm0, %v18102_v1  ;;  %v17988_v55 = vld [vmem:[%s18169_s4 + $0x60] sm:$0xff]  }
 0x150   : > { %14682 = vmatprep.mubr.msk.bf16.mxu0 %vm18103_vm0, %v18102_v1  ;;  %v6634_v8 = vrot.slane %v17988_v55, 2  ;;  %v1068_v55 = vld [vmem:[%s18169_s4] sm:$0xe] }
 0x152   : > { %v6635_v56 = vsel %vm1906_vm5, %v6632_v57, %v6634_v8  ;;  %v6637_v51 = vsel %vm1906_vm5, %v6634_v8, %v6636_v3  ;;  %v19123_v57 = vld [vmem:[%s18169_s4 + $0x4] sm:$0xf]  ;;  %v1084_v3 = vrot.slane %v18852_v40, 1 }
 0x156   : > { %13531 = vmatmul.mubr.msk.bf16.gmra.mrb[72].mxu1 %vm536_vm3, %v19099_v29 }
 0x157   : > { %14683 = vmatmul.mubr.msk.bf16.gmra.mrb[28].mxu0 %vm536_vm3, %v6633_v27  ;;  %13534 = vmatprep.mubr.msk.bf16.mxu1 %vm18103_vm0, %v18102_v1  ;;  %v19111_v27 = vld [vmem:[%s18169_s4 + $0x98] sm:$0xff]  }
 0x158   : > { %14686 = vmatprep.mubr.msk.bf16.mxu0 %vm18103_vm0, %v18102_v1 }
 0x15e   : > { %13535 = vmatmul.mubr.msk.bf16.gmra.mrb[76].mxu1 %vm536_vm3, %v19111_v27 }
 0x15f   : > { %14687 = vmatmul.mubr.msk.bf16.gmra.mrb[32].mxu0 %vm536_vm3, %v6635_v56  ;;  %13538 = vmatprep.mubr.msk.bf16.mxu1 %vm18103_vm0, %v18102_v1  ;;  %v19126_v56 = vcombine.low %v1068_v55, %v19123_v57  ;;  %v1082_v55 = vrot.slane %v18837_v25, 1  ;;  %v17727_v25 = vld [vmem:[%s22530_s1 + $0x68] sm:$0xff]  }
 0x160   : > { %14690 = vmatprep.mubr.msk.bf16.mxu0 %vm18103_vm0, %v18102_v1 }
 0x161   : > { %v1081_v8 = vrot.slane %v19126_v56, 1 }
 0x166   : > { %13539 = vmatmul.mubr.msk.bf16.gmra.mrb[80].mxu1 %vm536_vm3, %v19130_v49 }
 0x167   : > { %14691 = vmatmul.mubr.msk.bf16.gmra.mrb[36].mxu0 %vm536_vm3, %v6637_v51  ;;  %13550 = vmatprep.mubr.msk.bf16.mxu1 %vm18103_vm0, %v18102_v1  ;;  %v1083_v51 = vsel %vm1080_vm1, %v1081_v8, %v1082_v55  ;;  %v1085_v8 = vsel %vm1080_vm1, %v1082_v55, %v1084_v3  ;;  %v17737_v55 = vld [vmem:[%s22530_s1 + $0x78] sm:$0xff]  }
 0x168   : > { %14694 = vmatprep.mubr.msk.bf16.mxu0 %vm18103_vm0, %v18102_v1 }
 0x16e   : > { %13551 = vmatmul.mubr.msk.bf16.vlgmr.msra.gmra.mrb[0].mxu1 %vm536_vm3, %v1083_v51  ;;  %v17730_v51 = vld [vmem:[%s22530_s1 + $0x70] sm:$0xff]  }
 0x16f   : > { %14695 = vmatmul.mubr.msk.bf16.gmra.mrb[40].mxu0 %vm536_vm3, %v6639_v23  ;;  %13554 = vmatprep.mubr.msk.bf16.mxu1 %vm18103_vm0, %v18102_v1  ;;  %v6641_v23 = vsel %vm1906_vm5, %v6638_v36, %v6640_v60  ;;  %v1086_v36 = vrot.slane %v18870_v10, 1  ;;  %v6644_v10 = vrot.slane %v18776_v17, 2 }
 0x170   : > { %14698 = vmatprep.mubr.msk.bf16.mxu0 %vm18103_vm0, %v18102_v1  ;;  %13635 = vmatpush3.bf16.msra.mxu1 %v17725_v7  ;;  %v17995_v7 = vld [vmem:[%s18169_s4 + $0x80] sm:$0xff]  }
 0x171   : > { %13636 = vmatprep.subr.bf16.mxu1 %v18102_v1  ;;  %v6642_v40 = vrot.slane %v17995_v7, 2  ;;  %v22708_v7 = vshll.u32 %v18179_v12, 16 }
 0x173   : > { %v6643_v5 = vsel %vm1906_vm5, %v6640_v60, %v6642_v40  ;;  %v6645_v60 = vsel %vm1906_vm5, %v6642_v40, %v6644_v10  ;;  %v1476_v40 = vrot.slane %v22708_v7, 2 }
 0x174   : > { %13637 = vmatpush3.bf16.msra.mxu1 %v17727_v25  ;;  %v1087_v25 = vsel %vm1080_vm1, %v1084_v3, %v1086_v36 }
 0x175   : > { %13638 = vmatprep.subr.bf16.mxu1 %v18102_v1 }
 0x176   : > { %13555 = vmatmul.mubr.msk.bf16.gmra.mrb[4].mxu1 %vm536_vm3, %v1085_v8  ;;  %v6646_v8 = vrot.slane %v18792_v0, 2 }
 0x177   : > { %14699 = vmatmul.mubr.msk.bf16.gmra.mrb[44].mxu0 %vm536_vm3, %v6641_v23  ;;  %13558 = vmatprep.mubr.msk.bf16.mxu1 %vm18103_vm0, %v18102_v1  ;;  %v1088_v23 = vrot.slane %v18886_v62, 1 }
 0x178   : > { %14702 = vmatprep.mubr.msk.bf16.mxu0 %vm18103_vm0, %v18102_v1  ;;  %13639 = vmatpush3.bf16.msra.mxu1 %v17730_v51  ;;  %v1090_v51 = vrot.slane %v18906_v52, 1  ;;  %v6647_v62 = vsel %vm1906_vm5, %v6644_v10, %v6646_v8  ;;  %v1092_v52 = vrot.slane %v18923_v32, 1  ;;  %v1094_v32 = vrot.slane %v18943_v24, 1 }
 0x179   : > { %13640 = vmatprep.subr.bf16.mxu1 %v18102_v1  ;;  %v1089_v3 = vsel %vm1080_vm1, %v1086_v36, %v1088_v23  ;;  %v22709_v36 = vshrl.u32 %v18179_v12, 16 }
 0x17c   : > { %13641 = vmatpush3.bf16.msra.mxu1 %v17737_v55  ;;  %v1475_v55 = vrot.slane %v22709_v36, 1  ;;  %v1098_v36 = vrot.slane %v18974_v16, 1 }
 0x17d   : > { %13726 = vmatprep.subr.bf16.mxu1 %v18102_v1 }
 0x17e   : > { %13559 = vmatmul.mubr.msk.bf16.gmra.mrb[8].mxu1 %vm536_vm3, %v1087_v25  ;;  %v6648_v25 = vrot.slane %v18831_v28, 2  ;;  %v19211_v10 = vor.u32 %v1476_v40, %v1475_v55  ;;  %v6654_v40 = vrot.slane %v18902_v30, 2 }
 0x17f   : > { %14703 = vmatmul.mubr.msk.bf16.gmra.mrb[48].mxu0 %vm536_vm3, %v6643_v5  ;;  %13562 = vmatprep.mubr.msk.bf16.mxu1 %vm18103_vm0, %v18102_v1  ;;  %v1091_v5 = vsel %vm1080_vm1, %v1088_v23, %v1090_v51  ;;  %v1093_v23 = vsel %vm1080_vm1, %v1090_v51, %v1092_v52  ;;  %v6652_v51 = vrot.slane %v18882_v19, 2 }
 0x180   : > { %14706 = vmatprep.mubr.msk.bf16.mxu0 %vm18103_vm0, %v18102_v1  ;;  %v6649_v12 = vsel %vm1906_vm5, %v6646_v8, %v6648_v25  ;;  %v1095_v8 = vsel %vm1080_vm1, %v1092_v52, %v1094_v32 }
 0x186   : > { %13563 = vmatmul.mubr.msk.bf16.gmra.mrb[12].mxu1 %vm536_vm3, %v1089_v3 }
 0x187   : > { %14707 = vmatmul.mubr.msk.bf16.gmra.mrb[52].mxu0 %vm536_vm3, %v6645_v60  ;;  %13566 = vmatprep.mubr.msk.bf16.mxu1 %vm18103_vm0, %v18102_v1  ;;  %v6650_v60 = vrot.slane %v18867_v11, 2 }
 0x188   : > { %14710 = vmatprep.mubr.msk.bf16.mxu0 %vm18103_vm0, %v18102_v1 }
 0x189   : > { %v6651_v3 = vsel %vm1906_vm5, %v6648_v25, %v6650_v60  ;;  %v6653_v24 = vsel %vm1906_vm5, %v6650_v60, %v6652_v51  ;;  %v1100_v25 = vrot.slane %v18987_v46, 1 }
 0x18b   : > { %v1101_v52 = vsel %vm1080_vm1, %v1098_v36, %v1100_v25 }
 0x18e   : > { %13567 = vmatmul.mubr.msk.bf16.gmra.mrb[16].mxu1 %vm536_vm3, %v1091_v5  ;;  %v6656_v5 = vrot.slane %v18936_v20, 2 }
 0x18f   : > { %14711 = vmatmul.mubr.msk.bf16.gmra.mrb[56].mxu0 %vm536_vm3, %v6647_v62  ;;  %13570 = vmatprep.mubr.msk.bf16.mxu1 %vm18103_vm0, %v18102_v1  ;;  %v1096_v62 = vrot.slane %v18961_v42, 1  ;;  %v6655_v42 = vsel %vm1906_vm5, %v6652_v51, %v6654_v40  ;;  %v17731_v51 = vld [vmem:[%s18169_s4 + $0x2c] sm:$0xff]  }
 0x190   : > { %14714 = vmatprep.mubr.msk.bf16.mxu0 %vm18103_vm0, %v18102_v1  ;;  %v6657_v16 = vsel %vm1906_vm5, %v6654_v40, %v6656_v5  ;;  %v17732_v40 = vld [vmem:[%s18169_s4 + $0x34] sm:$0xff]  }
 0x191   : > { %v1097_v7 = vsel %vm1080_vm1, %v1094_v32, %v1096_v62  ;;  %v1099_v55 = vsel %vm1080_vm1, %v1096_v62, %v1098_v36  ;;  %v17728_v32 = vld [vmem:[%s18169_s4 + $0x24] sm:$0xff]  }
 0x196   : > { %13571 = vmatmul.mubr.msk.bf16.gmra.mrb[20].mxu1 %vm536_vm3, %v1093_v23  ;;  %v1102_v23 = vrot.slane %v19002_v38, 1  ;;  %v17729_v38 = vld [vmem:[%s22530_s1 + $0x200] sm:$0xff]  }
 0x197   : > { %14715 = vmatmul.mubr.msk.bf16.gmra.mrb[60].mxu0 %vm536_vm3, %v6649_v12  ;;  %13574 = vmatprep.mubr.msk.bf16.mxu1 %vm18103_vm0, %v18102_v1  ;;  %v6658_v12 = vrot.slane %v18956_v22, 2  ;;  %v1104_v22 = vrot.slane %v19022_v41, 1  ;;  %v1106_v41 = vrot.slane %v19039_v63, 1  ;;  %v1108_v63 = vrot.slane %v19051_v33, 1 }
 0x198   : > { %14718 = vmatprep.mubr.msk.bf16.mxu0 %vm18103_vm0, %v18102_v1  ;;  %v1103_v60 = vsel %vm1080_vm1, %v1100_v25, %v1102_v23  ;;  %v1110_v33 = vrot.slane %v19063_v6, 1  ;;  %v17734_v25 = vld [vmem:[%s18169_s4 + $0x44] sm:$0xff]   ;;  %v1114_v6 = vrot.slane %v19087_v2, 1  ;;  %v1118_v2 = vrot.slane %v19111_v27, 1 }
 0x199   : > { %v6659_v46 = vsel %vm1906_vm5, %v6656_v5, %v6658_v12  ;;  %v1107_v62 = vsel %vm1080_vm1, %v1104_v22, %v1106_v41  ;;  %v1109_v36 = vsel %vm1080_vm1, %v1106_v41, %v1108_v63  ;;  %v1112_v5 = vrot.slane %v19075_v37, 1  ;;  %v17996_v27 = vld [vmem:[%s18169_s4 + $0xa8] ss:$0 sps:$4 sm:$0x11]   ;;  %v17741_v41 = vld [vmem:[%s18169_s4 + $0x6c] sm:$0xff]  }
 0x19a   : > { %v1116_v37 = vrot.slane %v19099_v29, 1  ;;  %v1120_v29 = vrot.slane %v19130_v49, 1  ;;  %v1471_v49 = vshll.u32 %v19126_v56, 16 }
 0x19b   : > { %v1115_v12 = vsel %vm1080_vm1, %v1112_v5, %v1114_v6 }
 0x19e   : > { %13575 = vmatmul.mubr.msk.bf16.gmra.mrb[24].mxu1 %vm536_vm3, %v1095_v8  ;;  %v17736_v8 = vld [vmem:[%s22530_s1 + $0x208] sm:$0xff]  }
 0x19f   : > { %14719 = vmatmul.mubr.msk.bf16.gmra.mrb[64].mxu0 %vm536_vm3, %v6651_v3  ;;  %13578 = vmatprep.mubr.msk.bf16.mxu1 %vm18103_vm0, %v18102_v1  ;;  %v1105_v3 = vsel %vm1080_vm1, %v1102_v23, %v1104_v22  ;;  %v17738_v23 = vld [vmem:[%s18169_s4 + $0x54] sm:$0xff]   ;;  %v1119_v22 = vsel %vm1080_vm1, %v1116_v37, %v1118_v2 }
 0x1a0   : > { %14722 = vmatprep.mubr.msk.bf16.mxu0 %vm18103_vm0, %v18102_v1 }
 0x1a6   : > { %13579 = vmatmul.mubr.msk.bf16.gmra.mrb[28].mxu1 %vm536_vm3, %v1097_v7  ;;  %v17750_v7 = vld [vmem:[%s22530_s1 + $0x218] sm:$0xff]  }
 0x1a7   : > { %14723 = vmatmul.mubr.msk.bf16.gmra.mrb[68].mxu0 %vm536_vm3, %v6653_v24  ;;  %13582 = vmatprep.mubr.msk.bf16.mxu1 %vm18103_vm0, %v18102_v1  ;;  %v17743_v24 = vld [vmem:[%s22530_s1 + $0x210] sm:$0xff]  }
 0x1a8   : > { %14726 = vmatprep.mubr.msk.bf16.mxu0 %vm18103_vm0, %v18102_v1 }
 0x1ae   : > { %13583 = vmatmul.mubr.msk.bf16.gmra.mrb[32].mxu1 %vm536_vm3, %v1099_v55  ;;  %v1111_v55 = vsel %vm1080_vm1, %v1108_v63, %v1110_v33 }
 0x1af   : > { %14727 = vmatmul.mubr.msk.bf16.gmra.mrb[72].mxu0 %vm536_vm3, %v6655_v42  ;;  %13586 = vmatprep.mubr.msk.bf16.mxu1 %vm18103_vm0, %v18102_v1  ;;  %v17733_v42 = vld [vmem:[%s18169_s4 + $0x3c] sm:$0xff]  }
 0x1b0   : > { %14730 = vmatprep.mubr.msk.bf16.mxu0 %vm18103_vm0, %v18102_v1 }
 0x1b6   : > { %13587 = vmatmul.mubr.msk.bf16.gmra.mrb[36].mxu1 %vm536_vm3, %v1101_v52  ;;  %v17735_v52 = vld [vmem:[%s18169_s4 + $0x4c] sm:$0xff]  }
 0x1b7   : > { %14731 = vmatmul.mubr.msk.bf16.gmra.mrb[76].mxu0 %vm536_vm3, %v6657_v16  ;;  %13590 = vmatprep.mubr.msk.bf16.mxu1 %vm18103_vm0, %v18102_v1  ;;  %v1113_v16 = vsel %vm1080_vm1, %v1110_v33, %v1112_v5  ;;  %v22711_v33 = vshll.u32 %v18195_v21, 16 }
 0x1b8   : > { %14734 = vmatprep.mubr.msk.bf16.mxu0 %vm18103_vm0, %v18102_v1 }
 0x1be   : > { %13591 = vmatmul.mubr.msk.bf16.gmra.mrb[40].mxu1 %vm536_vm3, %v1103_v60  ;;  %v17739_v60 = vld [vmem:[%s18169_s4 + $0x5c] sm:$0xff]  }
 0x1bf   : > { %14735 = vmatmul.mubr.msk.bf16.gmra.mrb[80].mxu0 %vm536_vm3, %v6659_v46  ;;  %13594 = vmatprep.mubr.msk.bf16.mxu1 %vm18103_vm0, %v18102_v1  ;;  %v1117_v46 = vsel %vm1080_vm1, %v1114_v6, %v1116_v37  ;;  %v22712_v6 = vshrl.u32 %v18219_v34, 16 }
 0x1c0   : > { %14746 = vmatprep.mubr.msk.bf16.mxu0 %vm18103_vm0, %v18102_v1 }
 0x1c6   : > { %13595 = vmatmul.mubr.msk.bf16.gmra.mrb[44].mxu1 %vm536_vm3, %v1105_v3  ;;  %v1122_v3 = vrot.slane %v17996_v27, 1  ;;  %v17747_v27 = vld [vmem:[%s18169_s4 + $0x8c] sm:$0xff]  }
 0x1c7   : > { %14747 = vmatmul.mubr.msk.bf16.vlgmr.msra.gmra.mrb[0].mxu0 %vm536_vm3, %v17728_v32  ;;  %13598 = vmatprep.mubr.msk.bf16.mxu1 %vm18103_vm0, %v18102_v1  ;;  %v17740_v32 = vld [vmem:[%s18169_s4 + $0x64] sm:$0xff]  }
 0x1c8   : > { %14831 = vmatpush3.bf16.msra.mxu0 %v17729_v38  ;;  %14750 = vmatprep.mubr.msk.bf16.mxu0 %vm18103_vm0, %v18102_v1  ;;  %v1121_v38 = vsel %vm1080_vm1, %v1118_v2, %v1120_v29 }
 0x1c9   : > { %14832 = vmatprep.subr.bf16.mxu0 %v18102_v1 }
 0x1cc   : > { %14833 = vmatpush3.bf16.msra.mxu0 %v17736_v8  ;;  %v1468_v8 = vshrl.u32 %v19126_v56, 16 }
 0x1cd   : > { %14834 = vmatprep.subr.bf16.mxu0 %v18102_v1 }
 0x1ce   : > { %13599 = vmatmul.mubr.msk.bf16.gmra.mrb[48].mxu1 %vm536_vm3, %v1107_v62  ;;  %v1470_v62 = vrot.slane %v1468_v8, 1 }
 0x1cf   : > { %14751 = vmatmul.mubr.msk.bf16.gmra.mrb[4].mxu0 %vm536_vm3, %v17731_v51  ;;  %13602 = vmatprep.mubr.msk.bf16.mxu1 %vm18103_vm0, %v18102_v1  ;;  %v1123_v51 = vsel %vm1080_vm1, %v1120_v29, %v1122_v3  ;;  %v22715_v29 = vshll.u32 %v18257_v47, 16 }
 0x1d0   : > { %14754 = vmatprep.mubr.msk.bf16.mxu0 %vm18103_vm0, %v18102_v1  ;;  %14835 = vmatpush3.bf16.msra.mxu0 %v17743_v24  ;;  %v1473_v24 = vrot.slane %v1471_v49, 2  ;;  %v22717_v49 = vshll.u32 %v18286_v58, 16 }
 0x1d1   : > { %14836 = vmatprep.subr.bf16.mxu0 %v18102_v1 }
 0x1d2   : > { %v1474_v63 = vor.u32 %v1473_v24, %v1470_v62  ;;  %v17748_v62 = vld [vmem:[%s18169_s4 + $0x94] sm:$0xff]  }
 0x1d4   : > { %14837 = vmatpush3.bf16.msra.mxu0 %v17750_v7  ;;  %v17742_v7 = vld [vmem:[%s18169_s4 + $0x74] sm:$0xff]   ;;  %v1478_v56 = vsel %vm1466_vm4, %v1474_v63, %v19211_v10  ;;  %v22718_v63 = vshrl.u32 %v18308_v4, 16 }
 0x1d5   : > { %14922 = vmatprep.subr.bf16.mxu0 %v18102_v1 }
 0x1d6   : > { %13603 = vmatmul.mubr.msk.bf16.gmra.mrb[52].mxu1 %vm536_vm3, %v1109_v36 }
 0x1d7   : > { %14755 = vmatmul.mubr.msk.bf16.gmra.mrb[8].mxu0 %vm536_vm3, %v17732_v40  ;;  %13606 = vmatprep.mubr.msk.bf16.mxu1 %vm18103_vm0, %v18102_v1  ;;  %v22710_v40 = vshrl.u32 %v18195_v21, 16  ;;  %v17752_v21 = vld [vmem:[%s22530_s1 + $0x88] sm:$0xff]  }
 0x1d8   : > { %14758 = vmatprep.mubr.msk.bf16.mxu0 %vm18103_vm0, %v18102_v1 }
 0x1d9   : > { %v1479_v36 = vrot.slane %v22710_v40, 1 }
 0x1de   : > { %13607 = vmatmul.mubr.msk.bf16.gmra.mrb[56].mxu1 %vm536_vm3, %v1111_v55  ;;  %v17745_v55 = vld [vmem:[%s22530_s1 + $0x80] sm:$0xff]  }
 0x1df   : > { %14759 = vmatmul.mubr.msk.bf16.gmra.mrb[12].mxu0 %vm536_vm3, %v17733_v42  ;;  %13610 = vmatprep.mubr.msk.bf16.mxu1 %vm18103_vm0, %v18102_v1  ;;  %v1480_v42 = vrot.slane %v22711_v33, 2 }
 0x1e0   : > { %14762 = vmatprep.mubr.msk.bf16.mxu0 %vm18103_vm0, %v18102_v1 }
 0x1e1   : > { %v1481_v5 = vor.u32 %v1480_v42, %v1479_v36  ;;  %v17749_v36 = vld [vmem:[%s18169_s4 + $0x9c] sm:$0xff]   ;;  %v22720_v42 = vshrl.u32 %v18333_v18, 16 }
 0x1e6   : > { %13611 = vmatmul.mubr.msk.bf16.gmra.mrb[60].mxu1 %vm536_vm3, %v1113_v16  ;;  %v1482_v16 = vsel %vm1466_vm4, %v19211_v10, %v1481_v5  ;;  %v17767_v10 = vld [vmem:[%s22530_s1 + $0x98] sm:$0xff]  }
 0x1e7   : > { %14763 = vmatmul.mubr.msk.bf16.gmra.mrb[16].mxu0 %vm536_vm3, %v17734_v25  ;;  %13614 = vmatprep.mubr.msk.bf16.mxu1 %vm18103_vm0, %v18102_v1  ;;  %v17744_v25 = vld [vmem:[%s18169_s4 + $0x7c] sm:$0xff]  }
 0x1e8   : > { %14766 = vmatprep.mubr.msk.bf16.mxu0 %vm18103_vm0, %v18102_v1 }
 0x1ee   : > { %13615 = vmatmul.mubr.msk.bf16.gmra.mrb[64].mxu1 %vm536_vm3, %v1115_v12  ;;  %v22713_v12 = vshll.u32 %v18219_v34, 16 }
 0x1ef   : > { %14767 = vmatmul.mubr.msk.bf16.gmra.mrb[20].mxu0 %vm536_vm3, %v17735_v52  ;;  %13618 = vmatprep.mubr.msk.bf16.mxu1 %vm18103_vm0, %v18102_v1  ;;  %v1483_v52 = vrot.slane %v22712_v6, 1  ;;  %v22722_v6 = vshrl.u32 %v18352_v31, 16 }
 0x1f0   : > { %14770 = vmatprep.mubr.msk.bf16.mxu0 %vm18103_vm0, %v18102_v1  ;;  %v1484_v37 = vrot.slane %v22713_v12, 2 }
 0x1f2   : > { %v1485_v34 = vor.u32 %v1484_v37, %v1483_v52  ;;  %v1503_v52 = vrot.slane %v22722_v6, 1  ;;  %v19539_v6 = vld [vmem:[%s18169_s4 + $0x34] sm:$0xff]  }
 0x1f4   : > { %v1486_v2 = vsel %vm1466_vm4, %v1481_v5, %v1485_v34 }
 0x1f6   : > { %13619 = vmatmul.mubr.msk.bf16.gmra.mrb[68].mxu1 %vm536_vm3, %v1117_v46  ;;  %v17746_v46 = vld [vmem:[%s18169_s4 + $0x84] sm:$0xff]  }
 0x1f7   : > { %14771 = vmatmul.mubr.msk.bf16.gmra.mrb[24].mxu0 %vm536_vm3, %v17738_v23  ;;  %13622 = vmatprep.mubr.msk.bf16.mxu1 %vm18103_vm0, %v18102_v1  ;;  %v17760_v23 = vld [vmem:[%s22530_s1 + $0x90] sm:$0xff]  }
 0x1f8   : > { %14774 = vmatprep.mubr.msk.bf16.mxu0 %vm18103_vm0, %v18102_v1 }
 0x1fe   : > { %13623 = vmatmul.mubr.msk.bf16.gmra.mrb[72].mxu1 %vm536_vm3, %v1119_v22 }
 0x1ff   : > { %14775 = vmatmul.mubr.msk.bf16.gmra.mrb[28].mxu0 %vm536_vm3, %v17739_v60  ;;  %13626 = vmatprep.mubr.msk.bf16.mxu1 %vm18103_vm0, %v18102_v1  ;;  %v22714_v60 = vshrl.u32 %v18257_v47, 16  ;;  %v22716_v47 = vshrl.u32 %v18286_v58, 16  ;;  %v22719_v58 = vshll.u32 %v18308_v4, 16  ;;  %v22721_v4 = vshll.u32 %v18333_v18, 16 }
 0x200   : > { %14778 = vmatprep.mubr.msk.bf16.mxu0 %vm18103_vm0, %v18102_v1  ;;  %v22723_v18 = vshll.u32 %v18352_v31, 16  ;;  %v22725_v31 = vshll.u32 %v18361_v35, 16 }
 0x201   : > { %v1487_v22 = vrot.slane %v22714_v60, 1  ;;  %v1491_v8 = vrot.slane %v22716_v47, 1  ;;  %v1500_v5 = vrot.slane %v22721_v4, 2  ;;  %v7475_v47 = vld [vmem:[%s18169_s4 + $0x24] sm:$0xf] }
 0x202   : > { %v1504_v12 = vrot.slane %v22723_v18, 2  ;;  %v17759_v18 = vld [vmem:[%s22530_s1 + $0x220] sm:$0xff]  }
 0x204   : > { %v1505_v37 = vor.u32 %v1504_v12, %v1503_v52 }
 0x206   : > { %13627 = vmatmul.mubr.msk.bf16.gmra.mrb[76].mxu1 %vm536_vm3, %v1121_v38 }
 0x207   : > { %14779 = vmatmul.mubr.msk.bf16.gmra.mrb[32].mxu0 %vm536_vm3, %v17740_v32  ;;  %13630 = vmatprep.mubr.msk.bf16.mxu1 %vm18103_vm0, %v18102_v1  ;;  %v1488_v32 = vrot.slane %v22715_v29, 2 }
 0x208   : > { %14782 = vmatprep.mubr.msk.bf16.mxu0 %vm18103_vm0, %v18102_v1 }
 0x209   : > { %v1489_v38 = vor.u32 %v1488_v32, %v1487_v22  ;;  %v17754_v22 = vld [vmem:[%s18169_s4 + $0xb4] sm:$0xff]  }
 0x20b   : > { %v1490_v3 = vsel %vm1466_vm4, %v1485_v34, %v1489_v38 }
 0x20e   : > { %13631 = vmatmul.mubr.msk.bf16.gmra.mrb[80].mxu1 %vm536_vm3, %v1123_v51 }
 0x20f   : > { %14783 = vmatmul.mubr.msk.bf16.gmra.mrb[36].mxu0 %vm536_vm3, %v17741_v41  ;;  %13642 = vmatprep.mubr.msk.bf16.mxu1 %vm18103_vm0, %v18102_v1  ;;  %v1492_v41 = vrot.slane %v22717_v49, 2  ;;  %v17755_v49 = vld [vmem:[%s18169_s4 + $0xbc] sm:$0xff]  }
 0x210   : > { %14786 = vmatprep.mubr.msk.bf16.mxu0 %vm18103_vm0, %v18102_v1 }
 0x211   : > { %v1493_v51 = vor.u32 %v1492_v41, %v1491_v8  ;;  %v19507_v8 = vld [vmem:[%s18169_s4 + $0x28] sm:$0xf] }
 0x213   : > { %v1494_v24 = vsel %vm1466_vm4, %v1489_v38, %v1493_v51  ;;  %v22727_v38 = vshll.u32 %v18370_v43, 16 }
 0x216   : > { %13643 = vmatmul.mubr.msk.bf16.vlgmr.msra.gmra.mrb[0].mxu1 %vm536_vm3, %v1478_v56  ;;  %v1496_v56 = vrot.slane %v22719_v58, 2 }
 0x217   : > { %14787 = vmatmul.mubr.msk.bf16.gmra.mrb[40].mxu0 %vm536_vm3, %v17742_v7  ;;  %13646 = vmatprep.mubr.msk.bf16.mxu1 %vm18103_vm0, %v18102_v1  ;;  %v1495_v7 = vrot.slane %v22718_v63, 1 }
 0x218   : > { %14790 = vmatprep.mubr.msk.bf16.mxu0 %vm18103_vm0, %v18102_v1  ;;  %13727 = vmatpush3.bf16.msra.mxu1 %v17745_v55  ;;  %v1499_v55 = vrot.slane %v22720_v42, 1 }
 0x219   : > { %13728 = vmatprep.subr.bf16.mxu1 %v18102_v1  ;;  %v1497_v40 = vor.u32 %v1496_v56, %v1495_v7  ;;  %v19521_v7 = vld [vmem:[%s18169_s4 + $0x2c] sm:$0xff]  }
 0x21a   : > { %v7646_v12 = vshrl.u32 %v19521_v7, 16 }
 0x21b   : > { %v1498_v33 = vsel %vm1466_vm4, %v1493_v51, %v1497_v40  ;;  %v22728_v51 = vshrl.u32 %v18374_v45, 16 }
 0x21c   : > { %13729 = vmatpush3.bf16.msra.mxu1 %v17752_v21  ;;  %v1501_v21 = vor.u32 %v1500_v5, %v1499_v55  ;;  %v22730_v55 = vshrl.u32 %v18386_v54, 16  ;;  %v22731_v5 = vshll.u32 %v18386_v54, 16 }
 0x21d   : > { %13730 = vmatprep.subr.bf16.mxu1 %v18102_v1 }
 0x21e   : > { %13647 = vmatmul.mubr.msk.bf16.gmra.mrb[4].mxu1 %vm536_vm3, %v1482_v16  ;;  %v1502_v16 = vsel %vm1466_vm4, %v1497_v40, %v1501_v21  ;;  %v1506_v34 = vsel %vm1466_vm4, %v1501_v21, %v1505_v37  ;;  %v17756_v40 = vld [vmem:[%s18169_s4 + $0xc4] sm:$0xff]   ;;  %v1519_v4 = vrot.slane %v22730_v55, 1  ;;  %v1520_v21 = vrot.slane %v22731_v5, 2 }
 0x21f   : > { %14791 = vmatmul.mubr.msk.bf16.gmra.mrb[44].mxu0 %vm536_vm3, %v17744_v25  ;;  %13650 = vmatprep.mubr.msk.bf16.mxu1 %vm18103_vm0, %v18102_v1  ;;  %v17751_v25 = vld [vmem:[%s18169_s4 + $0xa4] sm:$0xff]   ;;  %v22737_v55 = vshll.u32 %v18464_v9, 16 }
 0x220   : > { %14794 = vmatprep.mubr.msk.bf16.mxu0 %vm18103_vm0, %v18102_v1  ;;  %13731 = vmatpush3.bf16.msra.mxu1 %v17760_v23  ;;  %v17753_v23 = vld [vmem:[%s18169_s4 + $0xac] sm:$0xff]   ;;  %v1521_v52 = vor.u32 %v1520_v21, %v1519_v4 }
 0x221   : > { %13732 = vmatprep.subr.bf16.mxu1 %v18102_v1  ;;  %v1532_v4 = vrot.slane %v22737_v55, 2  ;;  %v22743_v55 = vshll.u32 %v18563_v59, 16 }
 0x224   : > { %13733 = vmatpush3.bf16.msra.mxu1 %v17767_v10  ;;  %v22724_v10 = vshrl.u32 %v18361_v35, 16  ;;  %v22726_v35 = vshrl.u32 %v18370_v43, 16  ;;  %v12434_v43 = vcombine.low %v7475_v47, %v19507_v8 }
 0x225   : > { %13818 = vmatprep.subr.bf16.mxu1 %v18102_v1 }
 0x226   : > { %13651 = vmatmul.mubr.msk.bf16.gmra.mrb[8].mxu1 %vm536_vm3, %v1486_v2  ;;  %v1508_v2 = vrot.slane %v22725_v31, 2  ;;  %v1511_v32 = vrot.slane %v22726_v35, 1  ;;  %v7637_v58 = vshll.u32 %v12434_v43, 16 }
 0x227   : > { %14795 = vmatmul.mubr.msk.bf16.gmra.mrb[48].mxu0 %vm536_vm3, %v17746_v46  ;;  %13654 = vmatprep.mubr.msk.bf16.mxu1 %vm18103_vm0, %v18102_v1  ;;  %v1507_v46 = vrot.slane %v22724_v10, 1 }
 0x228   : > { %14798 = vmatprep.mubr.msk.bf16.mxu0 %vm18103_vm0, %v18102_v1 }
 0x229   : > { %v1509_v60 = vor.u32 %v1508_v2, %v1507_v46  ;;  %v22733_v46 = vshll.u32 %v18411_v15, 16 }
 0x22b   : > { %v1510_v29 = vsel %vm1466_vm4, %v1505_v37, %v1509_v60  ;;  %v7650_v37 = vshll.u32 %v19539_v6, 16  ;;  %v1524_v31 = vrot.slane %v22733_v46, 2 }
 0x22e   : > { %13655 = vmatmul.mubr.msk.bf16.gmra.mrb[12].mxu1 %vm536_vm3, %v1490_v3 }
 0x22f   : > { %14799 = vmatmul.mubr.msk.bf16.gmra.mrb[52].mxu0 %vm536_vm3, %v17747_v27  ;;  %13658 = vmatprep.mubr.msk.bf16.mxu1 %vm18103_vm0, %v18102_v1  ;;  %v1512_v27 = vrot.slane %v22727_v38, 2 }
 0x230   : > { %14802 = vmatprep.mubr.msk.bf16.mxu0 %vm18103_vm0, %v18102_v1 }
 0x231   : > { %v1513_v3 = vor.u32 %v1512_v27, %v1511_v32  ;;  %v7654_v32 = vshrl.u32 %v19539_v6, 16 }
 0x233   : > { %v1514_v41 = vsel %vm1466_vm4, %v1509_v60, %v1513_v3  ;;  %v7652_v60 = vrot.slane %v7650_v37, 1 }
 0x236   : > { %13659 = vmatmul.mubr.msk.bf16.gmra.mrb[16].mxu1 %vm536_vm3, %v1494_v24  ;;  %v22729_v24 = vshll.u32 %v18374_v45, 16  ;;  %v7642_v45 = vshll.u32 %v19521_v7, 16 }
 0x237   : > { %14803 = vmatmul.mubr.msk.bf16.gmra.mrb[56].mxu0 %vm536_vm3, %v17748_v62  ;;  %13662 = vmatprep.mubr.msk.bf16.mxu1 %vm18103_vm0, %v18102_v1  ;;  %v1515_v62 = vrot.slane %v22728_v51, 1  ;;  %v7656_v51 = vor.u32 %v7654_v32, %v7652_v60 }
 0x238   : > { %14806 = vmatprep.mubr.msk.bf16.mxu0 %vm18103_vm0, %v18102_v1  ;;  %v1516_v63 = vrot.slane %v22729_v24, 2 }
 0x23a   : > { %v1517_v56 = vor.u32 %v1516_v63, %v1515_v62  ;;  %v19592_v62 = vld [vmem:[%s18169_s4 + $0x44] sm:$0xff]   ;;  %v17782_v63 = vld [vmem:[%s22530_s1 + $0x238] sm:$0xff]  }
 0x23c   : > { %v1518_v42 = vsel %vm1466_vm4, %v1513_v3, %v1517_v56  ;;  %v22734_v3 = vshrl.u32 %v18422_v44, 16 }
 0x23e   : > { %13663 = vmatmul.mubr.msk.bf16.gmra.mrb[20].mxu1 %vm536_vm3, %v1498_v33  ;;  %v7639_v33 = vrot.slane %v7637_v58, 1  ;;  %v1527_v47 = vrot.slane %v22734_v3, 1  ;;  %v22740_v3 = vshrl.u32 %v18521_v13, 16 }
 0x23f   : > { %14807 = vmatmul.mubr.msk.bf16.gmra.mrb[60].mxu0 %vm536_vm3, %v17749_v36  ;;  %13666 = vmatprep.mubr.msk.bf16.mxu1 %vm18103_vm0, %v18102_v1  ;;  %v7635_v36 = vshrl.u32 %v12434_v43, 16 }
 0x240   : > { %14810 = vmatprep.mubr.msk.bf16.mxu0 %vm18103_vm0, %v18102_v1 }
 0x246   : > { %13667 = vmatmul.mubr.msk.bf16.gmra.mrb[24].mxu1 %vm536_vm3, %v1502_v16  ;;  %v7644_v16 = vrot.slane %v7642_v45, 1 }
 0x247   : > { %14811 = vmatmul.mubr.msk.bf16.gmra.mrb[64].mxu0 %vm536_vm3, %v17751_v25  ;;  %13670 = vmatprep.mubr.msk.bf16.mxu1 %vm18103_vm0, %v18102_v1  ;;  %v7640_v25 = vor.u32 %v7639_v33, %v7635_v36  ;;  %v22736_v33 = vshrl.u32 %v18464_v9, 16 }
 0x248   : > { %14814 = vmatprep.mubr.msk.bf16.mxu0 %vm18103_vm0, %v18102_v1  ;;  %v7648_v2 = vor.u32 %v7646_v12, %v7644_v16 }
 0x249   : > { %v7645_v54 = vsel %vm339_vm2, %v7640_v25, %v7644_v16  ;;  %v19618_v25 = vld [vmem:[%s18169_s4 + $0x4c] sm:$0xff]  }
 0x24a   : > { %v7653_v35 = vsel %vm339_vm2, %v7648_v2, %v7652_v60  ;;  %v19639_v60 = vld [vmem:[%s18169_s4 + $0x54] sm:$0xff]  }
 0x24e   : > { %13671 = vmatmul.mubr.msk.bf16.gmra.mrb[28].mxu1 %vm536_vm3, %v1506_v34  ;;  %v22732_v34 = vshrl.u32 %v18411_v15, 16 }
 0x24f   : > { %14815 = vmatmul.mubr.msk.bf16.gmra.mrb[68].mxu0 %vm536_vm3, %v17753_v23  ;;  %13674 = vmatprep.mubr.msk.bf16.mxu1 %vm18103_vm0, %v18102_v1  ;;  %v1522_v23 = vsel %vm1466_vm4, %v1517_v56, %v1521_v52 }
 0x250   : > { %14818 = vmatprep.mubr.msk.bf16.mxu0 %vm18103_vm0, %v18102_v1  ;;  %v1523_v10 = vrot.slane %v22732_v34, 1 }
 0x252   : > { %v1525_v15 = vor.u32 %v1524_v31, %v1523_v10  ;;  %v22739_v10 = vshll.u32 %v18494_v53, 16 }
 0x254   : > { %v1526_v27 = vsel %vm1466_vm4, %v1521_v52, %v1525_v15  ;;  %v7670_v52 = vshrl.u32 %v19592_v62, 16  ;;  %v1536_v46 = vrot.slane %v22739_v10, 2  ;;  %v22744_v10 = vshrl.u32 %v18605_v50, 16 }
 0x256   : > { %13675 = vmatmul.mubr.msk.bf16.gmra.mrb[32].mxu1 %vm536_vm3, %v1510_v29  ;;  %v17766_v29 = vld [vmem:[%s22530_s1 + $0x228] sm:$0xff]  }
 0x257   : > { %14819 = vmatmul.mubr.msk.bf16.gmra.mrb[72].mxu0 %vm536_vm3, %v17754_v22  ;;  %13678 = vmatprep.mubr.msk.bf16.mxu1 %vm18103_vm0, %v18102_v1  ;;  %v19561_v22 = vld [vmem:[%s18169_s4 + $0x3c] sm:$0xff]  }
 0x258   : > { %14822 = vmatprep.mubr.msk.bf16.mxu0 %vm18103_vm0, %v18102_v1  ;;  %v7658_v38 = vshll.u32 %v19561_v22, 16  ;;  %v7662_v56 = vshrl.u32 %v19561_v22, 16 }
 0x25e   : > { %13679 = vmatmul.mubr.msk.bf16.gmra.mrb[36].mxu1 %vm536_vm3, %v1514_v41  ;;  %v17775_v41 = vld [vmem:[%s22530_s1 + $0x230] sm:$0xff]  }
 0x25f   : > { %14823 = vmatmul.mubr.msk.bf16.gmra.mrb[76].mxu0 %vm536_vm3, %v17755_v49  ;;  %13682 = vmatprep.mubr.msk.bf16.mxu1 %vm18103_vm0, %v18102_v1  ;;  %v22735_v49 = vshll.u32 %v18422_v44, 16  ;;  %v7660_v44 = vrot.slane %v7658_v38, 1 }
 0x260   : > { %14826 = vmatprep.mubr.msk.bf16.mxu0 %vm18103_vm0, %v18102_v1 }
 0x261   : > { %v1528_v43 = vrot.slane %v22735_v49, 2  ;;  %v7661_v58 = vsel %vm339_vm2, %v7656_v51, %v7660_v44  ;;  %v7664_v5 = vor.u32 %v7662_v56, %v7660_v44  ;;  %v22741_v49 = vshll.u32 %v18521_v13, 16  ;;  %v19660_v44 = vld [vmem:[%s18169_s4 + $0x5c] sm:$0xff]  }
 0x263   : > { %v1529_v24 = vor.u32 %v1528_v43, %v1527_v47  ;;  %v1539_v47 = vrot.slane %v22740_v3, 1  ;;  %v1540_v43 = vrot.slane %v22741_v49, 2 }
 0x265   : > { %v1530_v36 = vsel %vm1466_vm4, %v1525_v15, %v1529_v24  ;;  %v7678_v15 = vshrl.u32 %v19618_v25, 16  ;;  %v1541_v13 = vor.u32 %v1540_v43, %v1539_v47 }
 0x266   : > { %13683 = vmatmul.mubr.msk.bf16.gmra.mrb[40].mxu1 %vm536_vm3, %v1518_v42  ;;  %v1531_v42 = vrot.slane %v22736_v33, 1  ;;  %v22742_v33 = vshrl.u32 %v18563_v59, 16 }
 0x267   : > { %14827 = vmatmul.mubr.msk.bf16.gmra.mrb[80].mxu0 %vm536_vm3, %v17756_v40  ;;  %13686 = vmatprep.mubr.msk.bf16.mxu1 %vm18103_vm0, %v18102_v1  ;;  %v7666_v40 = vshll.u32 %v19592_v62, 16 }
 0x268   : > { %14838 = vmatprep.mubr.msk.bf16.mxu0 %vm18103_vm0, %v18102_v1  ;;  %v1533_v9 = vor.u32 %v1532_v4, %v1531_v42  ;;  %v1543_v42 = vrot.slane %v22742_v33, 1  ;;  %v1544_v4 = vrot.slane %v22743_v55, 2  ;;  %v19726_v55 = vld [vmem:[%s18169_s4 + $0x74] sm:$0xff]  }
 0x269   : > { %v7668_v21 = vrot.slane %v7666_v40, 1 }
 0x26a   : > { %v1545_v59 = vor.u32 %v1544_v4, %v1543_v42 }
 0x26b   : > { %v7669_v16 = vsel %vm339_vm2, %v7664_v5, %v7668_v21  ;;  %v7672_v31 = vor.u32 %v7670_v52, %v7668_v21 }
 0x26e   : > { %13687 = vmatmul.mubr.msk.bf16.gmra.mrb[44].mxu1 %vm536_vm3, %v1522_v23  ;;  %v22738_v23 = vshrl.u32 %v18494_v53, 16 }
 0x26f   : > { %14839 = vmatmul.mubr.msk.bf16.vlgmr.msra.gmra.mrb[0].mxu0 %vm536_vm3, %v7645_v54  ;;  %13690 = vmatprep.mubr.msk.bf16.mxu1 %vm18103_vm0, %v18102_v1  ;;  %v7674_v54 = vshll.u32 %v19618_v25, 16 }
 0x270   : > { %14923 = vmatpush3.bf16.msra.mxu0 %v17759_v18  ;;  %14842 = vmatprep.mubr.msk.bf16.mxu0 %vm18103_vm0, %v18102_v1  ;;  %v1534_v18 = vsel %vm1466_vm4, %v1529_v24, %v1533_v9  ;;  %v1535_v34 = vrot.slane %v22738_v23, 1 }
 0x271   : > { %14924 = vmatprep.subr.bf16.mxu0 %v18102_v1  ;;  %v7676_v2 = vrot.slane %v7674_v54, 1 }
 0x272   : > { %v1537_v53 = vor.u32 %v1536_v46, %v1535_v34  ;;  %v1546_v34 = vsel %vm1466_vm4, %v1541_v13, %v1545_v59  ;;  %v1547_v46 = vrot.slane %v22744_v10, 1 }
 0x274   : > { %14925 = vmatpush3.bf16.msra.mxu0 %v17766_v29  ;;  %v7677_v29 = vsel %vm339_vm2, %v7672_v31, %v7676_v2  ;;  %v22745_v31 = vshll.u32 %v18605_v50, 16 }
 0x275   : > { %14926 = vmatprep.subr.bf16.mxu0 %v18102_v1 }
 0x276   : > { %13691 = vmatmul.mubr.msk.bf16.gmra.mrb[48].mxu1 %vm536_vm3, %v1526_v27  ;;  %v1538_v27 = vsel %vm1466_vm4, %v1533_v9, %v1537_v53  ;;  %v19681_v9 = vld [vmem:[%s18169_s4 + $0x64] sm:$0xff]  }
 0x277   : > { %14843 = vmatmul.mubr.msk.bf16.gmra.mrb[4].mxu0 %vm536_vm3, %v7653_v35  ;;  %13694 = vmatprep.mubr.msk.bf16.mxu1 %vm18103_vm0, %v18102_v1  ;;  %v7682_v35 = vshll.u32 %v19639_v60, 16  ;;  %v7698_v23 = vshll.u32 %v19681_v9, 16  ;;  %v7702_v47 = vshrl.u32 %v19681_v9, 16 }
 0x278   : > { %14846 = vmatprep.mubr.msk.bf16.mxu0 %vm18103_vm0, %v18102_v1  ;;  %14927 = vmatpush3.bf16.msra.mxu0 %v17775_v41  ;;  %v7680_v41 = vor.u32 %v7678_v15, %v7676_v2  ;;  %v1548_v2 = vrot.slane %v22745_v31, 2 }
 0x279   : > { %14928 = vmatprep.subr.bf16.mxu0 %v18102_v1  ;;  %v7684_v51 = vrot.slane %v7682_v35, 1 }
 0x27a   : > { %v1549_v50 = vor.u32 %v1548_v2, %v1547_v46 }
 0x27b   : > { %v7685_v24 = vsel %vm339_vm2, %v7680_v41, %v7684_v51  ;;  %v22746_v41 = vshrl.u32 %v18636_v61, 16 }
 0x27c   : > { %14929 = vmatpush3.bf16.msra.mxu0 %v17782_v63  ;;  %v7686_v63 = vshrl.u32 %v19639_v60, 16  ;;  %v1550_v43 = vsel %vm1466_vm4, %v1545_v59, %v1549_v50 }
 0x27d   : > { %15014 = vmatprep.subr.bf16.mxu0 %v18102_v1 }
 0x27e   : > { %13695 = vmatmul.mubr.msk.bf16.gmra.mrb[52].mxu1 %vm536_vm3, %v1530_v36  ;;  %v1542_v36 = vsel %vm1466_vm4, %v1537_v53, %v1541_v13  ;;  %v7688_v5 = vor.u32 %v7686_v63, %v7684_v51  ;;  %v1551_v51 = vrot.slane %v22746_v41, 1  ;;  %v22747_v13 = vshll.u32 %v18636_v61, 16 }
 0x27f   : > { %14847 = vmatmul.mubr.msk.bf16.gmra.mrb[8].mxu0 %vm536_vm3, %v7661_v58  ;;  %13698 = vmatprep.mubr.msk.bf16.mxu1 %vm18103_vm0, %v18102_v1  ;;  %v7690_v58 = vshll.u32 %v19660_v44, 16 }
 0x280   : > { %14850 = vmatprep.mubr.msk.bf16.mxu0 %vm18103_vm0, %v18102_v1 }
 0x281   : > { %v7692_v21 = vrot.slane %v7690_v58, 1 }
 0x286   : > { %13699 = vmatmul.mubr.msk.bf16.gmra.mrb[56].mxu1 %vm536_vm3, %v1534_v18  ;;  %v7694_v18 = vshrl.u32 %v19660_v44, 16 }
 0x287   : > { %14851 = vmatmul.mubr.msk.bf16.gmra.mrb[12].mxu0 %vm536_vm3, %v7669_v16  ;;  %13702 = vmatprep.mubr.msk.bf16.mxu1 %vm18103_vm0, %v18102_v1  ;;  %v7693_v16 = vsel %vm339_vm2, %v7688_v5, %v7692_v21 }
 0x288   : > { %14854 = vmatprep.mubr.msk.bf16.mxu0 %vm18103_vm0, %v18102_v1  ;;  %v7696_v53 = vor.u32 %v7694_v18, %v7692_v21 }
 0x28e   : > { %13703 = vmatmul.mubr.msk.bf16.gmra.mrb[60].mxu1 %vm536_vm3, %v1538_v27  ;;  %v19702_v27 = vld [vmem:[%s18169_s4 + $0x6c] sm:$0xff]  }
 0x28f   : > { %14855 = vmatmul.mubr.msk.bf16.gmra.mrb[16].mxu0 %vm536_vm3, %v7677_v29  ;;  %13706 = vmatprep.mubr.msk.bf16.mxu1 %vm18103_vm0, %v18102_v1  ;;  %v7700_v29 = vrot.slane %v7698_v23, 1  ;;  %v22653_v49 = vshll.u32 %v19702_v27, 16  ;;  %v7710_v59 = vshrl.u32 %v19702_v27, 16 }
 0x290   : > { %14858 = vmatprep.mubr.msk.bf16.mxu0 %vm18103_vm0, %v18102_v1 }
 0x291   : > { %v7701_v3 = vsel %vm339_vm2, %v7696_v53, %v7700_v29  ;;  %v7704_v33 = vor.u32 %v7702_v47, %v7700_v29  ;;  %v7708_v42 = vrot.slane %v22653_v49, 1  ;;  %v19745_v53 = vld [vmem:[%s18169_s4 + $0x7c] sm:$0xff]   ;;  %v8136_v49 = vld [vmem:[%s18169_s4 + $0x24] sm:$0xe] }
 0x292   : > { %v22639_v41 = vshll.u32 %v19745_v53, 16 }
 0x293   : > { %v7709_v21 = vsel %vm339_vm2, %v7704_v33, %v7708_v42  ;;  %v7712_v31 = vor.u32 %v7710_v59, %v7708_v42  ;;  %v19764_v42 = vld [vmem:[%s18169_s4 + $0x84] sm:$0xff]  }
 0x294   : > { %v7724_v33 = vrot.slane %v22639_v41, 1 }
 0x296   : > { %13707 = vmatmul.mubr.msk.bf16.gmra.mrb[64].mxu1 %vm536_vm3, %v1542_v36  ;;  %v19715_v36 = vld [vmem:[%s18169_s4 + $0xa8] ss:$0 sps:$4 sm:$0x33]  }
 0x297   : > { %14859 = vmatmul.mubr.msk.bf16.gmra.mrb[20].mxu0 %vm536_vm3, %v7685_v24  ;;  %13710 = vmatprep.mubr.msk.bf16.mxu1 %vm18103_vm0, %v18102_v1  ;;  %v1552_v24 = vrot.slane %v22747_v13, 2  ;;  %v1556_v4 = vshrl.u32 %v19715_v36, 16  ;;  %v1559_v5 = vshll.u32 %v19715_v36, 16 }
 0x298   : > { %14862 = vmatprep.mubr.msk.bf16.mxu0 %vm18103_vm0, %v18102_v1 }
 0x299   : > { %v1553_v61 = vor.u32 %v1552_v24, %v1551_v51  ;;  %v1558_v10 = vrot.slane %v1556_v4, 1  ;;  %v1561_v46 = vrot.slane %v1559_v5, 2 }
 0x29b   : > { %v1562_v29 = vor.u32 %v1561_v46, %v1558_v10  ;;  %v17777_v46 = vld [vmem:[%s22530_s1 + $0xa0] sm:$0xff]  }
 0x29d   : > { %v1563_v51 = vsel %vm1466_vm4, %v1553_v61, %v1562_v29  ;;  %v19785_v29 = vld [vmem:[%s18169_s4 + $0x8c] sm:$0xff]  }
 0x29e   : > { %13711 = vmatmul.mubr.msk.bf16.gmra.mrb[68].mxu1 %vm536_vm3, %v1546_v34  ;;  %v1554_v34 = vsel %vm1466_vm4, %v1549_v50, %v1553_v61  ;;  %v1894_v50 = vld [vmem:[%s18169_s4] sm:$0xc]  ;;  %v17997_v61 = vld [vmem:[%s18169_s4 + $0x8] sm:$0xff]  }
 0x29f   : > { %14863 = vmatmul.mubr.msk.bf16.gmra.mrb[24].mxu0 %vm536_vm3, %v7693_v16  ;;  %13714 = vmatprep.mubr.msk.bf16.mxu1 %vm18103_vm0, %v18102_v1  ;;  %v22645_v16 = vshll.u32 %v19726_v55, 16  ;;  %v12020_v13 = vcombine.low %v1894_v50, %v19123_v57  ;;  %v1908_v4 = vrot.slane %v17997_v61, 2  ;;  %v17998_v50 = vld [vmem:[%s18169_s4 + $0x10] sm:$0xff]  }
 0x2a0   : > { %14866 = vmatprep.mubr.msk.bf16.mxu0 %vm18103_vm0, %v18102_v1  ;;  %v17791_v61 = vld [vmem:[%s22530_s1 + $0xb0] sm:$0xff]  }
 0x2a1   : > { %v7716_v2 = vrot.slane %v22645_v16, 1  ;;  %v1907_v57 = vrot.slane %v12020_v13, 2 }
 0x2a3   : > { %v1909_v10 = vsel %vm1906_vm5, %v1907_v57, %v1908_v4 }
 0x2a6   : > { %13715 = vmatmul.mubr.msk.bf16.gmra.mrb[72].mxu1 %vm536_vm3, %v1550_v43  ;;  %v22648_v43 = vshrl.u32 %v19726_v55, 16 }
 0x2a7   : > { %14867 = vmatmul.mubr.msk.bf16.gmra.mrb[28].mxu0 %vm536_vm3, %v7701_v3  ;;  %13718 = vmatprep.mubr.msk.bf16.mxu1 %vm18103_vm0, %v18102_v1  ;;  %v7717_v3 = vsel %vm339_vm2, %v7712_v31, %v7716_v2 }
 0x2a8   : > { %14870 = vmatprep.mubr.msk.bf16.mxu0 %vm18103_vm0, %v18102_v1  ;;  %v7720_v24 = vor.u32 %v22648_v43, %v7716_v2 }
 0x2aa   : > { %v7725_v5 = vsel %vm339_vm2, %v7720_v24, %v7724_v33  ;;  %v22636_v24 = vshrl.u32 %v19764_v42, 16 }
 0x2ae   : > { %13719 = vmatmul.mubr.msk.bf16.gmra.mrb[76].mxu1 %vm536_vm3, %v1554_v34  ;;  %v22633_v34 = vshll.u32 %v19764_v42, 16 }
 0x2af   : > { %14871 = vmatmul.mubr.msk.bf16.gmra.mrb[32].mxu0 %vm536_vm3, %v7709_v21  ;;  %13722 = vmatprep.mubr.msk.bf16.mxu1 %vm18103_vm0, %v18102_v1  ;;  %v22642_v21 = vshrl.u32 %v19745_v53, 16 }
 0x2b0   : > { %14874 = vmatprep.mubr.msk.bf16.mxu0 %vm18103_vm0, %v18102_v1  ;;  %v7732_v2 = vrot.slane %v22633_v34, 1 }
 0x2b1   : > { %v7728_v31 = vor.u32 %v22642_v21, %v7724_v33  ;;  %v22632_v33 = vshll.u32 %v19785_v29, 16 }
 0x2b3   : > { %v7733_v13 = vsel %vm339_vm2, %v7728_v31, %v7732_v2 }
 0x2b6   : > { %13723 = vmatmul.mubr.msk.bf16.gmra.mrb[80].mxu1 %vm536_vm3, %v1563_v51  ;;  %v17784_v51 = vld [vmem:[%s22530_s1 + $0xa8] sm:$0xff]  }
 0x2b7   : > { %14875 = vmatmul.mubr.msk.bf16.gmra.mrb[36].mxu0 %vm536_vm3, %v7717_v3  ;;  %13734 = vmatprep.mubr.msk.bf16.mxu1 %vm18103_vm0, %v18102_v1  ;;  %v1910_v3 = vrot.slane %v17998_v50, 2  ;;  %v17793_v50 = vld [vmem:[%s22530_s1 + $0xb8] sm:$0xff]  }
 0x2b8   : > { %14878 = vmatprep.mubr.msk.bf16.mxu0 %vm18103_vm0, %v18102_v1 }
 0x2b9   : > { %v1911_v57 = vsel %vm1906_vm5, %v1908_v4, %v1910_v3  ;;  %v7740_v4 = vrot.slane %v22632_v33, 1 }
 0x2be   : > { %13735 = vmatmul.mubr.msk.bf16.vlgmr.msra.gmra.mrb[0].mxu1 %vm536_vm3, %v1909_v10  ;;  %v19811_v10 = vld [vmem:[%s18169_s4 + $0x94] sm:$0xff]  }
 0x2bf   : > { %14879 = vmatmul.mubr.msk.bf16.gmra.mrb[40].mxu0 %vm536_vm3, %v7725_v5  ;;  %13738 = vmatprep.mubr.msk.bf16.mxu1 %vm18103_vm0, %v18102_v1  ;;  %v7736_v5 = vor.u32 %v22636_v24, %v7732_v2 }
 0x2c0   : > { %14882 = vmatprep.mubr.msk.bf16.mxu0 %vm18103_vm0, %v18102_v1  ;;  %13819 = vmatpush3.bf16.msra.mxu1 %v17777_v46  ;;  %v17999_v46 = vld [vmem:[%s18169_s4 + $0x18] sm:$0xff]  }
 0x2c1   : > { %13820 = vmatprep.subr.bf16.mxu1 %v18102_v1  ;;  %v1912_v31 = vrot.slane %v17999_v46, 2  ;;  %v7741_v2 = vsel %vm339_vm2, %v7736_v5, %v7740_v4  ;;  %v19834_v46 = vld [vmem:[%s18169_s4 + $0x9c] sm:$0xff]  }
 0x2c2   : > { %v22637_v33 = vshll.u32 %v19834_v46, 16 }
 0x2c4   : > { %13821 = vmatpush3.bf16.msra.mxu1 %v17784_v51  ;;  %v22635_v51 = vshrl.u32 %v19785_v29, 16 }
 0x2c5   : > { %13822 = vmatprep.subr.bf16.mxu1 %v18102_v1 }
 0x2c6   : > { %13739 = vmatmul.mubr.msk.bf16.gmra.mrb[4].mxu1 %vm536_vm3, %v1911_v57  ;;  %v1913_v57 = vsel %vm1906_vm5, %v1910_v3, %v1912_v31  ;;  %v18000_v3 = vld [vmem:[%s18169_s4 + $0x20] sm:$0xff]  }
 0x2c7   : > { %14883 = vmatmul.mubr.msk.bf16.gmra.mrb[44].mxu0 %vm536_vm3, %v7733_v13  ;;  %13742 = vmatprep.mubr.msk.bf16.mxu1 %vm18103_vm0, %v18102_v1  ;;  %v22634_v13 = vshll.u32 %v19811_v10, 16 }
 0x2c8   : > { %14886 = vmatprep.mubr.msk.bf16.mxu0 %vm18103_vm0, %v18102_v1  ;;  %13823 = vmatpush3.bf16.msra.mxu1 %v17791_v61  ;;  %v7744_v61 = vor.u32 %v22635_v51, %v7740_v4 }
 0x2c9   : > { %13824 = vmatprep.subr.bf16.mxu1 %v18102_v1  ;;  %v7748_v5 = vrot.slane %v22634_v13, 1  ;;  %v22641_v13 = vshrl.u32 %v19834_v46, 16 }
 0x2cc   : > { %13825 = vmatpush3.bf16.msra.mxu1 %v17793_v50  ;;  %v1914_v50 = vrot.slane %v18000_v3, 2  ;;  %v19852_v3 = vld [vmem:[%s18169_s4 + $0xa4] sm:$0xff]  }
 0x2cd   : > { %13910 = vmatprep.subr.bf16.mxu1 %v18102_v1  ;;  %v22640_v51 = vshll.u32 %v19852_v3, 16 }
 0x2ce   : > { %13743 = vmatmul.mubr.msk.bf16.gmra.mrb[8].mxu1 %vm536_vm3, %v1913_v57  ;;  %v22638_v57 = vshrl.u32 %v19811_v10, 16  ;;  %v1915_v34 = vsel %vm1906_vm5, %v1912_v31, %v1914_v50  ;;  %v18001_v31 = vld [vmem:[%s18169_s4 + $0x28] sm:$0xff]  }
 0x2cf   : > { %14887 = vmatmul.mubr.msk.bf16.gmra.mrb[48].mxu0 %vm536_vm3, %v7741_v2  ;;  %13746 = vmatprep.mubr.msk.bf16.mxu1 %vm18103_vm0, %v18102_v1  ;;  %v7749_v2 = vsel %vm339_vm2, %v7744_v61, %v7748_v5  ;;  %v7756_v61 = vrot.slane %v22637_v33, 1  ;;  %v22644_v33 = vshrl.u32 %v19852_v3, 16 }
 0x2d0   : > { %14890 = vmatprep.mubr.msk.bf16.mxu0 %vm18103_vm0, %v18102_v1  ;;  %v7752_v4 = vor.u32 %v22638_v57, %v7748_v5 }
 0x2d1   : > { %v7760_v5 = vor.u32 %v22641_v13, %v7756_v61 }
 0x2d6   : > { %13747 = vmatmul.mubr.msk.bf16.gmra.mrb[12].mxu1 %vm536_vm3, %v1915_v34  ;;  %v7757_v34 = vsel %vm339_vm2, %v7752_v4, %v7756_v61  ;;  %v7764_v4 = vrot.slane %v22640_v51, 1 }
 0x2d7   : > { %14891 = vmatmul.mubr.msk.bf16.gmra.mrb[52].mxu0 %vm536_vm3, %v7749_v2  ;;  %13750 = vmatprep.mubr.msk.bf16.mxu1 %vm18103_vm0, %v18102_v1  ;;  %v1916_v2 = vrot.slane %v18001_v31, 2  ;;  %v19870_v31 = vld [vmem:[%s18169_s4 + $0xac] sm:$0xff]  }
 0x2d8   : > { %14894 = vmatprep.mubr.msk.bf16.mxu0 %vm18103_vm0, %v18102_v1  ;;  %v22643_v57 = vshll.u32 %v19870_v31, 16  ;;  %v7768_v61 = vor.u32 %v22644_v33, %v7764_v4  ;;  %v22647_v51 = vshrl.u32 %v19870_v31, 16 }
 0x2d9   : > { %v1917_v24 = vsel %vm1906_vm5, %v1914_v50, %v1916_v2  ;;  %v18002_v50 = vld [vmem:[%s18169_s4 + $0x30] sm:$0xff]  }
 0x2de   : > { %13751 = vmatmul.mubr.msk.bf16.gmra.mrb[16].mxu1 %vm536_vm3, %v1917_v24  ;;  %v7765_v24 = vsel %vm339_vm2, %v7760_v5, %v7764_v4  ;;  %v7772_v5 = vrot.slane %v22643_v57, 1 }
 0x2df   : > { %14895 = vmatmul.mubr.msk.bf16.gmra.mrb[56].mxu0 %vm536_vm3, %v7757_v34  ;;  %13754 = vmatprep.mubr.msk.bf16.mxu1 %vm18103_vm0, %v18102_v1  ;;  %v1918_v34 = vrot.slane %v18002_v50, 2  ;;  %v19888_v50 = vld [vmem:[%s18169_s4 + $0xb4] sm:$0xff]  }
 0x2e0   : > { %14898 = vmatprep.mubr.msk.bf16.mxu0 %vm18103_vm0, %v18102_v1  ;;  %v22646_v13 = vshll.u32 %v19888_v50, 16  ;;  %v7776_v4 = vor.u32 %v22647_v51, %v7772_v5  ;;  %v22650_v57 = vshrl.u32 %v19888_v50, 16 }
 0x2e1   : > { %v1919_v41 = vsel %vm1906_vm5, %v1916_v2, %v1918_v34  ;;  %v18003_v2 = vld [vmem:[%s18169_s4 + $0x38] sm:$0xff]  }
 0x2e6   : > { %13755 = vmatmul.mubr.msk.bf16.gmra.mrb[20].mxu1 %vm536_vm3, %v1919_v41  ;;  %v7773_v41 = vsel %vm339_vm2, %v7768_v61, %v7772_v5  ;;  %v7780_v61 = vrot.slane %v22646_v13, 1 }
 0x2e7   : > { %14899 = vmatmul.mubr.msk.bf16.gmra.mrb[60].mxu0 %vm536_vm3, %v7765_v24  ;;  %13758 = vmatprep.mubr.msk.bf16.mxu1 %vm18103_vm0, %v18102_v1  ;;  %v1920_v24 = vrot.slane %v18003_v2, 2  ;;  %v19906_v2 = vld [vmem:[%s18169_s4 + $0xbc] sm:$0xff]  }
 0x2e8   : > { %14902 = vmatprep.mubr.msk.bf16.mxu0 %vm18103_vm0, %v18102_v1  ;;  %v22649_v33 = vshll.u32 %v19906_v2, 16  ;;  %v7784_v5 = vor.u32 %v22650_v57, %v7780_v61  ;;  %v22652_v13 = vshrl.u32 %v19906_v2, 16 }
 0x2e9   : > { %v1921_v21 = vsel %vm1906_vm5, %v1918_v34, %v1920_v24  ;;  %v18004_v34 = vld [vmem:[%s18169_s4 + $0x40] sm:$0xff]  }
 0x2ee   : > { %13759 = vmatmul.mubr.msk.bf16.gmra.mrb[24].mxu1 %vm536_vm3, %v1921_v21  ;;  %v7781_v21 = vsel %vm339_vm2, %v7776_v4, %v7780_v61  ;;  %v7788_v4 = vrot.slane %v22649_v33, 1 }
 0x2ef   : > { %14903 = vmatmul.mubr.msk.bf16.gmra.mrb[64].mxu0 %vm536_vm3, %v7773_v41  ;;  %13762 = vmatprep.mubr.msk.bf16.mxu1 %vm18103_vm0, %v18102_v1  ;;  %v1922_v41 = vrot.slane %v18004_v34, 2  ;;  %v19924_v34 = vld [vmem:[%s18169_s4 + $0xc4] sm:$0xff]  }
 0x2f0   : > { %14906 = vmatprep.mubr.msk.bf16.mxu0 %vm18103_vm0, %v18102_v1  ;;  %v22651_v51 = vshll.u32 %v19924_v34, 16  ;;  %v7792_v61 = vor.u32 %v22652_v13, %v7788_v4  ;;  %v7798_v33 = vshrl.u32 %v19924_v34, 16 }
 0x2f1   : > { %v1923_v16 = vsel %vm1906_vm5, %v1920_v24, %v1922_v41  ;;  %v18005_v24 = vld [vmem:[%s18169_s4 + $0x48] sm:$0xff]  }
 0x2f6   : > { %13763 = vmatmul.mubr.msk.bf16.gmra.mrb[28].mxu1 %vm536_vm3, %v1923_v16  ;;  %v7789_v16 = vsel %vm339_vm2, %v7784_v5, %v7788_v4  ;;  %v7796_v5 = vrot.slane %v22651_v51, 1 }
 0x2f7   : > { %14907 = vmatmul.mubr.msk.bf16.gmra.mrb[68].mxu0 %vm536_vm3, %v7781_v21  ;;  %13766 = vmatprep.mubr.msk.bf16.mxu1 %vm18103_vm0, %v18102_v1  ;;  %v1924_v21 = vrot.slane %v18005_v24, 2  ;;  %v19942_v24 = vld [vmem:[%s18169_s4 + $0xcc] ss:$0 sps:$4 sm:$0x11]  }
 0x2f8   : > { %14910 = vmatprep.mubr.msk.bf16.mxu0 %vm18103_vm0, %v18102_v1  ;;  %v7802_v57 = vshll.u32 %v19942_v24, 16  ;;  %v7800_v51 = vor.u32 %v7798_v33, %v7796_v5 }
 0x2f9   : > { %v1925_v43 = vsel %vm1906_vm5, %v1922_v41, %v1924_v21  ;;  %v18006_v41 = vld [vmem:[%s18169_s4 + $0x50] sm:$0xff]  }
 0x2fe   : > { %13767 = vmatmul.mubr.msk.bf16.gmra.mrb[32].mxu1 %vm536_vm3, %v1925_v43  ;;  %v7797_v43 = vsel %vm339_vm2, %v7792_v61, %v7796_v5  ;;  %v18007_v61 = vld [vmem:[%s18169_s4 + $0x58] sm:$0xff]   ;;  %v8149_v5 = vrot.slane %v19521_v7, 1  ;;  %v17810_v7 = vld [vmem:[%s22530_s1 + $0x260] sm:$0xff]  }
 0x2ff   : > { %14911 = vmatmul.mubr.msk.bf16.gmra.mrb[72].mxu0 %vm536_vm3, %v7789_v16  ;;  %13770 = vmatprep.mubr.msk.bf16.mxu1 %vm18103_vm0, %v18102_v1  ;;  %v1926_v16 = vrot.slane %v18006_v41, 2  ;;  %v7804_v41 = vrot.slane %v7802_v57, 1  ;;  %v1928_v13 = vrot.slane %v18007_v61, 2  ;;  %v8151_v61 = vrot.slane %v19539_v6, 1  ;;  %v17812_v6 = vld [vmem:[%s18169_s4 + $0x6c] sm:$0xff]  }
 0x300   : > { %14914 = vmatprep.mubr.msk.bf16.mxu0 %vm18103_vm0, %v18102_v1 }
 0x301   : > { %v1927_v4 = vsel %vm1906_vm5, %v1924_v21, %v1926_v16  ;;  %v7805_v21 = vsel %vm339_vm2, %v7800_v51, %v7804_v41  ;;  %v18008_v51 = vld [vmem:[%s18169_s4 + $0x60] sm:$0xff]  }
 0x306   : > { %13771 = vmatmul.mubr.msk.bf16.gmra.mrb[36].mxu1 %vm536_vm3, %v1927_v4  ;;  %v1929_v4 = vsel %vm1906_vm5, %v1926_v16, %v1928_v13  ;;  %v17790_v16 = vld [vmem:[%s22530_s1 + $0x240] sm:$0xff]  }
 0x307   : > { %14915 = vmatmul.mubr.msk.bf16.gmra.mrb[76].mxu0 %vm536_vm3, %v7797_v43  ;;  %13774 = vmatprep.mubr.msk.bf16.mxu1 %vm18103_vm0, %v18102_v1  ;;  %v19963_v43 = vcombine.low %v8136_v49, %v19507_v8  ;;  %v1930_v8 = vrot.slane %v18008_v51, 2 }
 0x308   : > { %14918 = vmatprep.mubr.msk.bf16.mxu0 %vm18103_vm0, %v18102_v1 }
 0x309   : > { %v8148_v57 = vrot.slane %v19963_v43, 1  ;;  %v1931_v41 = vsel %vm1906_vm5, %v1928_v13, %v1930_v8 }
 0x30b   : > { %v8150_v49 = vsel %vm1080_vm1, %v8148_v57, %v8149_v5  ;;  %v8152_v57 = vsel %vm1080_vm1, %v8149_v5, %v8151_v61  ;;  %v18010_v5 = vld [vmem:[%s18169_s4 + $0x70] sm:$0xff]  }
 0x30e   : > { %13775 = vmatmul.mubr.msk.bf16.gmra.mrb[40].mxu1 %vm536_vm3, %v1929_v4  ;;  %v18009_v4 = vld [vmem:[%s18169_s4 + $0x68] sm:$0xff]  }
 0x30f   : > { %14919 = vmatmul.mubr.msk.bf16.gmra.mrb[80].mxu0 %vm536_vm3, %v7805_v21  ;;  %13778 = vmatprep.mubr.msk.bf16.mxu1 %vm18103_vm0, %v18102_v1  ;;  %v17792_v21 = vld [vmem:[%s22530_s1 + $0x248] sm:$0xff]   ;;  %v1932_v13 = vrot.slane %v18009_v4, 2 }
 0x310   : > { %14930 = vmatprep.mubr.msk.bf16.mxu0 %vm18103_vm0, %v18102_v1 }
 0x311   : > { %v1933_v51 = vsel %vm1906_vm5, %v1930_v8, %v1932_v13  ;;  %v1934_v8 = vrot.slane %v18010_v5, 2  ;;  %v8157_v5 = vrot.slane %v19618_v25, 1  ;;  %v8562_v25 = vrot.slane %v7682_v35, 2 }
 0x313   : > { %v1935_v4 = vsel %vm1906_vm5, %v1932_v13, %v1934_v8 }
 0x316   : > { %13779 = vmatmul.mubr.msk.bf16.gmra.mrb[44].mxu1 %vm536_vm3, %v1931_v41  ;;  %v17802_v41 = vld [vmem:[%s22530_s1 + $0x258] sm:$0xff]  }
 0x317   : > { %14931 = vmatmul.mubr.msk.bf16.vlgmr.msra.gmra.mrb[0].mxu0 %vm536_vm3, %v8150_v49  ;;  %13782 = vmatprep.mubr.msk.bf16.mxu1 %vm18103_vm0, %v18102_v1  ;;  %v17795_v49 = vld [vmem:[%s22530_s1 + $0x250] sm:$0xff]  }
 0x318   : > { %15015 = vmatpush3.bf16.msra.mxu0 %v17790_v16  ;;  %14934 = vmatprep.mubr.msk.bf16.mxu0 %vm18103_vm0, %v18102_v1  ;;  %v8153_v16 = vrot.slane %v19561_v22, 1  ;;  %v17832_v22 = vld [vmem:[%s22530_s1 + $0x278] sm:$0xff]  }
 0x319   : > { %15016 = vmatprep.subr.bf16.mxu0 %v18102_v1 }
 0x31c   : > { %15017 = vmatpush3.bf16.msra.mxu0 %v17792_v21  ;;  %v8154_v21 = vsel %vm1080_vm1, %v8151_v61, %v8153_v16 }
 0x31d   : > { %15018 = vmatprep.subr.bf16.mxu0 %v18102_v1 }
 0x31e   : > { %13783 = vmatmul.mubr.msk.bf16.gmra.mrb[48].mxu1 %vm536_vm3, %v1933_v51  ;;  %v18011_v51 = vld [vmem:[%s18169_s4 + $0x78] sm:$0xff]  }
 0x31f   : > { %14935 = vmatmul.mubr.msk.bf16.gmra.mrb[4].mxu0 %vm536_vm3, %v8152_v57  ;;  %13786 = vmatprep.mubr.msk.bf16.mxu1 %vm18103_vm0, %v18102_v1  ;;  %v8155_v57 = vrot.slane %v19592_v62, 1  ;;  %v1936_v61 = vrot.slane %v18011_v51, 2  ;;  %v18013_v51 = vld [vmem:[%s18169_s4 + $0x88] sm:$0xff]   ;;  %v8557_v62 = vrot.slane %v7678_v15, 1  ;;  %v8561_v15 = vrot.slane %v7686_v63, 1 }
 0x320   : > { %14938 = vmatprep.mubr.msk.bf16.mxu0 %vm18103_vm0, %v18102_v1  ;;  %15019 = vmatpush3.bf16.msra.mxu0 %v17795_v49  ;;  %v8565_v63 = vrot.slane %v7694_v18, 1  ;;  %v8569_v18 = vrot.slane %v7702_v47, 1 }
 0x321   : > { %15020 = vmatprep.subr.bf16.mxu0 %v18102_v1  ;;  %v8156_v13 = vsel %vm1080_vm1, %v8153_v16, %v8155_v57  ;;  %v1937_v49 = vsel %vm1906_vm5, %v1934_v8, %v1936_v61  ;;  %v8159_v8 = vrot.slane %v19639_v60, 1  ;;  %v8566_v60 = vrot.slane %v7690_v58, 2 }
 0x323   : > { %v8567_v35 = vor.u32 %v8566_v60, %v8565_v63  ;;  %v22754_v63 = vshll.u32 %v19764_v42, 16 }
 0x324   : > { %15021 = vmatpush3.bf16.msra.mxu0 %v17802_v41  ;;  %v18012_v41 = vld [vmem:[%s18169_s4 + $0x80] sm:$0xff]  }
 0x325   : > { %15106 = vmatprep.subr.bf16.mxu0 %v18102_v1  ;;  %v8586_v60 = vrot.slane %v22754_v63, 2 }
 0x326   : > { %13787 = vmatmul.mubr.msk.bf16.gmra.mrb[52].mxu1 %vm536_vm3, %v1935_v4  ;;  %v8158_v4 = vsel %vm1080_vm1, %v8155_v57, %v8157_v5 }
 0x327   : > { %14939 = vmatmul.mubr.msk.bf16.gmra.mrb[8].mxu0 %vm536_vm3, %v8154_v21  ;;  %13790 = vmatprep.mubr.msk.bf16.mxu1 %vm18103_vm0, %v18102_v1  ;;  %v1938_v21 = vrot.slane %v18012_v41, 2  ;;  %v18014_v41 = vld [vmem:[%s18169_s4 + $0x90] sm:$0xff]  }
 0x328   : > { %14942 = vmatprep.mubr.msk.bf16.mxu0 %vm18103_vm0, %v18102_v1 }
 0x329   : > { %v1939_v16 = vsel %vm1906_vm5, %v1936_v61, %v1938_v21  ;;  %v8161_v61 = vrot.slane %v19660_v44, 1  ;;  %v8570_v44 = vrot.slane %v7698_v23, 2  ;;  %v22748_v23 = vshll.u32 %v19702_v27, 16 }
 0x32b   : > { %v8571_v58 = vor.u32 %v8570_v44, %v8569_v18  ;;  %v17827_v18 = vld [vmem:[%s22530_s1 + $0xe0] sm:$0xff]  }
 0x32d   : > { %v8572_v47 = vsel %vm1466_vm4, %v8567_v35, %v8571_v58 }
 0x32e   : > { %13791 = vmatmul.mubr.msk.bf16.gmra.mrb[56].mxu1 %vm536_vm3, %v1937_v49  ;;  %v8160_v49 = vsel %vm1080_vm1, %v8157_v5, %v8159_v8 }
 0x32f   : > { %14943 = vmatmul.mubr.msk.bf16.gmra.mrb[12].mxu0 %vm536_vm3, %v8156_v13  ;;  %13794 = vmatprep.mubr.msk.bf16.mxu1 %vm18103_vm0, %v18102_v1  ;;  %v1940_v13 = vrot.slane %v18013_v51, 2  ;;  %v18015_v51 = vld [vmem:[%s18169_s4 + $0x98] sm:$0xff]  }
 0x330   : > { %14946 = vmatprep.mubr.msk.bf16.mxu0 %vm18103_vm0, %v18102_v1 }
 0x331   : > { %v1941_v57 = vsel %vm1906_vm5, %v1938_v21, %v1940_v13  ;;  %v8163_v21 = vrot.slane %v19681_v9, 1  ;;  %v8573_v9 = vrot.slane %v7710_v59, 1  ;;  %v17821_v59 = vld [vmem:[%s18169_s4 + $0xa4] sm:$0xff]  }
 0x336   : > { %13795 = vmatmul.mubr.msk.bf16.gmra.mrb[60].mxu1 %vm536_vm3, %v1939_v16  ;;  %v8162_v16 = vsel %vm1080_vm1, %v8159_v8, %v8161_v61 }
 0x337   : > { %14947 = vmatmul.mubr.msk.bf16.gmra.mrb[16].mxu0 %vm536_vm3, %v8158_v4  ;;  %13798 = vmatprep.mubr.msk.bf16.mxu1 %vm18103_vm0, %v18102_v1  ;;  %v1942_v4 = vrot.slane %v18014_v41, 2  ;;  %v18016_v41 = vld [vmem:[%s18169_s4 + $0xa0] sm:$0xff]  }
 0x338   : > { %14950 = vmatprep.mubr.msk.bf16.mxu0 %vm18103_vm0, %v18102_v1 }
 0x339   : > { %v1943_v5 = vsel %vm1906_vm5, %v1940_v13, %v1942_v4  ;;  %v8165_v13 = vrot.slane %v19702_v27, 1 }
 0x33e   : > { %13799 = vmatmul.mubr.msk.bf16.gmra.mrb[64].mxu1 %vm536_vm3, %v1941_v57  ;;  %v8164_v57 = vsel %vm1080_vm1, %v8161_v61, %v8163_v21 }
 0x33f   : > { %14951 = vmatmul.mubr.msk.bf16.gmra.mrb[20].mxu0 %vm536_vm3, %v8160_v49  ;;  %13802 = vmatprep.mubr.msk.bf16.mxu1 %vm18103_vm0, %v18102_v1  ;;  %v1944_v49 = vrot.slane %v18015_v51, 2  ;;  %v1948_v51 = vrot.slane %v19715_v36, 2 }
 0x340   : > { %14954 = vmatprep.mubr.msk.bf16.mxu0 %vm18103_vm0, %v18102_v1 }
 0x341   : > { %v1945_v8 = vsel %vm1906_vm5, %v1942_v4, %v1944_v49  ;;  %v8167_v4 = vrot.slane %v19726_v55, 1 }
 0x346   : > { %13803 = vmatmul.mubr.msk.bf16.gmra.mrb[68].mxu1 %vm536_vm3, %v1943_v5  ;;  %v8166_v5 = vsel %vm1080_vm1, %v8163_v21, %v8165_v13 }
 0x347   : > { %14955 = vmatmul.mubr.msk.bf16.gmra.mrb[24].mxu0 %vm536_vm3, %v8162_v16  ;;  %13806 = vmatprep.mubr.msk.bf16.mxu1 %vm18103_vm0, %v18102_v1  ;;  %v1946_v16 = vrot.slane %v18016_v41, 2  ;;  %v8171_v41 = vrot.slane %v19764_v42, 1 }
 0x348   : > { %14958 = vmatprep.mubr.msk.bf16.mxu0 %vm18103_vm0, %v18102_v1 }
 0x349   : > { %v1947_v61 = vsel %vm1906_vm5, %v1944_v49, %v1946_v16  ;;  %v1949_v21 = vsel %vm1906_vm5, %v1946_v16, %v1948_v51  ;;  %v8169_v49 = vrot.slane %v19745_v53, 1  ;;  %v17804_v16 = vld [vmem:[%s22530_s1 + $0xc8] sm:$0xff]   ;;  %v8173_v51 = vrot.slane %v19785_v29, 1 }
 0x34b   : > { %v8170_v36 = vsel %vm1080_vm1, %v8167_v4, %v8169_v49 }
 0x34e   : > { %13807 = vmatmul.mubr.msk.bf16.gmra.mrb[72].mxu1 %vm536_vm3, %v1945_v8  ;;  %v17794_v8 = vld [vmem:[%s18169_s4 + $0xc] sm:$0xff]  }
 0x34f   : > { %14959 = vmatmul.mubr.msk.bf16.gmra.mrb[28].mxu0 %vm536_vm3, %v8164_v57  ;;  %13810 = vmatprep.mubr.msk.bf16.mxu1 %vm18103_vm0, %v18102_v1  ;;  %v8168_v57 = vsel %vm1080_vm1, %v8165_v13, %v8167_v4  ;;  %v17797_v13 = vld [vmem:[%s22530_s1 + $0xc0] sm:$0xff]   ;;  %v17811_v4 = vld [vmem:[%s22530_s1 + $0xd0] sm:$0xff]  }
 0x350   : > { %14962 = vmatprep.mubr.msk.bf16.mxu0 %vm18103_vm0, %v18102_v1 }
 0x356   : > { %13811 = vmatmul.mubr.msk.bf16.gmra.mrb[76].mxu1 %vm536_vm3, %v1947_v61  ;;  %v8172_v61 = vsel %vm1080_vm1, %v8169_v49, %v8171_v41  ;;  %v8174_v49 = vsel %vm1080_vm1, %v8171_v41, %v8173_v51  ;;  %v8177_v41 = vrot.slane %v19834_v46, 1 }
 0x357   : > { %14963 = vmatmul.mubr.msk.bf16.gmra.mrb[32].mxu0 %vm536_vm3, %v8166_v5  ;;  %13814 = vmatprep.mubr.msk.bf16.mxu1 %vm18103_vm0, %v18102_v1  ;;  %v17796_v5 = vld [vmem:[%s18169_s4 + $0x14] sm:$0xff]  }
 0x358   : > { %14966 = vmatprep.mubr.msk.bf16.mxu0 %vm18103_vm0, %v18102_v1 }
 0x35e   : > { %13815 = vmatmul.mubr.msk.bf16.gmra.mrb[80].mxu1 %vm536_vm3, %v1949_v21  ;;  %v17798_v21 = vld [vmem:[%s18169_s4 + $0x1c] sm:$0xff]  }
 0x35f   : > { %14967 = vmatmul.mubr.msk.bf16.gmra.mrb[36].mxu0 %vm536_vm3, %v8168_v57  ;;  %13826 = vmatprep.mubr.msk.bf16.mxu1 %vm18103_vm0, %v18102_v1  ;;  %v17818_v57 = vld [vmem:[%s22530_s1 + $0xd8] sm:$0xff]  }
 0x360   : > { %14970 = vmatprep.mubr.msk.bf16.mxu0 %vm18103_vm0, %v18102_v1 }
 0x366   : > { %13827 = vmatmul.mubr.msk.bf16.vlgmr.msra.gmra.mrb[0].mxu1 %vm536_vm3, %v17794_v8  ;;  %v8175_v8 = vrot.slane %v19811_v10, 1 }
 0x367   : > { %14971 = vmatmul.mubr.msk.bf16.gmra.mrb[40].mxu0 %vm536_vm3, %v8170_v36  ;;  %13830 = vmatprep.mubr.msk.bf16.mxu1 %vm18103_vm0, %v18102_v1  ;;  %v17799_v36 = vld [vmem:[%s18169_s4 + $0x24] sm:$0xff]  }
 0x368   : > { %14974 = vmatprep.mubr.msk.bf16.mxu0 %vm18103_vm0, %v18102_v1  ;;  %13911 = vmatpush3.bf16.msra.mxu1 %v17797_v13  ;;  %v8176_v13 = vsel %vm1080_vm1, %v8173_v51, %v8175_v8 }
 0x369   : > { %13912 = vmatprep.subr.bf16.mxu1 %v18102_v1 }
 0x36c   : > { %13913 = vmatpush3.bf16.msra.mxu1 %v17804_v16  ;;  %v17800_v16 = vld [vmem:[%s18169_s4 + $0x2c] sm:$0xff]  }
 0x36d   : > { %13914 = vmatprep.subr.bf16.mxu1 %v18102_v1 }
 0x36e   : > { %13831 = vmatmul.mubr.msk.bf16.gmra.mrb[4].mxu1 %vm536_vm3, %v17796_v5  ;;  %v8178_v5 = vsel %vm1080_vm1, %v8175_v8, %v8177_v41  ;;  %v8183_v8 = vrot.slane %v19888_v50, 1 }
 0x36f   : > { %14975 = vmatmul.mubr.msk.bf16.gmra.mrb[44].mxu0 %vm536_vm3, %v8172_v61  ;;  %13834 = vmatprep.mubr.msk.bf16.mxu1 %vm18103_vm0, %v18102_v1  ;;  %v8179_v61 = vrot.slane %v19852_v3, 1 }
 0x370   : > { %14978 = vmatprep.mubr.msk.bf16.mxu0 %vm18103_vm0, %v18102_v1  ;;  %13915 = vmatpush3.bf16.msra.mxu1 %v17811_v4  ;;  %v17801_v4 = vld [vmem:[%s18169_s4 + $0x34] sm:$0xff]  }
 0x371   : > { %13916 = vmatprep.subr.bf16.mxu1 %v18102_v1  ;;  %v8180_v51 = vsel %vm1080_vm1, %v8177_v41, %v8179_v61  ;;  %v8185_v41 = vrot.slane %v19906_v2, 1 }
 0x374   : > { %13917 = vmatpush3.bf16.msra.mxu1 %v17818_v57  ;;  %v8181_v57 = vrot.slane %v19870_v31, 1 }
 0x375   : > { %14002 = vmatprep.subr.bf16.mxu1 %v18102_v1 }
 0x376   : > { %13835 = vmatmul.mubr.msk.bf16.gmra.mrb[8].mxu1 %vm536_vm3, %v17798_v21  ;;  %v17803_v21 = vld [vmem:[%s18169_s4 + $0x3c] sm:$0xff]  }
 0x377   : > { %14979 = vmatmul.mubr.msk.bf16.gmra.mrb[48].mxu0 %vm536_vm3, %v8174_v49  ;;  %13838 = vmatprep.mubr.msk.bf16.mxu1 %vm18103_vm0, %v18102_v1  ;;  %v8182_v49 = vsel %vm1080_vm1, %v8179_v61, %v8181_v57  ;;  %v8187_v61 = vrot.slane %v19924_v34, 1 }
 0x378   : > { %14982 = vmatprep.mubr.msk.bf16.mxu0 %vm18103_vm0, %v18102_v1 }
 0x37e   : > { %13839 = vmatmul.mubr.msk.bf16.gmra.mrb[12].mxu1 %vm536_vm3, %v17799_v36  ;;  %v17805_v36 = vld [vmem:[%s18169_s4 + $0x44] sm:$0xff]  }
 0x37f   : > { %14983 = vmatmul.mubr.msk.bf16.gmra.mrb[52].mxu0 %vm536_vm3, %v8176_v13  ;;  %13842 = vmatprep.mubr.msk.bf16.mxu1 %vm18103_vm0, %v18102_v1  ;;  %v8184_v13 = vsel %vm1080_vm1, %v8181_v57, %v8183_v8  ;;  %v8189_v57 = vrot.slane %v19942_v24, 1 }
 0x380   : > { %14986 = vmatprep.mubr.msk.bf16.mxu0 %vm18103_vm0, %v18102_v1 }
 0x386   : > { %13843 = vmatmul.mubr.msk.bf16.gmra.mrb[16].mxu1 %vm536_vm3, %v17800_v16  ;;  %v17806_v16 = vld [vmem:[%s18169_s4 + $0x4c] sm:$0xff]  }
 0x387   : > { %14987 = vmatmul.mubr.msk.bf16.gmra.mrb[56].mxu0 %vm536_vm3, %v8178_v5  ;;  %13846 = vmatprep.mubr.msk.bf16.mxu1 %vm18103_vm0, %v18102_v1  ;;  %v8186_v5 = vsel %vm1080_vm1, %v8183_v8, %v8185_v41  ;;  %v8541_v8 = vrot.slane %v7646_v12, 1  ;;  %v17809_v12 = vld [vmem:[%s18169_s4 + $0x64] sm:$0xff]  }
 0x388   : > { %14990 = vmatprep.mubr.msk.bf16.mxu0 %vm18103_vm0, %v18102_v1 }
 0x38e   : > { %13847 = vmatmul.mubr.msk.bf16.gmra.mrb[20].mxu1 %vm536_vm3, %v17801_v4  ;;  %v17807_v4 = vld [vmem:[%s18169_s4 + $0x54] sm:$0xff]  }
 0x38f   : > { %14991 = vmatmul.mubr.msk.bf16.gmra.mrb[60].mxu0 %vm536_vm3, %v8180_v51  ;;  %13850 = vmatprep.mubr.msk.bf16.mxu1 %vm18103_vm0, %v18102_v1  ;;  %v8188_v51 = vsel %vm1080_vm1, %v8185_v41, %v8187_v61 }
 0x390   : > { %14994 = vmatprep.mubr.msk.bf16.mxu0 %vm18103_vm0, %v18102_v1 }
 0x396   : > { %13851 = vmatmul.mubr.msk.bf16.gmra.mrb[24].mxu1 %vm536_vm3, %v17803_v21  ;;  %v8534_v21 = vshrl.u32 %v19963_v43, 16 }
 0x397   : > { %14995 = vmatmul.mubr.msk.bf16.gmra.mrb[64].mxu0 %vm536_vm3, %v8182_v49  ;;  %13854 = vmatprep.mubr.msk.bf16.mxu1 %vm18103_vm0, %v18102_v1  ;;  %v8537_v49 = vshll.u32 %v19963_v43, 16 }
 0x398   : > { %14998 = vmatprep.mubr.msk.bf16.mxu0 %vm18103_vm0, %v18102_v1  ;;  %v8536_v41 = vrot.slane %v8534_v21, 1  ;;  %v8550_v21 = vrot.slane %v7658_v38, 2  ;;  %v17813_v38 = vld [vmem:[%s18169_s4 + $0x74] sm:$0xff]  }
 0x39e   : > { %13855 = vmatmul.mubr.msk.bf16.gmra.mrb[28].mxu1 %vm536_vm3, %v17805_v36  ;;  %v17808_v36 = vld [vmem:[%s18169_s4 + $0x5c] sm:$0xff]  }
 0x39f   : > { %14999 = vmatmul.mubr.msk.bf16.gmra.mrb[68].mxu0 %vm536_vm3, %v8184_v13  ;;  %13858 = vmatprep.mubr.msk.bf16.mxu1 %vm18103_vm0, %v18102_v1  ;;  %v8190_v13 = vsel %vm1080_vm1, %v8187_v61, %v8189_v57  ;;  %v17817_v57 = vld [vmem:[%s22530_s1 + $0x268] sm:$0xff]  }
 0x3a0   : > { %15002 = vmatprep.mubr.msk.bf16.mxu0 %vm18103_vm0, %v18102_v1 }
 0x3a6   : > { %13859 = vmatmul.mubr.msk.bf16.gmra.mrb[32].mxu1 %vm536_vm3, %v17806_v16  ;;  %v8539_v16 = vrot.slane %v8537_v49, 2  ;;  %v17825_v49 = vld [vmem:[%s22530_s1 + $0x270] sm:$0xff]  }
 0x3a7   : > { %15003 = vmatmul.mubr.msk.bf16.gmra.mrb[72].mxu0 %vm536_vm3, %v8186_v5  ;;  %13862 = vmatprep.mubr.msk.bf16.mxu1 %vm18103_vm0, %v18102_v1  ;;  %v8542_v5 = vrot.slane %v7642_v45, 2  ;;  %v8545_v45 = vrot.slane %v7654_v32, 1  ;;  %v8549_v32 = vrot.slane %v7662_v56, 1 }
 0x3a8   : > { %15006 = vmatprep.mubr.msk.bf16.mxu0 %vm18103_vm0, %v18102_v1  ;;  %v8540_v24 = vor.u32 %v8539_v16, %v8536_v41  ;;  %v17814_v16 = vld [vmem:[%s18169_s4 + $0x7c] sm:$0xff]  }
 0x3a9   : > { %v8543_v43 = vor.u32 %v8542_v5, %v8541_v8  ;;  %v8551_v8 = vor.u32 %v8550_v21, %v8549_v32  ;;  %v22749_v32 = vshrl.u32 %v19726_v55, 16 }
 0x3ab   : > { %v8544_v61 = vsel %vm1466_vm4, %v8540_v24, %v8543_v43  ;;  %v17815_v24 = vld [vmem:[%s18169_s4 + $0x84] sm:$0xff]   ;;  %v8577_v21 = vrot.slane %v22749_v32, 1 }
 0x3ae   : > { %13863 = vmatmul.mubr.msk.bf16.gmra.mrb[36].mxu1 %vm536_vm3, %v17807_v4  ;;  %v8546_v4 = vrot.slane %v7650_v37, 2 }
 0x3af   : > { %15007 = vmatmul.mubr.msk.bf16.gmra.mrb[76].mxu0 %vm536_vm3, %v8188_v51  ;;  %13866 = vmatprep.mubr.msk.bf16.mxu1 %vm18103_vm0, %v18102_v1 }
 0x3b0   : > { %15010 = vmatprep.mubr.msk.bf16.mxu0 %vm18103_vm0, %v18102_v1  ;;  %v8547_v51 = vor.u32 %v8546_v4, %v8545_v45  ;;  %v17820_v4 = vld [vmem:[%s18169_s4 + $0x9c] sm:$0xff]  }
 0x3b2   : > { %v8548_v37 = vsel %vm1466_vm4, %v8543_v43, %v8547_v51  ;;  %v8552_v56 = vsel %vm1466_vm4, %v8547_v51, %v8551_v8  ;;  %v8574_v51 = vrot.slane %v22748_v23, 2  ;;  %v22755_v23 = vshrl.u32 %v19785_v29, 16 }
 0x3b6   : > { %13867 = vmatmul.mubr.msk.bf16.gmra.mrb[40].mxu1 %vm536_vm3, %v17808_v36  ;;  %v8553_v36 = vrot.slane %v7670_v52, 1 }
 0x3b7   : > { %15011 = vmatmul.mubr.msk.bf16.gmra.mrb[80].mxu0 %vm536_vm3, %v8190_v13  ;;  %13870 = vmatprep.mubr.msk.bf16.mxu1 %vm18103_vm0, %v18102_v1  ;;  %v8554_v13 = vrot.slane %v7666_v40, 2  ;;  %v8558_v40 = vrot.slane %v7674_v54, 2  ;;  %v8563_v54 = vor.u32 %v8562_v25, %v8561_v15  ;;  %v20358_v25 = vld [vmem:[%s18169_s4 + $0x1c] sm:$0xff]  }
 0x3b8   : > { %15022 = vmatprep.mubr.msk.bf16.mxu0 %vm18103_vm0, %v18102_v1 }
 0x3b9   : > { %v8555_v41 = vor.u32 %v8554_v13, %v8553_v36  ;;  %v8559_v5 = vor.u32 %v8558_v40, %v8557_v62  ;;  %v8568_v45 = vsel %vm1466_vm4, %v8563_v54, %v8567_v35  ;;  %v17822_v13 = vld [vmem:[%s18169_s4 + $0xac] sm:$0xff]  }
 0x3bb   : > { %v8556_v52 = vsel %vm1466_vm4, %v8551_v8, %v8555_v41  ;;  %v8560_v43 = vsel %vm1466_vm4, %v8555_v41, %v8559_v5  ;;  %v22751_v41 = vshrl.u32 %v19745_v53, 16 }
 0x3be   : > { %13871 = vmatmul.mubr.msk.bf16.gmra.mrb[44].mxu1 %vm536_vm3, %v17809_v12  ;;  %v17816_v12 = vld [vmem:[%s18169_s4 + $0x8c] sm:$0xff]  }
 0x3bf   : > { %15023 = vmatmul.mubr.msk.bf16.vlgmr.msra.gmra.mrb[0].mxu0 %vm536_vm3, %v8544_v61  ;;  %13874 = vmatprep.mubr.msk.bf16.mxu1 %vm18103_vm0, %v18102_v1  ;;  %v8564_v61 = vsel %vm1466_vm4, %v8559_v5, %v8563_v54 }
 0x3c0   : > { %15107 = vmatpush3.bf16.msra.mxu0 %v17810_v7  ;;  %15026 = vmatprep.mubr.msk.bf16.mxu0 %vm18103_vm0, %v18102_v1  ;;  %v17819_v7 = vld [vmem:[%s18169_s4 + $0x94] sm:$0xff]  }
 0x3c1   : > { %15108 = vmatprep.subr.bf16.mxu0 %v18102_v1 }
 0x3c4   : > { %15109 = vmatpush3.bf16.msra.mxu0 %v17817_v57  ;;  %v8575_v57 = vor.u32 %v8574_v51, %v8573_v9  ;;  %v8589_v51 = vrot.slane %v22755_v23, 1 }
 0x3c5   : > { %15110 = vmatprep.subr.bf16.mxu0 %v18102_v1 }
 0x3c6   : > { %13875 = vmatmul.mubr.msk.bf16.gmra.mrb[48].mxu1 %vm536_vm3, %v17812_v6  ;;  %v2765_v6 = vld [vmem:[%s18169_s4 + $0xc] sm:$0xf]  ;;  %v8576_v27 = vsel %vm1466_vm4, %v8571_v58, %v8575_v57 }
 0x3c7   : > { %15027 = vmatmul.mubr.msk.bf16.gmra.mrb[4].mxu0 %vm536_vm3, %v8548_v37  ;;  %13878 = vmatprep.mubr.msk.bf16.mxu1 %vm18103_vm0, %v18102_v1  ;;  %v20324_v37 = vld [vmem:[%s18169_s4 + $0x10] sm:$0xf] }
 0x3c8   : > { %15030 = vmatprep.mubr.msk.bf16.mxu0 %vm18103_vm0, %v18102_v1  ;;  %15111 = vmatpush3.bf16.msra.mxu0 %v17825_v49  ;;  %v22750_v49 = vshll.u32 %v19726_v55, 16 }
 0x3c9   : > { %15112 = vmatprep.subr.bf16.mxu0 %v18102_v1 }
 0x3ca   : > { %v8578_v8 = vrot.slane %v22750_v49, 2 }
 0x3cc   : > { %15113 = vmatpush3.bf16.msra.mxu0 %v17832_v22  ;;  %v12092_v22 = vcombine.low %v2765_v6, %v20324_v37 }
 0x3cd   : > { %15198 = vmatprep.subr.bf16.mxu0 %v18102_v1 }
 0x3ce   : > { %13879 = vmatmul.mubr.msk.bf16.gmra.mrb[52].mxu1 %vm536_vm3, %v17813_v38  ;;  %v8579_v38 = vor.u32 %v8578_v8, %v8577_v21  ;;  %v2927_v36 = vshll.u32 %v12092_v22, 16  ;;  %v2925_v40 = vshrl.u32 %v12092_v22, 16  ;;  %v17843_v21 = vld [vmem:[%s22530_s1 + $0xf0] sm:$0xff]  }
 0x3cf   : > { %15031 = vmatmul.mubr.msk.bf16.gmra.mrb[8].mxu0 %vm536_vm3, %v8552_v56  ;;  %13882 = vmatprep.mubr.msk.bf16.mxu1 %vm18103_vm0, %v18102_v1  ;;  %v20340_v56 = vld [vmem:[%s18169_s4 + $0x14] sm:$0xff]   ;;  %v20411_v22 = vld [vmem:[%s18169_s4 + $0x2c] sm:$0xff]  }
 0x3d0   : > { %15034 = vmatprep.mubr.msk.bf16.mxu0 %vm18103_vm0, %v18102_v1  ;;  %v8580_v55 = vsel %vm1466_vm4, %v8575_v57, %v8579_v38  ;;  %v2929_v5 = vrot.slane %v2927_v36, 1  ;;  %v22756_v57 = vshll.u32 %v19785_v29, 16 }
 0x3d2   : > { %v2930_v15 = vor.u32 %v2929_v5, %v2925_v40  ;;  %v8590_v6 = vrot.slane %v22756_v57, 2  ;;  %v2956_v40 = vshll.u32 %v20411_v22, 16 }
 0x3d4   : > { %v8591_v29 = vor.u32 %v8590_v6, %v8589_v51  ;;  %v22762_v51 = vshll.u32 %v19852_v3, 16 }
 0x3d6   : > { %13883 = vmatmul.mubr.msk.bf16.gmra.mrb[56].mxu1 %vm536_vm3, %v17814_v16  ;;  %v8581_v16 = vrot.slane %v22751_v41, 1  ;;  %v22758_v41 = vshll.u32 %v19811_v10, 16  ;;  %v8602_v57 = vrot.slane %v22762_v51, 2 }
 0x3d7   : > { %15035 = vmatmul.mubr.msk.bf16.gmra.mrb[12].mxu0 %vm536_vm3, %v8556_v52  ;;  %13886 = vmatprep.mubr.msk.bf16.mxu1 %vm18103_vm0, %v18102_v1  ;;  %v22752_v52 = vshll.u32 %v19745_v53, 16 }
 0x3d8   : > { %15038 = vmatprep.mubr.msk.bf16.mxu0 %vm18103_vm0, %v18102_v1 }
 0x3d9   : > { %v8582_v62 = vrot.slane %v22752_v52, 2 }
 0x3de   : > { %13887 = vmatmul.mubr.msk.bf16.gmra.mrb[60].mxu1 %vm536_vm3, %v17815_v24  ;;  %v2932_v24 = vshll.u32 %v20340_v56, 16 }
 0x3df   : > { %15039 = vmatmul.mubr.msk.bf16.gmra.mrb[16].mxu0 %vm536_vm3, %v8560_v43  ;;  %13890 = vmatprep.mubr.msk.bf16.mxu1 %vm18103_vm0, %v18102_v1  ;;  %v8583_v43 = vor.u32 %v8582_v62, %v8581_v16  ;;  %v8594_v16 = vrot.slane %v22758_v41, 2 }
 0x3e0   : > { %15042 = vmatprep.mubr.msk.bf16.mxu0 %vm18103_vm0, %v18102_v1  ;;  %v2934_v53 = vrot.slane %v2932_v24, 1 }
 0x3e1   : > { %v8584_v54 = vsel %vm1466_vm4, %v8579_v38, %v8583_v43  ;;  %v17850_v38 = vld [vmem:[%s22530_s1 + $0xf8] sm:$0xff]  }
 0x3e2   : > { %v2935_v35 = vsel %vm339_vm2, %v2930_v15, %v2934_v53  ;;  %v20437_v15 = vld [vmem:[%s18169_s4 + $0x34] sm:$0xff]  }
 0x3e6   : > { %13891 = vmatmul.mubr.msk.bf16.gmra.mrb[64].mxu1 %vm536_vm3, %v17816_v12  ;;  %v22753_v12 = vshrl.u32 %v19764_v42, 16 }
 0x3e7   : > { %15043 = vmatmul.mubr.msk.bf16.gmra.mrb[20].mxu0 %vm536_vm3, %v8564_v61  ;;  %13894 = vmatprep.mubr.msk.bf16.mxu1 %vm18103_vm0, %v18102_v1 }
 0x3e8   : > { %15046 = vmatprep.mubr.msk.bf16.mxu0 %vm18103_vm0, %v18102_v1  ;;  %v8585_v61 = vrot.slane %v22753_v12, 1 }
 0x3ea   : > { %v8587_v44 = vor.u32 %v8586_v60, %v8585_v61  ;;  %v22760_v61 = vshll.u32 %v19834_v46, 16 }
 0x3ec   : > { %v8588_v9 = vsel %vm1466_vm4, %v8583_v43, %v8587_v44  ;;  %v8592_v36 = vsel %vm1466_vm4, %v8587_v44, %v8591_v29  ;;  %v2958_v43 = vrot.slane %v2956_v40, 1  ;;  %v8598_v63 = vrot.slane %v22760_v61, 2 }
 0x3ee   : > { %13895 = vmatmul.mubr.msk.bf16.gmra.mrb[68].mxu1 %vm536_vm3, %v17819_v7  ;;  %v2936_v7 = vshrl.u32 %v20340_v56, 16 }
 0x3ef   : > { %15047 = vmatmul.mubr.msk.bf16.gmra.mrb[24].mxu0 %vm536_vm3, %v8568_v45  ;;  %13898 = vmatprep.mubr.msk.bf16.mxu1 %vm18103_vm0, %v18102_v1  ;;  %v2940_v45 = vshll.u32 %v20358_v25, 16 }
 0x3f0   : > { %15050 = vmatprep.mubr.msk.bf16.mxu0 %vm18103_vm0, %v18102_v1  ;;  %v2938_v42 = vor.u32 %v2936_v7, %v2934_v53 }
 0x3f1   : > { %v2942_v58 = vrot.slane %v2940_v45, 1 }
 0x3f6   : > { %13899 = vmatmul.mubr.msk.bf16.gmra.mrb[72].mxu1 %vm536_vm3, %v17820_v4  ;;  %v20382_v4 = vld [vmem:[%s18169_s4 + $0x24] sm:$0xff]  }
 0x3f7   : > { %15051 = vmatmul.mubr.msk.bf16.gmra.mrb[28].mxu0 %vm536_vm3, %v8572_v47  ;;  %13902 = vmatprep.mubr.msk.bf16.mxu1 %vm18103_vm0, %v18102_v1  ;;  %v17834_v47 = vld [vmem:[%s22530_s1 + $0xe8] sm:$0xff]   ;;  %v2948_v32 = vshll.u32 %v20382_v4, 16  ;;  %v2952_v62 = vshrl.u32 %v20382_v4, 16 }
 0x3f8   : > { %15054 = vmatprep.mubr.msk.bf16.mxu0 %vm18103_vm0, %v18102_v1 }
 0x3f9   : > { %v2950_v8 = vrot.slane %v2948_v32, 1 }
 0x3fe   : > { %13903 = vmatmul.mubr.msk.bf16.gmra.mrb[76].mxu1 %vm536_vm3, %v17821_v59  ;;  %v2943_v59 = vsel %vm339_vm2, %v2938_v42, %v2942_v58 }
 0x3ff   : > { %15055 = vmatmul.mubr.msk.bf16.gmra.mrb[32].mxu0 %vm536_vm3, %v8576_v27  ;;  %13906 = vmatprep.mubr.msk.bf16.mxu1 %vm18103_vm0, %v18102_v1  ;;  %v2944_v27 = vshrl.u32 %v20358_v25, 16 }
 0x400   : > { %15058 = vmatprep.mubr.msk.bf16.mxu0 %vm18103_vm0, %v18102_v1 }
 0x401   : > { %v2946_v49 = vor.u32 %v2944_v27, %v2942_v58  ;;  %v20458_v58 = vld [vmem:[%s18169_s4 + $0x3c] sm:$0xff]  }
 0x403   : > { %v2951_v52 = vsel %vm339_vm2, %v2946_v49, %v2950_v8 }
 0x406   : > { %13907 = vmatmul.mubr.msk.bf16.gmra.mrb[80].mxu1 %vm536_vm3, %v17822_v13  ;;  %v22757_v13 = vshrl.u32 %v19811_v10, 16  ;;  %v2954_v10 = vor.u32 %v2952_v62, %v2950_v8  ;;  %v20479_v8 = vld [vmem:[%s18169_s4 + $0x44] sm:$0xff]  }
 0x407   : > { %15059 = vmatmul.mubr.msk.bf16.gmra.mrb[36].mxu0 %vm536_vm3, %v8580_v55  ;;  %13918 = vmatprep.mubr.msk.bf16.mxu1 %vm18103_vm0, %v18102_v1 }
 0x408   : > { %15062 = vmatprep.mubr.msk.bf16.mxu0 %vm18103_vm0, %v18102_v1  ;;  %v8593_v55 = vrot.slane %v22757_v13, 1  ;;  %v2959_v60 = vsel %vm339_vm2, %v2954_v10, %v2958_v43 }
 0x40a   : > { %v8595_v5 = vor.u32 %v8594_v16, %v8593_v55  ;;  %v22764_v55 = vshll.u32 %v19870_v31, 16 }
 0x40c   : > { %v8596_v53 = vsel %vm1466_vm4, %v8591_v29, %v8595_v5  ;;  %v8606_v41 = vrot.slane %v22764_v55, 2 }
 0x40e   : > { %13919 = vmatmul.mubr.msk.bf16.vlgmr.msra.gmra.mrb[0].mxu1 %vm536_vm3, %v2935_v35  ;;  %v2960_v35 = vshrl.u32 %v20411_v22, 16 }
 0x40f   : > { %15063 = vmatmul.mubr.msk.bf16.gmra.mrb[40].mxu0 %vm536_vm3, %v8584_v54  ;;  %13922 = vmatprep.mubr.msk.bf16.mxu1 %vm18103_vm0, %v18102_v1  ;;  %v22759_v54 = vshrl.u32 %v19834_v46, 16 }
 0x410   : > { %15066 = vmatprep.mubr.msk.bf16.mxu0 %vm18103_vm0, %v18102_v1  ;;  %14003 = vmatpush3.bf16.msra.mxu1 %v17827_v18  ;;  %v2964_v18 = vshll.u32 %v20437_v15, 16  ;;  %v2962_v46 = vor.u32 %v2960_v35, %v2958_v43 }
 0x411   : > { %14004 = vmatprep.subr.bf16.mxu1 %v18102_v1  ;;  %v8597_v12 = vrot.slane %v22759_v54, 1 }
 0x412   : > { %v2966_v42 = vrot.slane %v2964_v18, 1 }
 0x413   : > { %v8599_v44 = vor.u32 %v8598_v63, %v8597_v12  ;;  %v22765_v12 = vshrl.u32 %v19888_v50, 16  ;;  %v22766_v63 = vshll.u32 %v19888_v50, 16 }
 0x414   : > { %14005 = vmatpush3.bf16.msra.mxu1 %v17834_v47  ;;  %v2967_v6 = vsel %vm339_vm2, %v2962_v46, %v2966_v42  ;;  %v2984_v46 = vshrl.u32 %v20479_v8, 16 }
 0x415   : > { %14006 = vmatprep.subr.bf16.mxu1 %v18102_v1  ;;  %v8600_v47 = vsel %vm1466_vm4, %v8595_v5, %v8599_v44  ;;  %v2980_v5 = vshll.u32 %v20479_v8, 16  ;;  %v8609_v61 = vrot.slane %v22765_v12, 1 }
 0x416   : > { %13923 = vmatmul.mubr.msk.bf16.gmra.mrb[4].mxu1 %vm536_vm3, %v2943_v59  ;;  %v2968_v59 = vshrl.u32 %v20437_v15, 16 }
 0x417   : > { %15067 = vmatmul.mubr.msk.bf16.gmra.mrb[44].mxu0 %vm536_vm3, %v8588_v9  ;;  %13926 = vmatprep.mubr.msk.bf16.mxu1 %vm18103_vm0, %v18102_v1  ;;  %v22761_v9 = vshrl.u32 %v19852_v3, 16  ;;  %v2982_v43 = vrot.slane %v2980_v5, 1 }
 0x418   : > { %15070 = vmatprep.mubr.msk.bf16.mxu0 %vm18103_vm0, %v18102_v1  ;;  %14007 = vmatpush3.bf16.msra.mxu1 %v17843_v21  ;;  %v2972_v21 = vshll.u32 %v20458_v58, 16  ;;  %v2970_v3 = vor.u32 %v2968_v59, %v2966_v42 }
 0x419   : > { %14008 = vmatprep.subr.bf16.mxu1 %v18102_v1  ;;  %v8601_v23 = vrot.slane %v22761_v9, 1  ;;  %v2986_v50 = vor.u32 %v2984_v46, %v2982_v43 }
 0x41a   : > { %v2974_v49 = vrot.slane %v2972_v21, 1 }
 0x41b   : > { %v8603_v29 = vor.u32 %v8602_v57, %v8601_v23  ;;  %v20521_v23 = vld [vmem:[%s18169_s4 + $0x54] sm:$0xff]   ;;  %v22767_v57 = vshrl.u32 %v19906_v2, 16 }
 0x41c   : > { %14009 = vmatpush3.bf16.msra.mxu1 %v17850_v38  ;;  %v2975_v16 = vsel %vm339_vm2, %v2970_v3, %v2974_v49 }
 0x41d   : > { %14094 = vmatprep.subr.bf16.mxu1 %v18102_v1  ;;  %v8604_v38 = vsel %vm1466_vm4, %v8599_v44, %v8603_v29 }
 0x41e   : > { %13927 = vmatmul.mubr.msk.bf16.gmra.mrb[8].mxu1 %vm536_vm3, %v2951_v52  ;;  %v2976_v52 = vshrl.u32 %v20458_v58, 16 }
 0x41f   : > { %15071 = vmatmul.mubr.msk.bf16.gmra.mrb[48].mxu0 %vm536_vm3, %v8592_v36  ;;  %13930 = vmatprep.mubr.msk.bf16.mxu1 %vm18103_vm0, %v18102_v1  ;;  %v22763_v36 = vshrl.u32 %v19870_v31, 16 }
 0x420   : > { %15074 = vmatprep.mubr.msk.bf16.mxu0 %vm18103_vm0, %v18102_v1  ;;  %v2978_v31 = vor.u32 %v2976_v52, %v2974_v49 }
 0x421   : > { %v8605_v13 = vrot.slane %v22763_v36, 1  ;;  %v22675_v36 = vshll.u32 %v20521_v23, 16 }
 0x422   : > { %v2983_v44 = vsel %vm339_vm2, %v2978_v31, %v2982_v43  ;;  %v22769_v31 = vshll.u32 %v19924_v34, 16 }
 0x423   : > { %v8607_v10 = vor.u32 %v8606_v41, %v8605_v13  ;;  %v2998_v55 = vrot.slane %v22675_v36, 1  ;;  %v20542_v41 = vld [vmem:[%s18169_s4 + $0x5c] sm:$0xff]  }
 0x424   : > { %v8618_v43 = vrot.slane %v22769_v31, 2  ;;  %v18017_v31 = vld [vmem:[%s18169_s4 + $0x28] sm:$0xf] }
 0x425   : > { %v8608_v54 = vsel %vm1466_vm4, %v8603_v29, %v8607_v10  ;;  %v22768_v29 = vshll.u32 %v19906_v2, 16 }
 0x426   : > { %13931 = vmatmul.mubr.msk.bf16.gmra.mrb[12].mxu1 %vm536_vm3, %v2959_v60  ;;  %v8610_v60 = vrot.slane %v22766_v63, 2  ;;  %v22669_v63 = vshll.u32 %v20542_v41, 16 }
 0x427   : > { %15075 = vmatmul.mubr.msk.bf16.gmra.mrb[52].mxu0 %vm536_vm3, %v8596_v53  ;;  %13934 = vmatprep.mubr.msk.bf16.mxu1 %vm18103_vm0, %v18102_v1  ;;  %v20500_v53 = vld [vmem:[%s18169_s4 + $0x4c] sm:$0xff]   ;;  %v8614_v3 = vrot.slane %v22768_v29, 2  ;;  %v22672_v29 = vshrl.u32 %v20542_v41, 16 }
 0x428   : > { %15078 = vmatprep.mubr.msk.bf16.mxu0 %vm18103_vm0, %v18102_v1  ;;  %v2988_v42 = vshll.u32 %v20500_v53, 16 }
 0x42a   : > { %v2990_v9 = vrot.slane %v2988_v42, 1 }
 0x42c   : > { %v2991_v49 = vsel %vm339_vm2, %v2986_v50, %v2990_v9  ;;  %v20568_v50 = vld [vmem:[%s18169_s4 + $0x64] sm:$0xff]  }
 0x42e   : > { %13935 = vmatmul.mubr.msk.bf16.gmra.mrb[16].mxu1 %vm536_vm3, %v2967_v6  ;;  %v8613_v6 = vrot.slane %v22767_v57, 1 }
 0x42f   : > { %15079 = vmatmul.mubr.msk.bf16.gmra.mrb[56].mxu0 %vm536_vm3, %v8600_v47  ;;  %13938 = vmatprep.mubr.msk.bf16.mxu1 %vm18103_vm0, %v18102_v1  ;;  %v8611_v47 = vor.u32 %v8610_v60, %v8609_v61  ;;  %v22676_v61 = vshrl.u32 %v20521_v23, 16 }
 0x430   : > { %15082 = vmatprep.mubr.msk.bf16.mxu0 %vm18103_vm0, %v18102_v1  ;;  %v8615_v13 = vor.u32 %v8614_v3, %v8613_v6  ;;  %v22663_v3 = vshll.u32 %v20568_v50, 16 }
 0x431   : > { %v8612_v51 = vsel %vm1466_vm4, %v8607_v10, %v8611_v47  ;;  %v8617_v10 = vrot.slane %v7798_v33, 1 }
 0x433   : > { %v8619_v60 = vor.u32 %v8618_v43, %v8617_v10 }
 0x436   : > { %13939 = vmatmul.mubr.msk.bf16.gmra.mrb[20].mxu1 %vm536_vm3, %v2975_v16  ;;  %v8616_v16 = vsel %vm1466_vm4, %v8611_v47, %v8615_v13  ;;  %v3006_v47 = vrot.slane %v22669_v63, 1 }
 0x437   : > { %15083 = vmatmul.mubr.msk.bf16.gmra.mrb[60].mxu0 %vm536_vm3, %v8604_v38  ;;  %13942 = vmatprep.mubr.msk.bf16.mxu1 %vm18103_vm0, %v18102_v1  ;;  %v2992_v38 = vshrl.u32 %v20500_v53, 16 }
 0x438   : > { %15086 = vmatprep.mubr.msk.bf16.mxu0 %vm18103_vm0, %v18102_v1 }
 0x439   : > { %v2994_v2 = vor.u32 %v2992_v38, %v2990_v9  ;;  %v8620_v9 = vsel %vm1466_vm4, %v8615_v13, %v8619_v60  ;;  %v3010_v13 = vor.u32 %v22672_v29, %v3006_v47 }
 0x43b   : > { %v2999_v12 = vsel %vm339_vm2, %v2994_v2, %v2998_v55  ;;  %v3014_v2 = vrot.slane %v22663_v3, 1 }
 0x43e   : > { %13943 = vmatmul.mubr.msk.bf16.gmra.mrb[24].mxu1 %vm536_vm3, %v2983_v44  ;;  %v3002_v44 = vor.u32 %v22676_v61, %v2998_v55  ;;  %v20585_v55 = vld [vmem:[%s18169_s4 + $0x6c] sm:$0xff]  }
 0x43f   : > { %15087 = vmatmul.mubr.msk.bf16.gmra.mrb[64].mxu0 %vm536_vm3, %v8608_v54  ;;  %13946 = vmatprep.mubr.msk.bf16.mxu1 %vm18103_vm0, %v18102_v1  ;;  %v20550_v54 = vld [vmem:[%s18169_s4 + $0xcc] ss:$0 sps:$4 sm:$0x33]  }
 0x440   : > { %15090 = vmatprep.mubr.msk.bf16.mxu0 %vm18103_vm0, %v18102_v1  ;;  %v8622_v33 = vshrl.u32 %v20550_v54, 16  ;;  %v8625_v34 = vshll.u32 %v20550_v54, 16  ;;  %v3007_v6 = vsel %vm339_vm2, %v3002_v44, %v3006_v47  ;;  %v18018_v47 = vld [vmem:[%s18169_s4 + $0x2c] sm:$0xff]  }
 0x442   : > { %v8627_v57 = vrot.slane %v8625_v34, 2  ;;  %v22655_v34 = vshll.u32 %v20585_v55, 16 }
 0x446   : > { %13947 = vmatmul.mubr.msk.bf16.gmra.mrb[28].mxu1 %vm536_vm3, %v2991_v49 }
 0x447   : > { %15091 = vmatmul.mubr.msk.bf16.gmra.mrb[68].mxu0 %vm536_vm3, %v8612_v51  ;;  %13950 = vmatprep.mubr.msk.bf16.mxu1 %vm18103_vm0, %v18102_v1  ;;  %v8624_v51 = vrot.slane %v8622_v33, 1  ;;  %v22666_v33 = vshrl.u32 %v20568_v50, 16 }
 0x448   : > { %15094 = vmatprep.mubr.msk.bf16.mxu0 %vm18103_vm0, %v18102_v1 }
 0x449   : > { %v8628_v49 = vor.u32 %v8627_v57, %v8624_v51  ;;  %v3022_v51 = vrot.slane %v22655_v34, 1  ;;  %v20605_v57 = vld [vmem:[%s18169_s4 + $0x74] sm:$0xff]  }
 0x44b   : > { %v8629_v10 = vsel %vm1466_vm4, %v8619_v60, %v8628_v49  ;;  %v3018_v60 = vor.u32 %v22666_v33, %v3014_v2  ;;  %v17842_v49 = vld [vmem:[%s22530_s1 + $0x280] sm:$0xff]  }
 0x44e   : > { %13951 = vmatmul.mubr.msk.bf16.gmra.mrb[32].mxu1 %vm536_vm3, %v2999_v12  ;;  %v3015_v12 = vsel %vm339_vm2, %v3010_v13, %v3014_v2  ;;  %v3023_v13 = vsel %vm339_vm2, %v3018_v60, %v3022_v51  ;;  %v18019_v2 = vld [vmem:[%s18169_s4 + $0x34] sm:$0xff]  }
 0x44f   : > { %15095 = vmatmul.mubr.msk.bf16.gmra.mrb[72].mxu0 %vm536_vm3, %v8616_v16  ;;  %13954 = vmatprep.mubr.msk.bf16.mxu1 %vm18103_vm0, %v18102_v1  ;;  %v8960_v16 = vld [vmem:[%s18169_s4 + $0x24] sm:$0xc] }
 0x450   : > { %15098 = vmatprep.mubr.msk.bf16.mxu0 %vm18103_vm0, %v18102_v1  ;;  %v12533_v43 = vcombine.low %v8960_v16, %v18017_v31  ;;  %v22660_v16 = vshrl.u32 %v20585_v55, 16  ;;  %v8975_v31 = vrot.slane %v18019_v2, 2 }
 0x452   : > { %v8972_v44 = vrot.slane %v12533_v43, 2  ;;  %v17849_v43 = vld [vmem:[%s22530_s1 + $0x288] sm:$0xff]  }
 0x456   : > { %13955 = vmatmul.mubr.msk.bf16.gmra.mrb[36].mxu1 %vm536_vm3, %v3007_v6 }
 0x457   : > { %15099 = vmatmul.mubr.msk.bf16.gmra.mrb[76].mxu0 %vm536_vm3, %v8620_v9  ;;  %13958 = vmatprep.mubr.msk.bf16.mxu1 %vm18103_vm0, %v18102_v1  ;;  %v8973_v9 = vrot.slane %v18018_v47, 2  ;;  %v20629_v47 = vld [vmem:[%s18169_s4 + $0x7c] sm:$0xff]  }
 0x458   : > { %15102 = vmatprep.mubr.msk.bf16.mxu0 %vm18103_vm0, %v18102_v1  ;;  %v22659_v34 = vshrl.u32 %v20629_v47, 16 }
 0x459   : > { %v8974_v6 = vsel %vm1906_vm5, %v8972_v44, %v8973_v9  ;;  %v8976_v60 = vsel %vm1906_vm5, %v8973_v9, %v8975_v31  ;;  %v18020_v9 = vld [vmem:[%s18169_s4 + $0x3c] sm:$0xff]  }
 0x45a   : > { %v8977_v2 = vrot.slane %v18020_v9, 2 }
 0x45e   : > { %13959 = vmatmul.mubr.msk.bf16.gmra.mrb[40].mxu1 %vm536_vm3, %v3015_v12  ;;  %v3026_v12 = vor.u32 %v22660_v16, %v3022_v51  ;;  %v17856_v51 = vld [vmem:[%s22530_s1 + $0x290] sm:$0xff]  }
 0x45f   : > { %15103 = vmatmul.mubr.msk.bf16.gmra.mrb[80].mxu0 %vm536_vm3, %v8629_v10  ;;  %13962 = vmatprep.mubr.msk.bf16.mxu1 %vm18103_vm0, %v18102_v1  ;;  %v22654_v10 = vshll.u32 %v20605_v57, 16 }
 0x460   : > { %15114 = vmatprep.mubr.msk.bf16.mxu0 %vm18103_vm0, %v18102_v1 }
 0x461   : > { %v3030_v44 = vrot.slane %v22654_v10, 1  ;;  %v20652_v10 = vld [vmem:[%s18169_s4 + $0x84] sm:$0xff]  }
 0x466   : > { %13963 = vmatmul.mubr.msk.bf16.gmra.mrb[44].mxu1 %vm536_vm3, %v3023_v13  ;;  %v22656_v13 = vshll.u32 %v20629_v47, 16 }
 0x467   : > { %15115 = vmatmul.mubr.msk.bf16.vlgmr.msra.gmra.mrb[0].mxu0 %vm536_vm3, %v8974_v6  ;;  %13966 = vmatprep.mubr.msk.bf16.mxu1 %vm18103_vm0, %v18102_v1  ;;  %v3031_v6 = vsel %vm339_vm2, %v3026_v12, %v3030_v44 }
 0x468   : > { %15199 = vmatpush3.bf16.msra.mxu0 %v17842_v49  ;;  %15118 = vmatprep.mubr.msk.bf16.mxu0 %vm18103_vm0, %v18102_v1  ;;  %v22657_v49 = vshrl.u32 %v20605_v57, 16  ;;  %v3038_v12 = vrot.slane %v22656_v13, 1 }
 0x469   : > { %15200 = vmatprep.subr.bf16.mxu0 %v18102_v1 }
 0x46c   : > { %15201 = vmatpush3.bf16.msra.mxu0 %v17849_v43  ;;  %v3034_v43 = vor.u32 %v22657_v49, %v3030_v44  ;;  %v22658_v44 = vshll.u32 %v20652_v10, 16  ;;  %v22662_v49 = vshrl.u32 %v20652_v10, 16 }
 0x46d   : > { %15202 = vmatprep.subr.bf16.mxu0 %v18102_v1 }
 0x46e   : > { %13967 = vmatmul.mubr.msk.bf16.gmra.mrb[48].mxu1 %vm536_vm3, %v3031_v6  ;;  %v8978_v6 = vsel %vm1906_vm5, %v8975_v31, %v8977_v2  ;;  %v3039_v9 = vsel %vm339_vm2, %v3034_v43, %v3038_v12  ;;  %v3042_v31 = vor.u32 %v22659_v34, %v3038_v12  ;;  %v3046_v43 = vrot.slane %v22658_v44, 1  ;;  %v18022_v12 = vld [vmem:[%s18169_s4 + $0x4c] sm:$0xff]   ;;  %v20693_v34 = vld [vmem:[%s18169_s4 + $0x94] sm:$0xff]  }
 0x46f   : > { %15119 = vmatmul.mubr.msk.bf16.gmra.mrb[4].mxu0 %vm536_vm3, %v8976_v60  ;;  %13970 = vmatprep.mubr.msk.bf16.mxu1 %vm18103_vm0, %v18102_v1  ;;  %v17858_v60 = vld [vmem:[%s22530_s1 + $0x298] sm:$0xff]   ;;  %v8981_v44 = vrot.slane %v18022_v12, 2  ;;  %v22664_v12 = vshll.u32 %v20693_v34, 16  ;;  %v22668_v3 = vshrl.u32 %v20693_v34, 16 }
 0x470   : > { %15122 = vmatprep.mubr.msk.bf16.mxu0 %vm18103_vm0, %v18102_v1  ;;  %15203 = vmatpush3.bf16.msra.mxu0 %v17856_v51  ;;  %v18021_v51 = vld [vmem:[%s18169_s4 + $0x44] sm:$0xff]  }
 0x471   : > { %15204 = vmatprep.subr.bf16.mxu0 %v18102_v1  ;;  %v8979_v13 = vrot.slane %v18021_v51, 2 }
 0x474   : > { %15205 = vmatpush3.bf16.msra.mxu0 %v17858_v60  ;;  %v20675_v60 = vld [vmem:[%s18169_s4 + $0x8c] sm:$0xff]  }
 0x475   : > { %15290 = vmatprep.subr.bf16.mxu0 %v18102_v1  ;;  %v22661_v51 = vshll.u32 %v20675_v60, 16  ;;  %v22665_v16 = vshrl.u32 %v20675_v60, 16 }
 0x476   : > { %13971 = vmatmul.mubr.msk.bf16.gmra.mrb[52].mxu1 %vm536_vm3, %v3039_v9  ;;  %v3047_v9 = vsel %vm339_vm2, %v3042_v31, %v3046_v43 }
 0x477   : > { %15123 = vmatmul.mubr.msk.bf16.gmra.mrb[8].mxu0 %vm536_vm3, %v8978_v6  ;;  %13974 = vmatprep.mubr.msk.bf16.mxu1 %vm18103_vm0, %v18102_v1  ;;  %v8980_v6 = vsel %vm1906_vm5, %v8977_v2, %v8979_v13  ;;  %v3050_v2 = vor.u32 %v22662_v49, %v3046_v43  ;;  %v3054_v31 = vrot.slane %v22661_v51, 1  ;;  %v18023_v43 = vld [vmem:[%s18169_s4 + $0x54] sm:$0xff]   ;;  %v20711_v49 = vld [vmem:[%s18169_s4 + $0x9c] sm:$0xff]  }
 0x478   : > { %15126 = vmatprep.mubr.msk.bf16.mxu0 %vm18103_vm0, %v18102_v1  ;;  %v8983_v51 = vrot.slane %v18023_v43, 2  ;;  %v22667_v43 = vshll.u32 %v20711_v49, 16  ;;  %v22671_v33 = vshrl.u32 %v20711_v49, 16 }
 0x47e   : > { %13975 = vmatmul.mubr.msk.bf16.gmra.mrb[56].mxu1 %vm536_vm3, %v3047_v9  ;;  %v3055_v9 = vsel %vm339_vm2, %v3050_v2, %v3054_v31  ;;  %v3062_v2 = vrot.slane %v22664_v12, 1 }
 0x47f   : > { %15127 = vmatmul.mubr.msk.bf16.gmra.mrb[12].mxu0 %vm536_vm3, %v8980_v6  ;;  %13978 = vmatprep.mubr.msk.bf16.mxu1 %vm18103_vm0, %v18102_v1  ;;  %v8982_v6 = vsel %vm1906_vm5, %v8979_v13, %v8981_v44  ;;  %v3058_v13 = vor.u32 %v22665_v16, %v3054_v31  ;;  %v18024_v31 = vld [vmem:[%s18169_s4 + $0x5c] sm:$0xff]   ;;  %v20729_v16 = vld [vmem:[%s18169_s4 + $0xa4] sm:$0xff]  }
 0x480   : > { %15130 = vmatprep.mubr.msk.bf16.mxu0 %vm18103_vm0, %v18102_v1  ;;  %v8985_v12 = vrot.slane %v18024_v31, 2  ;;  %v22670_v31 = vshll.u32 %v20729_v16, 16  ;;  %v22674_v63 = vshrl.u32 %v20729_v16, 16 }
 0x486   : > { %13979 = vmatmul.mubr.msk.bf16.gmra.mrb[60].mxu1 %vm536_vm3, %v3055_v9  ;;  %v3063_v9 = vsel %vm339_vm2, %v3058_v13, %v3062_v2  ;;  %v3070_v13 = vrot.slane %v22667_v43, 1 }
 0x487   : > { %15131 = vmatmul.mubr.msk.bf16.gmra.mrb[16].mxu0 %vm536_vm3, %v8982_v6  ;;  %13982 = vmatprep.mubr.msk.bf16.mxu1 %vm18103_vm0, %v18102_v1  ;;  %v8984_v6 = vsel %vm1906_vm5, %v8981_v44, %v8983_v51  ;;  %v3066_v44 = vor.u32 %v22668_v3, %v3062_v2  ;;  %v18025_v2 = vld [vmem:[%s18169_s4 + $0x64] sm:$0xff]   ;;  %v20747_v3 = vld [vmem:[%s18169_s4 + $0xac] sm:$0xff]  }
 0x488   : > { %15134 = vmatprep.mubr.msk.bf16.mxu0 %vm18103_vm0, %v18102_v1  ;;  %v8987_v43 = vrot.slane %v18025_v2, 2  ;;  %v22673_v2 = vshll.u32 %v20747_v3, 16  ;;  %v3088_v29 = vshrl.u32 %v20747_v3, 16 }
 0x48e   : > { %13983 = vmatmul.mubr.msk.bf16.gmra.mrb[64].mxu1 %vm536_vm3, %v3063_v9  ;;  %v3071_v9 = vsel %vm339_vm2, %v3066_v44, %v3070_v13  ;;  %v3078_v44 = vrot.slane %v22670_v31, 1 }
 0x48f   : > { %15135 = vmatmul.mubr.msk.bf16.gmra.mrb[20].mxu0 %vm536_vm3, %v8984_v6  ;;  %13986 = vmatprep.mubr.msk.bf16.mxu1 %vm18103_vm0, %v18102_v1  ;;  %v8986_v6 = vsel %vm1906_vm5, %v8983_v51, %v8985_v12  ;;  %v3074_v51 = vor.u32 %v22671_v33, %v3070_v13  ;;  %v18026_v13 = vld [vmem:[%s18169_s4 + $0x6c] sm:$0xff]   ;;  %v20765_v33 = vld [vmem:[%s18169_s4 + $0xb4] ss:$0 sps:$4 sm:$0x11]  }
 0x490   : > { %15138 = vmatprep.mubr.msk.bf16.mxu0 %vm18103_vm0, %v18102_v1  ;;  %v8989_v31 = vrot.slane %v18026_v13, 2  ;;  %v3092_v13 = vshll.u32 %v20765_v33, 16 }
 0x496   : > { %13987 = vmatmul.mubr.msk.bf16.gmra.mrb[68].mxu1 %vm536_vm3, %v3071_v9  ;;  %v3079_v9 = vsel %vm339_vm2, %v3074_v51, %v3078_v44  ;;  %v3086_v51 = vrot.slane %v22673_v2, 1 }
 0x497   : > { %15139 = vmatmul.mubr.msk.bf16.gmra.mrb[24].mxu0 %vm536_vm3, %v8986_v6  ;;  %13990 = vmatprep.mubr.msk.bf16.mxu1 %vm18103_vm0, %v18102_v1  ;;  %v8988_v6 = vsel %vm1906_vm5, %v8985_v12, %v8987_v43  ;;  %v3082_v12 = vor.u32 %v22674_v63, %v3078_v44  ;;  %v18027_v44 = vld [vmem:[%s18169_s4 + $0x74] sm:$0xff]   ;;  %v3426_v63 = vld [vmem:[%s18169_s4 + $0xc] sm:$0xe] }
 0x498   : > { %15142 = vmatprep.mubr.msk.bf16.mxu0 %vm18103_vm0, %v18102_v1  ;;  %v8991_v2 = vrot.slane %v18027_v44, 2 }
 0x49a   : > { %v8992_v36 = vsel %vm1906_vm5, %v8989_v31, %v8991_v2 }
 0x49e   : > { %13991 = vmatmul.mubr.msk.bf16.gmra.mrb[72].mxu1 %vm536_vm3, %v3079_v9  ;;  %v3087_v9 = vsel %vm339_vm2, %v3082_v12, %v3086_v51  ;;  %v3094_v12 = vrot.slane %v3092_v13, 1 }
 0x49f   : > { %15143 = vmatmul.mubr.msk.bf16.gmra.mrb[28].mxu0 %vm536_vm3, %v8988_v6  ;;  %13994 = vmatprep.mubr.msk.bf16.mxu1 %vm18103_vm0, %v18102_v1  ;;  %v8990_v6 = vsel %vm1906_vm5, %v8987_v43, %v8989_v31  ;;  %v3090_v43 = vor.u32 %v3088_v29, %v3086_v51  ;;  %v3439_v51 = vrot.slane %v20340_v56, 1  ;;  %v3835_v56 = vrot.slane %v2944_v27, 1 }
 0x4a0   : > { %15146 = vmatprep.mubr.msk.bf16.mxu0 %vm18103_vm0, %v18102_v1 }
 0x4a1   : > { %v3095_v61 = vsel %vm339_vm2, %v3090_v43, %v3094_v12  ;;  %v17859_v43 = vld [vmem:[%s22530_s1 + $0x108] sm:$0xff]  }
 0x4a6   : > { %13995 = vmatmul.mubr.msk.bf16.gmra.mrb[76].mxu1 %vm536_vm3, %v3087_v9  ;;  %v18028_v9 = vld [vmem:[%s18169_s4 + $0x7c] sm:$0xff]  }
 0x4a7   : > { %15147 = vmatmul.mubr.msk.bf16.gmra.mrb[32].mxu0 %vm536_vm3, %v8990_v6  ;;  %13998 = vmatprep.mubr.msk.bf16.mxu1 %vm18103_vm0, %v18102_v1  ;;  %v20784_v6 = vcombine.low %v3426_v63, %v20324_v37  ;;  %v8993_v44 = vrot.slane %v18028_v9, 2 }
 0x4a8   : > { %15150 = vmatprep.mubr.msk.bf16.mxu0 %vm18103_vm0, %v18102_v1 }
 0x4a9   : > { %v3438_v31 = vrot.slane %v20784_v6, 1  ;;  %v8994_v13 = vsel %vm1906_vm5, %v8991_v2, %v8993_v44  ;;  %v3441_v2 = vrot.slane %v20358_v25, 1  ;;  %v17884_v25 = vld [vmem:[%s22530_s1 + $0x128] sm:$0xff]  }
 0x4ab   : > { %v3440_v37 = vsel %vm1080_vm1, %v3438_v31, %v3439_v51  ;;  %v3442_v9 = vsel %vm1080_vm1, %v3439_v51, %v3441_v2  ;;  %v17862_v31 = vld [vmem:[%s22530_s1 + $0x110] sm:$0xff]   ;;  %v17869_v51 = vld [vmem:[%s22530_s1 + $0x118] sm:$0xff]  }
 0x4ae   : > { %13999 = vmatmul.mubr.msk.bf16.gmra.mrb[80].mxu1 %vm536_vm3, %v3095_v61  ;;  %v18029_v61 = vld [vmem:[%s18169_s4 + $0x84] sm:$0xff]  }
 0x4af   : > { %15151 = vmatmul.mubr.msk.bf16.gmra.mrb[36].mxu0 %vm536_vm3, %v8992_v36  ;;  %14010 = vmatprep.mubr.msk.bf16.mxu1 %vm18103_vm0, %v18102_v1  ;;  %v17857_v36 = vld [vmem:[%s22530_s1 + $0x100] sm:$0xff]   ;;  %v8995_v63 = vrot.slane %v18029_v61, 2 }
 0x4b0   : > { %15154 = vmatprep.mubr.msk.bf16.mxu0 %vm18103_vm0, %v18102_v1 }
 0x4b1   : > { %v8996_v12 = vsel %vm1906_vm5, %v8993_v44, %v8995_v63  ;;  %v3443_v44 = vrot.slane %v20382_v4, 1 }
 0x4b3   : > { %v3444_v61 = vsel %vm1080_vm1, %v3441_v2, %v3443_v44 }
 0x4b6   : > { %14011 = vmatmul.mubr.msk.bf16.vlgmr.msra.gmra.mrb[0].mxu1 %vm536_vm3, %v3440_v37 }
 0x4b7   : > { %15155 = vmatmul.mubr.msk.bf16.gmra.mrb[40].mxu0 %vm536_vm3, %v8994_v13  ;;  %14014 = vmatprep.mubr.msk.bf16.mxu1 %vm18103_vm0, %v18102_v1  ;;  %v18030_v13 = vld [vmem:[%s18169_s4 + $0x8c] sm:$0xff]  }
 0x4b8   : > { %15158 = vmatprep.mubr.msk.bf16.mxu0 %vm18103_vm0, %v18102_v1  ;;  %14095 = vmatpush3.bf16.msra.mxu1 %v17857_v36  ;;  %v8997_v37 = vrot.slane %v18030_v13, 2 }
 0x4b9   : > { %14096 = vmatprep.subr.bf16.mxu1 %v18102_v1 }
 0x4ba   : > { %v8998_v36 = vsel %vm1906_vm5, %v8995_v63, %v8997_v37  ;;  %v3445_v63 = vrot.slane %v20411_v22, 1  ;;  %v3847_v22 = vrot.slane %v2968_v59, 1  ;;  %v3851_v59 = vrot.slane %v2976_v52, 1 }
 0x4bb   : > { %v3855_v52 = vrot.slane %v2984_v46, 1  ;;  %v3859_v46 = vrot.slane %v2992_v38, 1  ;;  %v22770_v38 = vshrl.u32 %v20521_v23, 16 }
 0x4bc   : > { %14097 = vmatpush3.bf16.msra.mxu1 %v17859_v43  ;;  %v18031_v43 = vld [vmem:[%s18169_s4 + $0x94] sm:$0xff]  }
 0x4bd   : > { %14098 = vmatprep.subr.bf16.mxu1 %v18102_v1 }
 0x4be   : > { %14015 = vmatmul.mubr.msk.bf16.gmra.mrb[4].mxu1 %vm536_vm3, %v3442_v9  ;;  %v3446_v9 = vsel %vm1080_vm1, %v3443_v44, %v3445_v63  ;;  %v18033_v44 = vld [vmem:[%s18169_s4 + $0xa4] sm:$0xff]  }
 0x4bf   : > { %15159 = vmatmul.mubr.msk.bf16.gmra.mrb[44].mxu0 %vm536_vm3, %v8996_v12  ;;  %14018 = vmatprep.mubr.msk.bf16.mxu1 %vm18103_vm0, %v18102_v1  ;;  %v8999_v12 = vrot.slane %v18031_v43, 2  ;;  %v3449_v43 = vrot.slane %v20458_v58, 1  ;;  %v3856_v58 = vrot.slane %v2980_v5, 2 }
 0x4c0   : > { %15162 = vmatprep.mubr.msk.bf16.mxu0 %vm18103_vm0, %v18102_v1  ;;  %14099 = vmatpush3.bf16.msra.mxu1 %v17862_v31  ;;  %v18032_v31 = vld [vmem:[%s18169_s4 + $0x9c] sm:$0xff]  }
 0x4c1   : > { %14100 = vmatprep.subr.bf16.mxu1 %v18102_v1  ;;  %v9000_v2 = vsel %vm1906_vm5, %v8997_v37, %v8999_v12  ;;  %v9001_v13 = vrot.slane %v18032_v31, 2  ;;  %v3451_v31 = vrot.slane %v20479_v8, 1  ;;  %v3860_v8 = vrot.slane %v2988_v42, 2 }
 0x4c3   : > { %v3861_v5 = vor.u32 %v3860_v8, %v3859_v46  ;;  %v17891_v46 = vld [vmem:[%s22530_s1 + $0x2c0] sm:$0xff]  }
 0x4c4   : > { %14101 = vmatpush3.bf16.msra.mxu1 %v17869_v51  ;;  %v3447_v51 = vrot.slane %v20437_v15, 1  ;;  %v3852_v15 = vrot.slane %v2972_v21, 2  ;;  %v3857_v21 = vor.u32 %v3856_v58, %v3855_v52 }
 0x4c5   : > { %14186 = vmatprep.subr.bf16.mxu1 %v18102_v1 }
 0x4c6   : > { %14019 = vmatmul.mubr.msk.bf16.gmra.mrb[8].mxu1 %vm536_vm3, %v3444_v61  ;;  %v3448_v37 = vsel %vm1080_vm1, %v3445_v63, %v3447_v51  ;;  %v9003_v61 = vrot.slane %v18033_v44, 2  ;;  %v18034_v63 = vld [vmem:[%s18169_s4 + $0xac] sm:$0xff]   ;;  %v3453_v44 = vrot.slane %v20500_v53, 1  ;;  %v22771_v53 = vshll.u32 %v20521_v23, 16 }
 0x4c7   : > { %15163 = vmatmul.mubr.msk.bf16.gmra.mrb[48].mxu0 %vm536_vm3, %v8998_v36  ;;  %14022 = vmatprep.mubr.msk.bf16.mxu1 %vm18103_vm0, %v18102_v1  ;;  %v9002_v36 = vsel %vm1906_vm5, %v8999_v12, %v9001_v13  ;;  %v3450_v12 = vsel %vm1080_vm1, %v3447_v51, %v3449_v43  ;;  %v18035_v51 = vld [vmem:[%s18169_s4 + $0xb4] sm:$0xff]  }
 0x4c8   : > { %15166 = vmatprep.mubr.msk.bf16.mxu0 %vm18103_vm0, %v18102_v1  ;;  %v3864_v42 = vrot.slane %v22771_v53, 2 }
 0x4ce   : > { %14023 = vmatmul.mubr.msk.bf16.gmra.mrb[12].mxu1 %vm536_vm3, %v3446_v9  ;;  %v9005_v9 = vrot.slane %v18034_v63, 2  ;;  %v3455_v63 = vrot.slane %v20521_v23, 1  ;;  %v22772_v23 = vshrl.u32 %v20542_v41, 16 }
 0x4cf   : > { %15167 = vmatmul.mubr.msk.bf16.gmra.mrb[52].mxu0 %vm536_vm3, %v9000_v2  ;;  %14026 = vmatprep.mubr.msk.bf16.mxu1 %vm18103_vm0, %v18102_v1  ;;  %v9004_v2 = vsel %vm1906_vm5, %v9001_v13, %v9003_v61  ;;  %v3452_v13 = vsel %vm1080_vm1, %v3449_v43, %v3451_v31  ;;  %v18036_v43 = vld [vmem:[%s18169_s4 + $0xbc] sm:$0xff]  }
 0x4d0   : > { %15170 = vmatprep.mubr.msk.bf16.mxu0 %vm18103_vm0, %v18102_v1 }
 0x4d6   : > { %14027 = vmatmul.mubr.msk.bf16.gmra.mrb[16].mxu1 %vm536_vm3, %v3448_v37  ;;  %v9007_v37 = vrot.slane %v18035_v51, 2  ;;  %v3457_v51 = vrot.slane %v20542_v41, 1 }
 0x4d7   : > { %15171 = vmatmul.mubr.msk.bf16.gmra.mrb[56].mxu0 %vm536_vm3, %v9002_v36  ;;  %14030 = vmatprep.mubr.msk.bf16.mxu1 %vm18103_vm0, %v18102_v1  ;;  %v9006_v36 = vsel %vm1906_vm5, %v9003_v61, %v9005_v9  ;;  %v3454_v61 = vsel %vm1080_vm1, %v3451_v31, %v3453_v44  ;;  %v18037_v31 = vld [vmem:[%s18169_s4 + $0xc4] sm:$0xff]  }
 0x4d8   : > { %15174 = vmatprep.mubr.msk.bf16.mxu0 %vm18103_vm0, %v18102_v1 }
 0x4de   : > { %14031 = vmatmul.mubr.msk.bf16.gmra.mrb[20].mxu1 %vm536_vm3, %v3450_v12  ;;  %v9009_v12 = vrot.slane %v18036_v43, 2 }
 0x4df   : > { %15175 = vmatmul.mubr.msk.bf16.gmra.mrb[60].mxu0 %vm536_vm3, %v9004_v2  ;;  %14034 = vmatprep.mubr.msk.bf16.mxu1 %vm18103_vm0, %v18102_v1  ;;  %v9008_v2 = vsel %vm1906_vm5, %v9005_v9, %v9007_v37  ;;  %v3456_v9 = vsel %vm1080_vm1, %v3453_v44, %v3455_v63  ;;  %v9013_v44 = vrot.slane %v20550_v54, 2  ;;  %v3461_v54 = vrot.slane %v20585_v55, 1 }
 0x4e0   : > { %15178 = vmatprep.mubr.msk.bf16.mxu0 %vm18103_vm0, %v18102_v1 }
 0x4e6   : > { %14035 = vmatmul.mubr.msk.bf16.gmra.mrb[24].mxu1 %vm536_vm3, %v3452_v13  ;;  %v9011_v13 = vrot.slane %v18037_v31, 2  ;;  %v17868_v31 = vld [vmem:[%s22530_s1 + $0x2a8] sm:$0xff]  }
 0x4e7   : > { %15179 = vmatmul.mubr.msk.bf16.gmra.mrb[64].mxu0 %vm536_vm3, %v9006_v36  ;;  %14038 = vmatprep.mubr.msk.bf16.mxu1 %vm18103_vm0, %v18102_v1  ;;  %v9010_v36 = vsel %vm1906_vm5, %v9007_v37, %v9009_v12  ;;  %v3458_v37 = vsel %vm1080_vm1, %v3455_v63, %v3457_v51  ;;  %v17860_v63 = vld [vmem:[%s18169_s4 + $0x30] sm:$0xff]  }
 0x4e8   : > { %15182 = vmatprep.mubr.msk.bf16.mxu0 %vm18103_vm0, %v18102_v1  ;;  %v9014_v43 = vsel %vm1906_vm5, %v9011_v13, %v9013_v44  ;;  %v3465_v44 = vrot.slane %v20629_v47, 1 }
 0x4ee   : > { %14039 = vmatmul.mubr.msk.bf16.gmra.mrb[28].mxu1 %vm536_vm3, %v3454_v61  ;;  %v3459_v61 = vrot.slane %v20568_v50, 1 }
 0x4ef   : > { %15183 = vmatmul.mubr.msk.bf16.gmra.mrb[68].mxu0 %vm536_vm3, %v9008_v2  ;;  %14042 = vmatprep.mubr.msk.bf16.mxu1 %vm18103_vm0, %v18102_v1  ;;  %v9012_v2 = vsel %vm1906_vm5, %v9009_v12, %v9011_v13  ;;  %v3463_v13 = vrot.slane %v20605_v57, 1 }
 0x4f0   : > { %15186 = vmatprep.mubr.msk.bf16.mxu0 %vm18103_vm0, %v18102_v1  ;;  %v3460_v12 = vsel %vm1080_vm1, %v3457_v51, %v3459_v61  ;;  %v17863_v51 = vld [vmem:[%s18169_s4 + $0x38] sm:$0xff]  }
 0x4f6   : > { %14043 = vmatmul.mubr.msk.bf16.gmra.mrb[32].mxu1 %vm536_vm3, %v3456_v9  ;;  %v3462_v9 = vsel %vm1080_vm1, %v3459_v61, %v3461_v54  ;;  %v17882_v61 = vld [vmem:[%s22530_s1 + $0x2b8] sm:$0xff]  }
 0x4f7   : > { %15187 = vmatmul.mubr.msk.bf16.gmra.mrb[72].mxu0 %vm536_vm3, %v9010_v36  ;;  %14046 = vmatprep.mubr.msk.bf16.mxu1 %vm18103_vm0, %v18102_v1  ;;  %v17861_v36 = vld [vmem:[%s22530_s1 + $0x2a0] sm:$0xff]  }
 0x4f8   : > { %15190 = vmatprep.mubr.msk.bf16.mxu0 %vm18103_vm0, %v18102_v1 }
 0x4fe   : > { %14047 = vmatmul.mubr.msk.bf16.gmra.mrb[36].mxu1 %vm536_vm3, %v3458_v37  ;;  %v17875_v37 = vld [vmem:[%s22530_s1 + $0x2b0] sm:$0xff]  }
 0x4ff   : > { %15191 = vmatmul.mubr.msk.bf16.gmra.mrb[76].mxu0 %vm536_vm3, %v9012_v2  ;;  %14050 = vmatprep.mubr.msk.bf16.mxu1 %vm18103_vm0, %v18102_v1  ;;  %v3464_v2 = vsel %vm1080_vm1, %v3461_v54, %v3463_v13  ;;  %v3467_v54 = vrot.slane %v20652_v10, 1 }
 0x500   : > { %15194 = vmatprep.mubr.msk.bf16.mxu0 %vm18103_vm0, %v18102_v1 }
 0x506   : > { %14051 = vmatmul.mubr.msk.bf16.gmra.mrb[40].mxu1 %vm536_vm3, %v3460_v12  ;;  %v3466_v12 = vsel %vm1080_vm1, %v3463_v13, %v3465_v44 }
 0x507   : > { %15195 = vmatmul.mubr.msk.bf16.gmra.mrb[80].mxu0 %vm536_vm3, %v9014_v43  ;;  %14054 = vmatprep.mubr.msk.bf16.mxu1 %vm18103_vm0, %v18102_v1  ;;  %v17864_v43 = vld [vmem:[%s18169_s4 + $0x40] sm:$0xff]  }
 0x508   : > { %15206 = vmatprep.mubr.msk.bf16.mxu0 %vm18103_vm0, %v18102_v1 }
 0x50e   : > { %14055 = vmatmul.mubr.msk.bf16.gmra.mrb[44].mxu1 %vm536_vm3, %v3462_v9  ;;  %v3469_v9 = vrot.slane %v20675_v60, 1 }
 0x50f   : > { %15207 = vmatmul.mubr.msk.bf16.vlgmr.msra.gmra.mrb[0].mxu0 %vm536_vm3, %v17860_v63  ;;  %14058 = vmatprep.mubr.msk.bf16.mxu1 %vm18103_vm0, %v18102_v1  ;;  %v17865_v63 = vld [vmem:[%s18169_s4 + $0x48] sm:$0xff]  }
 0x510   : > { %15291 = vmatpush3.bf16.msra.mxu0 %v17861_v36  ;;  %15210 = vmatprep.mubr.msk.bf16.mxu0 %vm18103_vm0, %v18102_v1  ;;  %v3468_v36 = vsel %vm1080_vm1, %v3465_v44, %v3467_v54  ;;  %v3470_v13 = vsel %vm1080_vm1, %v3467_v54, %v3469_v9  ;;  %v3473_v44 = vrot.slane %v20711_v49, 1  ;;  %v17871_v54 = vld [vmem:[%s18169_s4 + $0x68] sm:$0xff]  }
 0x511   : > { %15292 = vmatprep.subr.bf16.mxu0 %v18102_v1 }
 0x514   : > { %15293 = vmatpush3.bf16.msra.mxu0 %v17868_v31  ;;  %v17866_v31 = vld [vmem:[%s18169_s4 + $0x50] sm:$0xff]  }
 0x515   : > { %15294 = vmatprep.subr.bf16.mxu0 %v18102_v1 }
 0x516   : > { %14059 = vmatmul.mubr.msk.bf16.gmra.mrb[48].mxu1 %vm536_vm3, %v3464_v2  ;;  %v17867_v2 = vld [vmem:[%s18169_s4 + $0x58] sm:$0xff]  }
 0x517   : > { %15211 = vmatmul.mubr.msk.bf16.gmra.mrb[4].mxu0 %vm536_vm3, %v17863_v51  ;;  %14062 = vmatprep.mubr.msk.bf16.mxu1 %vm18103_vm0, %v18102_v1  ;;  %v3471_v51 = vrot.slane %v20693_v34, 1 }
 0x518   : > { %15214 = vmatprep.mubr.msk.bf16.mxu0 %vm18103_vm0, %v18102_v1  ;;  %15295 = vmatpush3.bf16.msra.mxu0 %v17875_v37 }
 0x519   : > { %15296 = vmatprep.subr.bf16.mxu0 %v18102_v1  ;;  %v3472_v37 = vsel %vm1080_vm1, %v3469_v9, %v3471_v51  ;;  %v17872_v9 = vld [vmem:[%s18169_s4 + $0x70] sm:$0xff]  }
 0x51c   : > { %15297 = vmatpush3.bf16.msra.mxu0 %v17882_v61  ;;  %v17870_v61 = vld [vmem:[%s18169_s4 + $0x60] sm:$0xff]  }
 0x51d   : > { %15382 = vmatprep.subr.bf16.mxu0 %v18102_v1 }
 0x51e   : > { %14063 = vmatmul.mubr.msk.bf16.gmra.mrb[52].mxu1 %vm536_vm3, %v3466_v12  ;;  %v3475_v12 = vrot.slane %v20729_v16, 1 }
 0x51f   : > { %15215 = vmatmul.mubr.msk.bf16.gmra.mrb[8].mxu0 %vm536_vm3, %v17864_v43  ;;  %14066 = vmatprep.mubr.msk.bf16.mxu1 %vm18103_vm0, %v18102_v1  ;;  %v3474_v43 = vsel %vm1080_vm1, %v3471_v51, %v3473_v44  ;;  %v3824_v51 = vshrl.u32 %v20784_v6, 16 }
 0x520   : > { %15218 = vmatprep.mubr.msk.bf16.mxu0 %vm18103_vm0, %v18102_v1 }
 0x526   : > { %14067 = vmatmul.mubr.msk.bf16.gmra.mrb[56].mxu1 %vm536_vm3, %v3468_v36  ;;  %v3477_v36 = vrot.slane %v20747_v3, 1 }
 0x527   : > { %15219 = vmatmul.mubr.msk.bf16.gmra.mrb[12].mxu0 %vm536_vm3, %v17865_v63  ;;  %14070 = vmatprep.mubr.msk.bf16.mxu1 %vm18103_vm0, %v18102_v1  ;;  %v3476_v63 = vsel %vm1080_vm1, %v3473_v44, %v3475_v12  ;;  %v3831_v44 = vrot.slane %v2936_v7, 1 }
 0x528   : > { %15222 = vmatprep.mubr.msk.bf16.mxu0 %vm18103_vm0, %v18102_v1 }
 0x52e   : > { %14071 = vmatmul.mubr.msk.bf16.gmra.mrb[60].mxu1 %vm536_vm3, %v3470_v13  ;;  %v3479_v13 = vrot.slane %v20765_v33, 1 }
 0x52f   : > { %15223 = vmatmul.mubr.msk.bf16.gmra.mrb[16].mxu0 %vm536_vm3, %v17866_v31  ;;  %14074 = vmatprep.mubr.msk.bf16.mxu1 %vm18103_vm0, %v18102_v1  ;;  %v3478_v31 = vsel %vm1080_vm1, %v3475_v12, %v3477_v36 }
 0x530   : > { %15226 = vmatprep.mubr.msk.bf16.mxu0 %vm18103_vm0, %v18102_v1 }
 0x536   : > { %14075 = vmatmul.mubr.msk.bf16.gmra.mrb[64].mxu1 %vm536_vm3, %v3472_v37  ;;  %v17873_v37 = vld [vmem:[%s18169_s4 + $0x78] sm:$0xff]  }
 0x537   : > { %15227 = vmatmul.mubr.msk.bf16.gmra.mrb[20].mxu0 %vm536_vm3, %v17867_v2  ;;  %14078 = vmatprep.mubr.msk.bf16.mxu1 %vm18103_vm0, %v18102_v1  ;;  %v3827_v2 = vshll.u32 %v20784_v6, 16  ;;  %v17874_v6 = vld [vmem:[%s18169_s4 + $0x80] sm:$0xff]  }
 0x538   : > { %15230 = vmatprep.mubr.msk.bf16.mxu0 %vm18103_vm0, %v18102_v1 }
 0x539   : > { %v3829_v12 = vrot.slane %v3827_v2, 2 }
 0x53e   : > { %14079 = vmatmul.mubr.msk.bf16.gmra.mrb[68].mxu1 %vm536_vm3, %v3474_v43  ;;  %v3826_v43 = vrot.slane %v3824_v51, 1  ;;  %v17892_v51 = vld [vmem:[%s22530_s1 + $0x130] sm:$0xff]  }
 0x53f   : > { %15231 = vmatmul.mubr.msk.bf16.gmra.mrb[24].mxu0 %vm536_vm3, %v17870_v61  ;;  %14082 = vmatprep.mubr.msk.bf16.mxu1 %vm18103_vm0, %v18102_v1  ;;  %v3480_v61 = vsel %vm1080_vm1, %v3477_v36, %v3479_v13  ;;  %v17877_v36 = vld [vmem:[%s22530_s1 + $0x120] sm:$0xff]   ;;  %v3840_v13 = vrot.slane %v2948_v32, 2  ;;  %v17899_v32 = vld [vmem:[%s22530_s1 + $0x138] sm:$0xff]  }
 0x540   : > { %15234 = vmatprep.mubr.msk.bf16.mxu0 %vm18103_vm0, %v18102_v1  ;;  %v3830_v33 = vor.u32 %v3829_v12, %v3826_v43  ;;  %v17879_v43 = vld [vmem:[%s18169_s4 + $0x98] sm:$0xff]  }
 0x546   : > { %14083 = vmatmul.mubr.msk.bf16.gmra.mrb[72].mxu1 %vm536_vm3, %v3476_v63 }
 0x547   : > { %15235 = vmatmul.mubr.msk.bf16.gmra.mrb[28].mxu0 %vm536_vm3, %v17871_v54  ;;  %14086 = vmatprep.mubr.msk.bf16.mxu1 %vm18103_vm0, %v18102_v1  ;;  %v3832_v54 = vrot.slane %v2932_v24, 2  ;;  %v3836_v24 = vrot.slane %v2940_v45, 2  ;;  %v17876_v45 = vld [vmem:[%s18169_s4 + $0x88] sm:$0xff]  }
 0x548   : > { %15238 = vmatprep.mubr.msk.bf16.mxu0 %vm18103_vm0, %v18102_v1 }
 0x549   : > { %v3833_v7 = vor.u32 %v3832_v54, %v3831_v44  ;;  %v3844_v44 = vrot.slane %v2956_v40, 2  ;;  %v3848_v40 = vrot.slane %v2964_v18, 2  ;;  %v17880_v54 = vld [vmem:[%s18169_s4 + $0xa0] sm:$0xff]   ;;  %v3853_v18 = vor.u32 %v3852_v15, %v3851_v59 }
 0x54b   : > { %v3834_v63 = vsel %vm1466_vm4, %v3830_v33, %v3833_v7  ;;  %v3849_v12 = vor.u32 %v3848_v40, %v3847_v22  ;;  %v21171_v22 = vld [vmem:[%s18169_s4 + $0x38] sm:$0xff]  }
 0x54c   : > { %v10001_v8 = vshrl.u32 %v21171_v22, 16 }
 0x54e   : > { %14087 = vmatmul.mubr.msk.bf16.gmra.mrb[76].mxu1 %vm536_vm3, %v3478_v31  ;;  %v3839_v31 = vrot.slane %v2952_v62, 1  ;;  %v17878_v62 = vld [vmem:[%s18169_s4 + $0x90] sm:$0xff]  }
 0x54f   : > { %15239 = vmatmul.mubr.msk.bf16.gmra.mrb[32].mxu0 %vm536_vm3, %v17872_v9  ;;  %14090 = vmatprep.mubr.msk.bf16.mxu1 %vm18103_vm0, %v18102_v1  ;;  %v3837_v9 = vor.u32 %v3836_v24, %v3835_v56  ;;  %v3858_v56 = vsel %vm1466_vm4, %v3853_v18, %v3857_v21  ;;  %v17885_v24 = vld [vmem:[%s18169_s4 + $0xb8] sm:$0xff]  }
 0x550   : > { %15242 = vmatprep.mubr.msk.bf16.mxu0 %vm18103_vm0, %v18102_v1  ;;  %v3841_v4 = vor.u32 %v3840_v13, %v3839_v31  ;;  %v3867_v31 = vrot.slane %v22772_v23, 1  ;;  %v22773_v13 = vshll.u32 %v20542_v41, 16 }
 0x551   : > { %v3838_v27 = vsel %vm1466_vm4, %v3833_v7, %v3837_v9  ;;  %v17881_v7 = vld [vmem:[%s18169_s4 + $0xa8] sm:$0xff]  }
 0x552   : > { %v3842_v2 = vsel %vm1466_vm4, %v3837_v9, %v3841_v4  ;;  %v3863_v9 = vrot.slane %v22770_v38, 1 }
 0x556   : > { %14091 = vmatmul.mubr.msk.bf16.gmra.mrb[80].mxu1 %vm536_vm3, %v3480_v61 }
 0x557   : > { %15243 = vmatmul.mubr.msk.bf16.gmra.mrb[36].mxu0 %vm536_vm3, %v17873_v37  ;;  %14102 = vmatprep.mubr.msk.bf16.mxu1 %vm18103_vm0, %v18102_v1  ;;  %v3843_v37 = vrot.slane %v2960_v35, 1 }
 0x558   : > { %15246 = vmatprep.mubr.msk.bf16.mxu0 %vm18103_vm0, %v18102_v1 }
 0x559   : > { %v3845_v61 = vor.u32 %v3844_v44, %v3843_v37  ;;  %v22774_v44 = vshrl.u32 %v20568_v50, 16 }
 0x55b   : > { %v3846_v35 = vsel %vm1466_vm4, %v3841_v4, %v3845_v61  ;;  %v3850_v33 = vsel %vm1466_vm4, %v3845_v61, %v3849_v12  ;;  %v3871_v61 = vrot.slane %v22774_v44, 1 }
 0x55e   : > { %14103 = vmatmul.mubr.msk.bf16.vlgmr.msra.gmra.mrb[0].mxu1 %vm536_vm3, %v3834_v63  ;;  %v17883_v63 = vld [vmem:[%s18169_s4 + $0xb0] sm:$0xff]  }
 0x55f   : > { %15247 = vmatmul.mubr.msk.bf16.gmra.mrb[40].mxu0 %vm536_vm3, %v17874_v6  ;;  %14106 = vmatprep.mubr.msk.bf16.mxu1 %vm18103_vm0, %v18102_v1  ;;  %v3854_v6 = vsel %vm1466_vm4, %v3849_v12, %v3853_v18  ;;  %v22776_v18 = vshrl.u32 %v20585_v55, 16 }
 0x560   : > { %15250 = vmatprep.mubr.msk.bf16.mxu0 %vm18103_vm0, %v18102_v1  ;;  %14187 = vmatpush3.bf16.msra.mxu1 %v17877_v36  ;;  %v3862_v36 = vsel %vm1466_vm4, %v3857_v21, %v3861_v5 }
 0x561   : > { %14188 = vmatprep.subr.bf16.mxu1 %v18102_v1 }
 0x564   : > { %14189 = vmatpush3.bf16.msra.mxu1 %v17884_v25  ;;  %v3865_v25 = vor.u32 %v3864_v42, %v3863_v9  ;;  %v22779_v9 = vshll.u32 %v20605_v57, 16 }
 0x565   : > { %14190 = vmatprep.subr.bf16.mxu1 %v18102_v1 }
 0x566   : > { %14107 = vmatmul.mubr.msk.bf16.gmra.mrb[4].mxu1 %vm536_vm3, %v3838_v27  ;;  %v3866_v27 = vsel %vm1466_vm4, %v3861_v5, %v3865_v25  ;;  %v3880_v53 = vrot.slane %v22779_v9, 2 }
 0x567   : > { %15251 = vmatmul.mubr.msk.bf16.gmra.mrb[44].mxu0 %vm536_vm3, %v17876_v45  ;;  %14110 = vmatprep.mubr.msk.bf16.mxu1 %vm18103_vm0, %v18102_v1  ;;  %v17886_v45 = vld [vmem:[%s18169_s4 + $0xc0] sm:$0xff]  }
 0x568   : > { %15254 = vmatprep.mubr.msk.bf16.mxu0 %vm18103_vm0, %v18102_v1  ;;  %14191 = vmatpush3.bf16.msra.mxu1 %v17892_v51  ;;  %v3868_v51 = vrot.slane %v22773_v13, 2 }
 0x569   : > { %14192 = vmatprep.subr.bf16.mxu1 %v18102_v1 }
 0x56a   : > { %v3869_v4 = vor.u32 %v3868_v51, %v3867_v31 }
 0x56c   : > { %14193 = vmatpush3.bf16.msra.mxu1 %v17899_v32  ;;  %v9830_v32 = vld [vmem:[%s18169_s4 + $0x30] sm:$0xf]  ;;  %v3870_v37 = vsel %vm1466_vm4, %v3865_v25, %v3869_v4 }
 0x56d   : > { %14278 = vmatprep.subr.bf16.mxu1 %v18102_v1 }
 0x56e   : > { %14111 = vmatmul.mubr.msk.bf16.gmra.mrb[8].mxu1 %vm536_vm3, %v3842_v2  ;;  %v17887_v2 = vld [vmem:[%s18169_s4 + $0xc8] sm:$0xff]  }
 0x56f   : > { %15255 = vmatmul.mubr.msk.bf16.gmra.mrb[48].mxu0 %vm536_vm3, %v17878_v62  ;;  %14114 = vmatprep.mubr.msk.bf16.mxu1 %vm18103_vm0, %v18102_v1  ;;  %v21157_v62 = vld [vmem:[%s18169_s4 + $0x34] sm:$0xf] }
 0x570   : > { %15258 = vmatprep.mubr.msk.bf16.mxu0 %vm18103_vm0, %v18102_v1  ;;  %v12605_v41 = vcombine.low %v9830_v32, %v21157_v62 }
 0x572   : > { %v9992_v40 = vshll.u32 %v12605_v41, 16 }
 0x574   : > { %v9994_v59 = vrot.slane %v9992_v40, 1 }
 0x576   : > { %14115 = vmatmul.mubr.msk.bf16.gmra.mrb[12].mxu1 %vm536_vm3, %v3846_v35 }
 0x577   : > { %15259 = vmatmul.mubr.msk.bf16.gmra.mrb[52].mxu0 %vm536_vm3, %v17879_v43  ;;  %14118 = vmatprep.mubr.msk.bf16.mxu1 %vm18103_vm0, %v18102_v1  ;;  %v22775_v43 = vshll.u32 %v20568_v50, 16  ;;  %v9997_v50 = vshll.u32 %v21171_v22, 16 }
 0x578   : > { %15262 = vmatprep.mubr.msk.bf16.mxu0 %vm18103_vm0, %v18102_v1 }
 0x579   : > { %v3872_v35 = vrot.slane %v22775_v43, 2  ;;  %v9999_v21 = vrot.slane %v9997_v50, 1 }
 0x57b   : > { %v3873_v12 = vor.u32 %v3872_v35, %v3871_v61  ;;  %v10003_v42 = vor.u32 %v10001_v8, %v9999_v21  ;;  %v21242_v61 = vld [vmem:[%s18169_s4 + $0x50] sm:$0xff]   ;;  %v17914_v35 = vld [vmem:[%s22530_s1 + $0x2d8] sm:$0xff]  }
 0x57d   : > { %v3874_v15 = vsel %vm1466_vm4, %v3869_v4, %v3873_v12  ;;  %v22780_v4 = vshrl.u32 %v20629_v47, 16 }
 0x57e   : > { %14119 = vmatmul.mubr.msk.bf16.gmra.mrb[16].mxu1 %vm536_vm3, %v3850_v33  ;;  %v9990_v33 = vshrl.u32 %v12605_v41, 16 }
 0x57f   : > { %15263 = vmatmul.mubr.msk.bf16.gmra.mrb[56].mxu0 %vm536_vm3, %v17880_v54  ;;  %14122 = vmatprep.mubr.msk.bf16.mxu1 %vm18103_vm0, %v18102_v1  ;;  %v17888_v54 = vld [vmem:[%s18169_s4 + $0xd0] sm:$0xff]   ;;  %v3883_v32 = vrot.slane %v22780_v4, 1  ;;  %v22786_v4 = vshrl.u32 %v20693_v34, 16 }
 0x580   : > { %15266 = vmatprep.mubr.msk.bf16.mxu0 %vm18103_vm0, %v18102_v1  ;;  %v9995_v58 = vor.u32 %v9994_v59, %v9990_v33  ;;  %v22782_v59 = vshrl.u32 %v20652_v10, 16 }
 0x586   : > { %14123 = vmatmul.mubr.msk.bf16.gmra.mrb[20].mxu1 %vm536_vm3, %v3854_v6  ;;  %v22777_v6 = vshll.u32 %v20585_v55, 16  ;;  %v10000_v55 = vsel %vm339_vm2, %v9995_v58, %v9999_v21  ;;  %v21268_v58 = vld [vmem:[%s18169_s4 + $0x58] sm:$0xff]  }
 0x587   : > { %15267 = vmatmul.mubr.msk.bf16.gmra.mrb[60].mxu0 %vm536_vm3, %v17881_v7  ;;  %14126 = vmatprep.mubr.msk.bf16.mxu1 %vm18103_vm0, %v18102_v1  ;;  %v3875_v7 = vrot.slane %v22776_v18, 1  ;;  %v22783_v18 = vshll.u32 %v20652_v10, 16 }
 0x588   : > { %15270 = vmatprep.mubr.msk.bf16.mxu0 %vm18103_vm0, %v18102_v1  ;;  %v3876_v52 = vrot.slane %v22777_v6, 2 }
 0x58e   : > { %14127 = vmatmul.mubr.msk.bf16.gmra.mrb[24].mxu1 %vm536_vm3, %v3858_v56  ;;  %v3877_v56 = vor.u32 %v3876_v52, %v3875_v7  ;;  %v3888_v7 = vrot.slane %v22783_v18, 2  ;;  %v22789_v18 = vshll.u32 %v20711_v49, 16 }
 0x58f   : > { %15271 = vmatmul.mubr.msk.bf16.gmra.mrb[64].mxu0 %vm536_vm3, %v17883_v63  ;;  %14130 = vmatprep.mubr.msk.bf16.mxu1 %vm18103_vm0, %v18102_v1  ;;  %v21189_v63 = vld [vmem:[%s18169_s4 + $0x40] sm:$0xff]  }
 0x590   : > { %15274 = vmatprep.mubr.msk.bf16.mxu0 %vm18103_vm0, %v18102_v1  ;;  %v10005_v5 = vshll.u32 %v21189_v63, 16  ;;  %v10009_v31 = vshrl.u32 %v21189_v63, 16 }
 0x592   : > { %v10007_v25 = vrot.slane %v10005_v5, 1 }
 0x594   : > { %v10008_v23 = vsel %vm339_vm2, %v10003_v42, %v10007_v25  ;;  %v10011_v44 = vor.u32 %v10009_v31, %v10007_v25  ;;  %v21289_v25 = vld [vmem:[%s18169_s4 + $0x60] sm:$0xff]  }
 0x596   : > { %14131 = vmatmul.mubr.msk.bf16.gmra.mrb[28].mxu1 %vm536_vm3, %v3862_v36  ;;  %v22778_v36 = vshrl.u32 %v20605_v57, 16 }
 0x597   : > { %15275 = vmatmul.mubr.msk.bf16.gmra.mrb[68].mxu0 %vm536_vm3, %v17885_v24  ;;  %14134 = vmatprep.mubr.msk.bf16.mxu1 %vm18103_vm0, %v18102_v1  ;;  %v3878_v24 = vsel %vm1466_vm4, %v3873_v12, %v3877_v56 }
 0x598   : > { %15278 = vmatprep.mubr.msk.bf16.mxu0 %vm18103_vm0, %v18102_v1  ;;  %v3879_v38 = vrot.slane %v22778_v36, 1 }
 0x59a   : > { %v3881_v57 = vor.u32 %v3880_v53, %v3879_v38  ;;  %v22785_v38 = vshll.u32 %v20675_v60, 16 }
 0x59c   : > { %v3882_v51 = vsel %vm1466_vm4, %v3877_v56, %v3881_v57  ;;  %v10025_v56 = vshrl.u32 %v21242_v61, 16  ;;  %v3892_v9 = vrot.slane %v22785_v38, 2  ;;  %v22790_v38 = vshrl.u32 %v20729_v16, 16 }
 0x59e   : > { %14135 = vmatmul.mubr.msk.bf16.gmra.mrb[32].mxu1 %vm536_vm3, %v3866_v27  ;;  %v17898_v27 = vld [vmem:[%s22530_s1 + $0x2c8] sm:$0xff]  }
 0x59f   : > { %15279 = vmatmul.mubr.msk.bf16.gmra.mrb[72].mxu0 %vm536_vm3, %v17886_v45  ;;  %14138 = vmatprep.mubr.msk.bf16.mxu1 %vm18103_vm0, %v18102_v1  ;;  %v21211_v45 = vld [vmem:[%s18169_s4 + $0x48] sm:$0xff]  }
 0x5a0   : > { %15282 = vmatprep.mubr.msk.bf16.mxu0 %vm18103_vm0, %v18102_v1  ;;  %v10013_v13 = vshll.u32 %v21211_v45, 16  ;;  %v10017_v12 = vshrl.u32 %v21211_v45, 16 }
 0x5a6   : > { %14139 = vmatmul.mubr.msk.bf16.gmra.mrb[36].mxu1 %vm536_vm3, %v3870_v37  ;;  %v17907_v37 = vld [vmem:[%s22530_s1 + $0x2d0] sm:$0xff]  }
 0x5a7   : > { %15283 = vmatmul.mubr.msk.bf16.gmra.mrb[76].mxu0 %vm536_vm3, %v17887_v2  ;;  %14142 = vmatprep.mubr.msk.bf16.mxu1 %vm18103_vm0, %v18102_v1  ;;  %v22781_v2 = vshll.u32 %v20629_v47, 16  ;;  %v10015_v47 = vrot.slane %v10013_v13, 1 }
 0x5a8   : > { %15286 = vmatprep.mubr.msk.bf16.mxu0 %vm18103_vm0, %v18102_v1 }
 0x5a9   : > { %v3884_v41 = vrot.slane %v22781_v2, 2  ;;  %v10016_v40 = vsel %vm339_vm2, %v10011_v44, %v10015_v47  ;;  %v10019_v6 = vor.u32 %v10017_v12, %v10015_v47  ;;  %v22787_v2 = vshll.u32 %v20693_v34, 16  ;;  %v21310_v47 = vld [vmem:[%s18169_s4 + $0x68] sm:$0xff]  }
 0x5ab   : > { %v3885_v43 = vor.u32 %v3884_v41, %v3883_v32  ;;  %v3895_v32 = vrot.slane %v22786_v4, 1  ;;  %v3896_v41 = vrot.slane %v22787_v2, 2 }
 0x5ad   : > { %v3886_v33 = vsel %vm1466_vm4, %v3881_v57, %v3885_v43  ;;  %v10033_v57 = vshrl.u32 %v21268_v58, 16  ;;  %v3897_v34 = vor.u32 %v3896_v41, %v3895_v32 }
 0x5ae   : > { %14143 = vmatmul.mubr.msk.bf16.gmra.mrb[40].mxu1 %vm536_vm3, %v3874_v15  ;;  %v3887_v15 = vrot.slane %v22782_v59, 1  ;;  %v22788_v59 = vshrl.u32 %v20711_v49, 16 }
 0x5af   : > { %15287 = vmatmul.mubr.msk.bf16.gmra.mrb[80].mxu0 %vm536_vm3, %v17888_v54  ;;  %14146 = vmatprep.mubr.msk.bf16.mxu1 %vm18103_vm0, %v18102_v1  ;;  %v10021_v54 = vshll.u32 %v21242_v61, 16 }
 0x5b0   : > { %15298 = vmatprep.mubr.msk.bf16.mxu0 %vm18103_vm0, %v18102_v1  ;;  %v3889_v10 = vor.u32 %v3888_v7, %v3887_v15  ;;  %v3899_v15 = vrot.slane %v22788_v59, 1  ;;  %v3900_v7 = vrot.slane %v22789_v18, 2 }
 0x5b1   : > { %v10023_v52 = vrot.slane %v10021_v54, 1 }
 0x5b2   : > { %v3901_v49 = vor.u32 %v3900_v7, %v3899_v15  ;;  %v21376_v15 = vld [vmem:[%s18169_s4 + $0x80] sm:$0xff]  }
 0x5b3   : > { %v10024_v21 = vsel %vm339_vm2, %v10019_v6, %v10023_v52  ;;  %v10027_v53 = vor.u32 %v10025_v56, %v10023_v52 }
 0x5b6   : > { %14147 = vmatmul.mubr.msk.bf16.gmra.mrb[44].mxu1 %vm536_vm3, %v3878_v24  ;;  %v22784_v24 = vshrl.u32 %v20675_v60, 16 }
 0x5b7   : > { %15299 = vmatmul.mubr.msk.bf16.vlgmr.msra.gmra.mrb[0].mxu0 %vm536_vm3, %v10000_v55  ;;  %14150 = vmatprep.mubr.msk.bf16.mxu1 %vm18103_vm0, %v18102_v1  ;;  %v10029_v55 = vshll.u32 %v21268_v58, 16 }
 0x5b8   : > { %15383 = vmatpush3.bf16.msra.mxu0 %v17891_v46  ;;  %15302 = vmatprep.mubr.msk.bf16.mxu0 %vm18103_vm0, %v18102_v1  ;;  %v3890_v46 = vsel %vm1466_vm4, %v3885_v43, %v3889_v10  ;;  %v3891_v36 = vrot.slane %v22784_v24, 1 }
 0x5b9   : > { %15384 = vmatprep.subr.bf16.mxu0 %v18102_v1  ;;  %v10031_v42 = vrot.slane %v10029_v55, 1 }
 0x5ba   : > { %v3893_v60 = vor.u32 %v3892_v9, %v3891_v36  ;;  %v3902_v36 = vsel %vm1466_vm4, %v3897_v34, %v3901_v49  ;;  %v3903_v9 = vrot.slane %v22790_v38, 1 }
 0x5bc   : > { %15385 = vmatpush3.bf16.msra.mxu0 %v17898_v27  ;;  %v10032_v27 = vsel %vm339_vm2, %v10027_v53, %v10031_v42  ;;  %v22791_v53 = vshll.u32 %v20729_v16, 16 }
 0x5bd   : > { %15386 = vmatprep.subr.bf16.mxu0 %v18102_v1 }
 0x5be   : > { %14151 = vmatmul.mubr.msk.bf16.gmra.mrb[48].mxu1 %vm536_vm3, %v3882_v51  ;;  %v3894_v51 = vsel %vm1466_vm4, %v3889_v10, %v3893_v60  ;;  %v21331_v10 = vld [vmem:[%s18169_s4 + $0x70] sm:$0xff]  }
 0x5bf   : > { %15303 = vmatmul.mubr.msk.bf16.gmra.mrb[4].mxu0 %vm536_vm3, %v10008_v23  ;;  %14154 = vmatprep.mubr.msk.bf16.mxu1 %vm18103_vm0, %v18102_v1  ;;  %v10037_v23 = vshll.u32 %v21289_v25, 16  ;;  %v10053_v24 = vshll.u32 %v21331_v10, 16  ;;  %v10057_v32 = vshrl.u32 %v21331_v10, 16 }
 0x5c0   : > { %15306 = vmatprep.mubr.msk.bf16.mxu0 %vm18103_vm0, %v18102_v1  ;;  %15387 = vmatpush3.bf16.msra.mxu0 %v17907_v37  ;;  %v10035_v37 = vor.u32 %v10033_v57, %v10031_v42  ;;  %v3904_v42 = vrot.slane %v22791_v53, 2  ;;  %v21395_v53 = vld [vmem:[%s18169_s4 + $0x88] sm:$0xff]  }
 0x5c1   : > { %15388 = vmatprep.subr.bf16.mxu0 %v18102_v1  ;;  %v10039_v44 = vrot.slane %v10037_v23, 1 }
 0x5c2   : > { %v3905_v16 = vor.u32 %v3904_v42, %v3903_v9 }
 0x5c3   : > { %v10040_v43 = vsel %vm339_vm2, %v10035_v37, %v10039_v44  ;;  %v3907_v37 = vrot.slane %v3088_v29, 1 }
 0x5c4   : > { %15389 = vmatpush3.bf16.msra.mxu0 %v17914_v35  ;;  %v10041_v35 = vshrl.u32 %v21289_v25, 16  ;;  %v3906_v41 = vsel %vm1466_vm4, %v3901_v49, %v3905_v16 }
 0x5c5   : > { %15474 = vmatprep.subr.bf16.mxu0 %v18102_v1 }
 0x5c6   : > { %14155 = vmatmul.mubr.msk.bf16.gmra.mrb[52].mxu1 %vm536_vm3, %v3886_v33  ;;  %v3898_v33 = vsel %vm1466_vm4, %v3893_v60, %v3897_v34  ;;  %v10043_v6 = vor.u32 %v10041_v35, %v10039_v44  ;;  %v22792_v44 = vshll.u32 %v20747_v3, 16 }
 0x5c7   : > { %15307 = vmatmul.mubr.msk.bf16.gmra.mrb[8].mxu0 %vm536_vm3, %v10016_v40  ;;  %14158 = vmatprep.mubr.msk.bf16.mxu1 %vm18103_vm0, %v18102_v1  ;;  %v10045_v40 = vshll.u32 %v21310_v47, 16 }
 0x5c8   : > { %15310 = vmatprep.mubr.msk.bf16.mxu0 %vm18103_vm0, %v18102_v1  ;;  %v3908_v34 = vrot.slane %v22792_v44, 2 }
 0x5c9   : > { %v10047_v52 = vrot.slane %v10045_v40, 1 }
 0x5ca   : > { %v3909_v29 = vor.u32 %v3908_v34, %v3907_v37  ;;  %v18038_v37 = vld [vmem:[%s18169_s4 + $0x10] sm:$0xf] }
 0x5cc   : > { %v3910_v49 = vsel %vm1466_vm4, %v3905_v16, %v3909_v29  ;;  %v22693_v16 = vshrl.u32 %v21376_v15, 16 }
 0x5ce   : > { %14159 = vmatmul.mubr.msk.bf16.gmra.mrb[56].mxu1 %vm536_vm3, %v3890_v46  ;;  %v10049_v46 = vshrl.u32 %v21310_v47, 16 }
 0x5cf   : > { %15311 = vmatmul.mubr.msk.bf16.gmra.mrb[12].mxu0 %vm536_vm3, %v10024_v21  ;;  %14162 = vmatprep.mubr.msk.bf16.mxu1 %vm18103_vm0, %v18102_v1  ;;  %v10048_v21 = vsel %vm339_vm2, %v10043_v6, %v10047_v52 }
 0x5d0   : > { %15314 = vmatprep.mubr.msk.bf16.mxu0 %vm18103_vm0, %v18102_v1  ;;  %v10051_v60 = vor.u32 %v10049_v46, %v10047_v52  ;;  %v22690_v52 = vshll.u32 %v21376_v15, 16 }
 0x5d2   : > { %v10071_v9 = vrot.slane %v22690_v52, 1 }
 0x5d4   : > { %v10075_v34 = vor.u32 %v22693_v16, %v10071_v9 }
 0x5d6   : > { %14163 = vmatmul.mubr.msk.bf16.gmra.mrb[60].mxu1 %vm536_vm3, %v3894_v51  ;;  %v21352_v51 = vld [vmem:[%s18169_s4 + $0x78] sm:$0xff]  }
 0x5d7   : > { %15315 = vmatmul.mubr.msk.bf16.gmra.mrb[16].mxu0 %vm536_vm3, %v10032_v27  ;;  %14166 = vmatprep.mubr.msk.bf16.mxu1 %vm18103_vm0, %v18102_v1  ;;  %v10055_v27 = vrot.slane %v10053_v24, 1  ;;  %v22698_v2 = vshll.u32 %v21352_v51, 16  ;;  %v10065_v6 = vshrl.u32 %v21352_v51, 16 }
 0x5d8   : > { %15318 = vmatprep.mubr.msk.bf16.mxu0 %vm18103_vm0, %v18102_v1 }
 0x5d9   : > { %v10056_v4 = vsel %vm339_vm2, %v10051_v60, %v10055_v27  ;;  %v10063_v59 = vrot.slane %v22698_v2, 1  ;;  %v4250_v60 = vld [vmem:[%s18169_s4 + $0xc] sm:$0xc]  ;;  %v10491_v2 = vld [vmem:[%s18169_s4 + $0x30] sm:$0xe] }
 0x5da   : > { %v12191_v44 = vcombine.low %v4250_v60, %v18038_v37  ;;  %v21435_v60 = vld [vmem:[%s18169_s4 + $0x98] sm:$0xff]   ;;  %v17916_v37 = vld [vmem:[%s22530_s1 + $0x148] sm:$0xff]  }
 0x5db   : > { %v10067_v38 = vor.u32 %v10065_v6, %v10063_v59 }
 0x5de   : > { %14167 = vmatmul.mubr.msk.bf16.gmra.mrb[64].mxu1 %vm536_vm3, %v3898_v33  ;;  %v10059_v33 = vor.u32 %v10057_v32, %v10055_v27  ;;  %v10072_v27 = vsel %vm339_vm2, %v10067_v38, %v10071_v9  ;;  %v17909_v38 = vld [vmem:[%s22530_s1 + $0x140] sm:$0xff]  }
 0x5df   : > { %15319 = vmatmul.mubr.msk.bf16.gmra.mrb[20].mxu0 %vm536_vm3, %v10040_v43  ;;  %14170 = vmatprep.mubr.msk.bf16.mxu1 %vm18103_vm0, %v18102_v1  ;;  %v21365_v43 = vld [vmem:[%s18169_s4 + $0xb4] ss:$0 sps:$4 sm:$0x33]  }
 0x5e0   : > { %15322 = vmatprep.mubr.msk.bf16.mxu0 %vm18103_vm0, %v18102_v1  ;;  %v3912_v3 = vshrl.u32 %v21365_v43, 16  ;;  %v3915_v18 = vshll.u32 %v21365_v43, 16  ;;  %v10064_v7 = vsel %vm339_vm2, %v10059_v33, %v10063_v59  ;;  %v21414_v59 = vld [vmem:[%s18169_s4 + $0x90] sm:$0xff]  }
 0x5e6   : > { %14171 = vmatmul.mubr.msk.bf16.gmra.mrb[68].mxu1 %vm536_vm3, %v3902_v36  ;;  %v3917_v36 = vrot.slane %v3915_v18, 2 }
 0x5e7   : > { %15323 = vmatmul.mubr.msk.bf16.gmra.mrb[24].mxu0 %vm536_vm3, %v10048_v21  ;;  %14174 = vmatprep.mubr.msk.bf16.mxu1 %vm18103_vm0, %v18102_v1  ;;  %v3914_v21 = vrot.slane %v3912_v3, 1  ;;  %v18039_v3 = vld [vmem:[%s18169_s4 + $0x14] sm:$0xff]  }
 0x5e8   : > { %15326 = vmatprep.mubr.msk.bf16.mxu0 %vm18103_vm0, %v18102_v1  ;;  %v4263_v18 = vrot.slane %v18039_v3, 2  ;;  %v17923_v3 = vld [vmem:[%s22530_s1 + $0x150] sm:$0xff]  }
 0x5e9   : > { %v3918_v42 = vor.u32 %v3917_v36, %v3914_v21  ;;  %v22678_v21 = vshll.u32 %v21414_v59, 16 }
 0x5ee   : > { %14175 = vmatmul.mubr.msk.bf16.gmra.mrb[72].mxu1 %vm536_vm3, %v3906_v41  ;;  %v3919_v41 = vsel %vm1466_vm4, %v3909_v29, %v3918_v42  ;;  %v4262_v29 = vrot.slane %v12191_v44, 2  ;;  %v10087_v42 = vrot.slane %v22678_v21, 1 }
 0x5ef   : > { %15327 = vmatmul.mubr.msk.bf16.gmra.mrb[28].mxu0 %vm536_vm3, %v10056_v4  ;;  %14178 = vmatprep.mubr.msk.bf16.mxu1 %vm18103_vm0, %v18102_v1  ;;  %v22684_v4 = vshll.u32 %v21395_v53, 16 }
 0x5f0   : > { %15330 = vmatprep.mubr.msk.bf16.mxu0 %vm18103_vm0, %v18102_v1  ;;  %v4264_v36 = vsel %vm1906_vm5, %v4262_v29, %v4263_v18 }
 0x5f1   : > { %v10079_v33 = vrot.slane %v22684_v4, 1 }
 0x5f6   : > { %14179 = vmatmul.mubr.msk.bf16.gmra.mrb[76].mxu1 %vm536_vm3, %v3910_v49  ;;  %v22687_v49 = vshrl.u32 %v21395_v53, 16 }
 0x5f7   : > { %15331 = vmatmul.mubr.msk.bf16.gmra.mrb[32].mxu0 %vm536_vm3, %v10064_v7  ;;  %14182 = vmatprep.mubr.msk.bf16.mxu1 %vm18103_vm0, %v18102_v1  ;;  %v10080_v7 = vsel %vm339_vm2, %v10075_v34, %v10079_v33  ;;  %v22681_v34 = vshrl.u32 %v21414_v59, 16 }
 0x5f8   : > { %15334 = vmatprep.mubr.msk.bf16.mxu0 %vm18103_vm0, %v18102_v1  ;;  %v10083_v9 = vor.u32 %v22687_v49, %v10079_v33  ;;  %v22677_v33 = vshll.u32 %v21435_v60, 16 }
 0x5fa   : > { %v10088_v44 = vsel %vm339_vm2, %v10083_v9, %v10087_v42 }
 0x5fe   : > { %14183 = vmatmul.mubr.msk.bf16.gmra.mrb[80].mxu1 %vm536_vm3, %v3919_v41 }
 0x5ff   : > { %15335 = vmatmul.mubr.msk.bf16.gmra.mrb[36].mxu0 %vm536_vm3, %v10072_v27  ;;  %14194 = vmatprep.mubr.msk.bf16.mxu1 %vm18103_vm0, %v18102_v1  ;;  %v18040_v27 = vld [vmem:[%s18169_s4 + $0x1c] sm:$0xff]  }
 0x600   : > { %15338 = vmatprep.mubr.msk.bf16.mxu0 %vm18103_vm0, %v18102_v1  ;;  %v4265_v41 = vrot.slane %v18040_v27, 2  ;;  %v17925_v27 = vld [vmem:[%s22530_s1 + $0x158] sm:$0xff]  }
 0x602   : > { %v4266_v29 = vsel %vm1906_vm5, %v4263_v18, %v4265_v41  ;;  %v10095_v18 = vrot.slane %v22677_v33, 1 }
 0x606   : > { %14195 = vmatmul.mubr.msk.bf16.vlgmr.msra.gmra.mrb[0].mxu1 %vm536_vm3, %v4264_v36  ;;  %v21461_v36 = vld [vmem:[%s18169_s4 + $0xa0] sm:$0xff]  }
 0x607   : > { %15339 = vmatmul.mubr.msk.bf16.gmra.mrb[40].mxu0 %vm536_vm3, %v10080_v7  ;;  %14198 = vmatprep.mubr.msk.bf16.mxu1 %vm18103_vm0, %v18102_v1  ;;  %v10091_v7 = vor.u32 %v22681_v34, %v10087_v42 }
 0x608   : > { %15342 = vmatprep.mubr.msk.bf16.mxu0 %vm18103_vm0, %v18102_v1  ;;  %14279 = vmatpush3.bf16.msra.mxu1 %v17909_v38  ;;  %v18041_v38 = vld [vmem:[%s18169_s4 + $0x24] sm:$0xff]  }
 0x609   : > { %14280 = vmatprep.subr.bf16.mxu1 %v18102_v1  ;;  %v4267_v9 = vrot.slane %v18041_v38, 2  ;;  %v10096_v42 = vsel %vm339_vm2, %v10091_v7, %v10095_v18  ;;  %v21484_v38 = vld [vmem:[%s18169_s4 + $0xa8] sm:$0xff]  }
 0x60a   : > { %v22682_v33 = vshll.u32 %v21484_v38, 16 }
 0x60c   : > { %14281 = vmatpush3.bf16.msra.mxu1 %v17916_v37  ;;  %v22680_v37 = vshrl.u32 %v21435_v60, 16 }
 0x60d   : > { %14282 = vmatprep.subr.bf16.mxu1 %v18102_v1 }
 0x60e   : > { %14199 = vmatmul.mubr.msk.bf16.gmra.mrb[4].mxu1 %vm536_vm3, %v4266_v29  ;;  %v4268_v29 = vsel %vm1906_vm5, %v4265_v41, %v4267_v9  ;;  %v18042_v41 = vld [vmem:[%s18169_s4 + $0x2c] sm:$0xff]  }
 0x60f   : > { %15343 = vmatmul.mubr.msk.bf16.gmra.mrb[44].mxu0 %vm536_vm3, %v10088_v44  ;;  %14202 = vmatprep.mubr.msk.bf16.mxu1 %vm18103_vm0, %v18102_v1  ;;  %v22679_v44 = vshll.u32 %v21461_v36, 16 }
 0x610   : > { %15346 = vmatprep.mubr.msk.bf16.mxu0 %vm18103_vm0, %v18102_v1  ;;  %14283 = vmatpush3.bf16.msra.mxu1 %v17923_v3  ;;  %v10099_v3 = vor.u32 %v22680_v37, %v10095_v18 }
 0x611   : > { %14284 = vmatprep.subr.bf16.mxu1 %v18102_v1  ;;  %v10103_v7 = vrot.slane %v22679_v44, 1  ;;  %v22686_v44 = vshrl.u32 %v21484_v38, 16 }
 0x614   : > { %14285 = vmatpush3.bf16.msra.mxu1 %v17925_v27  ;;  %v4269_v27 = vrot.slane %v18042_v41, 2  ;;  %v21502_v41 = vld [vmem:[%s18169_s4 + $0xb0] sm:$0xff]  }
 0x615   : > { %14370 = vmatprep.subr.bf16.mxu1 %v18102_v1  ;;  %v22685_v37 = vshll.u32 %v21502_v41, 16 }
 0x616   : > { %14203 = vmatmul.mubr.msk.bf16.gmra.mrb[8].mxu1 %vm536_vm3, %v4268_v29  ;;  %v22683_v29 = vshrl.u32 %v21461_v36, 16  ;;  %v4270_v21 = vsel %vm1906_vm5, %v4267_v9, %v4269_v27  ;;  %v18043_v9 = vld [vmem:[%s18169_s4 + $0x34] sm:$0xff]  }
 0x617   : > { %15347 = vmatmul.mubr.msk.bf16.gmra.mrb[48].mxu0 %vm536_vm3, %v10096_v42  ;;  %14206 = vmatprep.mubr.msk.bf16.mxu1 %vm18103_vm0, %v18102_v1  ;;  %v10104_v42 = vsel %vm339_vm2, %v10099_v3, %v10103_v7  ;;  %v10111_v3 = vrot.slane %v22682_v33, 1  ;;  %v22689_v33 = vshrl.u32 %v21502_v41, 16 }
 0x618   : > { %15350 = vmatprep.mubr.msk.bf16.mxu0 %vm18103_vm0, %v18102_v1  ;;  %v10107_v18 = vor.u32 %v22683_v29, %v10103_v7 }
 0x619   : > { %v10115_v7 = vor.u32 %v22686_v44, %v10111_v3 }
 0x61e   : > { %14207 = vmatmul.mubr.msk.bf16.gmra.mrb[12].mxu1 %vm536_vm3, %v4270_v21  ;;  %v10112_v21 = vsel %vm339_vm2, %v10107_v18, %v10111_v3  ;;  %v10119_v18 = vrot.slane %v22685_v37, 1 }
 0x61f   : > { %15351 = vmatmul.mubr.msk.bf16.gmra.mrb[52].mxu0 %vm536_vm3, %v10104_v42  ;;  %14210 = vmatprep.mubr.msk.bf16.mxu1 %vm18103_vm0, %v18102_v1  ;;  %v4271_v42 = vrot.slane %v18043_v9, 2  ;;  %v21520_v9 = vld [vmem:[%s18169_s4 + $0xb8] sm:$0xff]  }
 0x620   : > { %15354 = vmatprep.mubr.msk.bf16.mxu0 %vm18103_vm0, %v18102_v1  ;;  %v22688_v29 = vshll.u32 %v21520_v9, 16  ;;  %v10123_v3 = vor.u32 %v22689_v33, %v10119_v18  ;;  %v22692_v37 = vshrl.u32 %v21520_v9, 16 }
 0x621   : > { %v4272_v34 = vsel %vm1906_vm5, %v4269_v27, %v4271_v42  ;;  %v18044_v27 = vld [vmem:[%s18169_s4 + $0x3c] sm:$0xff]  }
 0x626   : > { %14211 = vmatmul.mubr.msk.bf16.gmra.mrb[16].mxu1 %vm536_vm3, %v4272_v34  ;;  %v10120_v34 = vsel %vm339_vm2, %v10115_v7, %v10119_v18  ;;  %v10127_v7 = vrot.slane %v22688_v29, 1 }
 0x627   : > { %15355 = vmatmul.mubr.msk.bf16.gmra.mrb[56].mxu0 %vm536_vm3, %v10112_v21  ;;  %14214 = vmatprep.mubr.msk.bf16.mxu1 %vm18103_vm0, %v18102_v1  ;;  %v4273_v21 = vrot.slane %v18044_v27, 2  ;;  %v21538_v27 = vld [vmem:[%s18169_s4 + $0xc0] sm:$0xff]  }
 0x628   : > { %15358 = vmatprep.mubr.msk.bf16.mxu0 %vm18103_vm0, %v18102_v1  ;;  %v22691_v44 = vshll.u32 %v21538_v27, 16  ;;  %v10131_v18 = vor.u32 %v22692_v37, %v10127_v7  ;;  %v22695_v29 = vshrl.u32 %v21538_v27, 16 }
 0x629   : > { %v4274_v4 = vsel %vm1906_vm5, %v4271_v42, %v4273_v21  ;;  %v18045_v42 = vld [vmem:[%s18169_s4 + $0x44] sm:$0xff]  }
 0x62e   : > { %14215 = vmatmul.mubr.msk.bf16.gmra.mrb[20].mxu1 %vm536_vm3, %v4274_v4  ;;  %v10128_v4 = vsel %vm339_vm2, %v10123_v3, %v10127_v7  ;;  %v10135_v3 = vrot.slane %v22691_v44, 1 }
 0x62f   : > { %15359 = vmatmul.mubr.msk.bf16.gmra.mrb[60].mxu0 %vm536_vm3, %v10120_v34  ;;  %14218 = vmatprep.mubr.msk.bf16.mxu1 %vm18103_vm0, %v18102_v1  ;;  %v4275_v34 = vrot.slane %v18045_v42, 2  ;;  %v21556_v42 = vld [vmem:[%s18169_s4 + $0xc8] sm:$0xff]  }
 0x630   : > { %15362 = vmatprep.mubr.msk.bf16.mxu0 %vm18103_vm0, %v18102_v1  ;;  %v22694_v33 = vshll.u32 %v21556_v42, 16  ;;  %v10139_v7 = vor.u32 %v22695_v29, %v10135_v3  ;;  %v22697_v44 = vshrl.u32 %v21556_v42, 16 }
 0x631   : > { %v4276_v49 = vsel %vm1906_vm5, %v4273_v21, %v4275_v34  ;;  %v18046_v21 = vld [vmem:[%s18169_s4 + $0x4c] sm:$0xff]  }
 0x636   : > { %14219 = vmatmul.mubr.msk.bf16.gmra.mrb[24].mxu1 %vm536_vm3, %v4276_v49  ;;  %v10136_v49 = vsel %vm339_vm2, %v10131_v18, %v10135_v3  ;;  %v10143_v18 = vrot.slane %v22694_v33, 1 }
 0x637   : > { %15363 = vmatmul.mubr.msk.bf16.gmra.mrb[64].mxu0 %vm536_vm3, %v10128_v4  ;;  %14222 = vmatprep.mubr.msk.bf16.mxu1 %vm18103_vm0, %v18102_v1  ;;  %v4277_v4 = vrot.slane %v18046_v21, 2  ;;  %v21574_v21 = vld [vmem:[%s18169_s4 + $0xd0] sm:$0xff]  }
 0x638   : > { %15366 = vmatprep.mubr.msk.bf16.mxu0 %vm18103_vm0, %v18102_v1  ;;  %v22696_v37 = vshll.u32 %v21574_v21, 16  ;;  %v10147_v3 = vor.u32 %v22697_v44, %v10143_v18  ;;  %v10153_v33 = vshrl.u32 %v21574_v21, 16 }
 0x639   : > { %v4278_v52 = vsel %vm1906_vm5, %v4275_v34, %v4277_v4  ;;  %v18047_v34 = vld [vmem:[%s18169_s4 + $0x54] sm:$0xff]  }
 0x63e   : > { %14223 = vmatmul.mubr.msk.bf16.gmra.mrb[28].mxu1 %vm536_vm3, %v4278_v52  ;;  %v10144_v52 = vsel %vm339_vm2, %v10139_v7, %v10143_v18  ;;  %v10151_v7 = vrot.slane %v22696_v37, 1 }
 0x63f   : > { %15367 = vmatmul.mubr.msk.bf16.gmra.mrb[68].mxu0 %vm536_vm3, %v10136_v49  ;;  %14226 = vmatprep.mubr.msk.bf16.mxu1 %vm18103_vm0, %v18102_v1  ;;  %v4279_v49 = vrot.slane %v18047_v34, 2  ;;  %v21592_v34 = vld [vmem:[%s18169_s4 + $0xd8] ss:$0 sps:$4 sm:$0x11]  }
 0x640   : > { %15370 = vmatprep.mubr.msk.bf16.mxu0 %vm18103_vm0, %v18102_v1  ;;  %v10157_v29 = vshll.u32 %v21592_v34, 16  ;;  %v10155_v37 = vor.u32 %v10153_v33, %v10151_v7 }
 0x641   : > { %v4280_v16 = vsel %vm1906_vm5, %v4277_v4, %v4279_v49  ;;  %v18048_v4 = vld [vmem:[%s18169_s4 + $0x5c] sm:$0xff]  }
 0x646   : > { %14227 = vmatmul.mubr.msk.bf16.gmra.mrb[32].mxu1 %vm536_vm3, %v4280_v16  ;;  %v10152_v16 = vsel %vm339_vm2, %v10147_v3, %v10151_v7  ;;  %v18049_v3 = vld [vmem:[%s18169_s4 + $0x64] sm:$0xff]   ;;  %v10504_v7 = vrot.slane %v21171_v22, 1 }
 0x647   : > { %15371 = vmatmul.mubr.msk.bf16.gmra.mrb[72].mxu0 %vm536_vm3, %v10144_v52  ;;  %14230 = vmatprep.mubr.msk.bf16.mxu1 %vm18103_vm0, %v18102_v1  ;;  %v4281_v52 = vrot.slane %v18048_v4, 2  ;;  %v10159_v4 = vrot.slane %v10157_v29, 1  ;;  %v4283_v44 = vrot.slane %v18049_v3, 2  ;;  %v10506_v3 = vrot.slane %v21189_v63, 1  ;;  %v17942_v22 = vld [vmem:[%s22530_s1 + $0x300] sm:$0xff]   ;;  %v17944_v63 = vld [vmem:[%s18169_s4 + $0x78] sm:$0xff]  }
 0x648   : > { %15374 = vmatprep.mubr.msk.bf16.mxu0 %vm18103_vm0, %v18102_v1 }
 0x649   : > { %v4282_v18 = vsel %vm1906_vm5, %v4279_v49, %v4281_v52  ;;  %v10160_v49 = vsel %vm339_vm2, %v10155_v37, %v10159_v4  ;;  %v18050_v37 = vld [vmem:[%s18169_s4 + $0x6c] sm:$0xff]  }
 0x64e   : > { %14231 = vmatmul.mubr.msk.bf16.gmra.mrb[36].mxu1 %vm536_vm3, %v4282_v18  ;;  %v4284_v18 = vsel %vm1906_vm5, %v4281_v52, %v4283_v44  ;;  %v17922_v52 = vld [vmem:[%s22530_s1 + $0x2e0] sm:$0xff]  }
 0x64f   : > { %15375 = vmatmul.mubr.msk.bf16.gmra.mrb[76].mxu0 %vm536_vm3, %v10152_v16  ;;  %14234 = vmatprep.mubr.msk.bf16.mxu1 %vm18103_vm0, %v18102_v1  ;;  %v21613_v16 = vcombine.low %v10491_v2, %v21157_v62  ;;  %v4285_v62 = vrot.slane %v18050_v37, 2 }
 0x650   : > { %15378 = vmatprep.mubr.msk.bf16.mxu0 %vm18103_vm0, %v18102_v1 }
 0x651   : > { %v10503_v29 = vrot.slane %v21613_v16, 1  ;;  %v4286_v4 = vsel %vm1906_vm5, %v4283_v44, %v4285_v62 }
 0x653   : > { %v10505_v2 = vsel %vm1080_vm1, %v10503_v29, %v10504_v7  ;;  %v10507_v29 = vsel %vm1080_vm1, %v10504_v7, %v10506_v3  ;;  %v18052_v7 = vld [vmem:[%s18169_s4 + $0x7c] sm:$0xff]  }
 0x656   : > { %14235 = vmatmul.mubr.msk.bf16.gmra.mrb[40].mxu1 %vm536_vm3, %v4284_v18  ;;  %v18051_v18 = vld [vmem:[%s18169_s4 + $0x74] sm:$0xff]  }
 0x657   : > { %15379 = vmatmul.mubr.msk.bf16.gmra.mrb[80].mxu0 %vm536_vm3, %v10160_v49  ;;  %14238 = vmatprep.mubr.msk.bf16.mxu1 %vm18103_vm0, %v18102_v1  ;;  %v17924_v49 = vld [vmem:[%s22530_s1 + $0x2e8] sm:$0xff]   ;;  %v4287_v44 = vrot.slane %v18051_v18, 2 }
 0x658   : > { %15390 = vmatprep.mubr.msk.bf16.mxu0 %vm18103_vm0, %v18102_v1 }
 0x659   : > { %v4288_v37 = vsel %vm1906_vm5, %v4285_v62, %v4287_v44  ;;  %v4289_v62 = vrot.slane %v18052_v7, 2  ;;  %v10512_v7 = vrot.slane %v21268_v58, 1  ;;  %v10917_v58 = vrot.slane %v10037_v23, 2 }
 0x65b   : > { %v4290_v18 = vsel %vm1906_vm5, %v4287_v44, %v4289_v62 }
 0x65e   : > { %14239 = vmatmul.mubr.msk.bf16.gmra.mrb[44].mxu1 %vm536_vm3, %v4286_v4  ;;  %v17934_v4 = vld [vmem:[%s22530_s1 + $0x2f8] sm:$0xff]  }
 0x65f   : > { %15391 = vmatmul.mubr.msk.bf16.vlgmr.msra.gmra.mrb[0].mxu0 %vm536_vm3, %v10505_v2  ;;  %14242 = vmatprep.mubr.msk.bf16.mxu1 %vm18103_vm0, %v18102_v1  ;;  %v17927_v2 = vld [vmem:[%s22530_s1 + $0x2f0] sm:$0xff]  }
 0x660   : > { %15475 = vmatpush3.bf16.msra.mxu0 %v17922_v52  ;;  %15394 = vmatprep.mubr.msk.bf16.mxu0 %vm18103_vm0, %v18102_v1  ;;  %v10508_v52 = vrot.slane %v21211_v45, 1  ;;  %v17957_v45 = vld [vmem:[%s22530_s1 + $0x318] sm:$0xff]  }
 0x661   : > { %15476 = vmatprep.subr.bf16.mxu0 %v18102_v1 }
 0x664   : > { %15477 = vmatpush3.bf16.msra.mxu0 %v17924_v49  ;;  %v10509_v49 = vsel %vm1080_vm1, %v10506_v3, %v10508_v52 }
 0x665   : > { %15478 = vmatprep.subr.bf16.mxu0 %v18102_v1 }
 0x666   : > { %14243 = vmatmul.mubr.msk.bf16.gmra.mrb[48].mxu1 %vm536_vm3, %v4288_v37  ;;  %v18053_v37 = vld [vmem:[%s18169_s4 + $0x84] sm:$0xff]  }
 0x667   : > { %15395 = vmatmul.mubr.msk.bf16.gmra.mrb[4].mxu0 %vm536_vm3, %v10507_v29  ;;  %14246 = vmatprep.mubr.msk.bf16.mxu1 %vm18103_vm0, %v18102_v1  ;;  %v10510_v29 = vrot.slane %v21242_v61, 1  ;;  %v4291_v3 = vrot.slane %v18053_v37, 2  ;;  %v18055_v37 = vld [vmem:[%s18169_s4 + $0x94] sm:$0xff]   ;;  %v10912_v61 = vrot.slane %v10033_v57, 1  ;;  %v10916_v57 = vrot.slane %v10041_v35, 1 }
 0x668   : > { %15398 = vmatprep.mubr.msk.bf16.mxu0 %vm18103_vm0, %v18102_v1  ;;  %15479 = vmatpush3.bf16.msra.mxu0 %v17927_v2  ;;  %v10920_v35 = vrot.slane %v10049_v46, 1  ;;  %v10924_v46 = vrot.slane %v10057_v32, 1 }
 0x669   : > { %15480 = vmatprep.subr.bf16.mxu0 %v18102_v1  ;;  %v10511_v44 = vsel %vm1080_vm1, %v10508_v52, %v10510_v29  ;;  %v4292_v2 = vsel %vm1906_vm5, %v4289_v62, %v4291_v3  ;;  %v10514_v62 = vrot.slane %v21289_v25, 1  ;;  %v10921_v25 = vrot.slane %v10045_v40, 2 }
 0x66b   : > { %v10922_v23 = vor.u32 %v10921_v25, %v10920_v35 }
 0x66c   : > { %15481 = vmatpush3.bf16.msra.mxu0 %v17934_v4  ;;  %v18054_v4 = vld [vmem:[%s18169_s4 + $0x8c] sm:$0xff]  }
 0x66d   : > { %15566 = vmatprep.subr.bf16.mxu0 %v18102_v1 }
 0x66e   : > { %14247 = vmatmul.mubr.msk.bf16.gmra.mrb[52].mxu1 %vm536_vm3, %v4290_v18  ;;  %v10513_v18 = vsel %vm1080_vm1, %v10510_v29, %v10512_v7 }
 0x66f   : > { %15399 = vmatmul.mubr.msk.bf16.gmra.mrb[8].mxu0 %vm536_vm3, %v10509_v49  ;;  %14250 = vmatprep.mubr.msk.bf16.mxu1 %vm18103_vm0, %v18102_v1  ;;  %v4293_v49 = vrot.slane %v18054_v4, 2  ;;  %v18056_v4 = vld [vmem:[%s18169_s4 + $0x9c] sm:$0xff]  }
 0x670   : > { %15402 = vmatprep.mubr.msk.bf16.mxu0 %vm18103_vm0, %v18102_v1 }
 0x671   : > { %v4294_v52 = vsel %vm1906_vm5, %v4291_v3, %v4293_v49  ;;  %v10516_v3 = vrot.slane %v21310_v47, 1  ;;  %v10925_v47 = vrot.slane %v10053_v24, 2  ;;  %v22793_v24 = vshll.u32 %v21352_v51, 16 }
 0x673   : > { %v10926_v40 = vor.u32 %v10925_v47, %v10924_v46  ;;  %v18060_v46 = vld [vmem:[%s22530_s1 + $0x180] sm:$0xff]  }
 0x675   : > { %v10927_v32 = vsel %vm1466_vm4, %v10922_v23, %v10926_v40 }
 0x676   : > { %14251 = vmatmul.mubr.msk.bf16.gmra.mrb[56].mxu1 %vm536_vm3, %v4292_v2  ;;  %v10515_v2 = vsel %vm1080_vm1, %v10512_v7, %v10514_v62 }
 0x677   : > { %15403 = vmatmul.mubr.msk.bf16.gmra.mrb[12].mxu0 %vm536_vm3, %v10511_v44  ;;  %14254 = vmatprep.mubr.msk.bf16.mxu1 %vm18103_vm0, %v18102_v1  ;;  %v4295_v44 = vrot.slane %v18055_v37, 2  ;;  %v18057_v37 = vld [vmem:[%s18169_s4 + $0xa4] sm:$0xff]  }
 0x678   : > { %15406 = vmatprep.mubr.msk.bf16.mxu0 %vm18103_vm0, %v18102_v1 }
 0x679   : > { %v4296_v29 = vsel %vm1906_vm5, %v4293_v49, %v4295_v44  ;;  %v10518_v49 = vrot.slane %v21331_v10, 1  ;;  %v10928_v10 = vrot.slane %v10065_v6, 1  ;;  %v22794_v6 = vshrl.u32 %v21376_v15, 16 }
 0x67e   : > { %14255 = vmatmul.mubr.msk.bf16.gmra.mrb[60].mxu1 %vm536_vm3, %v4294_v52  ;;  %v10517_v52 = vsel %vm1080_vm1, %v10514_v62, %v10516_v3 }
 0x67f   : > { %15407 = vmatmul.mubr.msk.bf16.gmra.mrb[16].mxu0 %vm536_vm3, %v10513_v18  ;;  %14258 = vmatprep.mubr.msk.bf16.mxu1 %vm18103_vm0, %v18102_v1  ;;  %v4297_v18 = vrot.slane %v18056_v4, 2  ;;  %v18058_v4 = vld [vmem:[%s18169_s4 + $0xac] sm:$0xff]  }
 0x680   : > { %15410 = vmatprep.mubr.msk.bf16.mxu0 %vm18103_vm0, %v18102_v1 }
 0x681   : > { %v4298_v7 = vsel %vm1906_vm5, %v4295_v44, %v4297_v18  ;;  %v10520_v44 = vrot.slane %v21352_v51, 1  ;;  %v10932_v51 = vrot.slane %v22794_v6, 1 }
 0x686   : > { %14259 = vmatmul.mubr.msk.bf16.gmra.mrb[64].mxu1 %vm536_vm3, %v4296_v29  ;;  %v10519_v29 = vsel %vm1080_vm1, %v10516_v3, %v10518_v49 }
 0x687   : > { %15411 = vmatmul.mubr.msk.bf16.gmra.mrb[20].mxu0 %vm536_vm3, %v10515_v2  ;;  %14262 = vmatprep.mubr.msk.bf16.mxu1 %vm18103_vm0, %v18102_v1  ;;  %v4299_v2 = vrot.slane %v18057_v37, 2  ;;  %v4303_v37 = vrot.slane %v21365_v43, 2 }
 0x688   : > { %15414 = vmatprep.mubr.msk.bf16.mxu0 %vm18103_vm0, %v18102_v1 }
 0x689   : > { %v4300_v62 = vsel %vm1906_vm5, %v4297_v18, %v4299_v2  ;;  %v10522_v18 = vrot.slane %v21376_v15, 1 }
 0x68e   : > { %14263 = vmatmul.mubr.msk.bf16.gmra.mrb[68].mxu1 %vm536_vm3, %v4298_v7  ;;  %v10521_v7 = vsel %vm1080_vm1, %v10518_v49, %v10520_v44 }
 0x68f   : > { %15415 = vmatmul.mubr.msk.bf16.gmra.mrb[24].mxu0 %vm536_vm3, %v10517_v52  ;;  %14266 = vmatprep.mubr.msk.bf16.mxu1 %vm18103_vm0, %v18102_v1  ;;  %v4301_v52 = vrot.slane %v18058_v4, 2  ;;  %v10526_v4 = vrot.slane %v21414_v59, 1 }
 0x690   : > { %15418 = vmatprep.mubr.msk.bf16.mxu0 %vm18103_vm0, %v18102_v1 }
 0x691   : > { %v4302_v3 = vsel %vm1906_vm5, %v4299_v2, %v4301_v52  ;;  %v4304_v49 = vsel %vm1906_vm5, %v4301_v52, %v4303_v37  ;;  %v10524_v2 = vrot.slane %v21395_v53, 1  ;;  %v17936_v52 = vld [vmem:[%s22530_s1 + $0x168] sm:$0xff]   ;;  %v10528_v37 = vrot.slane %v21435_v60, 1 }
 0x693   : > { %v10525_v43 = vsel %vm1080_vm1, %v10522_v18, %v10524_v2 }
 0x696   : > { %14267 = vmatmul.mubr.msk.bf16.gmra.mrb[72].mxu1 %vm536_vm3, %v4300_v62  ;;  %v17926_v62 = vld [vmem:[%s18169_s4 + $0x18] sm:$0xff]  }
 0x697   : > { %15419 = vmatmul.mubr.msk.bf16.gmra.mrb[28].mxu0 %vm536_vm3, %v10519_v29  ;;  %14270 = vmatprep.mubr.msk.bf16.mxu1 %vm18103_vm0, %v18102_v1  ;;  %v10523_v29 = vsel %vm1080_vm1, %v10520_v44, %v10522_v18  ;;  %v17929_v44 = vld [vmem:[%s22530_s1 + $0x160] sm:$0xff]   ;;  %v17943_v18 = vld [vmem:[%s22530_s1 + $0x170] sm:$0xff]  }
 0x698   : > { %15422 = vmatprep.mubr.msk.bf16.mxu0 %vm18103_vm0, %v18102_v1 }
 0x69e   : > { %14271 = vmatmul.mubr.msk.bf16.gmra.mrb[76].mxu1 %vm536_vm3, %v4302_v3  ;;  %v10527_v3 = vsel %vm1080_vm1, %v10524_v2, %v10526_v4  ;;  %v10529_v2 = vsel %vm1080_vm1, %v10526_v4, %v10528_v37  ;;  %v10532_v4 = vrot.slane %v21484_v38, 1 }
 0x69f   : > { %15423 = vmatmul.mubr.msk.bf16.gmra.mrb[32].mxu0 %vm536_vm3, %v10521_v7  ;;  %14274 = vmatprep.mubr.msk.bf16.mxu1 %vm18103_vm0, %v18102_v1  ;;  %v17928_v7 = vld [vmem:[%s18169_s4 + $0x20] sm:$0xff]  }
 0x6a0   : > { %15426 = vmatprep.mubr.msk.bf16.mxu0 %vm18103_vm0, %v18102_v1 }
 0x6a6   : > { %14275 = vmatmul.mubr.msk.bf16.gmra.mrb[80].mxu1 %vm536_vm3, %v4304_v49  ;;  %v17930_v49 = vld [vmem:[%s18169_s4 + $0x28] sm:$0xff]  }
 0x6a7   : > { %15427 = vmatmul.mubr.msk.bf16.gmra.mrb[36].mxu0 %vm536_vm3, %v10523_v29  ;;  %14286 = vmatprep.mubr.msk.bf16.mxu1 %vm18103_vm0, %v18102_v1  ;;  %v17950_v29 = vld [vmem:[%s22530_s1 + $0x178] sm:$0xff]  }
 0x6a8   : > { %15430 = vmatprep.mubr.msk.bf16.mxu0 %vm18103_vm0, %v18102_v1 }
 0x6ae   : > { %14287 = vmatmul.mubr.msk.bf16.vlgmr.msra.gmra.mrb[0].mxu1 %vm536_vm3, %v17926_v62  ;;  %v10530_v62 = vrot.slane %v21461_v36, 1 }
 0x6af   : > { %15431 = vmatmul.mubr.msk.bf16.gmra.mrb[40].mxu0 %vm536_vm3, %v10525_v43  ;;  %14290 = vmatprep.mubr.msk.bf16.mxu1 %vm18103_vm0, %v18102_v1  ;;  %v17931_v43 = vld [vmem:[%s18169_s4 + $0x30] sm:$0xff]  }
 0x6b0   : > { %15434 = vmatprep.mubr.msk.bf16.mxu0 %vm18103_vm0, %v18102_v1  ;;  %14371 = vmatpush3.bf16.msra.mxu1 %v17929_v44  ;;  %v10531_v44 = vsel %vm1080_vm1, %v10528_v37, %v10530_v62 }
 0x6b1   : > { %14372 = vmatprep.subr.bf16.mxu1 %v18102_v1 }
 0x6b4   : > { %14373 = vmatpush3.bf16.msra.mxu1 %v17936_v52  ;;  %v17932_v52 = vld [vmem:[%s18169_s4 + $0x38] sm:$0xff]  }
 0x6b5   : > { %14374 = vmatprep.subr.bf16.mxu1 %v18102_v1 }
 0x6b6   : > { %14291 = vmatmul.mubr.msk.bf16.gmra.mrb[4].mxu1 %vm536_vm3, %v17928_v7  ;;  %v10533_v7 = vsel %vm1080_vm1, %v10530_v62, %v10532_v4  ;;  %v10538_v62 = vrot.slane %v21538_v27, 1 }
 0x6b7   : > { %15435 = vmatmul.mubr.msk.bf16.gmra.mrb[44].mxu0 %vm536_vm3, %v10527_v3  ;;  %14294 = vmatprep.mubr.msk.bf16.mxu1 %vm18103_vm0, %v18102_v1  ;;  %v10534_v3 = vrot.slane %v21502_v41, 1 }
 0x6b8   : > { %15438 = vmatprep.mubr.msk.bf16.mxu0 %vm18103_vm0, %v18102_v1  ;;  %14375 = vmatpush3.bf16.msra.mxu1 %v17943_v18  ;;  %v17933_v18 = vld [vmem:[%s18169_s4 + $0x40] sm:$0xff]  }
 0x6b9   : > { %14376 = vmatprep.subr.bf16.mxu1 %v18102_v1  ;;  %v10535_v37 = vsel %vm1080_vm1, %v10532_v4, %v10534_v3  ;;  %v10540_v4 = vrot.slane %v21556_v42, 1 }
 0x6bc   : > { %14377 = vmatpush3.bf16.msra.mxu1 %v17950_v29  ;;  %v10536_v29 = vrot.slane %v21520_v9, 1 }
 0x6bd   : > { %15658 = vmatprep.subr.bf16.mxu1 %v18102_v1 }
 0x6be   : > { %14295 = vmatmul.mubr.msk.bf16.gmra.mrb[8].mxu1 %vm536_vm3, %v17930_v49  ;;  %v17935_v49 = vld [vmem:[%s18169_s4 + $0x48] sm:$0xff]  }
 0x6bf   : > { %15439 = vmatmul.mubr.msk.bf16.gmra.mrb[48].mxu0 %vm536_vm3, %v10529_v2  ;;  %14298 = vmatprep.mubr.msk.bf16.mxu1 %vm18103_vm0, %v18102_v1  ;;  %v10537_v2 = vsel %vm1080_vm1, %v10534_v3, %v10536_v29  ;;  %v10542_v3 = vrot.slane %v21574_v21, 1 }
 0x6c0   : > { %15442 = vmatprep.mubr.msk.bf16.mxu0 %vm18103_vm0, %v18102_v1 }
 0x6c6   : > { %14299 = vmatmul.mubr.msk.bf16.gmra.mrb[12].mxu1 %vm536_vm3, %v17931_v43  ;;  %v17937_v43 = vld [vmem:[%s18169_s4 + $0x50] sm:$0xff]  }
 0x6c7   : > { %15443 = vmatmul.mubr.msk.bf16.gmra.mrb[52].mxu0 %vm536_vm3, %v10531_v44  ;;  %14302 = vmatprep.mubr.msk.bf16.mxu1 %vm18103_vm0, %v18102_v1  ;;  %v10539_v44 = vsel %vm1080_vm1, %v10536_v29, %v10538_v62  ;;  %v10544_v29 = vrot.slane %v21592_v34, 1 }
 0x6c8   : > { %15446 = vmatprep.mubr.msk.bf16.mxu0 %vm18103_vm0, %v18102_v1 }
 0x6ce   : > { %14303 = vmatmul.mubr.msk.bf16.gmra.mrb[16].mxu1 %vm536_vm3, %v17932_v52  ;;  %v17938_v52 = vld [vmem:[%s18169_s4 + $0x58] sm:$0xff]  }
 0x6cf   : > { %15447 = vmatmul.mubr.msk.bf16.gmra.mrb[56].mxu0 %vm536_vm3, %v10533_v7  ;;  %14306 = vmatprep.mubr.msk.bf16.mxu1 %vm18103_vm0, %v18102_v1  ;;  %v10541_v7 = vsel %vm1080_vm1, %v10538_v62, %v10540_v4  ;;  %v10896_v62 = vrot.slane %v10001_v8, 1  ;;  %v17941_v8 = vld [vmem:[%s18169_s4 + $0x70] sm:$0xff]  }
 0x6d0   : > { %15450 = vmatprep.mubr.msk.bf16.mxu0 %vm18103_vm0, %v18102_v1 }
 0x6d6   : > { %14307 = vmatmul.mubr.msk.bf16.gmra.mrb[20].mxu1 %vm536_vm3, %v17933_v18  ;;  %v17939_v18 = vld [vmem:[%s18169_s4 + $0x60] sm:$0xff]  }
 0x6d7   : > { %15451 = vmatmul.mubr.msk.bf16.gmra.mrb[60].mxu0 %vm536_vm3, %v10535_v37  ;;  %14310 = vmatprep.mubr.msk.bf16.mxu1 %vm18103_vm0, %v18102_v1  ;;  %v10543_v37 = vsel %vm1080_vm1, %v10540_v4, %v10542_v3 }
 0x6d8   : > { %15454 = vmatprep.mubr.msk.bf16.mxu0 %vm18103_vm0, %v18102_v1 }
 0x6de   : > { %14311 = vmatmul.mubr.msk.bf16.gmra.mrb[24].mxu1 %vm536_vm3, %v17935_v49  ;;  %v10889_v49 = vshrl.u32 %v21613_v16, 16 }
 0x6df   : > { %15455 = vmatmul.mubr.msk.bf16.gmra.mrb[64].mxu0 %vm536_vm3, %v10537_v2  ;;  %14314 = vmatprep.mubr.msk.bf16.mxu1 %vm18103_vm0, %v18102_v1  ;;  %v10892_v2 = vshll.u32 %v21613_v16, 16 }
 0x6e0   : > { %15458 = vmatprep.mubr.msk.bf16.mxu0 %vm18103_vm0, %v18102_v1  ;;  %v10891_v4 = vrot.slane %v10889_v49, 1  ;;  %v10905_v49 = vrot.slane %v10013_v13, 2  ;;  %v17945_v13 = vld [vmem:[%s18169_s4 + $0x80] sm:$0xff]  }
 0x6e6   : > { %14315 = vmatmul.mubr.msk.bf16.gmra.mrb[28].mxu1 %vm536_vm3, %v17937_v43  ;;  %v17940_v43 = vld [vmem:[%s18169_s4 + $0x68] sm:$0xff]  }
 0x6e7   : > { %15459 = vmatmul.mubr.msk.bf16.gmra.mrb[68].mxu0 %vm536_vm3, %v10539_v44  ;;  %14318 = vmatprep.mubr.msk.bf16.mxu1 %vm18103_vm0, %v18102_v1  ;;  %v10545_v44 = vsel %vm1080_vm1, %v10542_v3, %v10544_v29  ;;  %v17949_v29 = vld [vmem:[%s22530_s1 + $0x308] sm:$0xff]  }
 0x6e8   : > { %15462 = vmatprep.mubr.msk.bf16.mxu0 %vm18103_vm0, %v18102_v1 }
 0x6ee   : > { %14319 = vmatmul.mubr.msk.bf16.gmra.mrb[32].mxu1 %vm536_vm3, %v17938_v52  ;;  %v10894_v52 = vrot.slane %v10892_v2, 2  ;;  %v17956_v2 = vld [vmem:[%s22530_s1 + $0x310] sm:$0xff]  }
 0x6ef   : > { %15463 = vmatmul.mubr.msk.bf16.gmra.mrb[72].mxu0 %vm536_vm3, %v10541_v7  ;;  %14322 = vmatprep.mubr.msk.bf16.mxu1 %vm18103_vm0, %v18102_v1  ;;  %v10897_v7 = vrot.slane %v9997_v50, 2  ;;  %v10900_v50 = vrot.slane %v10009_v31, 1  ;;  %v10904_v31 = vrot.slane %v10017_v12, 1 }
 0x6f0   : > { %15466 = vmatprep.mubr.msk.bf16.mxu0 %vm18103_vm0, %v18102_v1  ;;  %v10895_v34 = vor.u32 %v10894_v52, %v10891_v4  ;;  %v17946_v52 = vld [vmem:[%s18169_s4 + $0x88] sm:$0xff]  }
 0x6f1   : > { %v10898_v16 = vor.u32 %v10897_v7, %v10896_v62  ;;  %v10906_v62 = vor.u32 %v10905_v49, %v10904_v31  ;;  %v22795_v49 = vshll.u32 %v21376_v15, 16  ;;  %v22796_v15 = vshrl.u32 %v21395_v53, 16 }
 0x6f3   : > { %v10899_v3 = vsel %vm1466_vm4, %v10895_v34, %v10898_v16  ;;  %v17947_v34 = vld [vmem:[%s18169_s4 + $0x90] sm:$0xff]  }
 0x6f6   : > { %14323 = vmatmul.mubr.msk.bf16.gmra.mrb[36].mxu1 %vm536_vm3, %v17939_v18  ;;  %v10901_v18 = vrot.slane %v10005_v5, 2 }
 0x6f7   : > { %15467 = vmatmul.mubr.msk.bf16.gmra.mrb[76].mxu0 %vm536_vm3, %v10543_v37  ;;  %14326 = vmatprep.mubr.msk.bf16.mxu1 %vm18103_vm0, %v18102_v1 }
 0x6f8   : > { %15470 = vmatprep.mubr.msk.bf16.mxu0 %vm18103_vm0, %v18102_v1  ;;  %v10902_v37 = vor.u32 %v10901_v18, %v10900_v50  ;;  %v17952_v18 = vld [vmem:[%s18169_s4 + $0xa8] sm:$0xff]  }
 0x6fa   : > { %v10903_v5 = vsel %vm1466_vm4, %v10898_v16, %v10902_v37  ;;  %v10907_v12 = vsel %vm1466_vm4, %v10902_v37, %v10906_v62  ;;  %v10929_v37 = vrot.slane %v22793_v24, 2  ;;  %v18061_v24 = vld [vmem:[%s22530_s1 + $0x188] sm:$0xff]  }
 0x6fe   : > { %14327 = vmatmul.mubr.msk.bf16.gmra.mrb[40].mxu1 %vm536_vm3, %v17940_v43  ;;  %v10908_v43 = vrot.slane %v10025_v56, 1 }
 0x6ff   : > { %15471 = vmatmul.mubr.msk.bf16.gmra.mrb[80].mxu0 %vm536_vm3, %v10545_v44  ;;  %14330 = vmatprep.mubr.msk.bf16.mxu1 %vm18103_vm0, %v18102_v1  ;;  %v10909_v44 = vrot.slane %v10021_v54, 2  ;;  %v10913_v54 = vrot.slane %v10029_v55, 2  ;;  %v10918_v55 = vor.u32 %v10917_v58, %v10916_v57  ;;  %v22799_v58 = vshrl.u32 %v21414_v59, 16 }
 0x700   : > { %15482 = vmatprep.mubr.msk.bf16.mxu0 %vm18103_vm0, %v18102_v1 }
 0x701   : > { %v10910_v4 = vor.u32 %v10909_v44, %v10908_v43  ;;  %v10914_v56 = vor.u32 %v10913_v54, %v10912_v61  ;;  %v10923_v50 = vsel %vm1466_vm4, %v10918_v55, %v10922_v23  ;;  %v17954_v43 = vld [vmem:[%s18169_s4 + $0xb8] sm:$0xff]   ;;  %v22801_v23 = vshrl.u32 %v18184_v14, 16 }
 0x703   : > { %v10911_v7 = vsel %vm1466_vm4, %v10906_v62, %v10910_v4  ;;  %v10915_v16 = vsel %vm1466_vm4, %v10910_v4, %v10914_v56  ;;  %v18059_v62 = vld [vmem:[%s18169_s4 + $0x1c] sm:$0xf]  ;;  %v10936_v4 = vrot.slane %v22796_v15, 1 }
 0x706   : > { %14331 = vmatmul.mubr.msk.bf16.gmra.mrb[44].mxu1 %vm536_vm3, %v17941_v8  ;;  %v17948_v8 = vld [vmem:[%s18169_s4 + $0x98] sm:$0xff]  }
 0x707   : > { %15483 = vmatmul.mubr.msk.bf16.vlgmr.msra.gmra.mrb[0].mxu0 %vm536_vm3, %v10899_v3  ;;  %14334 = vmatprep.mubr.msk.bf16.mxu1 %vm18103_vm0, %v18102_v1  ;;  %v10919_v3 = vsel %vm1466_vm4, %v10914_v56, %v10918_v55  ;;  %v10940_v55 = vrot.slane %v22799_v58, 1  ;;  %v22816_v58 = vshrl.u32 %v21502_v41, 16 }
 0x708   : > { %15567 = vmatpush3.bf16.msra.mxu0 %v17942_v22  ;;  %15486 = vmatprep.mubr.msk.bf16.mxu0 %vm18103_vm0, %v18102_v1  ;;  %v17951_v22 = vld [vmem:[%s18169_s4 + $0xa0] sm:$0xff]  }
 0x709   : > { %15568 = vmatprep.subr.bf16.mxu0 %v18102_v1 }
 0x70c   : > { %15569 = vmatpush3.bf16.msra.mxu0 %v17949_v29  ;;  %v10930_v29 = vor.u32 %v10929_v37, %v10928_v10 }
 0x70d   : > { %15570 = vmatprep.subr.bf16.mxu0 %v18102_v1 }
 0x70e   : > { %14335 = vmatmul.mubr.msk.bf16.gmra.mrb[48].mxu1 %vm536_vm3, %v17944_v63  ;;  %v5120_v63 = vld [vmem:[%s18169_s4 + $0x18] sm:$0xf]  ;;  %v10931_v31 = vsel %vm1466_vm4, %v10926_v40, %v10930_v29  ;;  %v22803_v40 = vshrl.u32 %v21435_v60, 16 }
 0x70f   : > { %15487 = vmatmul.mubr.msk.bf16.gmra.mrb[4].mxu0 %vm536_vm3, %v10903_v5  ;;  %14338 = vmatprep.mubr.msk.bf16.mxu1 %vm18103_vm0, %v18102_v1  ;;  %v17953_v5 = vld [vmem:[%s18169_s4 + $0xb0] sm:$0xff]  }
 0x710   : > { %15490 = vmatprep.mubr.msk.bf16.mxu0 %vm18103_vm0, %v18102_v1  ;;  %15571 = vmatpush3.bf16.msra.mxu0 %v17956_v2  ;;  %v10933_v2 = vrot.slane %v22795_v49, 2 }
 0x711   : > { %15572 = vmatprep.subr.bf16.mxu0 %v18102_v1 }
 0x714   : > { %15573 = vmatpush3.bf16.msra.mxu0 %v17957_v45  ;;  %v12263_v45 = vcombine.low %v5120_v63, %v18059_v62  ;;  %v22806_v63 = vshll.u32 %v18236_v39, 16 }
 0x716   : > { %14339 = vmatmul.mubr.msk.bf16.gmra.mrb[52].mxu1 %vm536_vm3, %v17945_v13  ;;  %v10934_v13 = vor.u32 %v10933_v2, %v10932_v51  ;;  %v5280_v61 = vshrl.u32 %v12263_v45, 16  ;;  %v22807_v51 = vshrl.u32 %v21461_v36, 16  ;;  %v22808_v2 = vshll.u32 %v21461_v36, 16 }
 0x717   : > { %15491 = vmatmul.mubr.msk.bf16.gmra.mrb[8].mxu0 %vm536_vm3, %v10907_v12  ;;  %14342 = vmatprep.mubr.msk.bf16.mxu1 %vm18103_vm0, %v18102_v1  ;;  %v5282_v12 = vshll.u32 %v12263_v45, 16  ;;  %v18063_v45 = vld [vmem:[%s22530_s1 + $0x198] sm:$0xff]   ;;  %v22809_v36 = vshrl.u32 %v18236_v39, 16 }
 0x718   : > { %15494 = vmatprep.mubr.msk.bf16.mxu0 %vm18103_vm0, %v18102_v1  ;;  %v10935_v44 = vsel %vm1466_vm4, %v10930_v29, %v10934_v13  ;;  %v10948_v49 = vrot.slane %v22807_v51, 1  ;;  %v10949_v62 = vrot.slane %v22808_v2, 2 }
 0x719   : > { %v5284_v54 = vrot.slane %v5282_v12, 1 }
 0x71e   : > { %14343 = vmatmul.mubr.msk.bf16.gmra.mrb[56].mxu1 %vm536_vm3, %v17946_v52  ;;  %v22797_v52 = vshll.u32 %v21395_v53, 16 }
 0x71f   : > { %15495 = vmatmul.mubr.msk.bf16.gmra.mrb[12].mxu0 %vm536_vm3, %v10911_v7  ;;  %14346 = vmatprep.mubr.msk.bf16.mxu1 %vm18103_vm0, %v18102_v1 }
 0x720   : > { %15498 = vmatprep.mubr.msk.bf16.mxu0 %vm18103_vm0, %v18102_v1  ;;  %v10937_v7 = vrot.slane %v22797_v52, 2 }
 0x722   : > { %v10938_v56 = vor.u32 %v10937_v7, %v10936_v4  ;;  %v22811_v4 = vshrl.u32 %v21484_v38, 16  ;;  %v22812_v7 = vshll.u32 %v21484_v38, 16 }
 0x724   : > { %v10939_v53 = vsel %vm1466_vm4, %v10934_v13, %v10938_v56  ;;  %v10950_v13 = vor.u32 %v10949_v62, %v10948_v49  ;;  %v10952_v52 = vrot.slane %v22811_v4, 1 }
 0x726   : > { %14347 = vmatmul.mubr.msk.bf16.gmra.mrb[60].mxu1 %vm536_vm3, %v17947_v34  ;;  %v5285_v34 = vor.u32 %v5284_v54, %v5280_v61  ;;  %v10953_v61 = vrot.slane %v22812_v7, 2 }
 0x727   : > { %15499 = vmatmul.mubr.msk.bf16.gmra.mrb[16].mxu0 %vm536_vm3, %v10915_v16  ;;  %14350 = vmatprep.mubr.msk.bf16.mxu1 %vm18103_vm0, %v18102_v1  ;;  %v22798_v16 = vshll.u32 %v18184_v14, 16 }
 0x728   : > { %15502 = vmatprep.mubr.msk.bf16.mxu0 %vm18103_vm0, %v18102_v1  ;;  %v10954_v39 = vor.u32 %v10953_v61, %v10952_v52  ;;  %v22834_v61 = vld [vmem:[#allocation7_spill] sm:$0xff] }
 0x729   : > { %v5289_v57 = vrot.slane %v22798_v16, 1  ;;  %v22814_v16 = vld [vmem:[#allocation3_spill] sm:$0xff] }
 0x72b   : > { %v5290_v35 = vsel %vm339_vm2, %v5285_v34, %v5289_v57 }
 0x72e   : > { %14351 = vmatmul.mubr.msk.bf16.gmra.mrb[64].mxu1 %vm536_vm3, %v17948_v8  ;;  %v22800_v8 = vshll.u32 %v21414_v59, 16 }
 0x72f   : > { %15503 = vmatmul.mubr.msk.bf16.gmra.mrb[20].mxu0 %vm536_vm3, %v10919_v3  ;;  %14354 = vmatprep.mubr.msk.bf16.mxu1 %vm18103_vm0, %v18102_v1 }
 0x730   : > { %15506 = vmatprep.mubr.msk.bf16.mxu0 %vm18103_vm0, %v18102_v1  ;;  %v10941_v3 = vrot.slane %v22800_v8, 2  ;;  %v22817_v8 = vshll.u32 %v21502_v41, 16 }
 0x732   : > { %v10942_v25 = vor.u32 %v10941_v3, %v10940_v55  ;;  %v10956_v55 = vrot.slane %v22816_v58, 1  ;;  %v10957_v3 = vrot.slane %v22817_v8, 2  ;;  %v22838_v8 = vld [vmem:[#allocation8_spill] sm:$0xff] }
 0x734   : > { %v10943_v47 = vsel %vm1466_vm4, %v10938_v56, %v10942_v25  ;;  %v22813_v56 = vshrl.u32 %v18260_v48, 16 }
 0x736   : > { %14355 = vmatmul.mubr.msk.bf16.gmra.mrb[68].mxu1 %vm536_vm3, %v17951_v22  ;;  %v5293_v22 = vor.u32 %v22801_v23, %v5289_v57  ;;  %v22815_v57 = vshll.u32 %v22814_v16, 16 }
 0x737   : > { %15507 = vmatmul.mubr.msk.bf16.gmra.mrb[24].mxu0 %vm536_vm3, %v10923_v50  ;;  %14358 = vmatprep.mubr.msk.bf16.mxu1 %vm18103_vm0, %v18102_v1  ;;  %v22802_v50 = vshll.u32 %v18205_v26, 16 }
 0x738   : > { %15510 = vmatprep.mubr.msk.bf16.mxu0 %vm18103_vm0, %v18102_v1  ;;  %v5321_v38 = vrot.slane %v22815_v57, 1  ;;  %v22148_v57 = vld [vmem:[%s18169_s4 + $0xd8] ss:$0 sps:$4 sm:$0x33]  }
 0x739   : > { %v5297_v59 = vrot.slane %v22802_v50, 1  ;;  %v10977_v58 = vshrl.u32 %v22148_v57, 16 }
 0x73b   : > { %v5298_v14 = vsel %vm339_vm2, %v5293_v22, %v5297_v59  ;;  %v22819_v22 = vld [vmem:[#allocation4_spill] sm:$0xff] }
 0x73c   : > { %v22820_v50 = vshll.u32 %v22819_v22, 16 }
 0x73e   : > { %14359 = vmatmul.mubr.msk.bf16.gmra.mrb[72].mxu1 %vm536_vm3, %v17952_v18  ;;  %v10944_v18 = vrot.slane %v22803_v40, 1  ;;  %v5329_v41 = vrot.slane %v22820_v50, 1  ;;  %v22822_v40 = vshll.u32 %v21520_v9, 16 }
 0x73f   : > { %15511 = vmatmul.mubr.msk.bf16.gmra.mrb[28].mxu0 %vm536_vm3, %v10927_v32  ;;  %14362 = vmatprep.mubr.msk.bf16.mxu1 %vm18103_vm0, %v18102_v1  ;;  %v22804_v32 = vshll.u32 %v21435_v60, 16  ;;  %v22805_v60 = vshrl.u32 %v18205_v26, 16 }
 0x740   : > { %15514 = vmatprep.mubr.msk.bf16.mxu0 %vm18103_vm0, %v18102_v1 }
 0x741   : > { %v10945_v10 = vrot.slane %v22804_v32, 2  ;;  %v5301_v29 = vor.u32 %v22805_v60, %v5297_v59 }
 0x743   : > { %v10946_v37 = vor.u32 %v10945_v10, %v10944_v18  ;;  %v10961_v18 = vrot.slane %v22822_v40, 2 }
 0x745   : > { %v10947_v6 = vsel %vm1466_vm4, %v10942_v25, %v10946_v37  ;;  %v10951_v15 = vsel %vm1466_vm4, %v10946_v37, %v10950_v13  ;;  %v22818_v25 = vshrl.u32 %v22814_v16, 16  ;;  %v22824_v37 = vld [vmem:[#allocation5_spill] sm:$0xff] }
 0x746   : > { %14363 = vmatmul.mubr.msk.bf16.gmra.mrb[76].mxu1 %vm536_vm3, %v17953_v5  ;;  %v5305_v5 = vrot.slane %v22806_v63, 1  ;;  %v22825_v60 = vshll.u32 %v22824_v37, 16  ;;  %v22826_v63 = vshrl.u32 %v21538_v27, 16  ;;  %v22828_v2 = vshrl.u32 %v22824_v37, 16 }
 0x747   : > { %15515 = vmatmul.mubr.msk.bf16.gmra.mrb[32].mxu0 %vm536_vm3, %v10931_v31  ;;  %14366 = vmatprep.mubr.msk.bf16.mxu1 %vm18103_vm0, %v18102_v1  ;;  %v18062_v31 = vld [vmem:[%s22530_s1 + $0x190] sm:$0xff]   ;;  %v5325_v23 = vor.u32 %v22818_v25, %v5321_v38  ;;  %v10979_v25 = vrot.slane %v10977_v58, 1 }
 0x748   : > { %15518 = vmatprep.mubr.msk.bf16.mxu0 %vm18103_vm0, %v18102_v1  ;;  %v5306_v26 = vsel %vm339_vm2, %v5301_v29, %v5305_v5  ;;  %v5309_v12 = vor.u32 %v22809_v36, %v5305_v5  ;;  %v10964_v5 = vrot.slane %v22826_v63, 1  ;;  %v22831_v36 = vshrl.u32 %v21556_v42, 16 }
 0x749   : > { %v5330_v32 = vsel %vm339_vm2, %v5325_v23, %v5329_v41 }
 0x74e   : > { %14367 = vmatmul.mubr.msk.bf16.gmra.mrb[80].mxu1 %vm536_vm3, %v17954_v43  ;;  %v22810_v43 = vshll.u32 %v18260_v48, 16  ;;  %v10958_v48 = vor.u32 %v10957_v3, %v10956_v55  ;;  %v22839_v3 = vshll.u32 %v22838_v8, 16 }
 0x74f   : > { %15519 = vmatmul.mubr.msk.bf16.gmra.mrb[36].mxu0 %vm536_vm3, %v10935_v44  ;;  %14378 = vmatprep.mubr.msk.bf16.mxu1 %vm18103_vm0, %v18102_v1 }
 0x750   : > { %15522 = vmatprep.mubr.msk.bf16.mxu0 %vm18103_vm0, %v18102_v1  ;;  %v5313_v44 = vrot.slane %v22810_v43, 1  ;;  %v10959_v59 = vsel %vm1466_vm4, %v10954_v39, %v10958_v48  ;;  %v22832_v43 = vshll.u32 %v21556_v42, 16 }
 0x752   : > { %v5314_v54 = vsel %vm339_vm2, %v5309_v12, %v5313_v44  ;;  %v5317_v34 = vor.u32 %v22813_v56, %v5313_v44  ;;  %v10968_v12 = vrot.slane %v22831_v36, 1  ;;  %v10969_v44 = vrot.slane %v22832_v43, 2 }
 0x753   : > { %v10972_v56 = vrot.slane %v10153_v33, 1  ;;  %v10980_v33 = vshll.u32 %v22148_v57, 16 }
 0x754   : > { %v10970_v4 = vor.u32 %v10969_v44, %v10968_v12  ;;  %v18067_v44 = vld [vmem:[%s18169_s4 + $0x48] sm:$0xff]  }
 0x755   : > { %v10982_v23 = vrot.slane %v10980_v33, 2 }
 0x756   : > { %14379 = vmatmul.mubr.msk.bf16.vlgmr.msra.gmra.mrb[0].mxu1 %vm536_vm3, %v5290_v35  ;;  %v5322_v35 = vsel %vm339_vm2, %v5317_v34, %v5321_v38  ;;  %v22836_v34 = vshll.u32 %v21574_v21, 16  ;;  %v22837_v21 = vshrl.u32 %v22834_v61, 16 }
 0x757   : > { %15523 = vmatmul.mubr.msk.bf16.gmra.mrb[40].mxu0 %vm536_vm3, %v10939_v53  ;;  %14382 = vmatprep.mubr.msk.bf16.mxu1 %vm18103_vm0, %v18102_v1  ;;  %v10955_v53 = vsel %vm1466_vm4, %v10950_v13, %v10954_v39  ;;  %v10983_v50 = vor.u32 %v10982_v23, %v10979_v25  ;;  %v18070_v23 = vld [vmem:[%s18169_s4 + $0x60] sm:$0xff]  }
 0x758   : > { %15526 = vmatprep.mubr.msk.bf16.mxu0 %vm18103_vm0, %v18102_v1  ;;  %15662 = vmatpush3.bf16.msra.mxu1 %v18060_v46  ;;  %v22821_v46 = vshrl.u32 %v21520_v9, 16  ;;  %v5337_v9 = vrot.slane %v22825_v60, 1  ;;  %v10973_v16 = vrot.slane %v22836_v34, 2  ;;  %v18065_v60 = vld [vmem:[%s18169_s4 + $0x38] sm:$0xff]   ;;  %v22851_v34 = vshrl.u32 %v18776_v17, 16 }
 0x759   : > { %15659 = vmatprep.subr.bf16.mxu1 %v18102_v1 }
 0x75a   : > { %v5341_v62 = vor.u32 %v22828_v2, %v5337_v9  ;;  %v18066_v2 = vld [vmem:[%s18169_s4 + $0x40] sm:$0xff]  }
 0x75c   : > { %15663 = vmatpush3.bf16.msra.mxu1 %v18061_v24 }
 0x75d   : > { %15660 = vmatprep.subr.bf16.mxu1 %v18102_v1 }
 0x75e   : > { %14383 = vmatmul.mubr.msk.bf16.gmra.mrb[4].mxu1 %vm536_vm3, %v5298_v14  ;;  %v22823_v14 = vshrl.u32 %v22819_v22, 16 }
 0x75f   : > { %15527 = vmatmul.mubr.msk.bf16.gmra.mrb[44].mxu0 %vm536_vm3, %v10943_v47  ;;  %14386 = vmatprep.mubr.msk.bf16.mxu1 %vm18103_vm0, %v18102_v1  ;;  %v10960_v47 = vrot.slane %v22821_v46, 1  ;;  %v22841_v46 = vld [vmem:[#allocation9_spill] sm:$0xff] }
 0x760   : > { %15530 = vmatprep.mubr.msk.bf16.mxu0 %vm18103_vm0, %v18102_v1  ;;  %15664 = vmatpush3.bf16.msra.mxu1 %v18062_v31  ;;  %v5333_v24 = vor.u32 %v22823_v14, %v5329_v41  ;;  %v22827_v31 = vshll.u32 %v21538_v27, 16  ;;  %v22840_v41 = vshrl.u32 %v22838_v8, 16 }
 0x761   : > { %15661 = vmatprep.subr.bf16.mxu1 %v18102_v1  ;;  %v10962_v10 = vor.u32 %v10961_v18, %v10960_v47  ;;  %v22842_v47 = vshll.u32 %v22841_v46, 16  ;;  %v11315_v18 = vld [vmem:[%s18169_s4 + $0x30] sm:$0xc] }
 0x762   : > { %v5338_v51 = vsel %vm339_vm2, %v5333_v24, %v5337_v9  ;;  %v11328_v9 = vrot.slane %v18065_v60, 2 }
 0x763   : > { %v10963_v29 = vsel %vm1466_vm4, %v10958_v48, %v10962_v10  ;;  %v5369_v40 = vrot.slane %v22842_v47, 1 }
 0x764   : > { %15665 = vmatpush3.bf16.msra.mxu1 %v18063_v45 }
 0x766   : > { %14387 = vmatmul.mubr.msk.bf16.gmra.mrb[8].mxu1 %vm536_vm3, %v5306_v26  ;;  %v22829_v26 = vld [vmem:[#allocation6_spill] sm:$0xff] }
 0x767   : > { %15531 = vmatmul.mubr.msk.bf16.gmra.mrb[48].mxu0 %vm536_vm3, %v10947_v6  ;;  %14390 = vmatprep.mubr.msk.bf16.mxu1 %vm18103_vm0, %v18102_v1  ;;  %v10965_v6 = vrot.slane %v22827_v31, 2  ;;  %v22830_v45 = vshll.u32 %v22829_v26, 16  ;;  %v22833_v52 = vshrl.u32 %v22829_v26, 16 }
 0x768   : > { %15534 = vmatprep.mubr.msk.bf16.mxu0 %vm18103_vm0, %v18102_v1 }
 0x769   : > { %v10966_v49 = vor.u32 %v10965_v6, %v10964_v5  ;;  %v5345_v27 = vrot.slane %v22830_v45, 1  ;;  %v22844_v5 = vld [vmem:[#allocation10_spill] sm:$0xff] }
 0x76a   : > { %v22845_v31 = vshll.u32 %v22844_v5, 16  ;;  %v22846_v26 = vshrl.u32 %v22844_v5, 16  ;;  %v22860_v5 = vshll.u32 %v18902_v30, 16 }
 0x76b   : > { %v10967_v13 = vsel %vm1466_vm4, %v10962_v10, %v10966_v49  ;;  %v5349_v7 = vor.u32 %v22833_v52, %v5345_v27  ;;  %v10971_v39 = vsel %vm1466_vm4, %v10966_v49, %v10970_v4  ;;  %v18064_v10 = vld [vmem:[%s18169_s4 + $0x34] sm:$0xf] }
 0x76c   : > { %v12704_v14 = vcombine.low %v11315_v18, %v18064_v10  ;;  %v5377_v6 = vrot.slane %v22845_v31, 1  ;;  %v18071_v18 = vld [vmem:[%s18169_s4 + $0x68] sm:$0xff]   ;;  %v5433_v31 = vrot.slane %v22860_v5, 1 }
 0x76e   : > { %14391 = vmatmul.mubr.msk.bf16.gmra.mrb[12].mxu1 %vm536_vm3, %v5314_v54  ;;  %v22835_v54 = vshll.u32 %v22834_v61, 16  ;;  %v11327_v37 = vrot.slane %v12704_v14, 2  ;;  %v5381_v45 = vor.u32 %v22846_v26, %v5377_v6  ;;  %v22858_v14 = vshll.u32 %v18882_v19, 16 }
 0x76f   : > { %15535 = vmatmul.mubr.msk.bf16.gmra.mrb[52].mxu0 %vm536_vm3, %v10951_v15  ;;  %14394 = vmatprep.mubr.msk.bf16.mxu1 %vm18103_vm0, %v18102_v1  ;;  %v5346_v15 = vsel %vm339_vm2, %v5341_v62, %v5345_v27  ;;  %v11330_v62 = vrot.slane %v18066_v2, 2  ;;  %v22847_v27 = vld [vmem:[#allocation11_spill] sm:$0xff]  ;;  %v22862_v26 = vshll.u32 %v18936_v20, 16 }
 0x770   : > { %15538 = vmatprep.mubr.msk.bf16.mxu0 %vm18103_vm0, %v18102_v1  ;;  %v5353_v42 = vrot.slane %v22835_v54, 1 }
 0x771   : > { %v11331_v12 = vsel %vm1906_vm5, %v11328_v9, %v11330_v62 }
 0x772   : > { %v5354_v38 = vsel %vm339_vm2, %v5349_v7, %v5353_v42  ;;  %v5357_v55 = vor.u32 %v22837_v21, %v5353_v42  ;;  %v22850_v7 = vshll.u32 %v18776_v17, 16  ;;  %v18069_v21 = vld [vmem:[%s18169_s4 + $0x58] sm:$0xff]   ;;  %v22853_v17 = vshrl.u32 %v18792_v0, 16 }
 0x774   : > { %v5393_v61 = vrot.slane %v22850_v7, 1 }
 0x776   : > { %14395 = vmatmul.mubr.msk.bf16.gmra.mrb[16].mxu1 %vm536_vm3, %v5322_v35  ;;  %v5361_v35 = vrot.slane %v22839_v3, 1  ;;  %v22854_v3 = vshll.u32 %v18831_v28, 16 }
 0x777   : > { %15539 = vmatmul.mubr.msk.bf16.gmra.mrb[56].mxu0 %vm536_vm3, %v10955_v53  ;;  %14398 = vmatprep.mubr.msk.bf16.mxu1 %vm18103_vm0, %v18102_v1  ;;  %v10974_v53 = vor.u32 %v10973_v16, %v10972_v56  ;;  %v5397_v16 = vor.u32 %v22851_v34, %v5393_v61 }
 0x778   : > { %15542 = vmatprep.mubr.msk.bf16.mxu0 %vm18103_vm0, %v18102_v1  ;;  %v5362_v22 = vsel %vm339_vm2, %v5357_v55, %v5361_v35  ;;  %v11336_v55 = vrot.slane %v18069_v21, 2  ;;  %v18079_v21 = vld [vmem:[%s18169_s4 + $0x98] sm:$0xff]  }
 0x779   : > { %v10975_v48 = vsel %vm1466_vm4, %v10970_v4, %v10974_v53  ;;  %v22849_v4 = vshrl.u32 %v22847_v27, 16 }
 0x77e   : > { %14399 = vmatmul.mubr.msk.bf16.gmra.mrb[20].mxu1 %vm536_vm3, %v5330_v32  ;;  %v10984_v32 = vsel %vm1466_vm4, %v10974_v53, %v10983_v50 }
 0x77f   : > { %15543 = vmatmul.mubr.msk.bf16.gmra.mrb[60].mxu0 %vm536_vm3, %v10959_v59  ;;  %14402 = vmatprep.mubr.msk.bf16.mxu1 %vm18103_vm0, %v18102_v1  ;;  %v5365_v59 = vor.u32 %v22840_v41, %v5361_v35  ;;  %v5409_v35 = vrot.slane %v22854_v3, 1  ;;  %v22856_v41 = vshll.u32 %v18867_v11, 16 }
 0x780   : > { %15546 = vmatprep.mubr.msk.bf16.mxu0 %vm18103_vm0, %v18102_v1 }
 0x781   : > { %v5370_v24 = vsel %vm339_vm2, %v5365_v59, %v5369_v40  ;;  %v5417_v59 = vrot.slane %v22856_v41, 1  ;;  %v18083_v41 = vld [vmem:[%s18169_s4 + $0xa8] sm:$0xff]  }
 0x786   : > { %14403 = vmatmul.mubr.msk.bf16.gmra.mrb[24].mxu1 %vm536_vm3, %v5338_v51  ;;  %v11329_v51 = vsel %vm1906_vm5, %v11327_v37, %v11328_v9  ;;  %v18072_v9 = vld [vmem:[%s18169_s4 + $0x70] sm:$0xff]  }
 0x787   : > { %15547 = vmatmul.mubr.msk.bf16.gmra.mrb[64].mxu0 %vm536_vm3, %v10963_v29  ;;  %14406 = vmatprep.mubr.msk.bf16.mxu1 %vm18103_vm0, %v18102_v1  ;;  %v22843_v29 = vshrl.u32 %v22841_v46, 16 }
 0x788   : > { %15550 = vmatprep.mubr.msk.bf16.mxu0 %vm18103_vm0, %v18102_v1 }
 0x789   : > { %v5373_v63 = vor.u32 %v22843_v29, %v5369_v40  ;;  %v11342_v29 = vrot.slane %v18072_v9, 2  ;;  %v18087_v9 = vld [vmem:[%s18169_s4 + $0xb8] sm:$0xff]  }
 0x78b   : > { %v5378_v49 = vsel %vm339_vm2, %v5373_v63, %v5377_v6 }
 0x78e   : > { %14407 = vmatmul.mubr.msk.bf16.gmra.mrb[28].mxu1 %vm536_vm3, %v5346_v15  ;;  %v11332_v15 = vrot.slane %v18067_v44, 2  ;;  %v22863_v44 = vshrl.u32 %v18936_v20, 16  ;;  %v18076_v20 = vld [vmem:[%s18169_s4 + $0x78] sm:$0xff]  }
 0x78f   : > { %15551 = vmatmul.mubr.msk.bf16.gmra.mrb[68].mxu0 %vm536_vm3, %v10967_v13  ;;  %14410 = vmatprep.mubr.msk.bf16.mxu1 %vm18103_vm0, %v18102_v1  ;;  %v22848_v13 = vshll.u32 %v22847_v27, 16  ;;  %v22295_v27 = vld [vmem:[%s18169_s4 + $0xc0] ss:$0 sps:$4 sm:$0x11]  }
 0x790   : > { %15554 = vmatprep.mubr.msk.bf16.mxu0 %vm18103_vm0, %v18102_v1  ;;  %v11333_v54 = vsel %vm1906_vm5, %v11330_v62, %v11332_v15 }
 0x791   : > { %v5385_v36 = vrot.slane %v22848_v13, 1 }
 0x793   : > { %v5386_v43 = vsel %vm339_vm2, %v5381_v45, %v5385_v36  ;;  %v5389_v52 = vor.u32 %v22849_v4, %v5385_v36  ;;  %v5441_v45 = vrot.slane %v22862_v26, 1  ;;  %v18090_v26 = vld [vmem:[%s18169_s4 + $0xb0] sm:$0xff]  }
 0x795   : > { %v5394_v42 = vsel %vm339_vm2, %v5389_v52, %v5393_v61  ;;  %v18075_v61 = vld [vmem:[%s18169_s4 + $0x88] sm:$0xff]  }
 0x796   : > { %14411 = vmatmul.mubr.msk.bf16.gmra.mrb[32].mxu1 %vm536_vm3, %v5354_v38  ;;  %v22852_v38 = vshll.u32 %v18792_v0, 16  ;;  %v22855_v0 = vshrl.u32 %v18831_v28, 16  ;;  %v22857_v28 = vshrl.u32 %v18867_v11, 16  ;;  %v22859_v11 = vshrl.u32 %v18882_v19, 16 }
 0x797   : > { %15555 = vmatmul.mubr.msk.bf16.gmra.mrb[72].mxu0 %vm536_vm3, %v10971_v39  ;;  %14414 = vmatprep.mubr.msk.bf16.mxu1 %vm18103_vm0, %v18102_v1  ;;  %v18068_v39 = vld [vmem:[%s18169_s4 + $0x50] sm:$0xff]   ;;  %v22861_v19 = vshrl.u32 %v18902_v30, 16  ;;  %v18074_v30 = vld [vmem:[%s18169_s4 + $0x80] sm:$0xff]  }
 0x798   : > { %15558 = vmatprep.mubr.msk.bf16.mxu0 %vm18103_vm0, %v18102_v1  ;;  %v11334_v56 = vrot.slane %v18068_v39, 2  ;;  %v5401_v53 = vrot.slane %v22852_v38, 1  ;;  %v5413_v50 = vor.u32 %v22855_v0, %v5409_v35  ;;  %v5421_v10 = vor.u32 %v22857_v28, %v5417_v59  ;;  %v18085_v28 = vld [vmem:[%s18169_s4 + $0xb0] sm:$0xff]  }
 0x799   : > { %v5437_v62 = vor.u32 %v22861_v19, %v5433_v31  ;;  %v18089_v19 = vld [vmem:[%s18169_s4 + $0xc0] sm:$0xff]  }
 0x79a   : > { %v11335_v58 = vsel %vm1906_vm5, %v11332_v15, %v11334_v56  ;;  %v5402_v33 = vsel %vm339_vm2, %v5397_v16, %v5401_v53  ;;  %v5405_v8 = vor.u32 %v22853_v17, %v5401_v53  ;;  %v5418_v40 = vsel %vm339_vm2, %v5413_v50, %v5417_v59  ;;  %v18077_v16 = vld [vmem:[%s18169_s4 + $0x90] sm:$0xff]   ;;  %v18078_v53 = vld [vmem:[%s18169_s4 + $0x80] sm:$0xff]   ;;  %v18080_v17 = vld [vmem:[%s18169_s4 + $0x88] sm:$0xff]  }
 0x79b   : > { %v5442_v36 = vsel %vm339_vm2, %v5437_v62, %v5441_v45  ;;  %v5445_v15 = vor.u32 %v22863_v44, %v5441_v45  ;;  %v11350_v38 = vrot.slane %v18077_v16, 2  ;;  %v11356_v59 = vrot.slane %v18083_v41, 2 }
 0x79c   : > { %v5410_v25 = vsel %vm339_vm2, %v5405_v8, %v5409_v35  ;;  %v5820_v8 = vrot.slane %v18080_v17, 1  ;;  %v11362_v62 = vrot.slane %v18089_v19, 2  ;;  %v5830_v45 = vrot.slane %v18090_v26, 1 }
 0x79d   : > { %v11368_v17 = vrot.slane %v22148_v57, 2 }
 0x79e   : > { %14415 = vmatmul.mubr.msk.bf16.gmra.mrb[36].mxu1 %vm536_vm3, %v5362_v22  ;;  %v11338_v22 = vrot.slane %v18070_v23, 2  ;;  %v18082_v23 = vld [vmem:[%s18169_s4 + $0x90] sm:$0xff]  }
 0x79f   : > { %15559 = vmatmul.mubr.msk.bf16.gmra.mrb[76].mxu0 %vm536_vm3, %v10975_v48  ;;  %14418 = vmatprep.mubr.msk.bf16.mxu1 %vm18103_vm0, %v18102_v1  ;;  %v11337_v48 = vsel %vm1906_vm5, %v11334_v56, %v11336_v55  ;;  %v22864_v56 = vrot.slane %v22841_v46, 1 }
 0x7a0   : > { %15562 = vmatprep.mubr.msk.bf16.mxu0 %vm18103_vm0, %v18102_v1  ;;  %v11339_v47 = vsel %vm1906_vm5, %v11336_v55, %v11338_v22  ;;  %v11352_v55 = vrot.slane %v18079_v21, 2 }
 0x7a2   : > { %v11353_v3 = vsel %vm1906_vm5, %v11350_v38, %v11352_v55 }
 0x7a6   : > { %14419 = vmatmul.mubr.msk.bf16.gmra.mrb[40].mxu1 %vm536_vm3, %v5370_v24  ;;  %v5425_v24 = vrot.slane %v22858_v14, 1  ;;  %v18086_v14 = vld [vmem:[%s18169_s4 + $0xa0] sm:$0xff]  }
 0x7a7   : > { %15563 = vmatmul.mubr.msk.bf16.gmra.mrb[80].mxu0 %vm536_vm3, %v10984_v32  ;;  %14422 = vmatprep.mubr.msk.bf16.mxu1 %vm18103_vm0, %v18102_v1  ;;  %v11340_v32 = vrot.slane %v18071_v18, 2 }
 0x7a8   : > { %15574 = vmatprep.mubr.msk.bf16.mxu0 %vm18103_vm0, %v18102_v1  ;;  %v5426_v60 = vsel %vm339_vm2, %v5421_v10, %v5425_v24  ;;  %v5429_v63 = vor.u32 %v22859_v11, %v5425_v24  ;;  %v11358_v10 = vrot.slane %v18085_v28, 2  ;;  %v5826_v24 = vrot.slane %v18086_v14, 1  ;;  %v18088_v11 = vld [vmem:[%s18169_s4 + $0xa8] sm:$0xff]  }
 0x7a9   : > { %v11341_v37 = vsel %vm1906_vm5, %v11338_v22, %v11340_v32  ;;  %v11343_v6 = vsel %vm1906_vm5, %v11340_v32, %v11342_v29  ;;  %v5822_v22 = vrot.slane %v18082_v23, 1 }
 0x7ab   : > { %v5823_v50 = vsel %vm1080_vm1, %v5820_v8, %v5822_v22 }
 0x7ae   : > { %14423 = vmatmul.mubr.msk.bf16.gmra.mrb[44].mxu1 %vm536_vm3, %v5378_v49  ;;  %v18073_v49 = vld [vmem:[%s18169_s4 + $0x78] sm:$0xff]  }
 0x7af   : > { %15575 = vmatmul.mubr.msk.bf16.vlgmr.msra.gmra.mrb[0].mxu0 %vm536_vm3, %v11329_v51  ;;  %14426 = vmatprep.mubr.msk.bf16.mxu1 %vm18103_vm0, %v18102_v1  ;;  %v5434_v51 = vsel %vm339_vm2, %v5429_v63, %v5433_v31  ;;  %v11344_v2 = vrot.slane %v18073_v49, 2  ;;  %v5828_v63 = vrot.slane %v18088_v11, 1 }
 0x7b0   : > { %15578 = vmatprep.mubr.msk.bf16.mxu0 %vm18103_vm0, %v18102_v1 }
 0x7b1   : > { %v11345_v13 = vsel %vm1906_vm5, %v11342_v29, %v11344_v2  ;;  %v11360_v29 = vrot.slane %v18087_v9, 2  ;;  %v5829_v49 = vsel %vm1080_vm1, %v5826_v24, %v5828_v63 }
 0x7b6   : > { %14427 = vmatmul.mubr.msk.bf16.gmra.mrb[48].mxu1 %vm536_vm3, %v5386_v43  ;;  %v11346_v43 = vrot.slane %v18074_v30, 2 }
 0x7b7   : > { %15579 = vmatmul.mubr.msk.bf16.gmra.mrb[4].mxu0 %vm536_vm3, %v11331_v12  ;;  %14430 = vmatprep.mubr.msk.bf16.mxu1 %vm18103_vm0, %v18102_v1  ;;  %v5447_v12 = vshll.u32 %v22295_v27, 16 }
 0x7b8   : > { %15582 = vmatprep.mubr.msk.bf16.mxu0 %vm18103_vm0, %v18102_v1  ;;  %v11347_v52 = vsel %vm1906_vm5, %v11344_v2, %v11346_v43 }
 0x7b9   : > { %v5449_v4 = vrot.slane %v5447_v12, 1  ;;  %v11363_v12 = vsel %vm1906_vm5, %v11360_v29, %v11362_v62 }
 0x7bb   : > { %v5450_v7 = vsel %vm339_vm2, %v5445_v15, %v5449_v4  ;;  %v18091_v15 = vld [vmem:[%s18169_s4 + $0xc8] sm:$0xff]  }
 0x7bc   : > { %v11364_v4 = vrot.slane %v18091_v15, 2 }
 0x7be   : > { %14431 = vmatmul.mubr.msk.bf16.gmra.mrb[52].mxu1 %vm536_vm3, %v5394_v42  ;;  %v5816_v42 = vrot.slane %v18076_v20, 1  ;;  %v11365_v20 = vsel %vm1906_vm5, %v11362_v62, %v11364_v4 }
 0x7bf   : > { %15583 = vmatmul.mubr.msk.bf16.gmra.mrb[8].mxu0 %vm536_vm3, %v11333_v54  ;;  %14434 = vmatprep.mubr.msk.bf16.mxu1 %vm18103_vm0, %v18102_v1  ;;  %v11348_v54 = vrot.slane %v18075_v61, 2 }
 0x7c0   : > { %15586 = vmatprep.mubr.msk.bf16.mxu0 %vm18103_vm0, %v18102_v1  ;;  %v5817_v34 = vsel %vm1080_vm1, %v22864_v56, %v5816_v42 }
 0x7c1   : > { %v11349_v39 = vsel %vm1906_vm5, %v11346_v43, %v11348_v54  ;;  %v11351_v46 = vsel %vm1906_vm5, %v11348_v54, %v11350_v38  ;;  %v5831_v43 = vsel %vm1080_vm1, %v5828_v63, %v5830_v45  ;;  %v5834_v38 = vrot.slane %v22295_v27, 1 }
 0x7c6   : > { %14435 = vmatmul.mubr.msk.bf16.gmra.mrb[56].mxu1 %vm536_vm3, %v5402_v33 }
 0x7c7   : > { %15587 = vmatmul.mubr.msk.bf16.gmra.mrb[12].mxu0 %vm536_vm3, %v11335_v58  ;;  %14438 = vmatprep.mubr.msk.bf16.mxu1 %vm18103_vm0, %v18102_v1  ;;  %v5818_v58 = vrot.slane %v18078_v53, 1 }
 0x7c8   : > { %15590 = vmatprep.mubr.msk.bf16.mxu0 %vm18103_vm0, %v18102_v1 }
 0x7c9   : > { %v5819_v33 = vsel %vm1080_vm1, %v5816_v42, %v5818_v58  ;;  %v5821_v35 = vsel %vm1080_vm1, %v5818_v58, %v5820_v8 }
 0x7ce   : > { %14439 = vmatmul.mubr.msk.bf16.gmra.mrb[60].mxu1 %vm536_vm3, %v5410_v25 }
 0x7cf   : > { %15591 = vmatmul.mubr.msk.bf16.gmra.mrb[16].mxu0 %vm536_vm3, %v11337_v48  ;;  %14442 = vmatprep.mubr.msk.bf16.mxu1 %vm18103_vm0, %v18102_v1  ;;  %v18081_v48 = vld [vmem:[%s18169_s4 + $0xa0] sm:$0xff]  }
 0x7d0   : > { %15594 = vmatprep.mubr.msk.bf16.mxu0 %vm18103_vm0, %v18102_v1  ;;  %v11354_v25 = vrot.slane %v18081_v48, 2 }
 0x7d2   : > { %v11355_v0 = vsel %vm1906_vm5, %v11352_v55, %v11354_v25  ;;  %v11357_v18 = vsel %vm1906_vm5, %v11354_v25, %v11356_v59 }
 0x7d6   : > { %14443 = vmatmul.mubr.msk.bf16.gmra.mrb[64].mxu1 %vm536_vm3, %v5418_v40 }
 0x7d7   : > { %15595 = vmatmul.mubr.msk.bf16.gmra.mrb[20].mxu0 %vm536_vm3, %v11339_v47  ;;  %14446 = vmatprep.mubr.msk.bf16.mxu1 %vm18103_vm0, %v18102_v1  ;;  %v18084_v47 = vld [vmem:[%s18169_s4 + $0x98] sm:$0xff]  }
 0x7d8   : > { %15598 = vmatprep.mubr.msk.bf16.mxu0 %vm18103_vm0, %v18102_v1  ;;  %v5824_v40 = vrot.slane %v18084_v47, 1 }
 0x7da   : > { %v5825_v32 = vsel %vm1080_vm1, %v5822_v22, %v5824_v40 }
 0x7de   : > { %14447 = vmatmul.mubr.msk.bf16.gmra.mrb[68].mxu1 %vm536_vm3, %v5426_v60  ;;  %v5827_v60 = vsel %vm1080_vm1, %v5824_v40, %v5826_v24 }
 0x7df   : > { %15599 = vmatmul.mubr.msk.bf16.gmra.mrb[24].mxu0 %vm536_vm3, %v11341_v37  ;;  %14450 = vmatprep.mubr.msk.bf16.mxu1 %vm18103_vm0, %v18102_v1  ;;  %v11359_v37 = vsel %vm1906_vm5, %v11356_v59, %v11358_v10 }
 0x7e0   : > { %15602 = vmatprep.mubr.msk.bf16.mxu0 %vm18103_vm0, %v18102_v1 }
 0x7e6   : > { %14451 = vmatmul.mubr.msk.bf16.gmra.mrb[72].mxu1 %vm536_vm3, %v5434_v51 }
 0x7e7   : > { %15603 = vmatmul.mubr.msk.bf16.gmra.mrb[28].mxu0 %vm536_vm3, %v11343_v6  ;;  %14454 = vmatprep.mubr.msk.bf16.mxu1 %vm18103_vm0, %v18102_v1  ;;  %v11361_v6 = vsel %vm1906_vm5, %v11358_v10, %v11360_v29 }
 0x7e8   : > { %15606 = vmatprep.mubr.msk.bf16.mxu0 %vm18103_vm0, %v18102_v1 }
 0x7ee   : > { %14455 = vmatmul.mubr.msk.bf16.gmra.mrb[76].mxu1 %vm536_vm3, %v5442_v36 }
 0x7ef   : > { %15607 = vmatmul.mubr.msk.bf16.gmra.mrb[32].mxu0 %vm536_vm3, %v11345_v13  ;;  %14458 = vmatprep.mubr.msk.bf16.mxu1 %vm18103_vm0, %v18102_v1 }
 0x7f0   : > { %15610 = vmatprep.mubr.msk.bf16.mxu0 %vm18103_vm0, %v18102_v1 }
 0x7f6   : > { %14459 = vmatmul.mubr.msk.bf16.gmra.mrb[80].mxu1 %vm536_vm3, %v5450_v7 }
 0x7f7   : > { %15611 = vmatmul.mubr.msk.bf16.gmra.mrb[36].mxu0 %vm536_vm3, %v11347_v52  ;;  %14514 = vmatprep.mubr.msk.bf16.mxu1 %vm18103_vm0, %v18102_v1  ;;  %v18092_v52 = vld [vmem:[%s18169_s4 + $0xb8] sm:$0xff]  }
 0x7f8   : > { %15614 = vmatprep.mubr.msk.bf16.mxu0 %vm18103_vm0, %v18102_v1  ;;  %v5832_v7 = vrot.slane %v18092_v52, 1 }
 0x7fa   : > { %v5835_v21 = vsel %vm1080_vm1, %v5832_v7, %v5834_v38 }
 0x7fe   : > { %14515 = vmatmul.mubr.msk.bf16.vlgmr.msra.gmra.mrb[44].mxu1 %vm536_vm3, %v5817_v34  ;;  %v18093_v34 = vld [vmem:[%s18169_s4 + $0xd0] sm:$0xff]   ;;  %s17641_s4 = smul.u32 28, %s22868_s13 }
 0x7ff   : > { %15615 = vmatmul.mubr.msk.bf16.gmra.mrb[40].mxu0 %vm536_vm3, %v11349_v39  ;;  %14518 = vmatprep.mubr.msk.bf16.mxu1 %vm18103_vm0, %v18102_v1  ;;  %v5833_v39 = vsel %vm1080_vm1, %v5830_v45, %v5832_v7  ;;  %v11366_v16 = vrot.slane %v18093_v34, 2 }
 0x800   : > { %15618 = vmatprep.mubr.msk.bf16.mxu0 %vm18103_vm0, %v18102_v1  ;;  %s22464_s11 = scalar_lea.vmem %s22532_s3, %s17641_s4 }
 0x806   : > { %14519 = vmatmul.mubr.msk.bf16.gmra.mrb[48].mxu1 %vm536_vm3, %v5819_v33 }
 0x807   : > { %15619 = vmatmul.mubr.msk.bf16.gmra.mrb[44].mxu0 %vm536_vm3, %v11351_v46  ;;  %14522 = vmatprep.mubr.msk.bf16.mxu1 %vm18103_vm0, %v18102_v1  ;;  %v11367_v46 = vsel %vm1906_vm5, %v11364_v4, %v11366_v16 }
 0x808   : > { %15622 = vmatprep.mubr.msk.bf16.mxu0 %vm18103_vm0, %v18102_v1 }
 0x80e   : > { %14523 = vmatmul.mubr.msk.bf16.gmra.mrb[52].mxu1 %vm536_vm3, %v5821_v35 }
 0x80f   : > { %15623 = vmatmul.mubr.msk.bf16.gmra.mrb[48].mxu0 %vm536_vm3, %v11353_v3  ;;  %14526 = vmatprep.mubr.msk.bf16.mxu1 %vm18103_vm0, %v18102_v1  ;;  %v11369_v3 = vsel %vm1906_vm5, %v11366_v16, %v11368_v17 }
 0x810   : > { %15626 = vmatprep.mubr.msk.bf16.mxu0 %vm18103_vm0, %v18102_v1 }
 0x816   : > { %14527 = vmatmul.mubr.msk.bf16.gmra.mrb[56].mxu1 %vm536_vm3, %v5823_v50 }
 0x817   : > { %15627 = vmatmul.mubr.msk.bf16.gmra.mrb[52].mxu0 %vm536_vm3, %v11355_v0  ;;  %14530 = vmatprep.mubr.msk.bf16.mxu1 %vm18103_vm0, %v18102_v1 }
 0x818   : > { %15630 = vmatprep.mubr.msk.bf16.mxu0 %vm18103_vm0, %v18102_v1 }
 0x81e   : > { %14531 = vmatmul.mubr.msk.bf16.gmra.mrb[60].mxu1 %vm536_vm3, %v5825_v32 }
 0x81f   : > { %15631 = vmatmul.mubr.msk.bf16.gmra.mrb[56].mxu0 %vm536_vm3, %v11357_v18  ;;  %14534 = vmatprep.mubr.msk.bf16.mxu1 %vm18103_vm0, %v18102_v1 }
 0x820   : > { %15634 = vmatprep.mubr.msk.bf16.mxu0 %vm18103_vm0, %v18102_v1 }
 0x826   : > { %14535 = vmatmul.mubr.msk.bf16.gmra.mrb[64].mxu1 %vm536_vm3, %v5827_v60 }
 0x827   : > { %15635 = vmatmul.mubr.msk.bf16.gmra.mrb[60].mxu0 %vm536_vm3, %v11359_v37  ;;  %14538 = vmatprep.mubr.msk.bf16.mxu1 %vm18103_vm0, %v18102_v1 }
 0x828   : > { %15638 = vmatprep.mubr.msk.bf16.mxu0 %vm18103_vm0, %v18102_v1 }
 0x829   : > { %v22381_v5 = vpop.f32.mrb[0].mxu1 }
 0x82a   : > { %v14380_v31 = vpop.f32.mrb[1].mxu1 }
 0x82b   : > { %v22384_v51 = vpop.f32.mrb[2].mxu1 }
 0x82c   : > { %v14381_v2 = vpop.f32.mrb[3].mxu1 }
 0x82e   : > { %14539 = vmatmul.mubr.msk.bf16.gmra.mrb[68].mxu1 %vm536_vm3, %v5829_v49 }
 0x82f   : > { %15639 = vmatmul.mubr.msk.bf16.gmra.mrb[64].mxu0 %vm536_vm3, %v11361_v6  ;;  %14542 = vmatprep.mubr.msk.bf16.mxu1 %vm18103_vm0, %v18102_v1 }
 0x830   : > { %15642 = vmatprep.mubr.msk.bf16.mxu0 %vm18103_vm0, %v18102_v1 }
 0x831   : > { %v5580_v13 = vpop.f32.mrb[4].mxu1 }
 0x832   : > { %v14384_v36 = vpop.f32.mrb[5].mxu1 }
 0x833   : > { %v22396_v30 = vpop.f32.mrb[6].mxu1 }
 0x834   : > { %v14385_v44 = vpop.f32.mrb[7].mxu1 }
 0x836   : > { %14543 = vmatmul.mubr.msk.bf16.gmra.mrb[72].mxu1 %vm536_vm3, %v5831_v43 }
 0x837   : > { %15643 = vmatmul.mubr.msk.bf16.gmra.mrb[68].mxu0 %vm536_vm3, %v11363_v12  ;;  %14546 = vmatprep.mubr.msk.bf16.mxu1 %vm18103_vm0, %v18102_v1 }
 0x838   : > { %15646 = vmatprep.mubr.msk.bf16.mxu0 %vm18103_vm0, %v18102_v1 }
 0x839   : > { %v22407_v61 = vpop.f32.mrb[8].mxu1 }
 0x83a   : > { %v14388_v54 = vpop.f32.mrb[9].mxu1 }
 0x83b   : > { %v5591_v42 = vpop.f32.mrb[10].mxu1 }
 0x83c   : > { %v14389_v56 = vpop.f32.mrb[11].mxu1 }
 0x83e   : > { %14547 = vmatmul.mubr.msk.bf16.gmra.mrb[76].mxu1 %vm536_vm3, %v5833_v39 }
 0x83f   : > { %15647 = vmatmul.mubr.msk.bf16.gmra.mrb[72].mxu0 %vm536_vm3, %v11365_v20  ;;  %14550 = vmatprep.mubr.msk.bf16.mxu1 %vm18103_vm0, %v18102_v1 }
 0x840   : > { %15650 = vmatprep.mubr.msk.bf16.mxu0 %vm18103_vm0, %v18102_v1 }
 0x841   : > { %v5596_v53 = vpop.f32.mrb[12].mxu1 }
 0x842   : > { %v14392_v58 = vpop.f32.mrb[13].mxu1 }
 0x843   : > { %v22420_v33 = vpop.f32.mrb[14].mxu1 }
 0x844   : > { %v14393_v55 = vpop.f32.mrb[15].mxu1 }
 0x845   : > { %v11813_v55 = vld [vmem:[%s22464_s11] sm:$0xf] }
 0x846   : > { %14551 = vmatmul.mubr.msk.bf16.gmra.mrb[80].mxu1 %vm536_vm3, %v5835_v21 }
 0x847   : > { %15651 = vmatmul.mubr.msk.bf16.gmra.mrb[76].mxu0 %vm536_vm3, %v11367_v46 }
 0x848   : > { %15654 = vmatprep.mubr.msk.bf16.mxu0 %vm18103_vm0, %v18102_v1 }
 0x849   : > { %v5604_v8 = vpop.f32.mrb[16].mxu1 }
 0x84a   : > { %v14396_v27 = vpop.f32.mrb[17].mxu1 }
 0x84b   : > { %v22429_v35 = vpop.f32.mrb[18].mxu1 }
 0x84c   : > { %v14397_v48 = vpop.f32.mrb[19].mxu1 }
 0x84f   : > { %15655 = vmatmul.mubr.msk.bf16.gmra.mrb[80].mxu0 %vm536_vm3, %v11369_v3 }
 0x851   : > { %v22432_v25 = vpop.f32.mrb[20].mxu1 }
 0x852   : > { %v14400_v23 = vpop.f32.mrb[21].mxu1 }
 0x853   : > { %v5615_v22 = vpop.f32.mrb[22].mxu1 }
 0x854   : > { %v14401_v0 = vpop.f32.mrb[23].mxu1 }
 0x859   : > { %v22434_v50 = vpop.f32.mrb[24].mxu1 }
 0x85a   : > { %v14404_v41 = vpop.f32.mrb[25].mxu1 }
 0x85b   : > { %v22436_v1 = vpop.f32.mrb[26].mxu1 }
 0x85c   : > { %v14405_v57 = vpop.f32.mrb[27].mxu1 }
 0x861   : > { %v5628_v59 = vpop.f32.mrb[28].mxu1 }
 0x862   : > { %v14408_v47 = vpop.f32.mrb[29].mxu1 }
 0x863   : > { %v22438_v40 = vpop.f32.mrb[30].mxu1 }
 0x864   : > { %v14409_v18 = vpop.f32.mrb[31].mxu1 }
 0x869   : > { %v22440_v32 = vpop.f32.mrb[32].mxu1 }
 0x86a   : > { %v14412_v28 = vpop.f32.mrb[33].mxu1 }
 0x86b   : > { %v5639_v10 = vpop.f32.mrb[34].mxu1 }
 0x86c   : > { %v14413_v14 = vpop.f32.mrb[35].mxu1 }
 0x871   : > { %v22442_v24 = vpop.f32.mrb[36].mxu1 }
 0x872   : > { %v14416_v37 = vpop.f32.mrb[37].mxu1 }
 0x873   : > { %v22444_v60 = vpop.f32.mrb[38].mxu1 }
 0x874   : > { %v14417_v9 = vpop.f32.mrb[39].mxu1 }
 0x879   : > { %v5652_v29 = vpop.f32.mrb[40].mxu1 }
 0x87a   : > { %v14420_v11 = vpop.f32.mrb[41].mxu1 }
 0x87b   : > { %v22446_v63 = vpop.f32.mrb[42].mxu1 }
 0x87c   : > { %v14421_v31 = vpop.f32.mrb[43].mxu1 }
 0x882   : > { %v11491_v6 = vpop.f32.mrb[0].mxu0 }
 0x883   : > { %v15666_v49 = vadd.f32 %v11491_v6, %v22381_v5  ;;  %v15576_v2 = vpop.f32.mrb[1].mxu0 }
 0x884   : > { %v11494_v19 = vpop.f32.mrb[2].mxu0  ;;  %v11816_v2 = vld [vmem:[%s22464_s11 + $0x4] sm:$0xf] }
 0x885   : > { %v15667_v62 = vadd.f32 %v11494_v19, %v22384_v51  ;;  %v15577_v26 = vpop.f32.mrb[3].mxu0 }
 0x88a   : > { %v11499_v45 = vpop.f32.mrb[4].mxu0 }
 0x88b   : > { %v15580_v13 = vpop.f32.mrb[5].mxu0 }
 0x88c   : > { %v11502_v36 = vpop.f32.mrb[6].mxu0 }
 0x88d   : > { %v15669_v12 = vadd.f32 %v11502_v36, %v22396_v30  ;;  %v15581_v43 = vpop.f32.mrb[7].mxu0  ;;  %v22458_v30 = vld [vmem:[%s22531_s2] ss:$0 sm:$0xff] }
 0x88f   : > { %v11700_v44 = vmax.f32 %v15666_v49, %v15669_v12 }
 0x891   : > { %11703 = vst.msk [vmem:[#allocation2] sm:$0xff] %vm536_vm3, %v11700_v44 }
 0x892   : > { %v11507_v15 = vpop.f32.mrb[8].mxu0 }
 0x893   : > { %v15670_v4 = vadd.f32 %v11507_v15, %v22407_v61  ;;  %v15584_v52 = vpop.f32.mrb[9].mxu0 }
 0x894   : > { %v11510_v5 = vpop.f32.mrb[10].mxu0 }
 0x895   : > { %v11701_v7 = vmax.f32 %v15667_v62, %v15670_v4  ;;  %v15585_v54 = vpop.f32.mrb[11].mxu0 }
 0x897   : > { %11704 = vst.msk [vmem:[#allocation2 + $0x8] sm:$0xff] %vm536_vm3, %v11701_v7 }
 0x89a   : > { %v11515_v51 = vpop.f32.mrb[12].mxu0 }
 0x89b   : > { %v15672_v20 = vadd.f32 %v11515_v51, %v5596_v53  ;;  %v15588_v42 = vpop.f32.mrb[13].mxu0 }
 0x89c   : > { %v11518_v39 = vpop.f32.mrb[14].mxu0 }
 0x89d   : > { %v15673_v56 = vadd.f32 %v11518_v39, %v22420_v33  ;;  %v15589_v34 = vpop.f32.mrb[15].mxu0 }
 0x89e   : > { %v11748_v61 = vld [vmem:[#allocation2] ss:$2 sm:$0x7f]  ;;  %v11762_v16 = vld [vmem:[#allocation2 + $0x1] ss:$2 sm:$0x7f] }
 0x89f   : > { %v11775_v38 = vmax.f32 %v11748_v61, %v11762_v16  ;;  %v11819_v16 = vld [vmem:[%s22464_s11 + $0x8] sm:$0xf] }
 0x8a1   : > { %v11789_v53 = vadd.f32 %v22458_v30, %v11775_v38 }
 0x8a2   : > { %v11523_v58 = vpop.f32.mrb[16].mxu0 }
 0x8a3   : > { %v11796_v46 = vmax.f32 %v11789_v53, 0.0  ;;  %v15592_v21 = vpop.f32.mrb[17].mxu0 }
 0x8a4   : > { %v11526_v17 = vpop.f32.mrb[18].mxu0 }
 0x8a5   : > { %v11803_v8 = vpack.c.bf16 %v11796_v46, %v11796_v46  ;;  %v15675_v27 = vadd.f32 %v11526_v17, %v22429_v35  ;;  %v15593_v3 = vpop.f32.mrb[19].mxu0 }
 0x8a7   : > { %v11814_v48 = vsel %vm22467_vm8, %v11803_v8, %v11813_v55  ;;  %v11706_v23 = vmax.f32 %v15672_v20, %v15675_v27 }
 0x8a8   : > { %11815 = vst [vmem:[%s22464_s11] sm:$0xf] %v11814_v48 }
 0x8a9   : > { %11710 = vst.msk [vmem:[#allocation2 + $0x18] sm:$0xff] %vm536_vm3, %v11706_v23 }
 0x8aa   : > { %v11531_v22 = vpop.f32.mrb[20].mxu0 }
 0x8ab   : > { %v15676_v0 = vadd.f32 %v11531_v22, %v22432_v25  ;;  %v15596_v41 = vpop.f32.mrb[21].mxu0 }
 0x8ac   : > { %v11534_v57 = vpop.f32.mrb[22].mxu0 }
 0x8ad   : > { %v11707_v59 = vmax.f32 %v15673_v56, %v15676_v0  ;;  %v15597_v47 = vpop.f32.mrb[23].mxu0 }
 0x8af   : > { %11711 = vst.msk [vmem:[#allocation2 + $0x20] sm:$0xff] %vm536_vm3, %v11707_v59 }
 0x8b2   : > { %v11539_v18 = vpop.f32.mrb[24].mxu0 }
 0x8b3   : > { %v15678_v35 = vadd.f32 %v11539_v18, %v22434_v50  ;;  %v15600_v28 = vpop.f32.mrb[25].mxu0 }
 0x8b4   : > { %v11542_v10 = vpop.f32.mrb[26].mxu0 }
 0x8b5   : > { %v15679_v14 = vadd.f32 %v11542_v10, %v22436_v1  ;;  %v15601_v37 = vpop.f32.mrb[27].mxu0 }
 0x8b6   : > { %v11750_v9 = vld [vmem:[#allocation2 + $0x18] ss:$2 sm:$0x7f]  ;;  %v11764_v29 = vld [vmem:[#allocation2 + $0x19] ss:$2 sm:$0x7f] }
 0x8b7   : > { %v11776_v11 = vmax.f32 %v11750_v9, %v11764_v29 }
 0x8b9   : > { %v11790_v25 = vadd.f32 %v22458_v30, %v11776_v11 }
 0x8ba   : > { %v11547_v31 = vpop.f32.mrb[28].mxu0 }
 0x8bb   : > { %v11797_v6 = vmax.f32 %v11790_v25, 0.0  ;;  %v15604_v49 = vpop.f32.mrb[29].mxu0 }
 0x8bc   : > { %v11550_v19 = vpop.f32.mrb[30].mxu0 }
 0x8bd   : > { %v11804_v62 = vpack.c.bf16 %v11797_v6, %v11797_v6  ;;  %v15681_v26 = vadd.f32 %v11550_v19, %v22438_v40  ;;  %v15605_v50 = vpop.f32.mrb[31].mxu0 }
 0x8bf   : > { %v11817_v45 = vsel %vm22467_vm8, %v11804_v62, %v11816_v2  ;;  %v11713_v1 = vmax.f32 %v15678_v35, %v15681_v26  ;;  %v11822_v26 = vld [vmem:[%s22464_s11 + $0xc] sm:$0xf] }
 0x8c0   : > { %11818 = vst [vmem:[%s22464_s11 + $0x4] sm:$0xf] %v11817_v45 }
 0x8c1   : > { %11717 = vst.msk [vmem:[#allocation2 + $0x30] sm:$0xff] %vm536_vm3, %v11713_v1 }
 0x8c2   : > { %v11555_v13 = vpop.f32.mrb[32].mxu0 }
 0x8c3   : > { %v15682_v36 = vadd.f32 %v11555_v13, %v22440_v32  ;;  %v15608_v12 = vpop.f32.mrb[33].mxu0 }
 0x8c4   : > { %v11558_v43 = vpop.f32.mrb[34].mxu0 }
 0x8c5   : > { %v11714_v44 = vmax.f32 %v15679_v14, %v15682_v36  ;;  %v15609_v15 = vpop.f32.mrb[35].mxu0 }
 0x8c7   : > { %11718 = vst.msk [vmem:[#allocation2 + $0x38] sm:$0xff] %vm536_vm3, %v11714_v44 }
 0x8ca   : > { %v11563_v4 = vpop.f32.mrb[36].mxu0 }
 0x8cb   : > { %v15684_v40 = vadd.f32 %v11563_v4, %v22442_v24  ;;  %v15612_v52 = vpop.f32.mrb[37].mxu0 }
 0x8cc   : > { %v11566_v5 = vpop.f32.mrb[38].mxu0 }
 0x8cd   : > { %v15685_v7 = vadd.f32 %v11566_v5, %v22444_v60  ;;  %v15613_v54 = vpop.f32.mrb[39].mxu0 }
 0x8ce   : > { %v11752_v51 = vld [vmem:[#allocation2 + $0x30] ss:$2 sm:$0x7f]  ;;  %v11766_v20 = vld [vmem:[#allocation2 + $0x31] ss:$2 sm:$0x7f] }
 0x8cf   : > { %v11777_v42 = vmax.f32 %v11752_v51, %v11766_v20 }
 0x8d1   : > { %v11791_v32 = vadd.f32 %v22458_v30, %v11777_v42  ;;  %v6045_v34 = vpop.f32.mrb[44].mxu1 }
 0x8d2   : > { %v11571_v39 = vpop.f32.mrb[40].mxu0  ;;  %v14516_v38 = vpop.f32.mrb[45].mxu1 }
 0x8d3   : > { %v11798_v56 = vmax.f32 %v11791_v32, 0.0  ;;  %v15616_v61 = vpop.f32.mrb[41].mxu0  ;;  %v6048_v24 = vpop.f32.mrb[46].mxu1 }
 0x8d4   : > { %v11574_v53 = vpop.f32.mrb[42].mxu0  ;;  %v14517_v60 = vpop.f32.mrb[47].mxu1 }
 0x8d5   : > { %v11805_v58 = vpack.c.bf16 %v11798_v56, %v11798_v56  ;;  %v15687_v46 = vadd.f32 %v11574_v53, %v22446_v63  ;;  %v15617_v21 = vpop.f32.mrb[43].mxu0 }
 0x8d7   : > { %v11820_v55 = vsel %vm22467_vm8, %v11805_v58, %v11819_v16  ;;  %v11720_v17 = vmax.f32 %v15684_v40, %v15687_v46 }
 0x8d8   : > { %11821 = vst [vmem:[%s22464_s11 + $0x8] sm:$0xf] %v11820_v55 }
 0x8d9   : > { %11724 = vst.msk [vmem:[#allocation2 + $0x48] sm:$0xff] %vm536_vm3, %v11720_v17  ;;  %v6053_v27 = vpop.f32.mrb[48].mxu1 }
 0x8da   : > { %v11579_v8 = vpop.f32.mrb[44].mxu0  ;;  %v14520_v23 = vpop.f32.mrb[49].mxu1 }
 0x8db   : > { %v15688_v3 = vadd.f32 %v11579_v8, %v6045_v34  ;;  %v15620_v48 = vpop.f32.mrb[45].mxu0  ;;  %v6056_v41 = vpop.f32.mrb[50].mxu1  ;;  %v11825_v23 = vld [vmem:[%s22464_s11 + $0x10] sm:$0xf] }
 0x8dc   : > { %v11582_v22 = vpop.f32.mrb[46].mxu0  ;;  %v14521_v59 = vpop.f32.mrb[51].mxu1 }
 0x8dd   : > { %v11721_v0 = vmax.f32 %v15685_v7, %v15688_v3  ;;  %v15621_v57 = vpop.f32.mrb[47].mxu0 }
 0x8df   : > { %11725 = vst.msk [vmem:[#allocation2 + $0x50] sm:$0xff] %vm536_vm3, %v11721_v0 }
 0x8e1   : > { %v6061_v47 = vpop.f32.mrb[52].mxu1 }
 0x8e2   : > { %v11587_v63 = vpop.f32.mrb[48].mxu0  ;;  %v14524_v28 = vpop.f32.mrb[53].mxu1 }
 0x8e3   : > { %v15690_v18 = vadd.f32 %v11587_v63, %v6053_v27  ;;  %v15624_v35 = vpop.f32.mrb[49].mxu0  ;;  %v6064_v14 = vpop.f32.mrb[54].mxu1 }
 0x8e4   : > { %v11590_v10 = vpop.f32.mrb[50].mxu0  ;;  %v14525_v31 = vpop.f32.mrb[55].mxu1 }
 0x8e5   : > { %v15691_v37 = vadd.f32 %v11590_v10, %v6056_v41  ;;  %v15625_v9 = vpop.f32.mrb[51].mxu0 }
 0x8e6   : > { %v11754_v29 = vld [vmem:[#allocation2 + $0x48] ss:$2 sm:$0x7f]  ;;  %v11768_v11 = vld [vmem:[#allocation2 + $0x49] ss:$2 sm:$0x7f] }
 0x8e7   : > { %v11778_v25 = vmax.f32 %v11754_v29, %v11768_v11 }
 0x8e9   : > { %v11792_v6 = vadd.f32 %v22458_v30, %v11778_v25  ;;  %v6069_v19 = vpop.f32.mrb[56].mxu1 }
 0x8ea   : > { %v11595_v49 = vpop.f32.mrb[52].mxu0  ;;  %v14528_v50 = vpop.f32.mrb[57].mxu1 }
 0x8eb   : > { %v11799_v2 = vmax.f32 %v11792_v6, 0.0  ;;  %v15628_v62 = vpop.f32.mrb[53].mxu0  ;;  %v6072_v13 = vpop.f32.mrb[58].mxu1 }
 0x8ec   : > { %v11598_v45 = vpop.f32.mrb[54].mxu0  ;;  %v14529_v43 = vpop.f32.mrb[59].mxu1 }
 0x8ed   : > { %v11806_v1 = vpack.c.bf16 %v11799_v2, %v11799_v2  ;;  %v15693_v36 = vadd.f32 %v11598_v45, %v6064_v14  ;;  %v15629_v12 = vpop.f32.mrb[55].mxu0 }
 0x8ef   : > { %v11823_v44 = vsel %vm22467_vm8, %v11806_v1, %v11822_v26  ;;  %v11727_v15 = vmax.f32 %v15690_v18, %v15693_v36 }
 0x8f0   : > { %11824 = vst [vmem:[%s22464_s11 + $0xc] sm:$0xf] %v11823_v44 }
 0x8f1   : > { %11731 = vst.msk [vmem:[#allocation2 + $0x60] sm:$0xff] %vm536_vm3, %v11727_v15  ;;  %v6077_v40 = vpop.f32.mrb[60].mxu1 }
 0x8f2   : > { %v11603_v4 = vpop.f32.mrb[56].mxu0  ;;  %v14532_v7 = vpop.f32.mrb[61].mxu1 }
 0x8f3   : > { %v15694_v52 = vadd.f32 %v11603_v4, %v6069_v19  ;;  %v15632_v5 = vpop.f32.mrb[57].mxu0  ;;  %v6080_v20 = vpop.f32.mrb[62].mxu1  ;;  %v11828_v7 = vld [vmem:[%s22464_s11 + $0x14] sm:$0xf] }
 0x8f4   : > { %v11606_v54 = vpop.f32.mrb[58].mxu0  ;;  %v14533_v32 = vpop.f32.mrb[63].mxu1 }
 0x8f5   : > { %v11728_v51 = vmax.f32 %v15691_v37, %v15694_v52  ;;  %v15633_v42 = vpop.f32.mrb[59].mxu0 }
 0x8f7   : > { %11732 = vst.msk [vmem:[#allocation2 + $0x68] sm:$0xff] %vm536_vm3, %v11728_v51 }
 0x8f9   : > { %v6085_v56 = vpop.f32.mrb[64].mxu1 }
 0x8fa   : > { %v11611_v39 = vpop.f32.mrb[60].mxu0  ;;  %v14536_v16 = vpop.f32.mrb[65].mxu1 }
 0x8fb   : > { %v15696_v34 = vadd.f32 %v11611_v39, %v6077_v40  ;;  %v15636_v61 = vpop.f32.mrb[61].mxu0  ;;  %v6088_v53 = vpop.f32.mrb[66].mxu1 }
 0x8fc   : > { %v11614_v38 = vpop.f32.mrb[62].mxu0  ;;  %v14537_v55 = vpop.f32.mrb[67].mxu1 }
 0x8fd   : > { %v15697_v58 = vadd.f32 %v11614_v38, %v6080_v20  ;;  %v15637_v24 = vpop.f32.mrb[63].mxu0 }
 0x8fe   : > { %v11756_v46 = vld [vmem:[#allocation2 + $0x60] ss:$2 sm:$0x7f]  ;;  %v11770_v21 = vld [vmem:[#allocation2 + $0x61] ss:$2 sm:$0x7f] }
 0x8ff   : > { %v11779_v60 = vmax.f32 %v11756_v46, %v11770_v21 }
 0x901   : > { %v11793_v17 = vadd.f32 %v22458_v30, %v11779_v60  ;;  %v6093_v3 = vpop.f32.mrb[68].mxu1 }
 0x902   : > { %v11619_v8 = vpop.f32.mrb[64].mxu0  ;;  %v14540_v22 = vpop.f32.mrb[69].mxu1 }
 0x903   : > { %v11800_v27 = vmax.f32 %v11793_v17, 0.0  ;;  %v15640_v48 = vpop.f32.mrb[65].mxu0  ;;  %v6096_v57 = vpop.f32.mrb[70].mxu1 }
 0x904   : > { %v11622_v0 = vpop.f32.mrb[66].mxu0  ;;  %v14541_v47 = vpop.f32.mrb[71].mxu1 }
 0x905   : > { %v11807_v41 = vpack.c.bf16 %v11800_v27, %v11800_v27  ;;  %v15699_v59 = vadd.f32 %v11622_v0, %v6088_v53  ;;  %v15641_v63 = vpop.f32.mrb[67].mxu0  ;;  %v11831_v27 = vld [vmem:[%s22464_s11 + $0x18] sm:$0xf] }
 0x907   : > { %v11826_v18 = vsel %vm22467_vm8, %v11807_v41, %v11825_v23  ;;  %v11734_v35 = vmax.f32 %v15696_v34, %v15699_v59 }
 0x908   : > { %11827 = vst [vmem:[%s22464_s11 + $0x10] sm:$0xf] %v11826_v18 }
 0x909   : > { %11738 = vst.msk [vmem:[#allocation2 + $0x78] sm:$0xff] %vm536_vm3, %v11734_v35  ;;  %v6101_v10 = vpop.f32.mrb[72].mxu1 }
 0x90a   : > { %v11627_v28 = vpop.f32.mrb[68].mxu0  ;;  %v14544_v9 = vpop.f32.mrb[73].mxu1 }
 0x90b   : > { %v15700_v14 = vadd.f32 %v11627_v28, %v6093_v3  ;;  %v15644_v37 = vpop.f32.mrb[69].mxu0  ;;  %v6104_v25 = vpop.f32.mrb[74].mxu1 }
 0x90c   : > { %v11630_v29 = vpop.f32.mrb[70].mxu0  ;;  %v14545_v6 = vpop.f32.mrb[75].mxu1 }
 0x90d   : > { %v11735_v11 = vmax.f32 %v15697_v58, %v15700_v14  ;;  %v15645_v31 = vpop.f32.mrb[71].mxu0 }
 0x90f   : > { %11739 = vst.msk [vmem:[#allocation2 + $0x80] sm:$0xff] %vm536_vm3, %v11735_v11 }
 0x911   : > { %v6109_v2 = vpop.f32.mrb[76].mxu1 }
 0x912   : > { %v11635_v49 = vpop.f32.mrb[72].mxu0  ;;  %v14548_v26 = vpop.f32.mrb[77].mxu1 }
 0x913   : > { %v15702_v19 = vadd.f32 %v11635_v49, %v6101_v10  ;;  %v15648_v62 = vpop.f32.mrb[73].mxu0  ;;  %v6112_v45 = vpop.f32.mrb[78].mxu1 }
 0x914   : > { %v11638_v50 = vpop.f32.mrb[74].mxu0  ;;  %v14549_v44 = vpop.f32.mrb[79].mxu1 }
 0x915   : > { %v15703_v1 = vadd.f32 %v11638_v50, %v6104_v25  ;;  %v15649_v13 = vpop.f32.mrb[75].mxu0 }
 0x916   : > { %v11758_v36 = vld [vmem:[#allocation2 + $0x78] ss:$2 sm:$0x7f]  ;;  %v11772_v12 = vld [vmem:[#allocation2 + $0x79] ss:$2 sm:$0x7f] }
 0x917   : > { %v11780_v43 = vmax.f32 %v11758_v36, %v11772_v12 }
 0x919   : > { %v11794_v15 = vadd.f32 %v22458_v30, %v11780_v43  ;;  %v6117_v52 = vpop.f32.mrb[80].mxu1 }
 0x91a   : > { %v11643_v4 = vpop.f32.mrb[76].mxu0  ;;  %v14552_v54 = vpop.f32.mrb[81].mxu1 }
 0x91b   : > { %v11801_v40 = vmax.f32 %v11794_v15, 0.0  ;;  %v15652_v5 = vpop.f32.mrb[77].mxu0  ;;  %v6120_v42 = vpop.f32.mrb[82].mxu1 }
 0x91c   : > { %v11646_v51 = vpop.f32.mrb[78].mxu0  ;;  %v14553_v56 = vpop.f32.mrb[83].mxu1 }
 0x91d   : > { %v11808_v20 = vpack.c.bf16 %v11801_v40, %v11801_v40  ;;  %v15705_v32 = vadd.f32 %v11646_v51, %v6112_v45  ;;  %v15653_v39 = vpop.f32.mrb[79].mxu0 }
 0x91f   : > { %v11829_v34 = vsel %vm22467_vm8, %v11808_v20, %v11828_v7  ;;  %v11741_v61 = vmax.f32 %v15702_v19, %v15705_v32 }
 0x920   : > { %11830 = vst [vmem:[%s22464_s11 + $0x14] sm:$0xf] %v11829_v34 }
 0x921   : > { %11745 = vst.msk [vmem:[#allocation2 + $0x90] sm:$0xff] %vm536_vm3, %v11741_v61 }
 0x922   : > { %v11651_v16 = vpop.f32.mrb[80].mxu0 }
 0x923   : > { %v15706_v38 = vadd.f32 %v11651_v16, %v6117_v52  ;;  %v15656_v53 = vpop.f32.mrb[81].mxu0 }
 0x924   : > { %v11654_v58 = vpop.f32.mrb[82].mxu0 }
 0x925   : > { %v11742_v24 = vmax.f32 %v15703_v1, %v15706_v38  ;;  %v15657_v46 = vpop.f32.mrb[83].mxu0 }
 0x927   : > { %11746 = vst.msk [vmem:[#allocation2 + $0x98] sm:$0xff] %vm536_vm3, %v11742_v24 }
 0x92e   : > { %v11760_v21 = vld [vmem:[#allocation2 + $0x90] ss:$2 sm:$0x7f]  ;;  %v11774_v60 = vld [vmem:[#allocation2 + $0x91] ss:$2 sm:$0x7f] }
 0x92f   : > { %v11781_v55 = vmax.f32 %v11760_v21, %v11774_v60 }
 0x931   : > { %v11795_v17 = vadd.f32 %v22458_v30, %v11781_v55 }
 0x933   : > { %v11802_v8 = vmax.f32 %v11795_v17, 0.0 }
 0x935   : > { %v11809_v3 = vpack.c.bf16 %v11802_v8, %v11802_v8 }
 0x937   : > { %v11832_v48 = vsel %vm22467_vm8, %v11809_v3, %v11831_v27 }
 0x938   : > { %11833 = vst [vmem:[%s22464_s11 + $0x18] sm:$0xf] %v11832_v48 }
 0x939 PF: > { %s13_s12 = sadd.s32 1, %s18100_s12  }
 0x93a   : > { %p10_p4 = scmp.ge.s32.totalorder %s13_s12, 4  }
 0x93c   :  { %12 = sbr.rel (!%p10_p4) target bundleno = 1 (0x1), region = 81 }

</bundles_post_ra>
